<compile_context>
chip_gen: v7x
topology: tpu7x:2x2x1
jax: 0.10.0
libtpu: 0.0.40
codegen_flags: <defaults>
</compile_context>

<pallas_src>
import functools
import math

import jax
import jax.numpy as jnp
from jax import lax
from jax.experimental import pallas as pl
from jax.experimental.pallas import tpu as pltpu


def _round_up(x, m):
    return ((x + m - 1) // m) * m


def _pick_tt(T, BB, Ip, *, cap=32, x_budget_bytes=4 << 20):
    """Timesteps per grid step: bounded by a VMEM budget for the double-buffered x slab."""
    per_step_bytes = 2 * BB * Ip * 4  # double-buffered f32 x slab per timestep
    return max(1, min(cap, T, x_budget_bytes // max(1, per_step_bytes)))


def _sigmoid(x):
    # tanh-form sigmoid: exact math, stays entirely on the EUP slot.
    return 0.5 * jnp.tanh(0.5 * x) + 0.5


def _lstm_kernel(*refs, num_layers, hidden_p, in_p, tt_block, seq_len,
                 mask_time, use_fori, inner_unroll):
    """One grid step = tt_block timesteps of the full num_layers-deep LSTM stack
    for one batch block.

    refs (L > 1): x, w0, wr, b, wfc, bfc | out | c_sc, z0_sc, zr_sc
    refs (L ==1): x, w0,     b, wfc, bfc | out | c_sc, z0_sc
      x   : (TT, BB, Ip)              time-major padded input block
      w0  : (Ip+Hp, 4Hp)              fused [W_ih ; W_hh] for layer 0 (per-gate padded)
      wr  : (L-1, 2Hp, 4Hp)           fused weights for layers 1..L-1
      b   : (L, 1, 4Hp)               b_ih + b_hh per layer
      wfc : (Hp, Op),  bfc: (1, Op)   final Linear
      out : (BB, Op)
      c_sc: (L, BB, Hp)               cell state
      z0_sc: (BB, Ip+Hp)              [x_t ; h_0^(t-1)]
      zr_sc: (L-1, BB, 2Hp)           [h_below^(t) ; h_l^(t-1)]
    """
    if num_layers > 1:
        (x_ref, w0_ref, wr_ref, b_ref, wfc_ref, bfc_ref,
         out_ref, c_sc, z0_sc, zr_sc) = refs
    else:
        (x_ref, w0_ref, b_ref, wfc_ref, bfc_ref,
         out_ref, c_sc, z0_sc) = refs
        wr_ref = zr_sc = None

    Hp = hidden_p
    BB = z0_sc.shape[0]
    t = pl.program_id(1)

    @pl.when(t == 0)
    def _():
        # Fresh state per batch block: h0 = c0 = 0 (matches the PyTorch module).
        c_sc[...] = jnp.zeros_like(c_sc)
        z0_sc[...] = jnp.zeros_like(z0_sc)
        if num_layers > 1:
            zr_sc[...] = jnp.zeros_like(zr_sc)

    # Bias broadcasts hoisted out of the timestep loop (once per grid step per layer).
    biases = [jnp.broadcast_to(b_ref[l], (BB, 4 * Hp)) for l in range(num_layers)]

    def cell(l, z, w, bias):
        # Single fused MXU matmul per cell: z = [inp ; h_prev] -> gates (BB, 4Hp).
        gates = jnp.dot(z.astype(w.dtype), w,
                        preferred_element_type=jnp.float32) + bias
        # PyTorch gate ordering i, f, g, o; each slice is a 128-lane-aligned tile.
        i_g = _sigmoid(gates[:, 0 * Hp:1 * Hp])
        f_g = _sigmoid(gates[:, 1 * Hp:2 * Hp])
        g_g = jnp.tanh(gates[:, 2 * Hp:3 * Hp])
        o_g = _sigmoid(gates[:, 3 * Hp:4 * Hp])
        c_new = f_g * c_sc[l] + i_g * g_g
        h_new = o_g * jnp.tanh(c_new)
        c_sc[l] = c_new
        return h_new

    def step(tt):
        # Layer 0: refresh the x half of z0; recurrent half already holds h_0^(t-1).
        z0_sc[:, :in_p] = x_ref[tt]
        h = cell(0, z0_sc[...], w0_ref[...], biases[0])
        z0_sc[:, in_p:] = h                       # recurrent input for next timestep
        for l in range(1, num_layers):            # static unroll over layers
            zr_sc[l - 1, :, :Hp] = h              # input-from-below for this timestep
            h = cell(l, zr_sc[l - 1], wr_ref[l - 1], biases[l])
            zr_sc[l - 1, :, Hp:] = h

    def guarded_step(tt):
        if mask_time:
            @pl.when(t * tt_block + tt < seq_len)
            def _():
                step(tt)
        else:
            step(tt)

    if use_fori:
        # Large Hp: keep a real loop with partial unroll to bound live ranges.
        def body(tt, carry):
            guarded_step(tt)
            return carry
        lax.fori_loop(0, tt_block, body, 0, unroll=inner_unroll)
    else:
        # Small Hp: full static unroll (amortizes grid-step overhead, state hot in vregs).
        for tt in range(tt_block):
            guarded_step(tt)

    # fc applied to the last-timestep output of the top layer.
    @pl.when(t == pl.num_programs(1) - 1)
    def _():
        if num_layers > 1:
            h_top = zr_sc[num_layers - 2, :, Hp:]
        else:
            h_top = z0_sc[:, in_p:]
        out_ref[...] = (jnp.dot(h_top.astype(wfc_ref.dtype), wfc_ref[...],
                                preferred_element_type=jnp.float32)
                        + bfc_ref[...])


def _pack_params(params, *, input_size, hidden_size, num_layers, output_size,
                 Ip, Hp, Op, weight_dtype):
    """Fuse input/recurrent weights, pad to lane-aligned per-gate layout, cast weights."""
    H = hidden_size

    def pad_gate_cols(w):  # (rows, 4H) -> (rows, 4Hp), each gate block zero-padded to Hp
        parts = []
        for g in range(4):
            blk = w[:, g * H:(g + 1) * H]
            parts.append(jnp.pad(blk, ((0, 0), (0, Hp - H))))
        return jnp.concatenate(parts, axis=1)

    # Layer 0: rows = [input (padded I->Ip) ; hidden (padded H->Hp)]
    w_ih0 = jnp.pad(params["w_ih"][0], ((0, Ip - input_size), (0, 0)))
    w_hh0 = jnp.pad(params["w_hh"][0], ((0, Hp - H), (0, 0)))
    w0 = pad_gate_cols(jnp.concatenate([w_ih0, w_hh0], axis=0)).astype(weight_dtype)

    # Layers 1..L-1: rows = [h_below (Hp) ; h_self (Hp)]  (omitted entirely if L == 1)
    wr = None
    if num_layers > 1:
        wr_list = []
        for l in range(1, num_layers):
            w_ih = jnp.pad(params["w_ih"][l], ((0, Hp - H), (0, 0)))
            w_hh = jnp.pad(params["w_hh"][l], ((0, Hp - H), (0, 0)))
            wr_list.append(pad_gate_cols(jnp.concatenate([w_ih, w_hh], axis=0)))
        wr = jnp.stack(wr_list, axis=0).astype(weight_dtype)

    # Biases stay f32 (added post-matmul in f32).
    b = jnp.stack([pad_gate_cols(params["b"][l]) for l in range(num_layers)], axis=0)

    w_fc = jnp.pad(params["w_fc"],
                   ((0, Hp - H), (0, Op - output_size))).astype(weight_dtype)
    b_fc = jnp.pad(params["b_fc"], ((0, 0), (0, Op - output_size)))

    return w0, wr, b, w_fc, b_fc


def lstm_model_forward(x, params, *, hidden_size, num_layers, output_size,
                       weight_dtype=jnp.float32):
    """x: (B, T, I) float32 -> (B, output_size) float32."""
    B, T, I = x.shape
    H = hidden_size
    Ip = _round_up(I, 128)    # lane multiples
    Hp = _round_up(H, 128)
    Op = _round_up(output_size, 128)

    # Batch blocking: pad to the f32 sublane multiple; split B >= 16 into >= 2 blocks so
    # the leading "parallel" grid axis can run on both v7x TensorCores (neutral on 1-TC chips).
    Bp = _round_up(B, 8)
    nb = 1 if Bp < 16 else max(2, pl.cdiv(Bp, 128))
    BB = _round_up(pl.cdiv(Bp, nb), 8)
    Bp = nb * BB

    # Timestep block from a VMEM budget; ragged T handled with an in-kernel validity guard.
    TT = _pick_tt(T, BB, Ip)
    nt = pl.cdiv(T, TT)
    T_pad = nt * TT
    mask_time = (T_pad != T)

    w0, wr, b, w_fc, b_fc = _pack_params(
        params, input_size=I, hidden_size=H, num_layers=num_layers,
        output_size=output_size, Ip=Ip, Hp=Hp, Op=Op, weight_dtype=weight_dtype)

    # Time-major, batch/feature padded input (single fused pad+transpose pass).
    x_pad = jnp.zeros((T_pad, Bp, Ip), jnp.float32)
    x_pad = x_pad.at[:T, :B, :I].set(jnp.transpose(x, (1, 0, 2)))

    use_fori = (Hp >= 512) and (TT > 1)
    inner_unroll = min(4, TT)

    kernel = functools.partial(
        _lstm_kernel, num_layers=num_layers, hidden_p=Hp, in_p=Ip,
        tt_block=TT, seq_len=T, mask_time=mask_time,
        use_fori=use_fori, inner_unroll=inner_unroll)

    def _const_spec(a):  # weights: block index never changes across the grid
        zero = (0,) * a.ndim
        return pl.BlockSpec(a.shape, lambda bi, ti, _z=zero: _z)

    in_specs = [pl.BlockSpec((TT, BB, Ip), lambda bi, ti: (ti, bi, 0)),
                _const_spec(w0)]
    args = [x_pad, w0]
    if num_layers > 1:
        in_specs.append(_const_spec(wr))
        args.append(wr)
    in_specs += [_const_spec(b), _const_spec(w_fc), _const_spec(b_fc)]
    args += [b, w_fc, b_fc]

    scratch = [
        pltpu.VMEM((num_layers, BB, Hp), jnp.float32),   # c
        pltpu.VMEM((BB, Ip + Hp), jnp.float32),          # z0 = [x_t ; h_0^(t-1)]
    ]
    if num_layers > 1:
        scratch.append(pltpu.VMEM((num_layers - 1, BB, 2 * Hp), jnp.float32))

    out_p = pl.pallas_call(
        kernel,
        out_shape=jax.ShapeDtypeStruct((Bp, Op), jnp.float32),
        grid_spec=pltpu.PrefetchScalarGridSpec(
            num_scalar_prefetch=0,
            grid=(nb, nt),
            in_specs=in_specs,
            out_specs=pl.BlockSpec((BB, Op), lambda bi, ti: (bi, 0)),
            scratch_shapes=scratch,
        ),
        compiler_params=pltpu.CompilerParams(
            dimension_semantics=("parallel", "arbitrary"),
            vmem_limit_bytes=64 * 1024 * 1024,
        ),
    )(*args)

    return out_p[:B, :output_size]


def init_params(key, input_size, hidden_size, num_layers, output_size):
    """Deterministic PyTorch-style uniform(-1/sqrt(H), 1/sqrt(H)) init (math layout)."""
    H = hidden_size
    k = 1.0 / math.sqrt(H)
    keys = jax.random.split(key, 4 * num_layers + 2)
    ki = iter(keys)
    u = lambda kk, shape: jax.random.uniform(kk, shape, jnp.float32, -k, k)

    w_ih_list, w_hh_list, b_list = [], [], []
    for l in range(num_layers):
        in_dim = input_size if l == 0 else H
        w_ih = u(next(ki), (4 * H, in_dim))    # PyTorch layout (4H, in)
        w_hh = u(next(ki), (4 * H, H))
        b_ih = u(next(ki), (4 * H,))
        b_hh = u(next(ki), (4 * H,))
        w_ih_list.append(w_ih.T)               # -> (in, 4H)
        w_hh_list.append(w_hh.T)               # -> (H, 4H)
        b_list.append((b_ih + b_hh)[None, :])  # -> (1, 4H)

    w_fc = u(next(ki), (output_size, H))       # PyTorch Linear weight (O, H)
    b_fc = u(next(ki), (output_size,))

    return {
        "w_ih": w_ih_list,
        "w_hh": w_hh_list,
        "b": b_list,
        "w_fc": w_fc.T,            # (H, O)
        "b_fc": b_fc[None, :],     # (1, O)
    }


def lstm_reference(x, params, *, hidden_size, num_layers):
    """Pure-JAX reference implementing the same math (for verification)."""
    B, T, _ = x.shape
    H = hidden_size
    h = [jnp.zeros((B, H), jnp.float32) for _ in range(num_layers)]
    c = [jnp.zeros((B, H), jnp.float32) for _ in range(num_layers)]
    for t in range(T):
        inp = x[:, t, :]
        for l in range(num_layers):
            gates = inp @ params["w_ih"][l] + h[l] @ params["w_hh"][l] + params["b"][l]
            i_g = jax.nn.sigmoid(gates[:, 0 * H:1 * H])
            f_g = jax.nn.sigmoid(gates[:, 1 * H:2 * H])
            g_g = jnp.tanh(gates[:, 2 * H:3 * H])
            o_g = jax.nn.sigmoid(gates[:, 3 * H:4 * H])
            c[l] = f_g * c[l] + i_g * g_g
            h[l] = o_g * jnp.tanh(c[l])
            inp = h[l]
    return inp @ params["w_fc"] + params["b_fc"]


if __name__ == "__main__":
    B, T = 2, 8              # batch, sequence length
    INPUT_SIZE = 4
    HIDDEN_SIZE = 32
    NUM_LAYERS = 2
    OUTPUT_SIZE = 1

    key = jax.random.PRNGKey(0)
    k_x, k_p = jax.random.split(key)
    x = jax.random.normal(k_x, (B, T, INPUT_SIZE), jnp.float32)
    params = init_params(k_p, INPUT_SIZE, HIDDEN_SIZE, NUM_LAYERS, OUTPUT_SIZE)

    ref = lstm_reference(x, params, hidden_size=HIDDEN_SIZE, num_layers=NUM_LAYERS)

    # f32 weights: exact-semantics path.
    out = lstm_model_forward(x, params, hidden_size=HIDDEN_SIZE,
                             num_layers=NUM_LAYERS, output_size=OUTPUT_SIZE)
    out = jax.block_until_ready(out)
    assert out.shape == (B, OUTPUT_SIZE)
    assert jnp.allclose(out, ref, atol=1e-4, rtol=1e-4), (out, ref)

    # bf16 weights (v6e/v7x MXU fast path): f32 accumulation, looser tolerance.
    out_bf16 = lstm_model_forward(x, params, hidden_size=HIDDEN_SIZE,
                                  num_layers=NUM_LAYERS, output_size=OUTPUT_SIZE,
                                  weight_dtype=jnp.bfloat16)
    out_bf16 = jax.block_until_ready(out_bf16)
    assert jnp.allclose(out_bf16, ref, atol=1e-1, rtol=1e-1), (out_bf16, ref)

    print("KERNEL_OK")
</pallas_src>

<mosaic_0001>
module attributes {stable_mosaic.version = 11 : i64} {
  func.func @_lstm_kernel(%arg0: i32, %arg1: i32, %arg2: memref<8x8x128xf32, #tpu.memory_space<vmem>>, %arg3: memref<256x512xf32, #tpu.memory_space<vmem>>, %arg4: memref<1x256x512xf32, #tpu.memory_space<vmem>>, %arg5: memref<2x1x512xf32, #tpu.memory_space<vmem>>, %arg6: memref<128x128xf32, #tpu.memory_space<vmem>>, %arg7: memref<1x128xf32, #tpu.memory_space<vmem>>, %arg8: memref<8x128xf32, #tpu.memory_space<vmem>>, %arg9: memref<2x8x128xf32, #tpu.memory_space<vmem>>, %arg10: memref<8x256xf32, #tpu.memory_space<vmem>>, %arg11: memref<1x8x256xf32, #tpu.memory_space<vmem>>) attributes {dimension_semantics = [#tpu.dimension_semantics<parallel>, #tpu.dimension_semantics<arbitrary>], iteration_bounds = array<i64: 1, 1>, scalar_prefetch = 0 : i64, scratch_operands = 3 : i64, tpu.core_type = #tpu.core_type<tc>, window_params = [{transform_indices = @transform_0, window_bounds = array<i64: 8, 8, 128>}, {pipeline_mode = #tpu.pipeline_mode<synchronous>, transform_indices = @transform_1, window_bounds = array<i64: 256, 512>}, {pipeline_mode = #tpu.pipeline_mode<synchronous>, transform_indices = @transform_2, window_bounds = array<i64: 1, 256, 512>}, {pipeline_mode = #tpu.pipeline_mode<synchronous>, transform_indices = @transform_3, window_bounds = array<i64: 2, 1, 512>}, {pipeline_mode = #tpu.pipeline_mode<synchronous>, transform_indices = @transform_4, window_bounds = array<i64: 128, 128>}, {pipeline_mode = #tpu.pipeline_mode<synchronous>, transform_indices = @transform_5, window_bounds = array<i64: 1, 128>}, {transform_indices = @transform_6, window_bounds = array<i64: 8, 128>}]} {
    %c0_i32 = arith.constant 0 : i32
    %0 = arith.cmpi eq, %arg1, %c0_i32 : i32
    %1 = arith.extui %0 : i1 to i32
    %c0_i32_0 = arith.constant 0 : i32
    %2 = arith.cmpi ne, %1, %c0_i32_0 : i32
    scf.if %2 {
      %cst_439 = arith.constant 0.000000e+00 : f32
      %750 = vector.broadcast %cst_439 : f32 to vector<2x8x128xf32>
      %c0_440 = arith.constant 0 : index
      %c0_441 = arith.constant 0 : index
      %c0_442 = arith.constant 0 : index
      %751 = vector.load %arg9[%c0_440, %c0_441, %c0_442] : memref<2x8x128xf32, #tpu.memory_space<vmem>>, vector<2x8x128xf32>
      tpu.vector_store %arg9[%c0_440, %c0_441, %c0_442], %750 {strides = array<i32>} : memref<2x8x128xf32, #tpu.memory_space<vmem>>, vector<2x8x128xf32>,
      %cst_443 = arith.constant 0.000000e+00 : f32
      %752 = vector.broadcast %cst_443 : f32 to vector<8x256xf32>
      %c0_444 = arith.constant 0 : index
      %c0_445 = arith.constant 0 : index
      %753 = vector.load %arg10[%c0_444, %c0_445] : memref<8x256xf32, #tpu.memory_space<vmem>>, vector<8x256xf32>
      tpu.vector_store %arg10[%c0_444, %c0_445], %752 {strides = array<i32>} : memref<8x256xf32, #tpu.memory_space<vmem>>, vector<8x256xf32>,
      %cst_446 = arith.constant 0.000000e+00 : f32
      %754 = vector.broadcast %cst_446 : f32 to vector<1x8x256xf32>
      %c0_447 = arith.constant 0 : index
      %c0_448 = arith.constant 0 : index
      %c0_449 = arith.constant 0 : index
      %755 = vector.load %arg11[%c0_447, %c0_448, %c0_449] : memref<1x8x256xf32, #tpu.memory_space<vmem>>, vector<1x8x256xf32>
      tpu.vector_store %arg11[%c0_447, %c0_448, %c0_449], %754 {strides = array<i32>} : memref<1x8x256xf32, #tpu.memory_space<vmem>>, vector<1x8x256xf32>,
    } else {
    }
    %c0 = arith.constant 0 : index
    %c0_1 = arith.constant 0 : index
    %c0_2 = arith.constant 0 : index
    %3 = vector.load %arg5[%c0, %c0_1, %c0_2] : memref<2x1x512xf32, #tpu.memory_space<vmem>>, vector<1x1x512xf32>
    %4 = vector.shape_cast %3 : vector<1x1x512xf32> to vector<1x512xf32>
    %5 = vector.shape_cast %4 : vector<1x512xf32> to vector<1x512xf32>
    %6 = vector.broadcast %5 : vector<1x512xf32> to vector<8x512xf32>
    %c1 = arith.constant 1 : index
    %c0_3 = arith.constant 0 : index
    %c0_4 = arith.constant 0 : index
    %7 = vector.load %arg5[%c1, %c0_3, %c0_4] : memref<2x1x512xf32, #tpu.memory_space<vmem>>, vector<1x1x512xf32>
    %8 = vector.shape_cast %7 : vector<1x1x512xf32> to vector<1x512xf32>
    %9 = vector.shape_cast %8 : vector<1x512xf32> to vector<1x512xf32>
    %10 = vector.broadcast %9 : vector<1x512xf32> to vector<8x512xf32>
    %c0_5 = arith.constant 0 : index
    %c0_6 = arith.constant 0 : index
    %c0_7 = arith.constant 0 : index
    %11 = vector.load %arg2[%c0_5, %c0_6, %c0_7] : memref<8x8x128xf32, #tpu.memory_space<vmem>>, vector<1x8x128xf32>
    %12 = vector.shape_cast %11 : vector<1x8x128xf32> to vector<8x128xf32>
    %c0_8 = arith.constant 0 : index
    %c0_9 = arith.constant 0 : index
    %13 = vector.load %arg10[%c0_8, %c0_9] : memref<8x256xf32, #tpu.memory_space<vmem>>, vector<8x128xf32>
    tpu.vector_store %arg10[%c0_8, %c0_9], %12 {strides = array<i32>} : memref<8x256xf32, #tpu.memory_space<vmem>>, vector<8x128xf32>,
    %c0_10 = arith.constant 0 : index
    %c0_11 = arith.constant 0 : index
    %14 = vector.load %arg10[%c0_10, %c0_11] : memref<8x256xf32, #tpu.memory_space<vmem>>, vector<8x256xf32>
    %c0_12 = arith.constant 0 : index
    %c0_13 = arith.constant 0 : index
    %15 = vector.load %arg3[%c0_12, %c0_13] : memref<256x512xf32, #tpu.memory_space<vmem>>, vector<256x512xf32>
    %cst = arith.constant dense<0.000000e+00> : vector<8x512xf32>
    %16 = tpu.matmul %14, %15, %cst {dimension_numbers = #tpu.dot_dimension_numbers<[1], [0], [0], [1], [0, 0, 1, 1], [], []>} : vector<8x256xf32>, vector<256x512xf32>, vector<8x512xf32> -> vector<8x512xf32>
    %17 = arith.addf %16, %6 : vector<8x512xf32>
    %18 = vector.extract_strided_slice %17 {offsets = [0, 0], sizes = [8, 128], strides = [1, 1]} : vector<8x512xf32> to vector<8x128xf32>
    %cst_14 = arith.constant 5.000000e-01 : f32
    %19 = vector.broadcast %cst_14 : f32 to vector<8x128xf32>
    %20 = arith.mulf %19, %18 : vector<8x128xf32>
    %21 = math.tanh %20 : vector<8x128xf32>
    %cst_15 = arith.constant 5.000000e-01 : f32
    %22 = vector.broadcast %cst_15 : f32 to vector<8x128xf32>
    %23 = arith.mulf %22, %21 : vector<8x128xf32>
    %cst_16 = arith.constant 5.000000e-01 : f32
    %24 = vector.broadcast %cst_16 : f32 to vector<8x128xf32>
    %25 = arith.addf %23, %24 : vector<8x128xf32>
    %26 = vector.extract_strided_slice %17 {offsets = [0, 128], sizes = [8, 128], strides = [1, 1]} : vector<8x512xf32> to vector<8x128xf32>
    %cst_17 = arith.constant 5.000000e-01 : f32
    %27 = vector.broadcast %cst_17 : f32 to vector<8x128xf32>
    %28 = arith.mulf %27, %26 : vector<8x128xf32>
    %29 = math.tanh %28 : vector<8x128xf32>
    %cst_18 = arith.constant 5.000000e-01 : f32
    %30 = vector.broadcast %cst_18 : f32 to vector<8x128xf32>
    %31 = arith.mulf %30, %29 : vector<8x128xf32>
    %cst_19 = arith.constant 5.000000e-01 : f32
    %32 = vector.broadcast %cst_19 : f32 to vector<8x128xf32>
    %33 = arith.addf %31, %32 : vector<8x128xf32>
    %34 = vector.extract_strided_slice %17 {offsets = [0, 256], sizes = [8, 128], strides = [1, 1]} : vector<8x512xf32> to vector<8x128xf32>
    %35 = math.tanh %34 : vector<8x128xf32>
    %36 = vector.extract_strided_slice %17 {offsets = [0, 384], sizes = [8, 128], strides = [1, 1]} : vector<8x512xf32> to vector<8x128xf32>
    %cst_20 = arith.constant 5.000000e-01 : f32
    %37 = vector.broadcast %cst_20 : f32 to vector<8x128xf32>
    %38 = arith.mulf %37, %36 : vector<8x128xf32>
    %39 = math.tanh %38 : vector<8x128xf32>
    %cst_21 = arith.constant 5.000000e-01 : f32
    %40 = vector.broadcast %cst_21 : f32 to vector<8x128xf32>
    %41 = arith.mulf %40, %39 : vector<8x128xf32>
    %cst_22 = arith.constant 5.000000e-01 : f32
    %42 = vector.broadcast %cst_22 : f32 to vector<8x128xf32>
    %43 = arith.addf %41, %42 : vector<8x128xf32>
    %c0_23 = arith.constant 0 : index
    %c0_24 = arith.constant 0 : index
    %c0_25 = arith.constant 0 : index
    %44 = vector.load %arg9[%c0_23, %c0_24, %c0_25] : memref<2x8x128xf32, #tpu.memory_space<vmem>>, vector<1x8x128xf32>
    %45 = vector.shape_cast %44 : vector<1x8x128xf32> to vector<8x128xf32>
    %46 = arith.mulf %33, %45 : vector<8x128xf32>
    %47 = arith.mulf %25, %35 : vector<8x128xf32>
    %48 = arith.addf %46, %47 : vector<8x128xf32>
    %49 = math.tanh %48 : vector<8x128xf32>
    %50 = arith.mulf %43, %49 : vector<8x128xf32>
    %c0_26 = arith.constant 0 : index
    %c0_27 = arith.constant 0 : index
    %c0_28 = arith.constant 0 : index
    %51 = vector.load %arg9[%c0_26, %c0_27, %c0_28] : memref<2x8x128xf32, #tpu.memory_space<vmem>>, vector<1x8x128xf32>
    %52 = vector.shape_cast %51 : vector<1x8x128xf32> to vector<8x128xf32>
    %53 = vector.shape_cast %48 : vector<8x128xf32> to vector<1x8x128xf32>
    tpu.vector_store %arg9[%c0_26, %c0_27, %c0_28], %53 {strides = array<i32>} : memref<2x8x128xf32, #tpu.memory_space<vmem>>, vector<1x8x128xf32>,
    %c0_29 = arith.constant 0 : index
    %c128 = arith.constant 128 : index
    %54 = vector.load %arg10[%c0_29, %c128] : memref<8x256xf32, #tpu.memory_space<vmem>>, vector<8x128xf32>
    tpu.vector_store %arg10[%c0_29, %c128], %50 {strides = array<i32>} : memref<8x256xf32, #tpu.memory_space<vmem>>, vector<8x128xf32>,
    %c0_30 = arith.constant 0 : index
    %c0_31 = arith.constant 0 : index
    %c0_32 = arith.constant 0 : index
    %55 = vector.load %arg11[%c0_30, %c0_31, %c0_32] : memref<1x8x256xf32, #tpu.memory_space<vmem>>, vector<1x8x128xf32>
    %56 = vector.shape_cast %55 : vector<1x8x128xf32> to vector<8x128xf32>
    %57 = vector.shape_cast %50 : vector<8x128xf32> to vector<1x8x128xf32>
    tpu.vector_store %arg11[%c0_30, %c0_31, %c0_32], %57 {strides = array<i32>} : memref<1x8x256xf32, #tpu.memory_space<vmem>>, vector<1x8x128xf32>,
    %c0_33 = arith.constant 0 : index
    %c0_34 = arith.constant 0 : index
    %c0_35 = arith.constant 0 : index
    %58 = vector.load %arg11[%c0_33, %c0_34, %c0_35] : memref<1x8x256xf32, #tpu.memory_space<vmem>>, vector<1x8x256xf32>
    %59 = vector.shape_cast %58 : vector<1x8x256xf32> to vector<8x256xf32>
    %c0_36 = arith.constant 0 : index
    %c0_37 = arith.constant 0 : index
    %c0_38 = arith.constant 0 : index
    %60 = vector.load %arg4[%c0_36, %c0_37, %c0_38] : memref<1x256x512xf32, #tpu.memory_space<vmem>>, vector<1x256x512xf32>
    %61 = vector.shape_cast %60 : vector<1x256x512xf32> to vector<256x512xf32>
    %cst_39 = arith.constant dense<0.000000e+00> : vector<8x512xf32>
    %62 = tpu.matmul %59, %61, %cst_39 {dimension_numbers = #tpu.dot_dimension_numbers<[1], [0], [0], [1], [0, 0, 1, 1], [], []>} : vector<8x256xf32>, vector<256x512xf32>, vector<8x512xf32> -> vector<8x512xf32>
    %63 = arith.addf %62, %10 : vector<8x512xf32>
    %64 = vector.extract_strided_slice %63 {offsets = [0, 0], sizes = [8, 128], strides = [1, 1]} : vector<8x512xf32> to vector<8x128xf32>
    %cst_40 = arith.constant 5.000000e-01 : f32
    %65 = vector.broadcast %cst_40 : f32 to vector<8x128xf32>
    %66 = arith.mulf %65, %64 : vector<8x128xf32>
    %67 = math.tanh %66 : vector<8x128xf32>
    %cst_41 = arith.constant 5.000000e-01 : f32
    %68 = vector.broadcast %cst_41 : f32 to vector<8x128xf32>
    %69 = arith.mulf %68, %67 : vector<8x128xf32>
    %cst_42 = arith.constant 5.000000e-01 : f32
    %70 = vector.broadcast %cst_42 : f32 to vector<8x128xf32>
    %71 = arith.addf %69, %70 : vector<8x128xf32>
    %72 = vector.extract_strided_slice %63 {offsets = [0, 128], sizes = [8, 128], strides = [1, 1]} : vector<8x512xf32> to vector<8x128xf32>
    %cst_43 = arith.constant 5.000000e-01 : f32
    %73 = vector.broadcast %cst_43 : f32 to vector<8x128xf32>
    %74 = arith.mulf %73, %72 : vector<8x128xf32>
    %75 = math.tanh %74 : vector<8x128xf32>
    %cst_44 = arith.constant 5.000000e-01 : f32
    %76 = vector.broadcast %cst_44 : f32 to vector<8x128xf32>
    %77 = arith.mulf %76, %75 : vector<8x128xf32>
    %cst_45 = arith.constant 5.000000e-01 : f32
    %78 = vector.broadcast %cst_45 : f32 to vector<8x128xf32>
    %79 = arith.addf %77, %78 : vector<8x128xf32>
    %80 = vector.extract_strided_slice %63 {offsets = [0, 256], sizes = [8, 128], strides = [1, 1]} : vector<8x512xf32> to vector<8x128xf32>
    %81 = math.tanh %80 : vector<8x128xf32>
    %82 = vector.extract_strided_slice %63 {offsets = [0, 384], sizes = [8, 128], strides = [1, 1]} : vector<8x512xf32> to vector<8x128xf32>
    %cst_46 = arith.constant 5.000000e-01 : f32
    %83 = vector.broadcast %cst_46 : f32 to vector<8x128xf32>
    %84 = arith.mulf %83, %82 : vector<8x128xf32>
    %85 = math.tanh %84 : vector<8x128xf32>
    %cst_47 = arith.constant 5.000000e-01 : f32
    %86 = vector.broadcast %cst_47 : f32 to vector<8x128xf32>
    %87 = arith.mulf %86, %85 : vector<8x128xf32>
    %cst_48 = arith.constant 5.000000e-01 : f32
    %88 = vector.broadcast %cst_48 : f32 to vector<8x128xf32>
    %89 = arith.addf %87, %88 : vector<8x128xf32>
    %c1_49 = arith.constant 1 : index
    %c0_50 = arith.constant 0 : index
    %c0_51 = arith.constant 0 : index
    %90 = vector.load %arg9[%c1_49, %c0_50, %c0_51] : memref<2x8x128xf32, #tpu.memory_space<vmem>>, vector<1x8x128xf32>
    %91 = vector.shape_cast %90 : vector<1x8x128xf32> to vector<8x128xf32>
    %92 = arith.mulf %79, %91 : vector<8x128xf32>
    %93 = arith.mulf %71, %81 : vector<8x128xf32>
    %94 = arith.addf %92, %93 : vector<8x128xf32>
    %95 = math.tanh %94 : vector<8x128xf32>
    %96 = arith.mulf %89, %95 : vector<8x128xf32>
    %c1_52 = arith.constant 1 : index
    %c0_53 = arith.constant 0 : index
    %c0_54 = arith.constant 0 : index
    %97 = vector.load %arg9[%c1_52, %c0_53, %c0_54] : memref<2x8x128xf32, #tpu.memory_space<vmem>>, vector<1x8x128xf32>
    %98 = vector.shape_cast %97 : vector<1x8x128xf32> to vector<8x128xf32>
    %99 = vector.shape_cast %94 : vector<8x128xf32> to vector<1x8x128xf32>
    tpu.vector_store %arg9[%c1_52, %c0_53, %c0_54], %99 {strides = array<i32>} : memref<2x8x128xf32, #tpu.memory_space<vmem>>, vector<1x8x128xf32>,
    %c0_55 = arith.constant 0 : index
    %c0_56 = arith.constant 0 : index
    %c128_57 = arith.constant 128 : index
    %100 = vector.load %arg11[%c0_55, %c0_56, %c128_57] : memref<1x8x256xf32, #tpu.memory_space<vmem>>, vector<1x8x128xf32>
    %101 = vector.shape_cast %100 : vector<1x8x128xf32> to vector<8x128xf32>
    %102 = vector.shape_cast %96 : vector<8x128xf32> to vector<1x8x128xf32>
    tpu.vector_store %arg11[%c0_55, %c0_56, %c128_57], %102 {strides = array<i32>} : memref<1x8x256xf32, #tpu.memory_space<vmem>>, vector<1x8x128xf32>,
    %c1_58 = arith.constant 1 : index
    %c0_59 = arith.constant 0 : index
    %c0_60 = arith.constant 0 : index
    %103 = vector.load %arg2[%c1_58, %c0_59, %c0_60] : memref<8x8x128xf32, #tpu.memory_space<vmem>>, vector<1x8x128xf32>
    %104 = vector.shape_cast %103 : vector<1x8x128xf32> to vector<8x128xf32>
    %c0_61 = arith.constant 0 : index
    %c0_62 = arith.constant 0 : index
    %105 = vector.load %arg10[%c0_61, %c0_62] : memref<8x256xf32, #tpu.memory_space<vmem>>, vector<8x128xf32>
    tpu.vector_store %arg10[%c0_61, %c0_62], %104 {strides = array<i32>} : memref<8x256xf32, #tpu.memory_space<vmem>>, vector<8x128xf32>,
    %c0_63 = arith.constant 0 : index
    %c0_64 = arith.constant 0 : index
    %106 = vector.load %arg10[%c0_63, %c0_64] : memref<8x256xf32, #tpu.memory_space<vmem>>, vector<8x256xf32>
    %c0_65 = arith.constant 0 : index
    %c0_66 = arith.constant 0 : index
    %107 = vector.load %arg3[%c0_65, %c0_66] : memref<256x512xf32, #tpu.memory_space<vmem>>, vector<256x512xf32>
    %cst_67 = arith.constant dense<0.000000e+00> : vector<8x512xf32>
    %108 = tpu.matmul %106, %107, %cst_67 {dimension_numbers = #tpu.dot_dimension_numbers<[1], [0], [0], [1], [0, 0, 1, 1], [], []>} : vector<8x256xf32>, vector<256x512xf32>, vector<8x512xf32> -> vector<8x512xf32>
    %109 = arith.addf %108, %6 : vector<8x512xf32>
    %110 = vector.extract_strided_slice %109 {offsets = [0, 0], sizes = [8, 128], strides = [1, 1]} : vector<8x512xf32> to vector<8x128xf32>
    %cst_68 = arith.constant 5.000000e-01 : f32
    %111 = vector.broadcast %cst_68 : f32 to vector<8x128xf32>
    %112 = arith.mulf %111, %110 : vector<8x128xf32>
    %113 = math.tanh %112 : vector<8x128xf32>
    %cst_69 = arith.constant 5.000000e-01 : f32
    %114 = vector.broadcast %cst_69 : f32 to vector<8x128xf32>
    %115 = arith.mulf %114, %113 : vector<8x128xf32>
    %cst_70 = arith.constant 5.000000e-01 : f32
    %116 = vector.broadcast %cst_70 : f32 to vector<8x128xf32>
    %117 = arith.addf %115, %116 : vector<8x128xf32>
    %118 = vector.extract_strided_slice %109 {offsets = [0, 128], sizes = [8, 128], strides = [1, 1]} : vector<8x512xf32> to vector<8x128xf32>
    %cst_71 = arith.constant 5.000000e-01 : f32
    %119 = vector.broadcast %cst_71 : f32 to vector<8x128xf32>
    %120 = arith.mulf %119, %118 : vector<8x128xf32>
    %121 = math.tanh %120 : vector<8x128xf32>
    %cst_72 = arith.constant 5.000000e-01 : f32
    %122 = vector.broadcast %cst_72 : f32 to vector<8x128xf32>
    %123 = arith.mulf %122, %121 : vector<8x128xf32>
    %cst_73 = arith.constant 5.000000e-01 : f32
    %124 = vector.broadcast %cst_73 : f32 to vector<8x128xf32>
    %125 = arith.addf %123, %124 : vector<8x128xf32>
    %126 = vector.extract_strided_slice %109 {offsets = [0, 256], sizes = [8, 128], strides = [1, 1]} : vector<8x512xf32> to vector<8x128xf32>
    %127 = math.tanh %126 : vector<8x128xf32>
    %128 = vector.extract_strided_slice %109 {offsets = [0, 384], sizes = [8, 128], strides = [1, 1]} : vector<8x512xf32> to vector<8x128xf32>
    %cst_74 = arith.constant 5.000000e-01 : f32
    %129 = vector.broadcast %cst_74 : f32 to vector<8x128xf32>
    %130 = arith.mulf %129, %128 : vector<8x128xf32>
    %131 = math.tanh %130 : vector<8x128xf32>
    %cst_75 = arith.constant 5.000000e-01 : f32
    %132 = vector.broadcast %cst_75 : f32 to vector<8x128xf32>
    %133 = arith.mulf %132, %131 : vector<8x128xf32>
    %cst_76 = arith.constant 5.000000e-01 : f32
    %134 = vector.broadcast %cst_76 : f32 to vector<8x128xf32>
    %135 = arith.addf %133, %134 : vector<8x128xf32>
    %c0_77 = arith.constant 0 : index
    %c0_78 = arith.constant 0 : index
    %c0_79 = arith.constant 0 : index
    %136 = vector.load %arg9[%c0_77, %c0_78, %c0_79] : memref<2x8x128xf32, #tpu.memory_space<vmem>>, vector<1x8x128xf32>
    %137 = vector.shape_cast %136 : vector<1x8x128xf32> to vector<8x128xf32>
    %138 = arith.mulf %125, %137 : vector<8x128xf32>
    %139 = arith.mulf %117, %127 : vector<8x128xf32>
    %140 = arith.addf %138, %139 : vector<8x128xf32>
    %141 = math.tanh %140 : vector<8x128xf32>
    %142 = arith.mulf %135, %141 : vector<8x128xf32>
    %c0_80 = arith.constant 0 : index
    %c0_81 = arith.constant 0 : index
    %c0_82 = arith.constant 0 : index
    %143 = vector.load %arg9[%c0_80, %c0_81, %c0_82] : memref<2x8x128xf32, #tpu.memory_space<vmem>>, vector<1x8x128xf32>
    %144 = vector.shape_cast %143 : vector<1x8x128xf32> to vector<8x128xf32>
    %145 = vector.shape_cast %140 : vector<8x128xf32> to vector<1x8x128xf32>
    tpu.vector_store %arg9[%c0_80, %c0_81, %c0_82], %145 {strides = array<i32>} : memref<2x8x128xf32, #tpu.memory_space<vmem>>, vector<1x8x128xf32>,
    %c0_83 = arith.constant 0 : index
    %c128_84 = arith.constant 128 : index
    %146 = vector.load %arg10[%c0_83, %c128_84] : memref<8x256xf32, #tpu.memory_space<vmem>>, vector<8x128xf32>
    tpu.vector_store %arg10[%c0_83, %c128_84], %142 {strides = array<i32>} : memref<8x256xf32, #tpu.memory_space<vmem>>, vector<8x128xf32>,
    %c0_85 = arith.constant 0 : index
    %c0_86 = arith.constant 0 : index
    %c0_87 = arith.constant 0 : index
    %147 = vector.load %arg11[%c0_85, %c0_86, %c0_87] : memref<1x8x256xf32, #tpu.memory_space<vmem>>, vector<1x8x128xf32>
    %148 = vector.shape_cast %147 : vector<1x8x128xf32> to vector<8x128xf32>
    %149 = vector.shape_cast %142 : vector<8x128xf32> to vector<1x8x128xf32>
    tpu.vector_store %arg11[%c0_85, %c0_86, %c0_87], %149 {strides = array<i32>} : memref<1x8x256xf32, #tpu.memory_space<vmem>>, vector<1x8x128xf32>,
    %c0_88 = arith.constant 0 : index
    %c0_89 = arith.constant 0 : index
    %c0_90 = arith.constant 0 : index
    %150 = vector.load %arg11[%c0_88, %c0_89, %c0_90] : memref<1x8x256xf32, #tpu.memory_space<vmem>>, vector<1x8x256xf32>
    %151 = vector.shape_cast %150 : vector<1x8x256xf32> to vector<8x256xf32>
    %c0_91 = arith.constant 0 : index
    %c0_92 = arith.constant 0 : index
    %c0_93 = arith.constant 0 : index
    %152 = vector.load %arg4[%c0_91, %c0_92, %c0_93] : memref<1x256x512xf32, #tpu.memory_space<vmem>>, vector<1x256x512xf32>
    %153 = vector.shape_cast %152 : vector<1x256x512xf32> to vector<256x512xf32>
    %cst_94 = arith.constant dense<0.000000e+00> : vector<8x512xf32>
    %154 = tpu.matmul %151, %153, %cst_94 {dimension_numbers = #tpu.dot_dimension_numbers<[1], [0], [0], [1], [0, 0, 1, 1], [], []>} : vector<8x256xf32>, vector<256x512xf32>, vector<8x512xf32> -> vector<8x512xf32>
    %155 = arith.addf %154, %10 : vector<8x512xf32>
    %156 = vector.extract_strided_slice %155 {offsets = [0, 0], sizes = [8, 128], strides = [1, 1]} : vector<8x512xf32> to vector<8x128xf32>
    %cst_95 = arith.constant 5.000000e-01 : f32
    %157 = vector.broadcast %cst_95 : f32 to vector<8x128xf32>
    %158 = arith.mulf %157, %156 : vector<8x128xf32>
    %159 = math.tanh %158 : vector<8x128xf32>
    %cst_96 = arith.constant 5.000000e-01 : f32
    %160 = vector.broadcast %cst_96 : f32 to vector<8x128xf32>
    %161 = arith.mulf %160, %159 : vector<8x128xf32>
    %cst_97 = arith.constant 5.000000e-01 : f32
    %162 = vector.broadcast %cst_97 : f32 to vector<8x128xf32>
    %163 = arith.addf %161, %162 : vector<8x128xf32>
    %164 = vector.extract_strided_slice %155 {offsets = [0, 128], sizes = [8, 128], strides = [1, 1]} : vector<8x512xf32> to vector<8x128xf32>
    %cst_98 = arith.constant 5.000000e-01 : f32
    %165 = vector.broadcast %cst_98 : f32 to vector<8x128xf32>
    %166 = arith.mulf %165, %164 : vector<8x128xf32>
    %167 = math.tanh %166 : vector<8x128xf32>
    %cst_99 = arith.constant 5.000000e-01 : f32
    %168 = vector.broadcast %cst_99 : f32 to vector<8x128xf32>
    %169 = arith.mulf %168, %167 : vector<8x128xf32>
    %cst_100 = arith.constant 5.000000e-01 : f32
    %170 = vector.broadcast %cst_100 : f32 to vector<8x128xf32>
    %171 = arith.addf %169, %170 : vector<8x128xf32>
    %172 = vector.extract_strided_slice %155 {offsets = [0, 256], sizes = [8, 128], strides = [1, 1]} : vector<8x512xf32> to vector<8x128xf32>
    %173 = math.tanh %172 : vector<8x128xf32>
    %174 = vector.extract_strided_slice %155 {offsets = [0, 384], sizes = [8, 128], strides = [1, 1]} : vector<8x512xf32> to vector<8x128xf32>
    %cst_101 = arith.constant 5.000000e-01 : f32
    %175 = vector.broadcast %cst_101 : f32 to vector<8x128xf32>
    %176 = arith.mulf %175, %174 : vector<8x128xf32>
    %177 = math.tanh %176 : vector<8x128xf32>
    %cst_102 = arith.constant 5.000000e-01 : f32
    %178 = vector.broadcast %cst_102 : f32 to vector<8x128xf32>
    %179 = arith.mulf %178, %177 : vector<8x128xf32>
    %cst_103 = arith.constant 5.000000e-01 : f32
    %180 = vector.broadcast %cst_103 : f32 to vector<8x128xf32>
    %181 = arith.addf %179, %180 : vector<8x128xf32>
    %c1_104 = arith.constant 1 : index
    %c0_105 = arith.constant 0 : index
    %c0_106 = arith.constant 0 : index
    %182 = vector.load %arg9[%c1_104, %c0_105, %c0_106] : memref<2x8x128xf32, #tpu.memory_space<vmem>>, vector<1x8x128xf32>
    %183 = vector.shape_cast %182 : vector<1x8x128xf32> to vector<8x128xf32>
    %184 = arith.mulf %171, %183 : vector<8x128xf32>
    %185 = arith.mulf %163, %173 : vector<8x128xf32>
    %186 = arith.addf %184, %185 : vector<8x128xf32>
    %187 = math.tanh %186 : vector<8x128xf32>
    %188 = arith.mulf %181, %187 : vector<8x128xf32>
    %c1_107 = arith.constant 1 : index
    %c0_108 = arith.constant 0 : index
    %c0_109 = arith.constant 0 : index
    %189 = vector.load %arg9[%c1_107, %c0_108, %c0_109] : memref<2x8x128xf32, #tpu.memory_space<vmem>>, vector<1x8x128xf32>
    %190 = vector.shape_cast %189 : vector<1x8x128xf32> to vector<8x128xf32>
    %191 = vector.shape_cast %186 : vector<8x128xf32> to vector<1x8x128xf32>
    tpu.vector_store %arg9[%c1_107, %c0_108, %c0_109], %191 {strides = array<i32>} : memref<2x8x128xf32, #tpu.memory_space<vmem>>, vector<1x8x128xf32>,
    %c0_110 = arith.constant 0 : index
    %c0_111 = arith.constant 0 : index
    %c128_112 = arith.constant 128 : index
    %192 = vector.load %arg11[%c0_110, %c0_111, %c128_112] : memref<1x8x256xf32, #tpu.memory_space<vmem>>, vector<1x8x128xf32>
    %193 = vector.shape_cast %192 : vector<1x8x128xf32> to vector<8x128xf32>
    %194 = vector.shape_cast %188 : vector<8x128xf32> to vector<1x8x128xf32>
    tpu.vector_store %arg11[%c0_110, %c0_111, %c128_112], %194 {strides = array<i32>} : memref<1x8x256xf32, #tpu.memory_space<vmem>>, vector<1x8x128xf32>,
    %c2 = arith.constant 2 : index
    %c0_113 = arith.constant 0 : index
    %c0_114 = arith.constant 0 : index
    %195 = vector.load %arg2[%c2, %c0_113, %c0_114] : memref<8x8x128xf32, #tpu.memory_space<vmem>>, vector<1x8x128xf32>
    %196 = vector.shape_cast %195 : vector<1x8x128xf32> to vector<8x128xf32>
    %c0_115 = arith.constant 0 : index
    %c0_116 = arith.constant 0 : index
    %197 = vector.load %arg10[%c0_115, %c0_116] : memref<8x256xf32, #tpu.memory_space<vmem>>, vector<8x128xf32>
    tpu.vector_store %arg10[%c0_115, %c0_116], %196 {strides = array<i32>} : memref<8x256xf32, #tpu.memory_space<vmem>>, vector<8x128xf32>,
    %c0_117 = arith.constant 0 : index
    %c0_118 = arith.constant 0 : index
    %198 = vector.load %arg10[%c0_117, %c0_118] : memref<8x256xf32, #tpu.memory_space<vmem>>, vector<8x256xf32>
    %c0_119 = arith.constant 0 : index
    %c0_120 = arith.constant 0 : index
    %199 = vector.load %arg3[%c0_119, %c0_120] : memref<256x512xf32, #tpu.memory_space<vmem>>, vector<256x512xf32>
    %cst_121 = arith.constant dense<0.000000e+00> : vector<8x512xf32>
    %200 = tpu.matmul %198, %199, %cst_121 {dimension_numbers = #tpu.dot_dimension_numbers<[1], [0], [0], [1], [0, 0, 1, 1], [], []>} : vector<8x256xf32>, vector<256x512xf32>, vector<8x512xf32> -> vector<8x512xf32>
    %201 = arith.addf %200, %6 : vector<8x512xf32>
    %202 = vector.extract_strided_slice %201 {offsets = [0, 0], sizes = [8, 128], strides = [1, 1]} : vector<8x512xf32> to vector<8x128xf32>
    %cst_122 = arith.constant 5.000000e-01 : f32
    %203 = vector.broadcast %cst_122 : f32 to vector<8x128xf32>
    %204 = arith.mulf %203, %202 : vector<8x128xf32>
    %205 = math.tanh %204 : vector<8x128xf32>
    %cst_123 = arith.constant 5.000000e-01 : f32
    %206 = vector.broadcast %cst_123 : f32 to vector<8x128xf32>
    %207 = arith.mulf %206, %205 : vector<8x128xf32>
    %cst_124 = arith.constant 5.000000e-01 : f32
    %208 = vector.broadcast %cst_124 : f32 to vector<8x128xf32>
    %209 = arith.addf %207, %208 : vector<8x128xf32>
    %210 = vector.extract_strided_slice %201 {offsets = [0, 128], sizes = [8, 128], strides = [1, 1]} : vector<8x512xf32> to vector<8x128xf32>
    %cst_125 = arith.constant 5.000000e-01 : f32
    %211 = vector.broadcast %cst_125 : f32 to vector<8x128xf32>
    %212 = arith.mulf %211, %210 : vector<8x128xf32>
    %213 = math.tanh %212 : vector<8x128xf32>
    %cst_126 = arith.constant 5.000000e-01 : f32
    %214 = vector.broadcast %cst_126 : f32 to vector<8x128xf32>
    %215 = arith.mulf %214, %213 : vector<8x128xf32>
    %cst_127 = arith.constant 5.000000e-01 : f32
    %216 = vector.broadcast %cst_127 : f32 to vector<8x128xf32>
    %217 = arith.addf %215, %216 : vector<8x128xf32>
    %218 = vector.extract_strided_slice %201 {offsets = [0, 256], sizes = [8, 128], strides = [1, 1]} : vector<8x512xf32> to vector<8x128xf32>
    %219 = math.tanh %218 : vector<8x128xf32>
    %220 = vector.extract_strided_slice %201 {offsets = [0, 384], sizes = [8, 128], strides = [1, 1]} : vector<8x512xf32> to vector<8x128xf32>
    %cst_128 = arith.constant 5.000000e-01 : f32
    %221 = vector.broadcast %cst_128 : f32 to vector<8x128xf32>
    %222 = arith.mulf %221, %220 : vector<8x128xf32>
    %223 = math.tanh %222 : vector<8x128xf32>
    %cst_129 = arith.constant 5.000000e-01 : f32
    %224 = vector.broadcast %cst_129 : f32 to vector<8x128xf32>
    %225 = arith.mulf %224, %223 : vector<8x128xf32>
    %cst_130 = arith.constant 5.000000e-01 : f32
    %226 = vector.broadcast %cst_130 : f32 to vector<8x128xf32>
    %227 = arith.addf %225, %226 : vector<8x128xf32>
    %c0_131 = arith.constant 0 : index
    %c0_132 = arith.constant 0 : index
    %c0_133 = arith.constant 0 : index
    %228 = vector.load %arg9[%c0_131, %c0_132, %c0_133] : memref<2x8x128xf32, #tpu.memory_space<vmem>>, vector<1x8x128xf32>
    %229 = vector.shape_cast %228 : vector<1x8x128xf32> to vector<8x128xf32>
    %230 = arith.mulf %217, %229 : vector<8x128xf32>
    %231 = arith.mulf %209, %219 : vector<8x128xf32>
    %232 = arith.addf %230, %231 : vector<8x128xf32>
    %233 = math.tanh %232 : vector<8x128xf32>
    %234 = arith.mulf %227, %233 : vector<8x128xf32>
    %c0_134 = arith.constant 0 : index
    %c0_135 = arith.constant 0 : index
    %c0_136 = arith.constant 0 : index
    %235 = vector.load %arg9[%c0_134, %c0_135, %c0_136] : memref<2x8x128xf32, #tpu.memory_space<vmem>>, vector<1x8x128xf32>
    %236 = vector.shape_cast %235 : vector<1x8x128xf32> to vector<8x128xf32>
    %237 = vector.shape_cast %232 : vector<8x128xf32> to vector<1x8x128xf32>
    tpu.vector_store %arg9[%c0_134, %c0_135, %c0_136], %237 {strides = array<i32>} : memref<2x8x128xf32, #tpu.memory_space<vmem>>, vector<1x8x128xf32>,
    %c0_137 = arith.constant 0 : index
    %c128_138 = arith.constant 128 : index
    %238 = vector.load %arg10[%c0_137, %c128_138] : memref<8x256xf32, #tpu.memory_space<vmem>>, vector<8x128xf32>
    tpu.vector_store %arg10[%c0_137, %c128_138], %234 {strides = array<i32>} : memref<8x256xf32, #tpu.memory_space<vmem>>, vector<8x128xf32>,
    %c0_139 = arith.constant 0 : index
    %c0_140 = arith.constant 0 : index
    %c0_141 = arith.constant 0 : index
    %239 = vector.load %arg11[%c0_139, %c0_140, %c0_141] : memref<1x8x256xf32, #tpu.memory_space<vmem>>, vector<1x8x128xf32>
    %240 = vector.shape_cast %239 : vector<1x8x128xf32> to vector<8x128xf32>
    %241 = vector.shape_cast %234 : vector<8x128xf32> to vector<1x8x128xf32>
    tpu.vector_store %arg11[%c0_139, %c0_140, %c0_141], %241 {strides = array<i32>} : memref<1x8x256xf32, #tpu.memory_space<vmem>>, vector<1x8x128xf32>,
    %c0_142 = arith.constant 0 : index
    %c0_143 = arith.constant 0 : index
    %c0_144 = arith.constant 0 : index
    %242 = vector.load %arg11[%c0_142, %c0_143, %c0_144] : memref<1x8x256xf32, #tpu.memory_space<vmem>>, vector<1x8x256xf32>
    %243 = vector.shape_cast %242 : vector<1x8x256xf32> to vector<8x256xf32>
    %c0_145 = arith.constant 0 : index
    %c0_146 = arith.constant 0 : index
    %c0_147 = arith.constant 0 : index
    %244 = vector.load %arg4[%c0_145, %c0_146, %c0_147] : memref<1x256x512xf32, #tpu.memory_space<vmem>>, vector<1x256x512xf32>
    %245 = vector.shape_cast %244 : vector<1x256x512xf32> to vector<256x512xf32>
    %cst_148 = arith.constant dense<0.000000e+00> : vector<8x512xf32>
    %246 = tpu.matmul %243, %245, %cst_148 {dimension_numbers = #tpu.dot_dimension_numbers<[1], [0], [0], [1], [0, 0, 1, 1], [], []>} : vector<8x256xf32>, vector<256x512xf32>, vector<8x512xf32> -> vector<8x512xf32>
    %247 = arith.addf %246, %10 : vector<8x512xf32>
    %248 = vector.extract_strided_slice %247 {offsets = [0, 0], sizes = [8, 128], strides = [1, 1]} : vector<8x512xf32> to vector<8x128xf32>
    %cst_149 = arith.constant 5.000000e-01 : f32
    %249 = vector.broadcast %cst_149 : f32 to vector<8x128xf32>
    %250 = arith.mulf %249, %248 : vector<8x128xf32>
    %251 = math.tanh %250 : vector<8x128xf32>
    %cst_150 = arith.constant 5.000000e-01 : f32
    %252 = vector.broadcast %cst_150 : f32 to vector<8x128xf32>
    %253 = arith.mulf %252, %251 : vector<8x128xf32>
    %cst_151 = arith.constant 5.000000e-01 : f32
    %254 = vector.broadcast %cst_151 : f32 to vector<8x128xf32>
    %255 = arith.addf %253, %254 : vector<8x128xf32>
    %256 = vector.extract_strided_slice %247 {offsets = [0, 128], sizes = [8, 128], strides = [1, 1]} : vector<8x512xf32> to vector<8x128xf32>
    %cst_152 = arith.constant 5.000000e-01 : f32
    %257 = vector.broadcast %cst_152 : f32 to vector<8x128xf32>
    %258 = arith.mulf %257, %256 : vector<8x128xf32>
    %259 = math.tanh %258 : vector<8x128xf32>
    %cst_153 = arith.constant 5.000000e-01 : f32
    %260 = vector.broadcast %cst_153 : f32 to vector<8x128xf32>
    %261 = arith.mulf %260, %259 : vector<8x128xf32>
    %cst_154 = arith.constant 5.000000e-01 : f32
    %262 = vector.broadcast %cst_154 : f32 to vector<8x128xf32>
    %263 = arith.addf %261, %262 : vector<8x128xf32>
    %264 = vector.extract_strided_slice %247 {offsets = [0, 256], sizes = [8, 128], strides = [1, 1]} : vector<8x512xf32> to vector<8x128xf32>
    %265 = math.tanh %264 : vector<8x128xf32>
    %266 = vector.extract_strided_slice %247 {offsets = [0, 384], sizes = [8, 128], strides = [1, 1]} : vector<8x512xf32> to vector<8x128xf32>
    %cst_155 = arith.constant 5.000000e-01 : f32
    %267 = vector.broadcast %cst_155 : f32 to vector<8x128xf32>
    %268 = arith.mulf %267, %266 : vector<8x128xf32>
    %269 = math.tanh %268 : vector<8x128xf32>
    %cst_156 = arith.constant 5.000000e-01 : f32
    %270 = vector.broadcast %cst_156 : f32 to vector<8x128xf32>
    %271 = arith.mulf %270, %269 : vector<8x128xf32>
    %cst_157 = arith.constant 5.000000e-01 : f32
    %272 = vector.broadcast %cst_157 : f32 to vector<8x128xf32>
    %273 = arith.addf %271, %272 : vector<8x128xf32>
    %c1_158 = arith.constant 1 : index
    %c0_159 = arith.constant 0 : index
    %c0_160 = arith.constant 0 : index
    %274 = vector.load %arg9[%c1_158, %c0_159, %c0_160] : memref<2x8x128xf32, #tpu.memory_space<vmem>>, vector<1x8x128xf32>
    %275 = vector.shape_cast %274 : vector<1x8x128xf32> to vector<8x128xf32>
    %276 = arith.mulf %263, %275 : vector<8x128xf32>
    %277 = arith.mulf %255, %265 : vector<8x128xf32>
    %278 = arith.addf %276, %277 : vector<8x128xf32>
    %279 = math.tanh %278 : vector<8x128xf32>
    %280 = arith.mulf %273, %279 : vector<8x128xf32>
    %c1_161 = arith.constant 1 : index
    %c0_162 = arith.constant 0 : index
    %c0_163 = arith.constant 0 : index
    %281 = vector.load %arg9[%c1_161, %c0_162, %c0_163] : memref<2x8x128xf32, #tpu.memory_space<vmem>>, vector<1x8x128xf32>
    %282 = vector.shape_cast %281 : vector<1x8x128xf32> to vector<8x128xf32>
    %283 = vector.shape_cast %278 : vector<8x128xf32> to vector<1x8x128xf32>
    tpu.vector_store %arg9[%c1_161, %c0_162, %c0_163], %283 {strides = array<i32>} : memref<2x8x128xf32, #tpu.memory_space<vmem>>, vector<1x8x128xf32>,
    %c0_164 = arith.constant 0 : index
    %c0_165 = arith.constant 0 : index
    %c128_166 = arith.constant 128 : index
    %284 = vector.load %arg11[%c0_164, %c0_165, %c128_166] : memref<1x8x256xf32, #tpu.memory_space<vmem>>, vector<1x8x128xf32>
    %285 = vector.shape_cast %284 : vector<1x8x128xf32> to vector<8x128xf32>
    %286 = vector.shape_cast %280 : vector<8x128xf32> to vector<1x8x128xf32>
    tpu.vector_store %arg11[%c0_164, %c0_165, %c128_166], %286 {strides = array<i32>} : memref<1x8x256xf32, #tpu.memory_space<vmem>>, vector<1x8x128xf32>,
    %c3 = arith.constant 3 : index
    %c0_167 = arith.constant 0 : index
    %c0_168 = arith.constant 0 : index
    %287 = vector.load %arg2[%c3, %c0_167, %c0_168] : memref<8x8x128xf32, #tpu.memory_space<vmem>>, vector<1x8x128xf32>
    %288 = vector.shape_cast %287 : vector<1x8x128xf32> to vector<8x128xf32>
    %c0_169 = arith.constant 0 : index
    %c0_170 = arith.constant 0 : index
    %289 = vector.load %arg10[%c0_169, %c0_170] : memref<8x256xf32, #tpu.memory_space<vmem>>, vector<8x128xf32>
    tpu.vector_store %arg10[%c0_169, %c0_170], %288 {strides = array<i32>} : memref<8x256xf32, #tpu.memory_space<vmem>>, vector<8x128xf32>,
    %c0_171 = arith.constant 0 : index
    %c0_172 = arith.constant 0 : index
    %290 = vector.load %arg10[%c0_171, %c0_172] : memref<8x256xf32, #tpu.memory_space<vmem>>, vector<8x256xf32>
    %c0_173 = arith.constant 0 : index
    %c0_174 = arith.constant 0 : index
    %291 = vector.load %arg3[%c0_173, %c0_174] : memref<256x512xf32, #tpu.memory_space<vmem>>, vector<256x512xf32>
    %cst_175 = arith.constant dense<0.000000e+00> : vector<8x512xf32>
    %292 = tpu.matmul %290, %291, %cst_175 {dimension_numbers = #tpu.dot_dimension_numbers<[1], [0], [0], [1], [0, 0, 1, 1], [], []>} : vector<8x256xf32>, vector<256x512xf32>, vector<8x512xf32> -> vector<8x512xf32>
    %293 = arith.addf %292, %6 : vector<8x512xf32>
    %294 = vector.extract_strided_slice %293 {offsets = [0, 0], sizes = [8, 128], strides = [1, 1]} : vector<8x512xf32> to vector<8x128xf32>
    %cst_176 = arith.constant 5.000000e-01 : f32
    %295 = vector.broadcast %cst_176 : f32 to vector<8x128xf32>
    %296 = arith.mulf %295, %294 : vector<8x128xf32>
    %297 = math.tanh %296 : vector<8x128xf32>
    %cst_177 = arith.constant 5.000000e-01 : f32
    %298 = vector.broadcast %cst_177 : f32 to vector<8x128xf32>
    %299 = arith.mulf %298, %297 : vector<8x128xf32>
    %cst_178 = arith.constant 5.000000e-01 : f32
    %300 = vector.broadcast %cst_178 : f32 to vector<8x128xf32>
    %301 = arith.addf %299, %300 : vector<8x128xf32>
    %302 = vector.extract_strided_slice %293 {offsets = [0, 128], sizes = [8, 128], strides = [1, 1]} : vector<8x512xf32> to vector<8x128xf32>
    %cst_179 = arith.constant 5.000000e-01 : f32
    %303 = vector.broadcast %cst_179 : f32 to vector<8x128xf32>
    %304 = arith.mulf %303, %302 : vector<8x128xf32>
    %305 = math.tanh %304 : vector<8x128xf32>
    %cst_180 = arith.constant 5.000000e-01 : f32
    %306 = vector.broadcast %cst_180 : f32 to vector<8x128xf32>
    %307 = arith.mulf %306, %305 : vector<8x128xf32>
    %cst_181 = arith.constant 5.000000e-01 : f32
    %308 = vector.broadcast %cst_181 : f32 to vector<8x128xf32>
    %309 = arith.addf %307, %308 : vector<8x128xf32>
    %310 = vector.extract_strided_slice %293 {offsets = [0, 256], sizes = [8, 128], strides = [1, 1]} : vector<8x512xf32> to vector<8x128xf32>
    %311 = math.tanh %310 : vector<8x128xf32>
    %312 = vector.extract_strided_slice %293 {offsets = [0, 384], sizes = [8, 128], strides = [1, 1]} : vector<8x512xf32> to vector<8x128xf32>
    %cst_182 = arith.constant 5.000000e-01 : f32
    %313 = vector.broadcast %cst_182 : f32 to vector<8x128xf32>
    %314 = arith.mulf %313, %312 : vector<8x128xf32>
    %315 = math.tanh %314 : vector<8x128xf32>
    %cst_183 = arith.constant 5.000000e-01 : f32
    %316 = vector.broadcast %cst_183 : f32 to vector<8x128xf32>
    %317 = arith.mulf %316, %315 : vector<8x128xf32>
    %cst_184 = arith.constant 5.000000e-01 : f32
    %318 = vector.broadcast %cst_184 : f32 to vector<8x128xf32>
    %319 = arith.addf %317, %318 : vector<8x128xf32>
    %c0_185 = arith.constant 0 : index
    %c0_186 = arith.constant 0 : index
    %c0_187 = arith.constant 0 : index
    %320 = vector.load %arg9[%c0_185, %c0_186, %c0_187] : memref<2x8x128xf32, #tpu.memory_space<vmem>>, vector<1x8x128xf32>
    %321 = vector.shape_cast %320 : vector<1x8x128xf32> to vector<8x128xf32>
    %322 = arith.mulf %309, %321 : vector<8x128xf32>
    %323 = arith.mulf %301, %311 : vector<8x128xf32>
    %324 = arith.addf %322, %323 : vector<8x128xf32>
    %325 = math.tanh %324 : vector<8x128xf32>
    %326 = arith.mulf %319, %325 : vector<8x128xf32>
    %c0_188 = arith.constant 0 : index
    %c0_189 = arith.constant 0 : index
    %c0_190 = arith.constant 0 : index
    %327 = vector.load %arg9[%c0_188, %c0_189, %c0_190] : memref<2x8x128xf32, #tpu.memory_space<vmem>>, vector<1x8x128xf32>
    %328 = vector.shape_cast %327 : vector<1x8x128xf32> to vector<8x128xf32>
    %329 = vector.shape_cast %324 : vector<8x128xf32> to vector<1x8x128xf32>
    tpu.vector_store %arg9[%c0_188, %c0_189, %c0_190], %329 {strides = array<i32>} : memref<2x8x128xf32, #tpu.memory_space<vmem>>, vector<1x8x128xf32>,
    %c0_191 = arith.constant 0 : index
    %c128_192 = arith.constant 128 : index
    %330 = vector.load %arg10[%c0_191, %c128_192] : memref<8x256xf32, #tpu.memory_space<vmem>>, vector<8x128xf32>
    tpu.vector_store %arg10[%c0_191, %c128_192], %326 {strides = array<i32>} : memref<8x256xf32, #tpu.memory_space<vmem>>, vector<8x128xf32>,
    %c0_193 = arith.constant 0 : index
    %c0_194 = arith.constant 0 : index
    %c0_195 = arith.constant 0 : index
    %331 = vector.load %arg11[%c0_193, %c0_194, %c0_195] : memref<1x8x256xf32, #tpu.memory_space<vmem>>, vector<1x8x128xf32>
    %332 = vector.shape_cast %331 : vector<1x8x128xf32> to vector<8x128xf32>
    %333 = vector.shape_cast %326 : vector<8x128xf32> to vector<1x8x128xf32>
    tpu.vector_store %arg11[%c0_193, %c0_194, %c0_195], %333 {strides = array<i32>} : memref<1x8x256xf32, #tpu.memory_space<vmem>>, vector<1x8x128xf32>,
    %c0_196 = arith.constant 0 : index
    %c0_197 = arith.constant 0 : index
    %c0_198 = arith.constant 0 : index
    %334 = vector.load %arg11[%c0_196, %c0_197, %c0_198] : memref<1x8x256xf32, #tpu.memory_space<vmem>>, vector<1x8x256xf32>
    %335 = vector.shape_cast %334 : vector<1x8x256xf32> to vector<8x256xf32>
    %c0_199 = arith.constant 0 : index
    %c0_200 = arith.constant 0 : index
    %c0_201 = arith.constant 0 : index
    %336 = vector.load %arg4[%c0_199, %c0_200, %c0_201] : memref<1x256x512xf32, #tpu.memory_space<vmem>>, vector<1x256x512xf32>
    %337 = vector.shape_cast %336 : vector<1x256x512xf32> to vector<256x512xf32>
    %cst_202 = arith.constant dense<0.000000e+00> : vector<8x512xf32>
    %338 = tpu.matmul %335, %337, %cst_202 {dimension_numbers = #tpu.dot_dimension_numbers<[1], [0], [0], [1], [0, 0, 1, 1], [], []>} : vector<8x256xf32>, vector<256x512xf32>, vector<8x512xf32> -> vector<8x512xf32>
    %339 = arith.addf %338, %10 : vector<8x512xf32>
    %340 = vector.extract_strided_slice %339 {offsets = [0, 0], sizes = [8, 128], strides = [1, 1]} : vector<8x512xf32> to vector<8x128xf32>
    %cst_203 = arith.constant 5.000000e-01 : f32
    %341 = vector.broadcast %cst_203 : f32 to vector<8x128xf32>
    %342 = arith.mulf %341, %340 : vector<8x128xf32>
    %343 = math.tanh %342 : vector<8x128xf32>
    %cst_204 = arith.constant 5.000000e-01 : f32
    %344 = vector.broadcast %cst_204 : f32 to vector<8x128xf32>
    %345 = arith.mulf %344, %343 : vector<8x128xf32>
    %cst_205 = arith.constant 5.000000e-01 : f32
    %346 = vector.broadcast %cst_205 : f32 to vector<8x128xf32>
    %347 = arith.addf %345, %346 : vector<8x128xf32>
    %348 = vector.extract_strided_slice %339 {offsets = [0, 128], sizes = [8, 128], strides = [1, 1]} : vector<8x512xf32> to vector<8x128xf32>
    %cst_206 = arith.constant 5.000000e-01 : f32
    %349 = vector.broadcast %cst_206 : f32 to vector<8x128xf32>
    %350 = arith.mulf %349, %348 : vector<8x128xf32>
    %351 = math.tanh %350 : vector<8x128xf32>
    %cst_207 = arith.constant 5.000000e-01 : f32
    %352 = vector.broadcast %cst_207 : f32 to vector<8x128xf32>
    %353 = arith.mulf %352, %351 : vector<8x128xf32>
    %cst_208 = arith.constant 5.000000e-01 : f32
    %354 = vector.broadcast %cst_208 : f32 to vector<8x128xf32>
    %355 = arith.addf %353, %354 : vector<8x128xf32>
    %356 = vector.extract_strided_slice %339 {offsets = [0, 256], sizes = [8, 128], strides = [1, 1]} : vector<8x512xf32> to vector<8x128xf32>
    %357 = math.tanh %356 : vector<8x128xf32>
    %358 = vector.extract_strided_slice %339 {offsets = [0, 384], sizes = [8, 128], strides = [1, 1]} : vector<8x512xf32> to vector<8x128xf32>
    %cst_209 = arith.constant 5.000000e-01 : f32
    %359 = vector.broadcast %cst_209 : f32 to vector<8x128xf32>
    %360 = arith.mulf %359, %358 : vector<8x128xf32>
    %361 = math.tanh %360 : vector<8x128xf32>
    %cst_210 = arith.constant 5.000000e-01 : f32
    %362 = vector.broadcast %cst_210 : f32 to vector<8x128xf32>
    %363 = arith.mulf %362, %361 : vector<8x128xf32>
    %cst_211 = arith.constant 5.000000e-01 : f32
    %364 = vector.broadcast %cst_211 : f32 to vector<8x128xf32>
    %365 = arith.addf %363, %364 : vector<8x128xf32>
    %c1_212 = arith.constant 1 : index
    %c0_213 = arith.constant 0 : index
    %c0_214 = arith.constant 0 : index
    %366 = vector.load %arg9[%c1_212, %c0_213, %c0_214] : memref<2x8x128xf32, #tpu.memory_space<vmem>>, vector<1x8x128xf32>
    %367 = vector.shape_cast %366 : vector<1x8x128xf32> to vector<8x128xf32>
    %368 = arith.mulf %355, %367 : vector<8x128xf32>
    %369 = arith.mulf %347, %357 : vector<8x128xf32>
    %370 = arith.addf %368, %369 : vector<8x128xf32>
    %371 = math.tanh %370 : vector<8x128xf32>
    %372 = arith.mulf %365, %371 : vector<8x128xf32>
    %c1_215 = arith.constant 1 : index
    %c0_216 = arith.constant 0 : index
    %c0_217 = arith.constant 0 : index
    %373 = vector.load %arg9[%c1_215, %c0_216, %c0_217] : memref<2x8x128xf32, #tpu.memory_space<vmem>>, vector<1x8x128xf32>
    %374 = vector.shape_cast %373 : vector<1x8x128xf32> to vector<8x128xf32>
    %375 = vector.shape_cast %370 : vector<8x128xf32> to vector<1x8x128xf32>
    tpu.vector_store %arg9[%c1_215, %c0_216, %c0_217], %375 {strides = array<i32>} : memref<2x8x128xf32, #tpu.memory_space<vmem>>, vector<1x8x128xf32>,
    %c0_218 = arith.constant 0 : index
    %c0_219 = arith.constant 0 : index
    %c128_220 = arith.constant 128 : index
    %376 = vector.load %arg11[%c0_218, %c0_219, %c128_220] : memref<1x8x256xf32, #tpu.memory_space<vmem>>, vector<1x8x128xf32>
    %377 = vector.shape_cast %376 : vector<1x8x128xf32> to vector<8x128xf32>
    %378 = vector.shape_cast %372 : vector<8x128xf32> to vector<1x8x128xf32>
    tpu.vector_store %arg11[%c0_218, %c0_219, %c128_220], %378 {strides = array<i32>} : memref<1x8x256xf32, #tpu.memory_space<vmem>>, vector<1x8x128xf32>,
    %c4 = arith.constant 4 : index
    %c0_221 = arith.constant 0 : index
    %c0_222 = arith.constant 0 : index
    %379 = vector.load %arg2[%c4, %c0_221, %c0_222] : memref<8x8x128xf32, #tpu.memory_space<vmem>>, vector<1x8x128xf32>
    %380 = vector.shape_cast %379 : vector<1x8x128xf32> to vector<8x128xf32>
    %c0_223 = arith.constant 0 : index
    %c0_224 = arith.constant 0 : index
    %381 = vector.load %arg10[%c0_223, %c0_224] : memref<8x256xf32, #tpu.memory_space<vmem>>, vector<8x128xf32>
    tpu.vector_store %arg10[%c0_223, %c0_224], %380 {strides = array<i32>} : memref<8x256xf32, #tpu.memory_space<vmem>>, vector<8x128xf32>,
    %c0_225 = arith.constant 0 : index
    %c0_226 = arith.constant 0 : index
    %382 = vector.load %arg10[%c0_225, %c0_226] : memref<8x256xf32, #tpu.memory_space<vmem>>, vector<8x256xf32>
    %c0_227 = arith.constant 0 : index
    %c0_228 = arith.constant 0 : index
    %383 = vector.load %arg3[%c0_227, %c0_228] : memref<256x512xf32, #tpu.memory_space<vmem>>, vector<256x512xf32>
    %cst_229 = arith.constant dense<0.000000e+00> : vector<8x512xf32>
    %384 = tpu.matmul %382, %383, %cst_229 {dimension_numbers = #tpu.dot_dimension_numbers<[1], [0], [0], [1], [0, 0, 1, 1], [], []>} : vector<8x256xf32>, vector<256x512xf32>, vector<8x512xf32> -> vector<8x512xf32>
    %385 = arith.addf %384, %6 : vector<8x512xf32>
    %386 = vector.extract_strided_slice %385 {offsets = [0, 0], sizes = [8, 128], strides = [1, 1]} : vector<8x512xf32> to vector<8x128xf32>
    %cst_230 = arith.constant 5.000000e-01 : f32
    %387 = vector.broadcast %cst_230 : f32 to vector<8x128xf32>
    %388 = arith.mulf %387, %386 : vector<8x128xf32>
    %389 = math.tanh %388 : vector<8x128xf32>
    %cst_231 = arith.constant 5.000000e-01 : f32
    %390 = vector.broadcast %cst_231 : f32 to vector<8x128xf32>
    %391 = arith.mulf %390, %389 : vector<8x128xf32>
    %cst_232 = arith.constant 5.000000e-01 : f32
    %392 = vector.broadcast %cst_232 : f32 to vector<8x128xf32>
    %393 = arith.addf %391, %392 : vector<8x128xf32>
    %394 = vector.extract_strided_slice %385 {offsets = [0, 128], sizes = [8, 128], strides = [1, 1]} : vector<8x512xf32> to vector<8x128xf32>
    %cst_233 = arith.constant 5.000000e-01 : f32
    %395 = vector.broadcast %cst_233 : f32 to vector<8x128xf32>
    %396 = arith.mulf %395, %394 : vector<8x128xf32>
    %397 = math.tanh %396 : vector<8x128xf32>
    %cst_234 = arith.constant 5.000000e-01 : f32
    %398 = vector.broadcast %cst_234 : f32 to vector<8x128xf32>
    %399 = arith.mulf %398, %397 : vector<8x128xf32>
    %cst_235 = arith.constant 5.000000e-01 : f32
    %400 = vector.broadcast %cst_235 : f32 to vector<8x128xf32>
    %401 = arith.addf %399, %400 : vector<8x128xf32>
    %402 = vector.extract_strided_slice %385 {offsets = [0, 256], sizes = [8, 128], strides = [1, 1]} : vector<8x512xf32> to vector<8x128xf32>
    %403 = math.tanh %402 : vector<8x128xf32>
    %404 = vector.extract_strided_slice %385 {offsets = [0, 384], sizes = [8, 128], strides = [1, 1]} : vector<8x512xf32> to vector<8x128xf32>
    %cst_236 = arith.constant 5.000000e-01 : f32
    %405 = vector.broadcast %cst_236 : f32 to vector<8x128xf32>
    %406 = arith.mulf %405, %404 : vector<8x128xf32>
    %407 = math.tanh %406 : vector<8x128xf32>
    %cst_237 = arith.constant 5.000000e-01 : f32
    %408 = vector.broadcast %cst_237 : f32 to vector<8x128xf32>
    %409 = arith.mulf %408, %407 : vector<8x128xf32>
    %cst_238 = arith.constant 5.000000e-01 : f32
    %410 = vector.broadcast %cst_238 : f32 to vector<8x128xf32>
    %411 = arith.addf %409, %410 : vector<8x128xf32>
    %c0_239 = arith.constant 0 : index
    %c0_240 = arith.constant 0 : index
    %c0_241 = arith.constant 0 : index
    %412 = vector.load %arg9[%c0_239, %c0_240, %c0_241] : memref<2x8x128xf32, #tpu.memory_space<vmem>>, vector<1x8x128xf32>
    %413 = vector.shape_cast %412 : vector<1x8x128xf32> to vector<8x128xf32>
    %414 = arith.mulf %401, %413 : vector<8x128xf32>
    %415 = arith.mulf %393, %403 : vector<8x128xf32>
    %416 = arith.addf %414, %415 : vector<8x128xf32>
    %417 = math.tanh %416 : vector<8x128xf32>
    %418 = arith.mulf %411, %417 : vector<8x128xf32>
    %c0_242 = arith.constant 0 : index
    %c0_243 = arith.constant 0 : index
    %c0_244 = arith.constant 0 : index
    %419 = vector.load %arg9[%c0_242, %c0_243, %c0_244] : memref<2x8x128xf32, #tpu.memory_space<vmem>>, vector<1x8x128xf32>
    %420 = vector.shape_cast %419 : vector<1x8x128xf32> to vector<8x128xf32>
    %421 = vector.shape_cast %416 : vector<8x128xf32> to vector<1x8x128xf32>
    tpu.vector_store %arg9[%c0_242, %c0_243, %c0_244], %421 {strides = array<i32>} : memref<2x8x128xf32, #tpu.memory_space<vmem>>, vector<1x8x128xf32>,
    %c0_245 = arith.constant 0 : index
    %c128_246 = arith.constant 128 : index
    %422 = vector.load %arg10[%c0_245, %c128_246] : memref<8x256xf32, #tpu.memory_space<vmem>>, vector<8x128xf32>
    tpu.vector_store %arg10[%c0_245, %c128_246], %418 {strides = array<i32>} : memref<8x256xf32, #tpu.memory_space<vmem>>, vector<8x128xf32>,
    %c0_247 = arith.constant 0 : index
    %c0_248 = arith.constant 0 : index
    %c0_249 = arith.constant 0 : index
    %423 = vector.load %arg11[%c0_247, %c0_248, %c0_249] : memref<1x8x256xf32, #tpu.memory_space<vmem>>, vector<1x8x128xf32>
    %424 = vector.shape_cast %423 : vector<1x8x128xf32> to vector<8x128xf32>
    %425 = vector.shape_cast %418 : vector<8x128xf32> to vector<1x8x128xf32>
    tpu.vector_store %arg11[%c0_247, %c0_248, %c0_249], %425 {strides = array<i32>} : memref<1x8x256xf32, #tpu.memory_space<vmem>>, vector<1x8x128xf32>,
    %c0_250 = arith.constant 0 : index
    %c0_251 = arith.constant 0 : index
    %c0_252 = arith.constant 0 : index
    %426 = vector.load %arg11[%c0_250, %c0_251, %c0_252] : memref<1x8x256xf32, #tpu.memory_space<vmem>>, vector<1x8x256xf32>
    %427 = vector.shape_cast %426 : vector<1x8x256xf32> to vector<8x256xf32>
    %c0_253 = arith.constant 0 : index
    %c0_254 = arith.constant 0 : index
    %c0_255 = arith.constant 0 : index
    %428 = vector.load %arg4[%c0_253, %c0_254, %c0_255] : memref<1x256x512xf32, #tpu.memory_space<vmem>>, vector<1x256x512xf32>
    %429 = vector.shape_cast %428 : vector<1x256x512xf32> to vector<256x512xf32>
    %cst_256 = arith.constant dense<0.000000e+00> : vector<8x512xf32>
    %430 = tpu.matmul %427, %429, %cst_256 {dimension_numbers = #tpu.dot_dimension_numbers<[1], [0], [0], [1], [0, 0, 1, 1], [], []>} : vector<8x256xf32>, vector<256x512xf32>, vector<8x512xf32> -> vector<8x512xf32>
    %431 = arith.addf %430, %10 : vector<8x512xf32>
    %432 = vector.extract_strided_slice %431 {offsets = [0, 0], sizes = [8, 128], strides = [1, 1]} : vector<8x512xf32> to vector<8x128xf32>
    %cst_257 = arith.constant 5.000000e-01 : f32
    %433 = vector.broadcast %cst_257 : f32 to vector<8x128xf32>
    %434 = arith.mulf %433, %432 : vector<8x128xf32>
    %435 = math.tanh %434 : vector<8x128xf32>
    %cst_258 = arith.constant 5.000000e-01 : f32
    %436 = vector.broadcast %cst_258 : f32 to vector<8x128xf32>
    %437 = arith.mulf %436, %435 : vector<8x128xf32>
    %cst_259 = arith.constant 5.000000e-01 : f32
    %438 = vector.broadcast %cst_259 : f32 to vector<8x128xf32>
    %439 = arith.addf %437, %438 : vector<8x128xf32>
    %440 = vector.extract_strided_slice %431 {offsets = [0, 128], sizes = [8, 128], strides = [1, 1]} : vector<8x512xf32> to vector<8x128xf32>
    %cst_260 = arith.constant 5.000000e-01 : f32
    %441 = vector.broadcast %cst_260 : f32 to vector<8x128xf32>
    %442 = arith.mulf %441, %440 : vector<8x128xf32>
    %443 = math.tanh %442 : vector<8x128xf32>
    %cst_261 = arith.constant 5.000000e-01 : f32
    %444 = vector.broadcast %cst_261 : f32 to vector<8x128xf32>
    %445 = arith.mulf %444, %443 : vector<8x128xf32>
    %cst_262 = arith.constant 5.000000e-01 : f32
    %446 = vector.broadcast %cst_262 : f32 to vector<8x128xf32>
    %447 = arith.addf %445, %446 : vector<8x128xf32>
    %448 = vector.extract_strided_slice %431 {offsets = [0, 256], sizes = [8, 128], strides = [1, 1]} : vector<8x512xf32> to vector<8x128xf32>
    %449 = math.tanh %448 : vector<8x128xf32>
    %450 = vector.extract_strided_slice %431 {offsets = [0, 384], sizes = [8, 128], strides = [1, 1]} : vector<8x512xf32> to vector<8x128xf32>
    %cst_263 = arith.constant 5.000000e-01 : f32
    %451 = vector.broadcast %cst_263 : f32 to vector<8x128xf32>
    %452 = arith.mulf %451, %450 : vector<8x128xf32>
    %453 = math.tanh %452 : vector<8x128xf32>
    %cst_264 = arith.constant 5.000000e-01 : f32
    %454 = vector.broadcast %cst_264 : f32 to vector<8x128xf32>
    %455 = arith.mulf %454, %453 : vector<8x128xf32>
    %cst_265 = arith.constant 5.000000e-01 : f32
    %456 = vector.broadcast %cst_265 : f32 to vector<8x128xf32>
    %457 = arith.addf %455, %456 : vector<8x128xf32>
    %c1_266 = arith.constant 1 : index
    %c0_267 = arith.constant 0 : index
    %c0_268 = arith.constant 0 : index
    %458 = vector.load %arg9[%c1_266, %c0_267, %c0_268] : memref<2x8x128xf32, #tpu.memory_space<vmem>>, vector<1x8x128xf32>
    %459 = vector.shape_cast %458 : vector<1x8x128xf32> to vector<8x128xf32>
    %460 = arith.mulf %447, %459 : vector<8x128xf32>
    %461 = arith.mulf %439, %449 : vector<8x128xf32>
    %462 = arith.addf %460, %461 : vector<8x128xf32>
    %463 = math.tanh %462 : vector<8x128xf32>
    %464 = arith.mulf %457, %463 : vector<8x128xf32>
    %c1_269 = arith.constant 1 : index
    %c0_270 = arith.constant 0 : index
    %c0_271 = arith.constant 0 : index
    %465 = vector.load %arg9[%c1_269, %c0_270, %c0_271] : memref<2x8x128xf32, #tpu.memory_space<vmem>>, vector<1x8x128xf32>
    %466 = vector.shape_cast %465 : vector<1x8x128xf32> to vector<8x128xf32>
    %467 = vector.shape_cast %462 : vector<8x128xf32> to vector<1x8x128xf32>
    tpu.vector_store %arg9[%c1_269, %c0_270, %c0_271], %467 {strides = array<i32>} : memref<2x8x128xf32, #tpu.memory_space<vmem>>, vector<1x8x128xf32>,
    %c0_272 = arith.constant 0 : index
    %c0_273 = arith.constant 0 : index
    %c128_274 = arith.constant 128 : index
    %468 = vector.load %arg11[%c0_272, %c0_273, %c128_274] : memref<1x8x256xf32, #tpu.memory_space<vmem>>, vector<1x8x128xf32>
    %469 = vector.shape_cast %468 : vector<1x8x128xf32> to vector<8x128xf32>
    %470 = vector.shape_cast %464 : vector<8x128xf32> to vector<1x8x128xf32>
    tpu.vector_store %arg11[%c0_272, %c0_273, %c128_274], %470 {strides = array<i32>} : memref<1x8x256xf32, #tpu.memory_space<vmem>>, vector<1x8x128xf32>,
    %c5 = arith.constant 5 : index
    %c0_275 = arith.constant 0 : index
    %c0_276 = arith.constant 0 : index
    %471 = vector.load %arg2[%c5, %c0_275, %c0_276] : memref<8x8x128xf32, #tpu.memory_space<vmem>>, vector<1x8x128xf32>
    %472 = vector.shape_cast %471 : vector<1x8x128xf32> to vector<8x128xf32>
    %c0_277 = arith.constant 0 : index
    %c0_278 = arith.constant 0 : index
    %473 = vector.load %arg10[%c0_277, %c0_278] : memref<8x256xf32, #tpu.memory_space<vmem>>, vector<8x128xf32>
    tpu.vector_store %arg10[%c0_277, %c0_278], %472 {strides = array<i32>} : memref<8x256xf32, #tpu.memory_space<vmem>>, vector<8x128xf32>,
    %c0_279 = arith.constant 0 : index
    %c0_280 = arith.constant 0 : index
    %474 = vector.load %arg10[%c0_279, %c0_280] : memref<8x256xf32, #tpu.memory_space<vmem>>, vector<8x256xf32>
    %c0_281 = arith.constant 0 : index
    %c0_282 = arith.constant 0 : index
    %475 = vector.load %arg3[%c0_281, %c0_282] : memref<256x512xf32, #tpu.memory_space<vmem>>, vector<256x512xf32>
    %cst_283 = arith.constant dense<0.000000e+00> : vector<8x512xf32>
    %476 = tpu.matmul %474, %475, %cst_283 {dimension_numbers = #tpu.dot_dimension_numbers<[1], [0], [0], [1], [0, 0, 1, 1], [], []>} : vector<8x256xf32>, vector<256x512xf32>, vector<8x512xf32> -> vector<8x512xf32>
    %477 = arith.addf %476, %6 : vector<8x512xf32>
    %478 = vector.extract_strided_slice %477 {offsets = [0, 0], sizes = [8, 128], strides = [1, 1]} : vector<8x512xf32> to vector<8x128xf32>
    %cst_284 = arith.constant 5.000000e-01 : f32
    %479 = vector.broadcast %cst_284 : f32 to vector<8x128xf32>
    %480 = arith.mulf %479, %478 : vector<8x128xf32>
    %481 = math.tanh %480 : vector<8x128xf32>
    %cst_285 = arith.constant 5.000000e-01 : f32
    %482 = vector.broadcast %cst_285 : f32 to vector<8x128xf32>
    %483 = arith.mulf %482, %481 : vector<8x128xf32>
    %cst_286 = arith.constant 5.000000e-01 : f32
    %484 = vector.broadcast %cst_286 : f32 to vector<8x128xf32>
    %485 = arith.addf %483, %484 : vector<8x128xf32>
    %486 = vector.extract_strided_slice %477 {offsets = [0, 128], sizes = [8, 128], strides = [1, 1]} : vector<8x512xf32> to vector<8x128xf32>
    %cst_287 = arith.constant 5.000000e-01 : f32
    %487 = vector.broadcast %cst_287 : f32 to vector<8x128xf32>
    %488 = arith.mulf %487, %486 : vector<8x128xf32>
    %489 = math.tanh %488 : vector<8x128xf32>
    %cst_288 = arith.constant 5.000000e-01 : f32
    %490 = vector.broadcast %cst_288 : f32 to vector<8x128xf32>
    %491 = arith.mulf %490, %489 : vector<8x128xf32>
    %cst_289 = arith.constant 5.000000e-01 : f32
    %492 = vector.broadcast %cst_289 : f32 to vector<8x128xf32>
    %493 = arith.addf %491, %492 : vector<8x128xf32>
    %494 = vector.extract_strided_slice %477 {offsets = [0, 256], sizes = [8, 128], strides = [1, 1]} : vector<8x512xf32> to vector<8x128xf32>
    %495 = math.tanh %494 : vector<8x128xf32>
    %496 = vector.extract_strided_slice %477 {offsets = [0, 384], sizes = [8, 128], strides = [1, 1]} : vector<8x512xf32> to vector<8x128xf32>
    %cst_290 = arith.constant 5.000000e-01 : f32
    %497 = vector.broadcast %cst_290 : f32 to vector<8x128xf32>
    %498 = arith.mulf %497, %496 : vector<8x128xf32>
    %499 = math.tanh %498 : vector<8x128xf32>
    %cst_291 = arith.constant 5.000000e-01 : f32
    %500 = vector.broadcast %cst_291 : f32 to vector<8x128xf32>
    %501 = arith.mulf %500, %499 : vector<8x128xf32>
    %cst_292 = arith.constant 5.000000e-01 : f32
    %502 = vector.broadcast %cst_292 : f32 to vector<8x128xf32>
    %503 = arith.addf %501, %502 : vector<8x128xf32>
    %c0_293 = arith.constant 0 : index
    %c0_294 = arith.constant 0 : index
    %c0_295 = arith.constant 0 : index
    %504 = vector.load %arg9[%c0_293, %c0_294, %c0_295] : memref<2x8x128xf32, #tpu.memory_space<vmem>>, vector<1x8x128xf32>
    %505 = vector.shape_cast %504 : vector<1x8x128xf32> to vector<8x128xf32>
    %506 = arith.mulf %493, %505 : vector<8x128xf32>
    %507 = arith.mulf %485, %495 : vector<8x128xf32>
    %508 = arith.addf %506, %507 : vector<8x128xf32>
    %509 = math.tanh %508 : vector<8x128xf32>
    %510 = arith.mulf %503, %509 : vector<8x128xf32>
    %c0_296 = arith.constant 0 : index
    %c0_297 = arith.constant 0 : index
    %c0_298 = arith.constant 0 : index
    %511 = vector.load %arg9[%c0_296, %c0_297, %c0_298] : memref<2x8x128xf32, #tpu.memory_space<vmem>>, vector<1x8x128xf32>
    %512 = vector.shape_cast %511 : vector<1x8x128xf32> to vector<8x128xf32>
    %513 = vector.shape_cast %508 : vector<8x128xf32> to vector<1x8x128xf32>
    tpu.vector_store %arg9[%c0_296, %c0_297, %c0_298], %513 {strides = array<i32>} : memref<2x8x128xf32, #tpu.memory_space<vmem>>, vector<1x8x128xf32>,
    %c0_299 = arith.constant 0 : index
    %c128_300 = arith.constant 128 : index
    %514 = vector.load %arg10[%c0_299, %c128_300] : memref<8x256xf32, #tpu.memory_space<vmem>>, vector<8x128xf32>
    tpu.vector_store %arg10[%c0_299, %c128_300], %510 {strides = array<i32>} : memref<8x256xf32, #tpu.memory_space<vmem>>, vector<8x128xf32>,
    %c0_301 = arith.constant 0 : index
    %c0_302 = arith.constant 0 : index
    %c0_303 = arith.constant 0 : index
    %515 = vector.load %arg11[%c0_301, %c0_302, %c0_303] : memref<1x8x256xf32, #tpu.memory_space<vmem>>, vector<1x8x128xf32>
    %516 = vector.shape_cast %515 : vector<1x8x128xf32> to vector<8x128xf32>
    %517 = vector.shape_cast %510 : vector<8x128xf32> to vector<1x8x128xf32>
    tpu.vector_store %arg11[%c0_301, %c0_302, %c0_303], %517 {strides = array<i32>} : memref<1x8x256xf32, #tpu.memory_space<vmem>>, vector<1x8x128xf32>,
    %c0_304 = arith.constant 0 : index
    %c0_305 = arith.constant 0 : index
    %c0_306 = arith.constant 0 : index
    %518 = vector.load %arg11[%c0_304, %c0_305, %c0_306] : memref<1x8x256xf32, #tpu.memory_space<vmem>>, vector<1x8x256xf32>
    %519 = vector.shape_cast %518 : vector<1x8x256xf32> to vector<8x256xf32>
    %c0_307 = arith.constant 0 : index
    %c0_308 = arith.constant 0 : index
    %c0_309 = arith.constant 0 : index
    %520 = vector.load %arg4[%c0_307, %c0_308, %c0_309] : memref<1x256x512xf32, #tpu.memory_space<vmem>>, vector<1x256x512xf32>
    %521 = vector.shape_cast %520 : vector<1x256x512xf32> to vector<256x512xf32>
    %cst_310 = arith.constant dense<0.000000e+00> : vector<8x512xf32>
    %522 = tpu.matmul %519, %521, %cst_310 {dimension_numbers = #tpu.dot_dimension_numbers<[1], [0], [0], [1], [0, 0, 1, 1], [], []>} : vector<8x256xf32>, vector<256x512xf32>, vector<8x512xf32> -> vector<8x512xf32>
    %523 = arith.addf %522, %10 : vector<8x512xf32>
    %524 = vector.extract_strided_slice %523 {offsets = [0, 0], sizes = [8, 128], strides = [1, 1]} : vector<8x512xf32> to vector<8x128xf32>
    %cst_311 = arith.constant 5.000000e-01 : f32
    %525 = vector.broadcast %cst_311 : f32 to vector<8x128xf32>
    %526 = arith.mulf %525, %524 : vector<8x128xf32>
    %527 = math.tanh %526 : vector<8x128xf32>
    %cst_312 = arith.constant 5.000000e-01 : f32
    %528 = vector.broadcast %cst_312 : f32 to vector<8x128xf32>
    %529 = arith.mulf %528, %527 : vector<8x128xf32>
    %cst_313 = arith.constant 5.000000e-01 : f32
    %530 = vector.broadcast %cst_313 : f32 to vector<8x128xf32>
    %531 = arith.addf %529, %530 : vector<8x128xf32>
    %532 = vector.extract_strided_slice %523 {offsets = [0, 128], sizes = [8, 128], strides = [1, 1]} : vector<8x512xf32> to vector<8x128xf32>
    %cst_314 = arith.constant 5.000000e-01 : f32
    %533 = vector.broadcast %cst_314 : f32 to vector<8x128xf32>
    %534 = arith.mulf %533, %532 : vector<8x128xf32>
    %535 = math.tanh %534 : vector<8x128xf32>
    %cst_315 = arith.constant 5.000000e-01 : f32
    %536 = vector.broadcast %cst_315 : f32 to vector<8x128xf32>
    %537 = arith.mulf %536, %535 : vector<8x128xf32>
    %cst_316 = arith.constant 5.000000e-01 : f32
    %538 = vector.broadcast %cst_316 : f32 to vector<8x128xf32>
    %539 = arith.addf %537, %538 : vector<8x128xf32>
    %540 = vector.extract_strided_slice %523 {offsets = [0, 256], sizes = [8, 128], strides = [1, 1]} : vector<8x512xf32> to vector<8x128xf32>
    %541 = math.tanh %540 : vector<8x128xf32>
    %542 = vector.extract_strided_slice %523 {offsets = [0, 384], sizes = [8, 128], strides = [1, 1]} : vector<8x512xf32> to vector<8x128xf32>
    %cst_317 = arith.constant 5.000000e-01 : f32
    %543 = vector.broadcast %cst_317 : f32 to vector<8x128xf32>
    %544 = arith.mulf %543, %542 : vector<8x128xf32>
    %545 = math.tanh %544 : vector<8x128xf32>
    %cst_318 = arith.constant 5.000000e-01 : f32
    %546 = vector.broadcast %cst_318 : f32 to vector<8x128xf32>
    %547 = arith.mulf %546, %545 : vector<8x128xf32>
    %cst_319 = arith.constant 5.000000e-01 : f32
    %548 = vector.broadcast %cst_319 : f32 to vector<8x128xf32>
    %549 = arith.addf %547, %548 : vector<8x128xf32>
    %c1_320 = arith.constant 1 : index
    %c0_321 = arith.constant 0 : index
    %c0_322 = arith.constant 0 : index
    %550 = vector.load %arg9[%c1_320, %c0_321, %c0_322] : memref<2x8x128xf32, #tpu.memory_space<vmem>>, vector<1x8x128xf32>
    %551 = vector.shape_cast %550 : vector<1x8x128xf32> to vector<8x128xf32>
    %552 = arith.mulf %539, %551 : vector<8x128xf32>
    %553 = arith.mulf %531, %541 : vector<8x128xf32>
    %554 = arith.addf %552, %553 : vector<8x128xf32>
    %555 = math.tanh %554 : vector<8x128xf32>
    %556 = arith.mulf %549, %555 : vector<8x128xf32>
    %c1_323 = arith.constant 1 : index
    %c0_324 = arith.constant 0 : index
    %c0_325 = arith.constant 0 : index
    %557 = vector.load %arg9[%c1_323, %c0_324, %c0_325] : memref<2x8x128xf32, #tpu.memory_space<vmem>>, vector<1x8x128xf32>
    %558 = vector.shape_cast %557 : vector<1x8x128xf32> to vector<8x128xf32>
    %559 = vector.shape_cast %554 : vector<8x128xf32> to vector<1x8x128xf32>
    tpu.vector_store %arg9[%c1_323, %c0_324, %c0_325], %559 {strides = array<i32>} : memref<2x8x128xf32, #tpu.memory_space<vmem>>, vector<1x8x128xf32>,
    %c0_326 = arith.constant 0 : index
    %c0_327 = arith.constant 0 : index
    %c128_328 = arith.constant 128 : index
    %560 = vector.load %arg11[%c0_326, %c0_327, %c128_328] : memref<1x8x256xf32, #tpu.memory_space<vmem>>, vector<1x8x128xf32>
    %561 = vector.shape_cast %560 : vector<1x8x128xf32> to vector<8x128xf32>
    %562 = vector.shape_cast %556 : vector<8x128xf32> to vector<1x8x128xf32>
    tpu.vector_store %arg11[%c0_326, %c0_327, %c128_328], %562 {strides = array<i32>} : memref<1x8x256xf32, #tpu.memory_space<vmem>>, vector<1x8x128xf32>,
    %c6 = arith.constant 6 : index
    %c0_329 = arith.constant 0 : index
    %c0_330 = arith.constant 0 : index
    %563 = vector.load %arg2[%c6, %c0_329, %c0_330] : memref<8x8x128xf32, #tpu.memory_space<vmem>>, vector<1x8x128xf32>
    %564 = vector.shape_cast %563 : vector<1x8x128xf32> to vector<8x128xf32>
    %c0_331 = arith.constant 0 : index
    %c0_332 = arith.constant 0 : index
    %565 = vector.load %arg10[%c0_331, %c0_332] : memref<8x256xf32, #tpu.memory_space<vmem>>, vector<8x128xf32>
    tpu.vector_store %arg10[%c0_331, %c0_332], %564 {strides = array<i32>} : memref<8x256xf32, #tpu.memory_space<vmem>>, vector<8x128xf32>,
    %c0_333 = arith.constant 0 : index
    %c0_334 = arith.constant 0 : index
    %566 = vector.load %arg10[%c0_333, %c0_334] : memref<8x256xf32, #tpu.memory_space<vmem>>, vector<8x256xf32>
    %c0_335 = arith.constant 0 : index
    %c0_336 = arith.constant 0 : index
    %567 = vector.load %arg3[%c0_335, %c0_336] : memref<256x512xf32, #tpu.memory_space<vmem>>, vector<256x512xf32>
    %cst_337 = arith.constant dense<0.000000e+00> : vector<8x512xf32>
    %568 = tpu.matmul %566, %567, %cst_337 {dimension_numbers = #tpu.dot_dimension_numbers<[1], [0], [0], [1], [0, 0, 1, 1], [], []>} : vector<8x256xf32>, vector<256x512xf32>, vector<8x512xf32> -> vector<8x512xf32>
    %569 = arith.addf %568, %6 : vector<8x512xf32>
    %570 = vector.extract_strided_slice %569 {offsets = [0, 0], sizes = [8, 128], strides = [1, 1]} : vector<8x512xf32> to vector<8x128xf32>
    %cst_338 = arith.constant 5.000000e-01 : f32
    %571 = vector.broadcast %cst_338 : f32 to vector<8x128xf32>
    %572 = arith.mulf %571, %570 : vector<8x128xf32>
    %573 = math.tanh %572 : vector<8x128xf32>
    %cst_339 = arith.constant 5.000000e-01 : f32
    %574 = vector.broadcast %cst_339 : f32 to vector<8x128xf32>
    %575 = arith.mulf %574, %573 : vector<8x128xf32>
    %cst_340 = arith.constant 5.000000e-01 : f32
    %576 = vector.broadcast %cst_340 : f32 to vector<8x128xf32>
    %577 = arith.addf %575, %576 : vector<8x128xf32>
    %578 = vector.extract_strided_slice %569 {offsets = [0, 128], sizes = [8, 128], strides = [1, 1]} : vector<8x512xf32> to vector<8x128xf32>
    %cst_341 = arith.constant 5.000000e-01 : f32
    %579 = vector.broadcast %cst_341 : f32 to vector<8x128xf32>
    %580 = arith.mulf %579, %578 : vector<8x128xf32>
    %581 = math.tanh %580 : vector<8x128xf32>
    %cst_342 = arith.constant 5.000000e-01 : f32
    %582 = vector.broadcast %cst_342 : f32 to vector<8x128xf32>
    %583 = arith.mulf %582, %581 : vector<8x128xf32>
    %cst_343 = arith.constant 5.000000e-01 : f32
    %584 = vector.broadcast %cst_343 : f32 to vector<8x128xf32>
    %585 = arith.addf %583, %584 : vector<8x128xf32>
    %586 = vector.extract_strided_slice %569 {offsets = [0, 256], sizes = [8, 128], strides = [1, 1]} : vector<8x512xf32> to vector<8x128xf32>
    %587 = math.tanh %586 : vector<8x128xf32>
    %588 = vector.extract_strided_slice %569 {offsets = [0, 384], sizes = [8, 128], strides = [1, 1]} : vector<8x512xf32> to vector<8x128xf32>
    %cst_344 = arith.constant 5.000000e-01 : f32
    %589 = vector.broadcast %cst_344 : f32 to vector<8x128xf32>
    %590 = arith.mulf %589, %588 : vector<8x128xf32>
    %591 = math.tanh %590 : vector<8x128xf32>
    %cst_345 = arith.constant 5.000000e-01 : f32
    %592 = vector.broadcast %cst_345 : f32 to vector<8x128xf32>
    %593 = arith.mulf %592, %591 : vector<8x128xf32>
    %cst_346 = arith.constant 5.000000e-01 : f32
    %594 = vector.broadcast %cst_346 : f32 to vector<8x128xf32>
    %595 = arith.addf %593, %594 : vector<8x128xf32>
    %c0_347 = arith.constant 0 : index
    %c0_348 = arith.constant 0 : index
    %c0_349 = arith.constant 0 : index
    %596 = vector.load %arg9[%c0_347, %c0_348, %c0_349] : memref<2x8x128xf32, #tpu.memory_space<vmem>>, vector<1x8x128xf32>
    %597 = vector.shape_cast %596 : vector<1x8x128xf32> to vector<8x128xf32>
    %598 = arith.mulf %585, %597 : vector<8x128xf32>
    %599 = arith.mulf %577, %587 : vector<8x128xf32>
    %600 = arith.addf %598, %599 : vector<8x128xf32>
    %601 = math.tanh %600 : vector<8x128xf32>
    %602 = arith.mulf %595, %601 : vector<8x128xf32>
    %c0_350 = arith.constant 0 : index
    %c0_351 = arith.constant 0 : index
    %c0_352 = arith.constant 0 : index
    %603 = vector.load %arg9[%c0_350, %c0_351, %c0_352] : memref<2x8x128xf32, #tpu.memory_space<vmem>>, vector<1x8x128xf32>
    %604 = vector.shape_cast %603 : vector<1x8x128xf32> to vector<8x128xf32>
    %605 = vector.shape_cast %600 : vector<8x128xf32> to vector<1x8x128xf32>
    tpu.vector_store %arg9[%c0_350, %c0_351, %c0_352], %605 {strides = array<i32>} : memref<2x8x128xf32, #tpu.memory_space<vmem>>, vector<1x8x128xf32>,
    %c0_353 = arith.constant 0 : index
    %c128_354 = arith.constant 128 : index
    %606 = vector.load %arg10[%c0_353, %c128_354] : memref<8x256xf32, #tpu.memory_space<vmem>>, vector<8x128xf32>
    tpu.vector_store %arg10[%c0_353, %c128_354], %602 {strides = array<i32>} : memref<8x256xf32, #tpu.memory_space<vmem>>, vector<8x128xf32>,
    %c0_355 = arith.constant 0 : index
    %c0_356 = arith.constant 0 : index
    %c0_357 = arith.constant 0 : index
    %607 = vector.load %arg11[%c0_355, %c0_356, %c0_357] : memref<1x8x256xf32, #tpu.memory_space<vmem>>, vector<1x8x128xf32>
    %608 = vector.shape_cast %607 : vector<1x8x128xf32> to vector<8x128xf32>
    %609 = vector.shape_cast %602 : vector<8x128xf32> to vector<1x8x128xf32>
    tpu.vector_store %arg11[%c0_355, %c0_356, %c0_357], %609 {strides = array<i32>} : memref<1x8x256xf32, #tpu.memory_space<vmem>>, vector<1x8x128xf32>,
    %c0_358 = arith.constant 0 : index
    %c0_359 = arith.constant 0 : index
    %c0_360 = arith.constant 0 : index
    %610 = vector.load %arg11[%c0_358, %c0_359, %c0_360] : memref<1x8x256xf32, #tpu.memory_space<vmem>>, vector<1x8x256xf32>
    %611 = vector.shape_cast %610 : vector<1x8x256xf32> to vector<8x256xf32>
    %c0_361 = arith.constant 0 : index
    %c0_362 = arith.constant 0 : index
    %c0_363 = arith.constant 0 : index
    %612 = vector.load %arg4[%c0_361, %c0_362, %c0_363] : memref<1x256x512xf32, #tpu.memory_space<vmem>>, vector<1x256x512xf32>
    %613 = vector.shape_cast %612 : vector<1x256x512xf32> to vector<256x512xf32>
    %cst_364 = arith.constant dense<0.000000e+00> : vector<8x512xf32>
    %614 = tpu.matmul %611, %613, %cst_364 {dimension_numbers = #tpu.dot_dimension_numbers<[1], [0], [0], [1], [0, 0, 1, 1], [], []>} : vector<8x256xf32>, vector<256x512xf32>, vector<8x512xf32> -> vector<8x512xf32>
    %615 = arith.addf %614, %10 : vector<8x512xf32>
    %616 = vector.extract_strided_slice %615 {offsets = [0, 0], sizes = [8, 128], strides = [1, 1]} : vector<8x512xf32> to vector<8x128xf32>
    %cst_365 = arith.constant 5.000000e-01 : f32
    %617 = vector.broadcast %cst_365 : f32 to vector<8x128xf32>
    %618 = arith.mulf %617, %616 : vector<8x128xf32>
    %619 = math.tanh %618 : vector<8x128xf32>
    %cst_366 = arith.constant 5.000000e-01 : f32
    %620 = vector.broadcast %cst_366 : f32 to vector<8x128xf32>
    %621 = arith.mulf %620, %619 : vector<8x128xf32>
    %cst_367 = arith.constant 5.000000e-01 : f32
    %622 = vector.broadcast %cst_367 : f32 to vector<8x128xf32>
    %623 = arith.addf %621, %622 : vector<8x128xf32>
    %624 = vector.extract_strided_slice %615 {offsets = [0, 128], sizes = [8, 128], strides = [1, 1]} : vector<8x512xf32> to vector<8x128xf32>
    %cst_368 = arith.constant 5.000000e-01 : f32
    %625 = vector.broadcast %cst_368 : f32 to vector<8x128xf32>
    %626 = arith.mulf %625, %624 : vector<8x128xf32>
    %627 = math.tanh %626 : vector<8x128xf32>
    %cst_369 = arith.constant 5.000000e-01 : f32
    %628 = vector.broadcast %cst_369 : f32 to vector<8x128xf32>
    %629 = arith.mulf %628, %627 : vector<8x128xf32>
    %cst_370 = arith.constant 5.000000e-01 : f32
    %630 = vector.broadcast %cst_370 : f32 to vector<8x128xf32>
    %631 = arith.addf %629, %630 : vector<8x128xf32>
    %632 = vector.extract_strided_slice %615 {offsets = [0, 256], sizes = [8, 128], strides = [1, 1]} : vector<8x512xf32> to vector<8x128xf32>
    %633 = math.tanh %632 : vector<8x128xf32>
    %634 = vector.extract_strided_slice %615 {offsets = [0, 384], sizes = [8, 128], strides = [1, 1]} : vector<8x512xf32> to vector<8x128xf32>
    %cst_371 = arith.constant 5.000000e-01 : f32
    %635 = vector.broadcast %cst_371 : f32 to vector<8x128xf32>
    %636 = arith.mulf %635, %634 : vector<8x128xf32>
    %637 = math.tanh %636 : vector<8x128xf32>
    %cst_372 = arith.constant 5.000000e-01 : f32
    %638 = vector.broadcast %cst_372 : f32 to vector<8x128xf32>
    %639 = arith.mulf %638, %637 : vector<8x128xf32>
    %cst_373 = arith.constant 5.000000e-01 : f32
    %640 = vector.broadcast %cst_373 : f32 to vector<8x128xf32>
    %641 = arith.addf %639, %640 : vector<8x128xf32>
    %c1_374 = arith.constant 1 : index
    %c0_375 = arith.constant 0 : index
    %c0_376 = arith.constant 0 : index
    %642 = vector.load %arg9[%c1_374, %c0_375, %c0_376] : memref<2x8x128xf32, #tpu.memory_space<vmem>>, vector<1x8x128xf32>
    %643 = vector.shape_cast %642 : vector<1x8x128xf32> to vector<8x128xf32>
    %644 = arith.mulf %631, %643 : vector<8x128xf32>
    %645 = arith.mulf %623, %633 : vector<8x128xf32>
    %646 = arith.addf %644, %645 : vector<8x128xf32>
    %647 = math.tanh %646 : vector<8x128xf32>
    %648 = arith.mulf %641, %647 : vector<8x128xf32>
    %c1_377 = arith.constant 1 : index
    %c0_378 = arith.constant 0 : index
    %c0_379 = arith.constant 0 : index
    %649 = vector.load %arg9[%c1_377, %c0_378, %c0_379] : memref<2x8x128xf32, #tpu.memory_space<vmem>>, vector<1x8x128xf32>
    %650 = vector.shape_cast %649 : vector<1x8x128xf32> to vector<8x128xf32>
    %651 = vector.shape_cast %646 : vector<8x128xf32> to vector<1x8x128xf32>
    tpu.vector_store %arg9[%c1_377, %c0_378, %c0_379], %651 {strides = array<i32>} : memref<2x8x128xf32, #tpu.memory_space<vmem>>, vector<1x8x128xf32>,
    %c0_380 = arith.constant 0 : index
    %c0_381 = arith.constant 0 : index
    %c128_382 = arith.constant 128 : index
    %652 = vector.load %arg11[%c0_380, %c0_381, %c128_382] : memref<1x8x256xf32, #tpu.memory_space<vmem>>, vector<1x8x128xf32>
    %653 = vector.shape_cast %652 : vector<1x8x128xf32> to vector<8x128xf32>
    %654 = vector.shape_cast %648 : vector<8x128xf32> to vector<1x8x128xf32>
    tpu.vector_store %arg11[%c0_380, %c0_381, %c128_382], %654 {strides = array<i32>} : memref<1x8x256xf32, #tpu.memory_space<vmem>>, vector<1x8x128xf32>,
    %c7 = arith.constant 7 : index
    %c0_383 = arith.constant 0 : index
    %c0_384 = arith.constant 0 : index
    %655 = vector.load %arg2[%c7, %c0_383, %c0_384] : memref<8x8x128xf32, #tpu.memory_space<vmem>>, vector<1x8x128xf32>
    %656 = vector.shape_cast %655 : vector<1x8x128xf32> to vector<8x128xf32>
    %c0_385 = arith.constant 0 : index
    %c0_386 = arith.constant 0 : index
    %657 = vector.load %arg10[%c0_385, %c0_386] : memref<8x256xf32, #tpu.memory_space<vmem>>, vector<8x128xf32>
    tpu.vector_store %arg10[%c0_385, %c0_386], %656 {strides = array<i32>} : memref<8x256xf32, #tpu.memory_space<vmem>>, vector<8x128xf32>,
    %c0_387 = arith.constant 0 : index
    %c0_388 = arith.constant 0 : index
    %658 = vector.load %arg10[%c0_387, %c0_388] : memref<8x256xf32, #tpu.memory_space<vmem>>, vector<8x256xf32>
    %c0_389 = arith.constant 0 : index
    %c0_390 = arith.constant 0 : index
    %659 = vector.load %arg3[%c0_389, %c0_390] : memref<256x512xf32, #tpu.memory_space<vmem>>, vector<256x512xf32>
    %cst_391 = arith.constant dense<0.000000e+00> : vector<8x512xf32>
    %660 = tpu.matmul %658, %659, %cst_391 {dimension_numbers = #tpu.dot_dimension_numbers<[1], [0], [0], [1], [0, 0, 1, 1], [], []>} : vector<8x256xf32>, vector<256x512xf32>, vector<8x512xf32> -> vector<8x512xf32>
    %661 = arith.addf %660, %6 : vector<8x512xf32>
    %662 = vector.extract_strided_slice %661 {offsets = [0, 0], sizes = [8, 128], strides = [1, 1]} : vector<8x512xf32> to vector<8x128xf32>
    %cst_392 = arith.constant 5.000000e-01 : f32
    %663 = vector.broadcast %cst_392 : f32 to vector<8x128xf32>
    %664 = arith.mulf %663, %662 : vector<8x128xf32>
    %665 = math.tanh %664 : vector<8x128xf32>
    %cst_393 = arith.constant 5.000000e-01 : f32
    %666 = vector.broadcast %cst_393 : f32 to vector<8x128xf32>
    %667 = arith.mulf %666, %665 : vector<8x128xf32>
    %cst_394 = arith.constant 5.000000e-01 : f32
    %668 = vector.broadcast %cst_394 : f32 to vector<8x128xf32>
    %669 = arith.addf %667, %668 : vector<8x128xf32>
    %670 = vector.extract_strided_slice %661 {offsets = [0, 128], sizes = [8, 128], strides = [1, 1]} : vector<8x512xf32> to vector<8x128xf32>
    %cst_395 = arith.constant 5.000000e-01 : f32
    %671 = vector.broadcast %cst_395 : f32 to vector<8x128xf32>
    %672 = arith.mulf %671, %670 : vector<8x128xf32>
    %673 = math.tanh %672 : vector<8x128xf32>
    %cst_396 = arith.constant 5.000000e-01 : f32
    %674 = vector.broadcast %cst_396 : f32 to vector<8x128xf32>
    %675 = arith.mulf %674, %673 : vector<8x128xf32>
    %cst_397 = arith.constant 5.000000e-01 : f32
    %676 = vector.broadcast %cst_397 : f32 to vector<8x128xf32>
    %677 = arith.addf %675, %676 : vector<8x128xf32>
    %678 = vector.extract_strided_slice %661 {offsets = [0, 256], sizes = [8, 128], strides = [1, 1]} : vector<8x512xf32> to vector<8x128xf32>
    %679 = math.tanh %678 : vector<8x128xf32>
    %680 = vector.extract_strided_slice %661 {offsets = [0, 384], sizes = [8, 128], strides = [1, 1]} : vector<8x512xf32> to vector<8x128xf32>
    %cst_398 = arith.constant 5.000000e-01 : f32
    %681 = vector.broadcast %cst_398 : f32 to vector<8x128xf32>
    %682 = arith.mulf %681, %680 : vector<8x128xf32>
    %683 = math.tanh %682 : vector<8x128xf32>
    %cst_399 = arith.constant 5.000000e-01 : f32
    %684 = vector.broadcast %cst_399 : f32 to vector<8x128xf32>
    %685 = arith.mulf %684, %683 : vector<8x128xf32>
    %cst_400 = arith.constant 5.000000e-01 : f32
    %686 = vector.broadcast %cst_400 : f32 to vector<8x128xf32>
    %687 = arith.addf %685, %686 : vector<8x128xf32>
    %c0_401 = arith.constant 0 : index
    %c0_402 = arith.constant 0 : index
    %c0_403 = arith.constant 0 : index
    %688 = vector.load %arg9[%c0_401, %c0_402, %c0_403] : memref<2x8x128xf32, #tpu.memory_space<vmem>>, vector<1x8x128xf32>
    %689 = vector.shape_cast %688 : vector<1x8x128xf32> to vector<8x128xf32>
    %690 = arith.mulf %677, %689 : vector<8x128xf32>
    %691 = arith.mulf %669, %679 : vector<8x128xf32>
    %692 = arith.addf %690, %691 : vector<8x128xf32>
    %693 = math.tanh %692 : vector<8x128xf32>
    %694 = arith.mulf %687, %693 : vector<8x128xf32>
    %c0_404 = arith.constant 0 : index
    %c0_405 = arith.constant 0 : index
    %c0_406 = arith.constant 0 : index
    %695 = vector.load %arg9[%c0_404, %c0_405, %c0_406] : memref<2x8x128xf32, #tpu.memory_space<vmem>>, vector<1x8x128xf32>
    %696 = vector.shape_cast %695 : vector<1x8x128xf32> to vector<8x128xf32>
    %697 = vector.shape_cast %692 : vector<8x128xf32> to vector<1x8x128xf32>
    tpu.vector_store %arg9[%c0_404, %c0_405, %c0_406], %697 {strides = array<i32>} : memref<2x8x128xf32, #tpu.memory_space<vmem>>, vector<1x8x128xf32>,
    %c0_407 = arith.constant 0 : index
    %c128_408 = arith.constant 128 : index
    %698 = vector.load %arg10[%c0_407, %c128_408] : memref<8x256xf32, #tpu.memory_space<vmem>>, vector<8x128xf32>
    tpu.vector_store %arg10[%c0_407, %c128_408], %694 {strides = array<i32>} : memref<8x256xf32, #tpu.memory_space<vmem>>, vector<8x128xf32>,
    %c0_409 = arith.constant 0 : index
    %c0_410 = arith.constant 0 : index
    %c0_411 = arith.constant 0 : index
    %699 = vector.load %arg11[%c0_409, %c0_410, %c0_411] : memref<1x8x256xf32, #tpu.memory_space<vmem>>, vector<1x8x128xf32>
    %700 = vector.shape_cast %699 : vector<1x8x128xf32> to vector<8x128xf32>
    %701 = vector.shape_cast %694 : vector<8x128xf32> to vector<1x8x128xf32>
    tpu.vector_store %arg11[%c0_409, %c0_410, %c0_411], %701 {strides = array<i32>} : memref<1x8x256xf32, #tpu.memory_space<vmem>>, vector<1x8x128xf32>,
    %c0_412 = arith.constant 0 : index
    %c0_413 = arith.constant 0 : index
    %c0_414 = arith.constant 0 : index
    %702 = vector.load %arg11[%c0_412, %c0_413, %c0_414] : memref<1x8x256xf32, #tpu.memory_space<vmem>>, vector<1x8x256xf32>
    %703 = vector.shape_cast %702 : vector<1x8x256xf32> to vector<8x256xf32>
    %c0_415 = arith.constant 0 : index
    %c0_416 = arith.constant 0 : index
    %c0_417 = arith.constant 0 : index
    %704 = vector.load %arg4[%c0_415, %c0_416, %c0_417] : memref<1x256x512xf32, #tpu.memory_space<vmem>>, vector<1x256x512xf32>
    %705 = vector.shape_cast %704 : vector<1x256x512xf32> to vector<256x512xf32>
    %cst_418 = arith.constant dense<0.000000e+00> : vector<8x512xf32>
    %706 = tpu.matmul %703, %705, %cst_418 {dimension_numbers = #tpu.dot_dimension_numbers<[1], [0], [0], [1], [0, 0, 1, 1], [], []>} : vector<8x256xf32>, vector<256x512xf32>, vector<8x512xf32> -> vector<8x512xf32>
    %707 = arith.addf %706, %10 : vector<8x512xf32>
    %708 = vector.extract_strided_slice %707 {offsets = [0, 0], sizes = [8, 128], strides = [1, 1]} : vector<8x512xf32> to vector<8x128xf32>
    %cst_419 = arith.constant 5.000000e-01 : f32
    %709 = vector.broadcast %cst_419 : f32 to vector<8x128xf32>
    %710 = arith.mulf %709, %708 : vector<8x128xf32>
    %711 = math.tanh %710 : vector<8x128xf32>
    %cst_420 = arith.constant 5.000000e-01 : f32
    %712 = vector.broadcast %cst_420 : f32 to vector<8x128xf32>
    %713 = arith.mulf %712, %711 : vector<8x128xf32>
    %cst_421 = arith.constant 5.000000e-01 : f32
    %714 = vector.broadcast %cst_421 : f32 to vector<8x128xf32>
    %715 = arith.addf %713, %714 : vector<8x128xf32>
    %716 = vector.extract_strided_slice %707 {offsets = [0, 128], sizes = [8, 128], strides = [1, 1]} : vector<8x512xf32> to vector<8x128xf32>
    %cst_422 = arith.constant 5.000000e-01 : f32
    %717 = vector.broadcast %cst_422 : f32 to vector<8x128xf32>
    %718 = arith.mulf %717, %716 : vector<8x128xf32>
    %719 = math.tanh %718 : vector<8x128xf32>
    %cst_423 = arith.constant 5.000000e-01 : f32
    %720 = vector.broadcast %cst_423 : f32 to vector<8x128xf32>
    %721 = arith.mulf %720, %719 : vector<8x128xf32>
    %cst_424 = arith.constant 5.000000e-01 : f32
    %722 = vector.broadcast %cst_424 : f32 to vector<8x128xf32>
    %723 = arith.addf %721, %722 : vector<8x128xf32>
    %724 = vector.extract_strided_slice %707 {offsets = [0, 256], sizes = [8, 128], strides = [1, 1]} : vector<8x512xf32> to vector<8x128xf32>
    %725 = math.tanh %724 : vector<8x128xf32>
    %726 = vector.extract_strided_slice %707 {offsets = [0, 384], sizes = [8, 128], strides = [1, 1]} : vector<8x512xf32> to vector<8x128xf32>
    %cst_425 = arith.constant 5.000000e-01 : f32
    %727 = vector.broadcast %cst_425 : f32 to vector<8x128xf32>
    %728 = arith.mulf %727, %726 : vector<8x128xf32>
    %729 = math.tanh %728 : vector<8x128xf32>
    %cst_426 = arith.constant 5.000000e-01 : f32
    %730 = vector.broadcast %cst_426 : f32 to vector<8x128xf32>
    %731 = arith.mulf %730, %729 : vector<8x128xf32>
    %cst_427 = arith.constant 5.000000e-01 : f32
    %732 = vector.broadcast %cst_427 : f32 to vector<8x128xf32>
    %733 = arith.addf %731, %732 : vector<8x128xf32>
    %c1_428 = arith.constant 1 : index
    %c0_429 = arith.constant 0 : index
    %c0_430 = arith.constant 0 : index
    %734 = vector.load %arg9[%c1_428, %c0_429, %c0_430] : memref<2x8x128xf32, #tpu.memory_space<vmem>>, vector<1x8x128xf32>
    %735 = vector.shape_cast %734 : vector<1x8x128xf32> to vector<8x128xf32>
    %736 = arith.mulf %723, %735 : vector<8x128xf32>
    %737 = arith.mulf %715, %725 : vector<8x128xf32>
    %738 = arith.addf %736, %737 : vector<8x128xf32>
    %739 = math.tanh %738 : vector<8x128xf32>
    %740 = arith.mulf %733, %739 : vector<8x128xf32>
    %c1_431 = arith.constant 1 : index
    %c0_432 = arith.constant 0 : index
    %c0_433 = arith.constant 0 : index
    %741 = vector.load %arg9[%c1_431, %c0_432, %c0_433] : memref<2x8x128xf32, #tpu.memory_space<vmem>>, vector<1x8x128xf32>
    %742 = vector.shape_cast %741 : vector<1x8x128xf32> to vector<8x128xf32>
    %743 = vector.shape_cast %738 : vector<8x128xf32> to vector<1x8x128xf32>
    tpu.vector_store %arg9[%c1_431, %c0_432, %c0_433], %743 {strides = array<i32>} : memref<2x8x128xf32, #tpu.memory_space<vmem>>, vector<1x8x128xf32>,
    %c0_434 = arith.constant 0 : index
    %c0_435 = arith.constant 0 : index
    %c128_436 = arith.constant 128 : index
    %744 = vector.load %arg11[%c0_434, %c0_435, %c128_436] : memref<1x8x256xf32, #tpu.memory_space<vmem>>, vector<1x8x128xf32>
    %745 = vector.shape_cast %744 : vector<1x8x128xf32> to vector<8x128xf32>
    %746 = vector.shape_cast %740 : vector<8x128xf32> to vector<1x8x128xf32>
    tpu.vector_store %arg11[%c0_434, %c0_435, %c128_436], %746 {strides = array<i32>} : memref<1x8x256xf32, #tpu.memory_space<vmem>>, vector<1x8x128xf32>,
    %c0_i32_437 = arith.constant 0 : i32
    %747 = arith.cmpi eq, %arg1, %c0_i32_437 : i32
    %748 = arith.extui %747 : i1 to i32
    %c0_i32_438 = arith.constant 0 : i32
    %749 = arith.cmpi ne, %748, %c0_i32_438 : i32
    scf.if %749 {
      %c0_439 = arith.constant 0 : index
      %c0_440 = arith.constant 0 : index
      %c128_441 = arith.constant 128 : index
      %750 = vector.load %arg11[%c0_439, %c0_440, %c128_441] : memref<1x8x256xf32, #tpu.memory_space<vmem>>, vector<1x8x128xf32>
      %751 = vector.shape_cast %750 : vector<1x8x128xf32> to vector<8x128xf32>
      %c0_442 = arith.constant 0 : index
      %c0_443 = arith.constant 0 : index
      %752 = vector.load %arg6[%c0_442, %c0_443] : memref<128x128xf32, #tpu.memory_space<vmem>>, vector<128x128xf32>
      %cst_444 = arith.constant dense<0.000000e+00> : vector<8x128xf32>
      %753 = tpu.matmul %751, %752, %cst_444 {dimension_numbers = #tpu.dot_dimension_numbers<[1], [0], [0], [1], [0, 0, 1, 1], [], []>} : vector<8x128xf32>, vector<128x128xf32>, vector<8x128xf32> -> vector<8x128xf32>
      %c0_445 = arith.constant 0 : index
      %c0_446 = arith.constant 0 : index
      %754 = vector.load %arg7[%c0_445, %c0_446] : memref<1x128xf32, #tpu.memory_space<vmem>>, vector<1x128xf32>
      %755 = vector.broadcast %754 : vector<1x128xf32> to vector<8x128xf32>
      %756 = arith.addf %753, %755 : vector<8x128xf32>
      %c0_447 = arith.constant 0 : index
      %c0_448 = arith.constant 0 : index
      %757 = vector.load %arg8[%c0_447, %c0_448] : memref<8x128xf32, #tpu.memory_space<vmem>>, vector<8x128xf32>
      tpu.vector_store %arg8[%c0_447, %c0_448], %756 {strides = array<i32>} : memref<8x128xf32, #tpu.memory_space<vmem>>, vector<8x128xf32>,
    } else {
    }
    return
  }
  func.func @transform_0(%arg0: i32, %arg1: i32) -> (i32, i32, i32) {
    %c0_i32 = arith.constant 0 : i32
    %c0_i32_0 = arith.constant 0 : i32
    return %arg1, %arg0, %c0_i32 : i32, i32, i32
  }
  func.func @transform_1(%arg0: i32, %arg1: i32) -> (i32, i32) {
    %c0_i32 = arith.constant 0 : i32
    %c0_i32_0 = arith.constant 0 : i32
    %c0_i32_1 = arith.constant 0 : i32
    return %c0_i32, %c0_i32_0 : i32, i32
  }
  func.func @transform_2(%arg0: i32, %arg1: i32) -> (i32, i32, i32) {
    %c0_i32 = arith.constant 0 : i32
    %c0_i32_0 = arith.constant 0 : i32
    %c0_i32_1 = arith.constant 0 : i32
    %c0_i32_2 = arith.constant 0 : i32
    return %c0_i32, %c0_i32_0, %c0_i32_1 : i32, i32, i32
  }
  func.func @transform_3(%arg0: i32, %arg1: i32) -> (i32, i32, i32) {
    %c0_i32 = arith.constant 0 : i32
    %c0_i32_0 = arith.constant 0 : i32
    %c0_i32_1 = arith.constant 0 : i32
    %c0_i32_2 = arith.constant 0 : i32
    return %c0_i32, %c0_i32_0, %c0_i32_1 : i32, i32, i32
  }
  func.func @transform_4(%arg0: i32, %arg1: i32) -> (i32, i32) {
    %c0_i32 = arith.constant 0 : i32
    %c0_i32_0 = arith.constant 0 : i32
    %c0_i32_1 = arith.constant 0 : i32
    return %c0_i32, %c0_i32_0 : i32, i32
  }
  func.func @transform_5(%arg0: i32, %arg1: i32) -> (i32, i32) {
    %c0_i32 = arith.constant 0 : i32
    %c0_i32_0 = arith.constant 0 : i32
    %c0_i32_1 = arith.constant 0 : i32
    return %c0_i32, %c0_i32_0 : i32, i32
  }
  func.func @transform_6(%arg0: i32, %arg1: i32) -> (i32, i32) {
    %c0_i32 = arith.constant 0 : i32
    %c0_i32_0 = arith.constant 0 : i32
    return %arg0, %c0_i32 : i32, i32
  }
}

</mosaic_0001>

<bundles_post_ra>
// kernel: tpu_custom_call.1
= control target key start
LH: loop header
LB: loop body
LE: loop exit
PB: predicated region body
PF: predicated region fallthrough
CT: control target
= control target key end

     0   :  { %11 = vsyncpa [#allocation6], 0  ;;  %s7770_s0 = inlined_call_operand.hbm [shape: f32[8,8,128], index: 0, kind: input, shape index: {}]   ;;  %s7771_s1 = inlined_call_operand.hbm [shape: f32[256,512], index: 1, kind: input, shape index: {}]   ;;  %s7772_s2 = inlined_call_operand.hbm [shape: f32[1,256,512], index: 2, kind: input, shape index: {}]   ;;  %s7773_s3 = inlined_call_operand.hbm [shape: f32[2,1,512], index: 3, kind: input, shape index: {}]   ;;  %s7774_s4 = inlined_call_operand.hbm [shape: f32[128,128], index: 4, kind: input, shape index: {}]   ;;  %s7775_s5 = inlined_call_operand.hbm [shape: f32[1,128], index: 5, kind: input, shape index: {}]   ;;  %s7776_s6 = inlined_call_operand.hbm [shape: f32[8,128], index: 6, kind: output, shape index: {}]  }
   0x1   :  { %12 = vsyncpa [#allocation9], 0 }
   0x2   :  { %13 = vsyncpa [#allocation12], 0 }
   0x3   :  { %14 = vsyncpa [#allocation15], 0 }
   0x4   :  { %15 = vsyncpa [#allocation7], 0  ;;  %s7460_s21 = smov [#allocation8]   ;;  %s7296_s25 = scalar_lea.hbm %s7771_s1, 16384 }
   0x5   :  { %s33_s22 = sshll.u32 %s7460_s21, 4  ;;  %p7297_p0 = scmp.ne.s32.totalorder %s7771_s1, %s7296_s25  ;;  %s34_s22 = int_to_ptr.vmem [resolvable:$true] %s33_s22 }
   0x6   :  { %p7300_p1 = scmp.lt.u32.totalorder %s7296_s25, %s7771_s1 }
   0x8   :  { %p7302_p2 = pnand %p7300_p1, %p7297_p0 }
   0xa   :  { %7305 = shalt.err (!%p7302_p2)
}
   0xb   :  { %s7306_s30 = scalar_lea.vmem %s34_s22, 16384  ;;  %p7311_p4 = scmp.lt.s32.totalorder %s34_s22, %s34_s22 }
   0xc   :  { %p7307_p3 = scmp.ne.s32.totalorder %s34_s22, %s7306_s30  ;;  %p7312_p5 = scmp.lt.s32.totalorder %s7306_s30, %s7306_s30 }
   0xe   :  { %p7313_p6 = por %p7312_p5, %p7311_p4 }
  0x10   :  { %p7314_p7 = pnand %p7313_p6, %p7307_p3 }
  0x12   :  { %7317 = shalt.err (!%p7314_p7)
}
  0x13   :  { %s7461_s7 = smov 512   ;;  %s7462_s8 = smov 32  }
  0x14   :  { %39 = dma.hbm_to_vmem [thread:$0]  %s7771_s1, 16384, %s34_s22, [#allocation9], %s7461_s7, %s7461_s7, %s7462_s8  }
  0x15   :  { %s7463_s11 = smov [#allocation11]   ;;  %s7318_s15 = scalar_lea.hbm %s7773_s3, 128 }
  0x16   :  { %s57_s12 = sshll.u32 %s7463_s11, 4  ;;  %p7319_p8 = scmp.ne.s32.totalorder %s7773_s3, %s7318_s15  ;;  %s58_s12 = int_to_ptr.vmem [resolvable:$true] %s57_s12 }
  0x17   :  { %p7322_p9 = scmp.lt.u32.totalorder %s7318_s15, %s7773_s3 }
  0x19   :  { %p7324_p10 = pnand %p7322_p9, %p7319_p8 }
  0x1b   :  { %7327 = shalt.err (!%p7324_p10)
}
  0x1c   :  { %s7328_s20 = scalar_lea.vmem %s58_s12, 128  ;;  %p7333_p12 = scmp.lt.s32.totalorder %s58_s12, %s58_s12 }
  0x1d   :  { %p7329_p11 = scmp.ne.s32.totalorder %s58_s12, %s7328_s20  ;;  %p7334_p13 = scmp.lt.s32.totalorder %s7328_s20, %s7328_s20 }
  0x1f   :  { %p7335_p0 = por %p7334_p13, %p7333_p12 }
  0x21   :  { %p7336_p1 = pnand %p7335_p0, %p7329_p11 }
  0x23   :  { %7339 = shalt.err (!%p7336_p1)
}
  0x24   :  { %s7464_s1 = smov 64   ;;  %s7465_s21 = smov 4  }
  0x25   :  { %63 = dma.hbm_to_vmem [thread:$0]  %s7773_s3, 128, %s58_s12, [#allocation12], %s7464_s1, %s7464_s1, %s7465_s21  }
  0x26   :  { %s7466_s24 = smov [#allocation5]   ;;  %s7340_s28 = scalar_lea.hbm %s7770_s0, 1024 }
  0x27   :  { %s21_s25 = sshll.u32 %s7466_s24, 4  ;;  %p7341_p2 = scmp.ne.s32.totalorder %s7770_s0, %s7340_s28  ;;  %s22_s25 = int_to_ptr.vmem [resolvable:$true] %s21_s25 }
  0x28   :  { %p7344_p3 = scmp.lt.u32.totalorder %s7340_s28, %s7770_s0 }
  0x2a   :  { %p7346_p4 = pnand %p7344_p3, %p7341_p2 }
  0x2c   :  { %7349 = shalt.err (!%p7346_p4)
}
  0x2d   :  { %s7350_s11 = scalar_lea.vmem %s22_s25, 1024  ;;  %p7355_p6 = scmp.lt.s32.totalorder %s22_s25, %s22_s25 }
  0x2e   :  { %p7351_p5 = scmp.ne.s32.totalorder %s22_s25, %s7350_s11  ;;  %p7356_p7 = scmp.lt.s32.totalorder %s7350_s11, %s7350_s11 }
  0x30   :  { %p7357_p8 = por %p7356_p7, %p7355_p6 }
  0x32   :  { %p7358_p9 = pnand %p7357_p8, %p7351_p5 }
  0x34   :  { %7361 = shalt.err (!%p7358_p9)
}
  0x35   :  { %s7467_s3 = smov 128   ;;  %s7468_s12 = smov 8  }
  0x36   :  { %27 = dma.hbm_to_vmem [thread:$0]  %s7770_s0, 1024, %s22_s25, [#allocation6], %s7467_s3, %s7467_s3, %s7468_s12  }
  0x37   :  { %s7469_s15 = smov [#allocation10]   ;;  %s7470_s17 = smov [#allocation13]  }
  0x38   :  { %s45_s16 = sshll.u32 %s7469_s15, 4  ;;  %s69_s18 = sshll.u32 %s7470_s17, 4  ;;  %s46_s16 = int_to_ptr.vmem [resolvable:$true] %s45_s16  ;;  %s70_s18 = int_to_ptr.vmem [resolvable:$true] %s69_s18 }
  0x39   :  { %s7362_s1 = scalar_lea.hbm %s7772_s2, 16384 }
  0x3a   :  { %p7363_p10 = scmp.ne.s32.totalorder %s7772_s2, %s7362_s1  ;;  %p7366_p11 = scmp.lt.u32.totalorder %s7362_s1, %s7772_s2 }
  0x3c   :  { %p7368_p12 = pnand %p7366_p11, %p7363_p10 }
  0x3e   :  { %7371 = shalt.err (!%p7368_p12)
}
  0x3f   :  { %s7372_s0 = scalar_lea.vmem %s46_s16, 16384  ;;  %p7377_p0 = scmp.lt.s32.totalorder %s46_s16, %s46_s16 }
  0x40   :  { %p7373_p13 = scmp.ne.s32.totalorder %s46_s16, %s7372_s0  ;;  %p7378_p1 = scmp.lt.s32.totalorder %s7372_s0, %s7372_s0 }
  0x42   :  { %p7379_p2 = por %p7378_p1, %p7377_p0 }
  0x44   :  { %p7380_p3 = pnand %p7379_p2, %p7373_p13 }
  0x46   :  { %7383 = shalt.err (!%p7380_p3)
}
  0x47   :  { %51 = dma.hbm_to_vmem [thread:$0]  %s7772_s2, 16384, %s46_s16, [#allocation9], %s7461_s7, %s7461_s7, %s7462_s8  }
  0x48   :  { %s7384_s29 = scalar_lea.hbm %s7774_s4, 2048 }
  0x49   :  { %p7385_p4 = scmp.ne.s32.totalorder %s7774_s4, %s7384_s29  ;;  %p7388_p5 = scmp.lt.u32.totalorder %s7384_s29, %s7774_s4 }
  0x4b   :  { %p7390_p6 = pnand %p7388_p5, %p7385_p4 }
  0x4d   :  { %7393 = shalt.err (!%p7390_p6)
}
  0x4e   :  { %s7394_s13 = scalar_lea.vmem %s70_s18, 2048  ;;  %p7399_p8 = scmp.lt.s32.totalorder %s70_s18, %s70_s18 }
  0x4f   :  { %p7395_p7 = scmp.ne.s32.totalorder %s70_s18, %s7394_s13  ;;  %p7400_p9 = scmp.lt.s32.totalorder %s7394_s13, %s7394_s13 }
  0x51   :  { %p7401_p10 = por %p7400_p9, %p7399_p8 }
  0x53   :  { %p7402_p11 = pnand %p7401_p10, %p7395_p7 }
  0x55   :  { %7405 = shalt.err (!%p7402_p11)
}
  0x56   :  { %75 = dma.hbm_to_vmem [thread:$0]  %s7774_s4, 2048, %s70_s18, [#allocation12], %s7467_s3, %s7467_s3, %s7468_s12  }
  0x57   :  { %s7471_s8 = smov [#allocation14]   ;;  %s7406_s17 = scalar_lea.hbm %s7775_s5, 16 }
  0x58   :  { %s82_s14 = sshll.u32 %s7471_s8, 4  ;;  %p7407_p12 = scmp.ne.s32.totalorder %s7775_s5, %s7406_s17  ;;  %s83_s14 = int_to_ptr.vmem [resolvable:$true] %s82_s14 }
  0x59   :  { %p7410_p13 = scmp.lt.u32.totalorder %s7406_s17, %s7775_s5 }
  0x5b   :  { %p7412_p0 = pnand %p7410_p13, %p7407_p12 }
  0x5d   :  { %7415 = shalt.err (!%p7412_p0)
}
  0x5e   :  { %s7416_s22 = scalar_lea.vmem %s83_s14, 16  ;;  %s7420_s4 = scalar_lea.vmem %s83_s14, 32 }
  0x5f   :  { %p7417_p1 = scmp.ne.s32.totalorder %s83_s14, %s7416_s22  ;;  %p7421_p2 = scmp.lt.s32.totalorder %s83_s14, %s83_s14 }
  0x60   :  { %p7422_p3 = scmp.lt.s32.totalorder %s7420_s4, %s7416_s22 }
  0x62   :  { %p7423_p4 = por %p7422_p3, %p7421_p2 }
  0x64   :  { %p7424_p5 = pnand %p7423_p4, %p7417_p1 }
  0x66   :  { %7427 = shalt.err (!%p7424_p5)
}
  0x67   :  { %85 = dma.hbm_to_vmem [thread:$0]  %s7775_s5, 16, %s83_s14, [#allocation15]  }
  0x68   :  { %7450 = dma.done.wait [#allocation6], 1024  }
  0x69   :  { %7451 = vsyncadd [#allocation6], 4294966272 }
  0x6a   :  { %7452 = dma.done.wait [#allocation9], 32768  }
  0x6b   :  { %7453 = vsyncadd [#allocation9], 4294934528 }
  0x6c   :  { %7454 = dma.done.wait [#allocation12], 2176  }
  0x6d   :  { %7455 = vsyncadd [#allocation12], 4294965120 }
  0x6e   :  { %7456 = dma.done.wait [#allocation15], 16  }
  0x6f   :  { %7457 = vsyncadd [#allocation15], 4294967280  ;;  %v7472_v0 = vmov 0.0   ;;  %v164_v1 = vld [vmem:[#allocation8 + $0x8] sm:$0xff]  ;;  %v163_v3 = vld [vmem:[#allocation8] sm:$0xff]  ;;  %vm7474_vm0 = vmmov 0  }
  0x70   :  { %355 = vmatprep.mubr.f32.mxu0 %v7472_v0  ;;  %426 = vmatprep.mubr.f32.mxu1 %v7472_v0  ;;  %v168_v2 = vld [vmem:[#allocation8 + $0x28] sm:$0xff]  ;;  %v167_v5 = vld [vmem:[#allocation8 + $0x20] sm:$0xff]  ;;  %v166_v12 = vld [vmem:[#allocation8 + $0x18] sm:$0xff]  ;;  %s7475_s5 = smov [#allocation16]  }
  0x71   :  { %v5048_v4 = vpack.c.bf16 %v168_v2, %v164_v1  ;;  %v172_v6 = vld [vmem:[#allocation8 + $0x48] sm:$0xff]  ;;  %v5050_v8 = vpack.c.bf16 %v167_v5, %v163_v3  ;;  %v171_v10 = vld [vmem:[#allocation8 + $0x40] sm:$0xff]  ;;  %v170_v13 = vld [vmem:[#allocation8 + $0x38] sm:$0xff]  ;;  %s4983_s18 = sshll.u32 %s7475_s5, 4  ;;  %s4984_s18 = int_to_ptr.vmem [resolvable:$true] %s4983_s18 }
  0x72   :  { %v176_v7 = vld [vmem:[#allocation8 + $0x68] sm:$0xff]  ;;  %v175_v11 = vld [vmem:[#allocation8 + $0x60] sm:$0xff]  ;;  %v165_v14 = vld [vmem:[#allocation8 + $0x10] sm:$0xff]  ;;  %v5112_v17 = vpack.c.bf16 %v170_v13, %v166_v12  ;;  %s7428_s23 = scalar_lea.vmem %s4984_s18, 128  ;;  %p7433_p7 = scmp.lt.s32.totalorder %s4984_s18, %s4984_s18 }
  0x73   :  { %v5052_v9 = vpack.c.bf16 %v176_v7, %v172_v6  ;;  %5049 = vmatprep.subr.bf16.mxu0 %v5048_v4  ;;  %v169_v15 = vld [vmem:[#allocation8 + $0x30] sm:$0xff]  ;;  %v5054_v16 = vpack.c.bf16 %v175_v11, %v171_v10  ;;  %v180_v19 = vld [vmem:[#allocation8 + $0x88] sm:$0xff]  ;;  %v179_v21 = vld [vmem:[#allocation8 + $0x80] sm:$0xff]  ;;  %p7429_p6 = scmp.ne.s32.totalorder %s4984_s18, %s7428_s23  ;;  %p7434_p8 = scmp.lt.s32.totalorder %s7428_s23, %s7428_s23 }
  0x74   :  { %5051 = vmatpush1.bf16.msra.mxu0 %v5050_v8  ;;  %v5114_v18 = vpack.c.bf16 %v169_v15, %v165_v14  ;;  %v184_v20 = vld [vmem:[#allocation8 + $0xa8] sm:$0xff]  ;;  %v183_v23 = vld [vmem:[#allocation8 + $0xa0] sm:$0xff]  ;;  %v174_v24 = vld [vmem:[#allocation8 + $0x58] sm:$0xff]  ;;  %5113 = vmatprep.subr.bf16.mxu1 %v5112_v17 }
  0x75   :  { %5053 = vmatprep.subr.bf16.mxu0 %v5052_v9  ;;  %v5056_v22 = vpack.c.bf16 %v184_v20, %v180_v19  ;;  %v178_v25 = vld [vmem:[#allocation8 + $0x78] sm:$0xff]  ;;  %v173_v27 = vld [vmem:[#allocation8 + $0x50] sm:$0xff]  ;;  %v188_v29 = vld [vmem:[#allocation8 + $0xc8] sm:$0xff]  ;;  %v5058_v32 = vpack.c.bf16 %v183_v23, %v179_v21  ;;  %p7435_p9 = por %p7434_p8, %p7433_p7 }
  0x76   :  { %v5116_v26 = vpack.c.bf16 %v178_v25, %v174_v24  ;;  %v177_v28 = vld [vmem:[#allocation8 + $0x70] sm:$0xff]  ;;  %5115 = vmatpush1.bf16.msra.mxu1 %v5114_v18  ;;  %v192_v31 = vld [vmem:[#allocation8 + $0xe8] sm:$0xff]  ;;  %v182_v33 = vld [vmem:[#allocation8 + $0x98] sm:$0xff] }
  0x77   :  { %v5118_v30 = vpack.c.bf16 %v177_v28, %v173_v27  ;;  %v186_v34 = vld [vmem:[#allocation8 + $0xb8] sm:$0xff]  ;;  %v181_v35 = vld [vmem:[#allocation8 + $0x90] sm:$0xff]  ;;  %v5060_v36 = vpack.c.bf16 %v192_v31, %v188_v29  ;;  %v187_v37 = vld [vmem:[#allocation8 + $0xc0] sm:$0xff]  ;;  %p7436_p10 = pnand %p7435_p9, %p7429_p6 }
  0x78   :  { %5055 = vmatpush1.bf16.msra.mxu0 %v5054_v16  ;;  %5117 = vmatprep.subr.bf16.mxu1 %v5116_v26  ;;  %v191_v38 = vld [vmem:[#allocation8 + $0xe0] sm:$0xff]  ;;  %v5120_v39 = vpack.c.bf16 %v186_v34, %v182_v33  ;;  %v185_v40 = vld [vmem:[#allocation8 + $0xb0] sm:$0xff]  ;;  %v196_v41 = vld [vmem:[#allocation8 + $0x108] sm:$0xff] }
  0x79   :  { %5057 = vmatprep.subr.bf16.mxu0 %v5056_v22  ;;  %v200_v42 = vld [vmem:[#allocation8 + $0x128] sm:$0xff]  ;;  %v190_v43 = vld [vmem:[#allocation8 + $0xd8] sm:$0xff]  ;;  %v5122_v44 = vpack.c.bf16 %v185_v40, %v181_v35  ;;  %v5062_v46 = vpack.c.bf16 %v191_v38, %v187_v37  ;;  %v195_v47 = vld [vmem:[#allocation8 + $0x100] sm:$0xff] }
  0x7a   :  { %5119 = vmatpush1.bf16.msra.mxu1 %v5118_v30  ;;  %v194_v45 = vld [vmem:[#allocation8 + $0xf8] sm:$0xff]  ;;  %v189_v49 = vld [vmem:[#allocation8 + $0xd0] sm:$0xff]  ;;  %v5064_v51 = vpack.c.bf16 %v200_v42, %v196_v41  ;;  %v199_v52 = vld [vmem:[#allocation8 + $0x120] sm:$0xff] }
  0x7b   :  { %5121 = vmatprep.subr.bf16.mxu1 %v5120_v39  ;;  %v5124_v48 = vpack.c.bf16 %v194_v45, %v190_v43  ;;  %v193_v50 = vld [vmem:[#allocation8 + $0xf0] sm:$0xff]  ;;  %v198_v53 = vld [vmem:[#allocation8 + $0x118] sm:$0xff]  ;;  %v204_v55 = vld [vmem:[#allocation8 + $0x148] sm:$0xff]  ;;  %v5066_v58 = vpack.c.bf16 %v199_v52, %v195_v47 }
  0x7c   :  { %5059 = vmatpush1.bf16.msra.mxu0 %v5058_v32  ;;  %v202_v54 = vld [vmem:[#allocation8 + $0x138] sm:$0xff]  ;;  %v208_v56 = vld [vmem:[#allocation8 + $0x168] sm:$0xff]  ;;  %v5126_v57 = vpack.c.bf16 %v193_v50, %v189_v49  ;;  %v203_v59 = vld [vmem:[#allocation8 + $0x140] sm:$0xff] }
  0x7d   :  { %5061 = vmatprep.subr.bf16.mxu0 %v5060_v36  ;;  %v5128_v60 = vpack.c.bf16 %v202_v54, %v198_v53  ;;  %v197_v61 = vld [vmem:[#allocation8 + $0x110] sm:$0xff]  ;;  %v5068_v63 = vpack.c.bf16 %v208_v56, %v204_v55  ;;  %v207_v1 = vld [vmem:[#allocation8 + $0x160] sm:$0xff]  ;;  %v206_v2 = vld [vmem:[#allocation8 + $0x158] sm:$0xff] }
  0x7e   :  { %5123 = vmatpush1.bf16.msra.mxu1 %v5122_v44  ;;  %v201_v62 = vld [vmem:[#allocation8 + $0x130] sm:$0xff]  ;;  %v210_v3 = vld [vmem:[#allocation8 + $0x178] sm:$0xff]  ;;  %v212_v4 = vld [vmem:[#allocation8 + $0x188] sm:$0xff]  ;;  %v5070_v7 = vpack.c.bf16 %v207_v1, %v203_v59 }
  0x7f   :  { %5125 = vmatprep.subr.bf16.mxu1 %v5124_v48  ;;  %v216_v5 = vld [vmem:[#allocation8 + $0x1a8] sm:$0xff]  ;;  %v5130_v6 = vpack.c.bf16 %v201_v62, %v197_v61  ;;  %v211_v8 = vld [vmem:[#allocation8 + $0x180] sm:$0xff]  ;;  %v5132_v9 = vpack.c.bf16 %v210_v3, %v206_v2  ;;  %v205_v10 = vld [vmem:[#allocation8 + $0x150] sm:$0xff] }
  0x80   :  { %5063 = vmatpush1.bf16.msra.mxu0 %v5062_v46  ;;  %v209_v11 = vld [vmem:[#allocation8 + $0x170] sm:$0xff]  ;;  %v5072_v12 = vpack.c.bf16 %v216_v5, %v212_v4  ;;  %v215_v13 = vld [vmem:[#allocation8 + $0x1a0] sm:$0xff]  ;;  %v214_v14 = vld [vmem:[#allocation8 + $0x198] sm:$0xff] }
  0x81   :  { %5065 = vmatprep.subr.bf16.mxu0 %v5064_v51  ;;  %v218_v15 = vld [vmem:[#allocation8 + $0x1b8] sm:$0xff]  ;;  %v220_v16 = vld [vmem:[#allocation8 + $0x1c8] sm:$0xff]  ;;  %v5134_v18 = vpack.c.bf16 %v209_v11, %v205_v10  ;;  %v5074_v19 = vpack.c.bf16 %v215_v13, %v211_v8  ;;  %v219_v20 = vld [vmem:[#allocation8 + $0x1c0] sm:$0xff] }
  0x82   :  { %5127 = vmatpush1.bf16.msra.mxu1 %v5126_v57  ;;  %v224_v17 = vld [vmem:[#allocation8 + $0x1e8] sm:$0xff]  ;;  %v5136_v21 = vpack.c.bf16 %v218_v15, %v214_v14  ;;  %v213_v22 = vld [vmem:[#allocation8 + $0x190] sm:$0xff]  ;;  %v223_v25 = vld [vmem:[#allocation8 + $0x1e0] sm:$0xff] }
  0x83   :  { %5129 = vmatprep.subr.bf16.mxu1 %v5128_v60  ;;  %v217_v23 = vld [vmem:[#allocation8 + $0x1b0] sm:$0xff]  ;;  %v5076_v24 = vpack.c.bf16 %v224_v17, %v220_v16  ;;  %v222_v26 = vld [vmem:[#allocation8 + $0x1d8] sm:$0xff]  ;;  %v228_v28 = vld [vmem:[#allocation8 + $0x208] sm:$0xff]  ;;  %v5078_v31 = vpack.c.bf16 %v223_v25, %v219_v20 }
  0x84   :  { %5067 = vmatpush1.bf16.msra.mxu0 %v5066_v58  ;;  %v226_v27 = vld [vmem:[#allocation8 + $0x1f8] sm:$0xff]  ;;  %v232_v29 = vld [vmem:[#allocation8 + $0x228] sm:$0xff]  ;;  %v5138_v30 = vpack.c.bf16 %v217_v23, %v213_v22  ;;  %v227_v32 = vld [vmem:[#allocation8 + $0x200] sm:$0xff] }
  0x85   :  { %5069 = vmatprep.subr.bf16.mxu0 %v5068_v63  ;;  %v5140_v33 = vpack.c.bf16 %v226_v27, %v222_v26  ;;  %v221_v34 = vld [vmem:[#allocation8 + $0x1d0] sm:$0xff]  ;;  %v5080_v36 = vpack.c.bf16 %v232_v29, %v228_v28  ;;  %v231_v37 = vld [vmem:[#allocation8 + $0x220] sm:$0xff]  ;;  %v230_v38 = vld [vmem:[#allocation8 + $0x218] sm:$0xff] }
  0x86   :  { %5131 = vmatpush1.bf16.msra.mxu1 %v5130_v6  ;;  %v225_v35 = vld [vmem:[#allocation8 + $0x1f0] sm:$0xff]  ;;  %v234_v39 = vld [vmem:[#allocation8 + $0x238] sm:$0xff]  ;;  %v236_v40 = vld [vmem:[#allocation8 + $0x248] sm:$0xff]  ;;  %v5082_v43 = vpack.c.bf16 %v231_v37, %v227_v32 }
  0x87   :  { %5133 = vmatprep.subr.bf16.mxu1 %v5132_v9  ;;  %v240_v41 = vld [vmem:[#allocation8 + $0x268] sm:$0xff]  ;;  %v5142_v42 = vpack.c.bf16 %v225_v35, %v221_v34  ;;  %v235_v44 = vld [vmem:[#allocation8 + $0x240] sm:$0xff]  ;;  %v5144_v45 = vpack.c.bf16 %v234_v39, %v230_v38  ;;  %v229_v46 = vld [vmem:[#allocation8 + $0x210] sm:$0xff] }
  0x88   :  { %5071 = vmatpush1.bf16.msra.mxu0 %v5070_v7  ;;  %v233_v47 = vld [vmem:[#allocation8 + $0x230] sm:$0xff]  ;;  %v5084_v48 = vpack.c.bf16 %v240_v41, %v236_v40  ;;  %v239_v49 = vld [vmem:[#allocation8 + $0x260] sm:$0xff]  ;;  %v238_v50 = vld [vmem:[#allocation8 + $0x258] sm:$0xff] }
  0x89   :  { %5073 = vmatprep.subr.bf16.mxu0 %v5072_v12  ;;  %v242_v51 = vld [vmem:[#allocation8 + $0x278] sm:$0xff]  ;;  %v244_v52 = vld [vmem:[#allocation8 + $0x288] sm:$0xff]  ;;  %v5146_v54 = vpack.c.bf16 %v233_v47, %v229_v46  ;;  %v5086_v55 = vpack.c.bf16 %v239_v49, %v235_v44  ;;  %v243_v56 = vld [vmem:[#allocation8 + $0x280] sm:$0xff] }
  0x8a   :  { %5135 = vmatpush1.bf16.msra.mxu1 %v5134_v18  ;;  %v248_v53 = vld [vmem:[#allocation8 + $0x2a8] sm:$0xff]  ;;  %v5148_v57 = vpack.c.bf16 %v242_v51, %v238_v50  ;;  %v237_v58 = vld [vmem:[#allocation8 + $0x250] sm:$0xff]  ;;  %v247_v61 = vld [vmem:[#allocation8 + $0x2a0] sm:$0xff] }
  0x8b   :  { %5137 = vmatprep.subr.bf16.mxu1 %v5136_v21  ;;  %v241_v59 = vld [vmem:[#allocation8 + $0x270] sm:$0xff]  ;;  %v5088_v60 = vpack.c.bf16 %v248_v53, %v244_v52  ;;  %v246_v62 = vld [vmem:[#allocation8 + $0x298] sm:$0xff]  ;;  %v252_v1 = vld [vmem:[#allocation8 + $0x2c8] sm:$0xff]  ;;  %v5090_v4 = vpack.c.bf16 %v247_v61, %v243_v56 }
  0x8c   :  { %5075 = vmatpush1.bf16.msra.mxu0 %v5074_v19  ;;  %v250_v63 = vld [vmem:[#allocation8 + $0x2b8] sm:$0xff]  ;;  %v256_v2 = vld [vmem:[#allocation8 + $0x2e8] sm:$0xff]  ;;  %v5150_v3 = vpack.c.bf16 %v241_v59, %v237_v58  ;;  %v251_v5 = vld [vmem:[#allocation8 + $0x2c0] sm:$0xff] }
  0x8d   :  { %5077 = vmatprep.subr.bf16.mxu0 %v5076_v24  ;;  %v5152_v6 = vpack.c.bf16 %v250_v63, %v246_v62  ;;  %v245_v7 = vld [vmem:[#allocation8 + $0x290] sm:$0xff]  ;;  %v5092_v9 = vpack.c.bf16 %v256_v2, %v252_v1  ;;  %v255_v10 = vld [vmem:[#allocation8 + $0x2e0] sm:$0xff]  ;;  %v254_v11 = vld [vmem:[#allocation8 + $0x2d8] sm:$0xff] }
  0x8e   :  { %5139 = vmatpush1.bf16.msra.mxu1 %v5138_v30  ;;  %v249_v8 = vld [vmem:[#allocation8 + $0x2b0] sm:$0xff]  ;;  %v258_v12 = vld [vmem:[#allocation8 + $0x2f8] sm:$0xff]  ;;  %v260_v13 = vld [vmem:[#allocation8 + $0x308] sm:$0xff]  ;;  %v5094_v16 = vpack.c.bf16 %v255_v10, %v251_v5 }
  0x8f   :  { %5141 = vmatprep.subr.bf16.mxu1 %v5140_v33  ;;  %v264_v14 = vld [vmem:[#allocation8 + $0x328] sm:$0xff]  ;;  %v5154_v15 = vpack.c.bf16 %v249_v8, %v245_v7  ;;  %v259_v17 = vld [vmem:[#allocation8 + $0x300] sm:$0xff]  ;;  %v5156_v18 = vpack.c.bf16 %v258_v12, %v254_v11  ;;  %v253_v19 = vld [vmem:[#allocation8 + $0x2d0] sm:$0xff] }
  0x90   :  { %5079 = vmatpush1.bf16.msra.mxu0 %v5078_v31  ;;  %v257_v20 = vld [vmem:[#allocation8 + $0x2f0] sm:$0xff]  ;;  %v5096_v21 = vpack.c.bf16 %v264_v14, %v260_v13  ;;  %v263_v22 = vld [vmem:[#allocation8 + $0x320] sm:$0xff]  ;;  %v262_v23 = vld [vmem:[#allocation8 + $0x318] sm:$0xff] }
  0x91   :  { %5081 = vmatprep.subr.bf16.mxu0 %v5080_v36  ;;  %v266_v24 = vld [vmem:[#allocation8 + $0x338] sm:$0xff]  ;;  %v268_v25 = vld [vmem:[#allocation8 + $0x348] sm:$0xff]  ;;  %v5158_v27 = vpack.c.bf16 %v257_v20, %v253_v19  ;;  %v5098_v28 = vpack.c.bf16 %v263_v22, %v259_v17  ;;  %v267_v29 = vld [vmem:[#allocation8 + $0x340] sm:$0xff] }
  0x92   :  { %5143 = vmatpush1.bf16.msra.mxu1 %v5142_v42  ;;  %v272_v26 = vld [vmem:[#allocation8 + $0x368] sm:$0xff]  ;;  %v5160_v30 = vpack.c.bf16 %v266_v24, %v262_v23  ;;  %v261_v31 = vld [vmem:[#allocation8 + $0x310] sm:$0xff]  ;;  %v271_v34 = vld [vmem:[#allocation8 + $0x360] sm:$0xff] }
  0x93   :  { %5145 = vmatprep.subr.bf16.mxu1 %v5144_v45  ;;  %v265_v32 = vld [vmem:[#allocation8 + $0x330] sm:$0xff]  ;;  %v5100_v33 = vpack.c.bf16 %v272_v26, %v268_v25  ;;  %v270_v35 = vld [vmem:[#allocation8 + $0x358] sm:$0xff]  ;;  %v276_v37 = vld [vmem:[#allocation8 + $0x388] sm:$0xff]  ;;  %v5102_v40 = vpack.c.bf16 %v271_v34, %v267_v29 }
  0x94   :  { %5083 = vmatpush1.bf16.msra.mxu0 %v5082_v43  ;;  %v274_v36 = vld [vmem:[#allocation8 + $0x378] sm:$0xff]  ;;  %v280_v38 = vld [vmem:[#allocation8 + $0x3a8] sm:$0xff]  ;;  %v5162_v39 = vpack.c.bf16 %v265_v32, %v261_v31  ;;  %v275_v41 = vld [vmem:[#allocation8 + $0x380] sm:$0xff] }
  0x95   :  { %5085 = vmatprep.subr.bf16.mxu0 %v5084_v48  ;;  %v5164_v42 = vpack.c.bf16 %v274_v36, %v270_v35  ;;  %v269_v43 = vld [vmem:[#allocation8 + $0x350] sm:$0xff]  ;;  %v5104_v45 = vpack.c.bf16 %v280_v38, %v276_v37  ;;  %v279_v46 = vld [vmem:[#allocation8 + $0x3a0] sm:$0xff]  ;;  %v278_v47 = vld [vmem:[#allocation8 + $0x398] sm:$0xff] }
  0x96   :  { %5147 = vmatpush1.bf16.msra.mxu1 %v5146_v54  ;;  %v273_v44 = vld [vmem:[#allocation8 + $0x370] sm:$0xff]  ;;  %v282_v48 = vld [vmem:[#allocation8 + $0x3b8] sm:$0xff]  ;;  %v284_v49 = vld [vmem:[#allocation8 + $0x3c8] sm:$0xff]  ;;  %v5106_v52 = vpack.c.bf16 %v279_v46, %v275_v41 }
  0x97   :  { %5149 = vmatprep.subr.bf16.mxu1 %v5148_v57  ;;  %v288_v50 = vld [vmem:[#allocation8 + $0x3e8] sm:$0xff]  ;;  %v5166_v51 = vpack.c.bf16 %v273_v44, %v269_v43  ;;  %v283_v53 = vld [vmem:[#allocation8 + $0x3c0] sm:$0xff]  ;;  %v5168_v54 = vpack.c.bf16 %v282_v48, %v278_v47  ;;  %v281_v56 = vld [vmem:[#allocation8 + $0x3b0] sm:$0xff] }
  0x98   :  { %5087 = vmatpush1.bf16.msra.mxu0 %v5086_v55  ;;  %v277_v55 = vld [vmem:[#allocation8 + $0x390] sm:$0xff]  ;;  %v5108_v57 = vpack.c.bf16 %v288_v50, %v284_v49  ;;  %v287_v58 = vld [vmem:[#allocation8 + $0x3e0] sm:$0xff]  ;;  %v286_v59 = vld [vmem:[#allocation8 + $0x3d8] sm:$0xff] }
  0x99   :  { %5089 = vmatprep.subr.bf16.mxu0 %v5088_v60  ;;  %v290_v60 = vld [vmem:[#allocation8 + $0x3f8] sm:$0xff]  ;;  %v458_v61 = vld [vmem:[#allocation10 + $0x8] sm:$0xff]  ;;  %v5170_v63 = vpack.c.bf16 %v281_v56, %v277_v55  ;;  %v5110_v1 = vpack.c.bf16 %v287_v58, %v283_v53  ;;  %v457_v5 = vld [vmem:[#allocation10] sm:$0xff] }
  0x9a   :  { %5151 = vmatpush1.bf16.msra.mxu1 %v5150_v3  ;;  %v462_v62 = vld [vmem:[#allocation10 + $0x28] sm:$0xff]  ;;  %v5172_v2 = vpack.c.bf16 %v290_v60, %v286_v59  ;;  %v285_v3 = vld [vmem:[#allocation8 + $0x3d0] sm:$0xff]  ;;  %v461_v7 = vld [vmem:[#allocation10 + $0x20] sm:$0xff] }
  0x9b   :  { %5153 = vmatprep.subr.bf16.mxu1 %v5152_v6  ;;  %v5176_v6 = vpack.c.bf16 %v462_v62, %v458_v61  ;;  %v460_v8 = vld [vmem:[#allocation10 + $0x18] sm:$0xff]  ;;  %v466_v10 = vld [vmem:[#allocation10 + $0x48] sm:$0xff]  ;;  %v159_v12 = vld [vmem:[#allocation5] sm:$0xff]  ;;  %v5178_v14 = vpack.c.bf16 %v461_v7, %v457_v5 }
  0x9c   :  { %5091 = vmatpush1.bf16.msra.mxu0 %v5090_v4  ;;  %v289_v4 = vld [vmem:[#allocation8 + $0x3f0] sm:$0xff]  ;;  %v470_v11 = vld [vmem:[#allocation10 + $0x68] sm:$0xff]  ;;  %v469_v20 = vld [vmem:[#allocation10 + $0x60] sm:$0xff] }
  0x9d   :  { %5093 = vmatprep.subr.bf16.mxu0 %v5092_v9  ;;  %v464_v9 = vld [vmem:[#allocation10 + $0x38] sm:$0xff]  ;;  %v5174_v13 = vpack.c.bf16 %v289_v4, %v285_v3  ;;  %v463_v17 = vld [vmem:[#allocation10 + $0x30] sm:$0xff]  ;;  %v5180_v19 = vpack.c.bf16 %v470_v11, %v466_v10  ;;  %v474_v23 = vld [vmem:[#allocation10 + $0x88] sm:$0xff] }
  0x9e   :  { %5155 = vmatpush1.bf16.msra.mxu1 %v5154_v15  ;;  %v5240_v15 = vpack.c.bf16 %v464_v9, %v460_v8  ;;  %v472_v22 = vld [vmem:[#allocation10 + $0x78] sm:$0xff]  ;;  %v478_v24 = vld [vmem:[#allocation10 + $0xa8] sm:$0xff]  ;;  %v471_v29 = vld [vmem:[#allocation10 + $0x70] sm:$0xff] }
  0x9f   :  { %5157 = vmatprep.subr.bf16.mxu1 %v5156_v18  ;;  %v465_v18 = vld [vmem:[#allocation10 + $0x40] sm:$0xff]  ;;  %v5184_v31 = vpack.c.bf16 %v478_v24, %v474_v23  ;;  %v480_v34 = vld [vmem:[#allocation10 + $0xb8] sm:$0xff]  ;;  %v482_v35 = vld [vmem:[#allocation10 + $0xc8] sm:$0xff] }
  0xa0   :  { %5095 = vmatpush1.bf16.msra.mxu0 %v5094_v16  ;;  %v459_v16 = vld [vmem:[#allocation10 + $0x10] sm:$0xff]  ;;  %v5182_v26 = vpack.c.bf16 %v469_v20, %v465_v18  ;;  %v477_v32 = vld [vmem:[#allocation10 + $0xa0] sm:$0xff]  ;;  %v486_v36 = vld [vmem:[#allocation10 + $0xe8] sm:$0xff] }
  0xa1   :  { %5097 = vmatprep.subr.bf16.mxu0 %v5096_v21  ;;  %v468_v21 = vld [vmem:[#allocation10 + $0x58] sm:$0xff]  ;;  %v5242_v25 = vpack.c.bf16 %v463_v17, %v459_v16  ;;  %v479_v41 = vld [vmem:[#allocation10 + $0xb0] sm:$0xff]  ;;  %v5188_v43 = vpack.c.bf16 %v486_v36, %v482_v35  ;;  %v485_v44 = vld [vmem:[#allocation10 + $0xe0] sm:$0xff] }
  0xa2   :  { %5159 = vmatpush1.bf16.msra.mxu1 %v5158_v27  ;;  %v5244_v27 = vpack.c.bf16 %v472_v22, %v468_v21  ;;  %v488_v46 = vld [vmem:[#allocation10 + $0xf8] sm:$0xff]  ;;  %v490_v47 = vld [vmem:[#allocation10 + $0x108] sm:$0xff]  ;;  %v487_v53 = vld [vmem:[#allocation10 + $0xf0] sm:$0xff] }
  0xa3   :  { %5161 = vmatprep.subr.bf16.mxu1 %v5160_v30  ;;  %v473_v30 = vld [vmem:[#allocation10 + $0x80] sm:$0xff]  ;;  %v494_v48 = vld [vmem:[#allocation10 + $0x128] sm:$0xff]  ;;  %v496_v58 = vld [vmem:[#allocation10 + $0x138] sm:$0xff] }
  0xa4   :  { %5099 = vmatpush1.bf16.msra.mxu0 %v5098_v28  ;;  %v467_v28 = vld [vmem:[#allocation10 + $0x50] sm:$0xff]  ;;  %v5186_v38 = vpack.c.bf16 %v477_v32, %v473_v30  ;;  %v5192_v55 = vpack.c.bf16 %v494_v48, %v490_v47  ;;  %v493_v56 = vld [vmem:[#allocation10 + $0x120] sm:$0xff]  ;;  %v498_v59 = vld [vmem:[#allocation10 + $0x148] sm:$0xff] }
  0xa5   :  { %5101 = vmatprep.subr.bf16.mxu0 %v5100_v33  ;;  %v476_v33 = vld [vmem:[#allocation10 + $0x98] sm:$0xff]  ;;  %v5246_v37 = vpack.c.bf16 %v471_v29, %v467_v28  ;;  %v502_v60 = vld [vmem:[#allocation10 + $0x168] sm:$0xff]  ;;  %v497_v3 = vld [vmem:[#allocation10 + $0x140] sm:$0xff] }
  0xa6   :  { %5163 = vmatpush1.bf16.msra.mxu1 %v5162_v39  ;;  %v5248_v39 = vpack.c.bf16 %v480_v34, %v476_v33  ;;  %v5196_v4 = vpack.c.bf16 %v502_v60, %v498_v59  ;;  %v501_v5 = vld [vmem:[#allocation10 + $0x160] sm:$0xff]  ;;  %v504_v7 = vld [vmem:[#allocation10 + $0x178] sm:$0xff]  ;;  %v506_v8 = vld [vmem:[#allocation10 + $0x188] sm:$0xff] }
  0xa7   :  { %5165 = vmatprep.subr.bf16.mxu1 %v5164_v42  ;;  %v481_v42 = vld [vmem:[#allocation10 + $0xc0] sm:$0xff]  ;;  %v510_v9 = vld [vmem:[#allocation10 + $0x1a8] sm:$0xff]  ;;  %v5198_v11 = vpack.c.bf16 %v501_v5, %v497_v3  ;;  %v508_v18 = vld [vmem:[#allocation10 + $0x198] sm:$0xff] }
  0xa8   :  { %5103 = vmatpush1.bf16.msra.mxu0 %v5102_v40  ;;  %v475_v40 = vld [vmem:[#allocation10 + $0x90] sm:$0xff]  ;;  %v5190_v50 = vpack.c.bf16 %v485_v44, %v481_v42  ;;  %v5200_v16 = vpack.c.bf16 %v510_v9, %v506_v8  ;;  %v509_v17 = vld [vmem:[#allocation10 + $0x1a0] sm:$0xff]  ;;  %v520_v33 = vld [vmem:[#allocation10 + $0x1f8] sm:$0xff] }
  0xa9   :  { %5105 = vmatprep.subr.bf16.mxu0 %v5104_v45  ;;  %v484_v45 = vld [vmem:[#allocation10 + $0xd8] sm:$0xff]  ;;  %v5250_v49 = vpack.c.bf16 %v479_v41, %v475_v40  ;;  %v507_v23 = vld [vmem:[#allocation10 + $0x190] sm:$0xff]  ;;  %v513_v29 = vld [vmem:[#allocation10 + $0x1c0] sm:$0xff] }
  0xaa   :  { %5167 = vmatpush1.bf16.msra.mxu1 %v5166_v51  ;;  %v5252_v51 = vpack.c.bf16 %v488_v46, %v484_v45  ;;  %v511_v24 = vld [vmem:[#allocation10 + $0x1b0] sm:$0xff]  ;;  %v517_v30 = vld [vmem:[#allocation10 + $0x1e0] sm:$0xff]  ;;  %v528_v45 = vld [vmem:[#allocation10 + $0x238] sm:$0xff] }
  0xab   :  { %5169 = vmatprep.subr.bf16.mxu1 %v5168_v54  ;;  %v489_v54 = vld [vmem:[#allocation10 + $0x100] sm:$0xff]  ;;  %v5206_v32 = vpack.c.bf16 %v517_v30, %v513_v29  ;;  %v515_v34 = vld [vmem:[#allocation10 + $0x1d0] sm:$0xff]  ;;  %v560_v30 = vld [vmem:[#allocation10 + $0x338] sm:$0xff] }
  0xac   :  { %5107 = vmatpush1.bf16.msra.mxu0 %v5106_v52  ;;  %v483_v52 = vld [vmem:[#allocation10 + $0xd0] sm:$0xff]  ;;  %v5194_v62 = vpack.c.bf16 %v493_v56, %v489_v54  ;;  %v521_v41 = vld [vmem:[#allocation10 + $0x200] sm:$0xff] }
  0xad   :  { %5109 = vmatprep.subr.bf16.mxu0 %v5108_v57  ;;  %v492_v57 = vld [vmem:[#allocation10 + $0x118] sm:$0xff]  ;;  %v5254_v61 = vpack.c.bf16 %v487_v53, %v483_v52  ;;  %v519_v35 = vld [vmem:[#allocation10 + $0x1f0] sm:$0xff]  ;;  %v525_v42 = vld [vmem:[#allocation10 + $0x220] sm:$0xff] }
  0xae   :  { %5171 = vmatpush1.bf16.msra.mxu1 %v5170_v63  ;;  %v5256_v63 = vpack.c.bf16 %v496_v58, %v492_v57  ;;  %v5210_v44 = vpack.c.bf16 %v525_v42, %v521_v41  ;;  %v523_v46 = vld [vmem:[#allocation10 + $0x210] sm:$0xff]  ;;  %v529_v53 = vld [vmem:[#allocation10 + $0x240] sm:$0xff]  ;;  %v536_v57 = vld [vmem:[#allocation10 + $0x278] sm:$0xff] }
  0xaf   :  { %5173 = vmatprep.subr.bf16.mxu1 %v5172_v2  ;;  %v495_v2 = vld [vmem:[#allocation10 + $0x130] sm:$0xff]  ;;  %v533_v54 = vld [vmem:[#allocation10 + $0x260] sm:$0xff]  ;;  %v568_v42 = vld [vmem:[#allocation10 + $0x378] sm:$0xff] }
  0xb0   :  { %5111 = vmatpush1.bf16.msra.mxu0 %v5110_v1  ;;  %v491_v1 = vld [vmem:[#allocation10 + $0x110] sm:$0xff]  ;;  %v5214_v56 = vpack.c.bf16 %v533_v54, %v529_v53  ;;  %v541_v3 = vld [vmem:[#allocation10 + $0x2a0] sm:$0xff]  ;;  %v576_v54 = vld [vmem:[#allocation10 + $0x3b8] sm:$0xff] }
  0xb1   :  { %5177 = vmatprep.subr.bf16.mxu0 %v5176_v6  ;;  %v500_v6 = vld [vmem:[#allocation10 + $0x158] sm:$0xff]  ;;  %v5258_v10 = vpack.c.bf16 %v495_v2, %v491_v1  ;;  %v527_v47 = vld [vmem:[#allocation10 + $0x230] sm:$0xff]  ;;  %v537_v2 = vld [vmem:[#allocation10 + $0x280] sm:$0xff] }
  0xb2   :  { %5175 = vmatpush1.bf16.msra.mxu1 %v5174_v13  ;;  %v499_v13 = vld [vmem:[#allocation10 + $0x150] sm:$0xff]  ;;  %v5218_v5 = vpack.c.bf16 %v541_v3, %v537_v2  ;;  %v584_v3 = vld [vmem:[#allocation10 + $0x3f8] sm:$0xff] }
  0xb3   :  { %356 = vmatmul.mubr.f32.vlgmr.msra.gmra.mrb[0].mxu0 %v159_v12  ;;  %5241 = vmatprep.subr.bf16.mxu1 %v5240_v15  ;;  %v505_v15 = vld [vmem:[#allocation10 + $0x180] sm:$0xff]  ;;  %v531_v58 = vld [vmem:[#allocation10 + $0x250] sm:$0xff] }
  0xb4   :  { %5179 = vmatpush1.bf16.msra.mxu0 %v5178_v14  ;;  %649 = vmatprep.mubr.f32.mxu0 %v7472_v0  ;;  %v503_v14 = vld [vmem:[#allocation10 + $0x170] sm:$0xff]  ;;  %v5202_v21 = vpack.c.bf16 %v509_v17, %v505_v15  ;;  %v549_v15 = vld [vmem:[#allocation10 + $0x2e0] sm:$0xff] }
  0xb5   :  { %5181 = vmatprep.subr.bf16.mxu0 %v5180_v19  ;;  %427 = vmatmul.mubr.f32.vlgmr.msra.gmra.mrb[0].mxu1 %v159_v12  ;;  %v5260_v12 = vpack.c.bf16 %v504_v7, %v500_v6  ;;  %v512_v19 = vld [vmem:[#allocation10 + $0x1b8] sm:$0xff]  ;;  %v5262_v20 = vpack.c.bf16 %v503_v14, %v499_v13  ;;  %v535_v59 = vld [vmem:[#allocation10 + $0x270] sm:$0xff]  ;;  %v545_v14 = vld [vmem:[#allocation10 + $0x2c0] sm:$0xff] }
  0xb6   :  { %5243 = vmatpush1.bf16.msra.mxu1 %v5242_v25  ;;  %720 = vmatprep.mubr.f32.mxu1 %v7472_v0  ;;  %v5264_v22 = vpack.c.bf16 %v512_v19, %v508_v18  ;;  %v5266_v25 = vpack.c.bf16 %v511_v24, %v507_v23  ;;  %v544_v6 = vld [vmem:[#allocation10 + $0x2b8] sm:$0xff]  ;;  %v539_v7 = vld [vmem:[#allocation10 + $0x290] sm:$0xff]  ;;  %v5222_v17 = vpack.c.bf16 %v549_v15, %v545_v14  ;;  %v554_v23 = vld [vmem:[#allocation10 + $0x308] sm:$0xff]  ;;  %v116_v14 = vlaneseq }
  0xb7   :  { %5245 = vmatprep.subr.bf16.mxu1 %v5244_v27  ;;  %v518_v27 = vld [vmem:[#allocation10 + $0x1e8] sm:$0xff]  ;;  %v543_v8 = vld [vmem:[#allocation10 + $0x2b0] sm:$0xff]  ;;  %v552_v18 = vld [vmem:[#allocation10 + $0x2f8] sm:$0xff] }
  0xb8   :  { %5183 = vmatpush1.bf16.msra.mxu0 %v5182_v26  ;;  %v514_v26 = vld [vmem:[#allocation10 + $0x1c8] sm:$0xff]  ;;  %v547_v19 = vld [vmem:[#allocation10 + $0x2d0] sm:$0xff]  ;;  %v7599_v15 = vshrl.u32 %v116_v14, 7 }
  0xb9   :  { %5185 = vmatprep.subr.bf16.mxu0 %v5184_v31  ;;  %v5204_v28 = vpack.c.bf16 %v518_v27, %v514_v26  ;;  %v516_v31 = vld [vmem:[#allocation10 + $0x1d8] sm:$0xff]  ;;  %v558_v24 = vld [vmem:[#allocation10 + $0x328] sm:$0xff]  ;;  %v553_v26 = vld [vmem:[#allocation10 + $0x300] sm:$0xff] }
  0xba   :  { %5247 = vmatpush1.bf16.msra.mxu1 %v5246_v37  ;;  %v5268_v36 = vpack.c.bf16 %v520_v33, %v516_v31  ;;  %v5270_v37 = vpack.c.bf16 %v519_v35, %v515_v34  ;;  %v557_v27 = vld [vmem:[#allocation10 + $0x320] sm:$0xff]  ;;  %v555_v31 = vld [vmem:[#allocation10 + $0x310] sm:$0xff]  ;;  %v562_v35 = vld [vmem:[#allocation10 + $0x348] sm:$0xff] }
  0xbb   :  { %5249 = vmatprep.subr.bf16.mxu1 %v5248_v39  ;;  %v526_v39 = vld [vmem:[#allocation10 + $0x228] sm:$0xff]  ;;  %v5226_v29 = vpack.c.bf16 %v557_v27, %v553_v26  ;;  %v130_v26 = vsub.s32 3, %v7599_v15 }
  0xbc   :  { %5187 = vmatpush1.bf16.msra.mxu0 %v5186_v38  ;;  %v522_v38 = vld [vmem:[#allocation10 + $0x208] sm:$0xff] }
  0xbd   :  { %5189 = vmatprep.subr.bf16.mxu0 %v5188_v43  ;;  %v5208_v40 = vpack.c.bf16 %v526_v39, %v522_v38  ;;  %v524_v43 = vld [vmem:[#allocation10 + $0x218] sm:$0xff]  ;;  %v561_v38 = vld [vmem:[#allocation10 + $0x340] sm:$0xff]  ;;  %v783_v14 = vld [vmem:[#allocation8 + $0xe8] sm:$0xff] }
  0xbe   :  { %5251 = vmatpush1.bf16.msra.mxu1 %v5250_v49  ;;  %v5272_v48 = vpack.c.bf16 %v528_v45, %v524_v43  ;;  %v5274_v49 = vpack.c.bf16 %v527_v47, %v523_v46  ;;  %v565_v39 = vld [vmem:[#allocation10 + $0x360] sm:$0xff]  ;;  %v563_v43 = vld [vmem:[#allocation10 + $0x350] sm:$0xff]  ;;  %v570_v47 = vld [vmem:[#allocation10 + $0x388] sm:$0xff] }
  0xbf   :  { %5253 = vmatprep.subr.bf16.mxu1 %v5252_v51  ;;  %v534_v51 = vld [vmem:[#allocation10 + $0x268] sm:$0xff]  ;;  %v5230_v41 = vpack.c.bf16 %v565_v39, %v561_v38 }
  0xc0   :  { %5191 = vmatpush1.bf16.msra.mxu0 %v5190_v50  ;;  %v530_v50 = vld [vmem:[#allocation10 + $0x248] sm:$0xff] }
  0xc1   :  { %5193 = vmatprep.subr.bf16.mxu0 %v5192_v55  ;;  %v5212_v52 = vpack.c.bf16 %v534_v51, %v530_v50  ;;  %v532_v55 = vld [vmem:[#allocation10 + $0x258] sm:$0xff]  ;;  %v569_v50 = vld [vmem:[#allocation10 + $0x380] sm:$0xff] }
  0xc2   :  { %5255 = vmatpush1.bf16.msra.mxu1 %v5254_v61  ;;  %v5276_v60 = vpack.c.bf16 %v536_v57, %v532_v55  ;;  %v5278_v61 = vpack.c.bf16 %v535_v59, %v531_v58  ;;  %v573_v51 = vld [vmem:[#allocation10 + $0x3a0] sm:$0xff]  ;;  %v571_v55 = vld [vmem:[#allocation10 + $0x390] sm:$0xff]  ;;  %v578_v59 = vld [vmem:[#allocation10 + $0x3c8] sm:$0xff] }
  0xc3   :  { %5257 = vmatprep.subr.bf16.mxu1 %v5256_v63  ;;  %v542_v63 = vld [vmem:[#allocation10 + $0x2a8] sm:$0xff]  ;;  %v5234_v53 = vpack.c.bf16 %v573_v51, %v569_v50 }
  0xc4   :  { %5195 = vmatpush1.bf16.msra.mxu0 %v5194_v62  ;;  %v538_v62 = vld [vmem:[#allocation10 + $0x288] sm:$0xff] }
  0xc5   :  { %5197 = vmatprep.subr.bf16.mxu0 %v5196_v4  ;;  %v5216_v1 = vpack.c.bf16 %v542_v63, %v538_v62  ;;  %v540_v4 = vld [vmem:[#allocation10 + $0x298] sm:$0xff]  ;;  %v577_v62 = vld [vmem:[#allocation10 + $0x3c0] sm:$0xff]  ;;  %v763_v50 = vld [vmem:[#allocation8 + $0x48] sm:$0xff] }
  0xc6   :  { %5259 = vmatpush1.bf16.msra.mxu1 %v5258_v10  ;;  %v5280_v9 = vpack.c.bf16 %v544_v6, %v540_v4  ;;  %v5282_v10 = vpack.c.bf16 %v543_v8, %v539_v7  ;;  %v581_v63 = vld [vmem:[#allocation10 + $0x3e0] sm:$0xff]  ;;  %v579_v4 = vld [vmem:[#allocation10 + $0x3d0] sm:$0xff]  ;;  %v755_v8 = vld [vmem:[#allocation8 + $0x8] sm:$0xff] }
  0xc7   :  { %5261 = vmatprep.subr.bf16.mxu1 %v5260_v12  ;;  %v550_v12 = vld [vmem:[#allocation10 + $0x2e8] sm:$0xff]  ;;  %v5238_v2 = vpack.c.bf16 %v581_v63, %v577_v62  ;;  %v766_v62 = vld [vmem:[#allocation8 + $0x60] sm:$0xff] }
  0xc8   :  { %5199 = vmatpush1.bf16.msra.mxu0 %v5198_v11  ;;  %v546_v11 = vld [vmem:[#allocation10 + $0x2c8] sm:$0xff] }
  0xc9   :  { %5201 = vmatprep.subr.bf16.mxu0 %v5200_v16  ;;  %v5220_v13 = vpack.c.bf16 %v550_v12, %v546_v11  ;;  %v548_v16 = vld [vmem:[#allocation10 + $0x2d8] sm:$0xff]  ;;  %v767_v51 = vld [vmem:[#allocation8 + $0x68] sm:$0xff] }
  0xca   :  { %5263 = vmatpush1.bf16.msra.mxu1 %v5262_v20  ;;  %v551_v20 = vld [vmem:[#allocation10 + $0x2f0] sm:$0xff]  ;;  %v757_v11 = vld [vmem:[#allocation8 + $0x18] sm:$0xff] }
  0xcb   :  { %5265 = vmatprep.subr.bf16.mxu1 %v5264_v22  ;;  %v5286_v22 = vpack.c.bf16 %v551_v20, %v547_v19  ;;  %v761_v12 = vld [vmem:[#allocation8 + $0x38] sm:$0xff]  ;;  %v126_v19 = vsub.s32 2, %v7599_v15 }
  0xcc   :  { %5203 = vmatpush1.bf16.msra.mxu0 %v5202_v21  ;;  %v5284_v21 = vpack.c.bf16 %v552_v18, %v548_v16  ;;  %v118_v16 = vsub.s32 0, %v7599_v15  ;;  %v122_v18 = vsub.s32 1, %v7599_v15 }
  0xcd   :  { %5205 = vmatprep.subr.bf16.mxu0 %v5204_v28  ;;  %v556_v28 = vld [vmem:[#allocation10 + $0x318] sm:$0xff] }
  0xce   :  { %5267 = vmatpush1.bf16.msra.mxu1 %v5266_v25  ;;  %v5224_v25 = vpack.c.bf16 %v558_v24, %v554_v23  ;;  %v5288_v33 = vpack.c.bf16 %v560_v30, %v556_v28 }
  0xcf   :  { %5269 = vmatprep.subr.bf16.mxu1 %v5268_v36  ;;  %v566_v36 = vld [vmem:[#allocation10 + $0x368] sm:$0xff] }
  0xd0   :  { %5207 = vmatpush1.bf16.msra.mxu0 %v5206_v32  ;;  %v559_v32 = vld [vmem:[#allocation10 + $0x330] sm:$0xff] }
  0xd1   :  { %5209 = vmatprep.subr.bf16.mxu0 %v5208_v40  ;;  %v5290_v34 = vpack.c.bf16 %v559_v32, %v555_v31  ;;  %v564_v40 = vld [vmem:[#allocation10 + $0x358] sm:$0xff] }
  0xd2   :  { %5271 = vmatpush1.bf16.msra.mxu1 %v5270_v37  ;;  %v5228_v37 = vpack.c.bf16 %v566_v36, %v562_v35  ;;  %v5292_v45 = vpack.c.bf16 %v568_v42, %v564_v40 }
  0xd3   :  { %5273 = vmatprep.subr.bf16.mxu1 %v5272_v48  ;;  %v574_v48 = vld [vmem:[#allocation10 + $0x3a8] sm:$0xff] }
  0xd4   :  { %5211 = vmatpush1.bf16.msra.mxu0 %v5210_v44  ;;  %v567_v44 = vld [vmem:[#allocation10 + $0x370] sm:$0xff] }
  0xd5   :  { %5213 = vmatprep.subr.bf16.mxu0 %v5212_v52  ;;  %v5294_v46 = vpack.c.bf16 %v567_v44, %v563_v43  ;;  %v572_v52 = vld [vmem:[#allocation10 + $0x398] sm:$0xff] }
  0xd6   :  { %5275 = vmatpush1.bf16.msra.mxu1 %v5274_v49  ;;  %v5232_v49 = vpack.c.bf16 %v574_v48, %v570_v47  ;;  %v5296_v57 = vpack.c.bf16 %v576_v54, %v572_v52  ;;  %v754_v48 = vld [vmem:[#allocation8] sm:$0xff]  ;;  %v760_v54 = vld [vmem:[#allocation8 + $0x30] sm:$0xff] }
  0xd7   :  { %5277 = vmatprep.subr.bf16.mxu1 %v5276_v60  ;;  %v582_v60 = vld [vmem:[#allocation10 + $0x3e8] sm:$0xff] }
  0xd8   :  { %5215 = vmatpush1.bf16.msra.mxu0 %v5214_v56  ;;  %v575_v56 = vld [vmem:[#allocation10 + $0x3b0] sm:$0xff] }
  0xd9   :  { %5217 = vmatprep.subr.bf16.mxu0 %v5216_v1  ;;  %v5298_v58 = vpack.c.bf16 %v575_v56, %v571_v55  ;;  %v580_v1 = vld [vmem:[#allocation10 + $0x3d8] sm:$0xff] }
  0xda   :  { %5279 = vmatpush1.bf16.msra.mxu1 %v5278_v61  ;;  %v5236_v61 = vpack.c.bf16 %v582_v60, %v578_v59  ;;  %v5300_v6 = vpack.c.bf16 %v584_v3, %v580_v1  ;;  %v5308_v60 = vpack.c.bf16 %v767_v51, %v763_v50  ;;  %v771_v1 = vld [vmem:[#allocation8 + $0x88] sm:$0xff]  ;;  %v788_v50 = vld [vmem:[#allocation8 + $0x110] sm:$0xff] }
  0xdb   :  { %5281 = vmatprep.subr.bf16.mxu1 %v5280_v9  ;;  %v759_v9 = vld [vmem:[#allocation8 + $0x28] sm:$0xff]  ;;  %v792_v51 = vld [vmem:[#allocation8 + $0x130] sm:$0xff] }
  0xdc   :  { %5219 = vmatpush1.bf16.msra.mxu0 %v5218_v5  ;;  %v583_v5 = vld [vmem:[#allocation10 + $0x3f0] sm:$0xff] }
  0xdd   :  { %5221 = vmatprep.subr.bf16.mxu0 %v5220_v13  ;;  %v5302_v7 = vpack.c.bf16 %v583_v5, %v579_v4  ;;  %v5368_v13 = vpack.c.bf16 %v761_v12, %v757_v11  ;;  %v764_v4 = vld [vmem:[#allocation8 + $0x50] sm:$0xff]  ;;  %v774_v11 = vld [vmem:[#allocation8 + $0xa0] sm:$0xff] }
  0xde   :  { %5283 = vmatpush1.bf16.msra.mxu1 %v5282_v10  ;;  %v5304_v10 = vpack.c.bf16 %v759_v9, %v755_v8  ;;  %v768_v5 = vld [vmem:[#allocation8 + $0x70] sm:$0xff]  ;;  %v777_v8 = vld [vmem:[#allocation8 + $0xb8] sm:$0xff] }
  0xdf   :  { %5285 = vmatprep.subr.bf16.mxu1 %v5284_v21  ;;  %v5374_v12 = vpack.c.bf16 %v768_v5, %v764_v4  ;;  %v802_v5 = vld [vmem:[#allocation8 + $0x180] sm:$0xff] }
  0xe0   :  { %5223 = vmatpush1.bf16.msra.mxu0 %v5222_v17  ;;  %v114_v17 = vld [vmem:[#allocation11] sm:$0xf] }
  0xe1   :  { %5225 = vmatprep.subr.bf16.mxu0 %v5224_v25  ;;  %v7606_v20 = vrot.slane %v114_v17, %v118_v16  ;;  %v7610_v21 = vrot.slane %v114_v17, %v122_v18  ;;  %v7614_v23 = vrot.slane %v114_v17, %v126_v19 }
  0xe2   :  { %5287 = vmatpush1.bf16.msra.mxu1 %v5286_v22 }
  0xe3   :  { %5289 = vmatprep.subr.bf16.mxu1 %v5288_v33  ;;  %v7622_v33 = vrot.slane %v114_v17, %v130_v26 }
  0xe4   :  { %5227 = vmatpush1.bf16.msra.mxu0 %v5226_v29 }
  0xe5   :  { %5229 = vmatprep.subr.bf16.mxu0 %v5228_v37 }
  0xe6   :  { %5291 = vmatpush1.bf16.msra.mxu1 %v5290_v34 }
  0xe7   :  { %5293 = vmatprep.subr.bf16.mxu1 %v5292_v45 }
  0xe8   :  { %5231 = vmatpush1.bf16.msra.mxu0 %v5230_v41 }
  0xe9   :  { %5233 = vmatprep.subr.bf16.mxu0 %v5232_v49  ;;  %v758_v49 = vld [vmem:[#allocation8 + $0x20] sm:$0xff] }
  0xea   :  { %5295 = vmatpush1.bf16.msra.mxu1 %v5294_v46  ;;  %v5306_v56 = vpack.c.bf16 %v758_v49, %v754_v48  ;;  %v799_v48 = vld [vmem:[#allocation8 + $0x168] sm:$0xff] }
  0xeb   :  { %5297 = vmatprep.subr.bf16.mxu1 %v5296_v57  ;;  %v765_v57 = vld [vmem:[#allocation8 + $0x58] sm:$0xff] }
  0xec   :  { %5235 = vmatpush1.bf16.msra.mxu0 %v5234_v53  ;;  %v756_v53 = vld [vmem:[#allocation8 + $0x10] sm:$0xff] }
  0xed   :  { %5237 = vmatprep.subr.bf16.mxu0 %v5236_v61  ;;  %v762_v61 = vld [vmem:[#allocation8 + $0x40] sm:$0xff]  ;;  %v5370_v63 = vpack.c.bf16 %v760_v54, %v756_v53  ;;  %v797_v53 = vld [vmem:[#allocation8 + $0x158] sm:$0xff] }
  0xee   :  { %5299 = vmatpush1.bf16.msra.mxu1 %v5298_v58  ;;  %v769_v58 = vld [vmem:[#allocation8 + $0x78] sm:$0xff] }
  0xef   :  { %5301 = vmatprep.subr.bf16.mxu1 %v5300_v6  ;;  %v5372_v3 = vpack.c.bf16 %v769_v58, %v765_v57  ;;  %v5310_v6 = vpack.c.bf16 %v766_v62, %v762_v61  ;;  %v801_v54 = vld [vmem:[#allocation8 + $0x178] sm:$0xff]  ;;  %v798_v57 = vld [vmem:[#allocation8 + $0x160] sm:$0xff]  ;;  %v5386_v58 = vpack.c.bf16 %v792_v51, %v788_v50  ;;  %v796_v62 = vld [vmem:[#allocation8 + $0x150] sm:$0xff] }
  0xf0   :  { %5239 = vmatpush1.bf16.msra.mxu0 %v5238_v2  ;;  %v775_v2 = vld [vmem:[#allocation8 + $0xa8] sm:$0xff]  ;;  %v5388_v61 = vpack.c.bf16 %v801_v54, %v797_v53  ;;  %v826_v51 = vld [vmem:[#allocation8 + $0x240] sm:$0xff] }
  0xf1   :  { %5305 = vmatprep.subr.bf16.mxu0 %v5304_v10  ;;  %v5312_v9 = vpack.c.bf16 %v775_v2, %v771_v1  ;;  %v770_v10 = vld [vmem:[#allocation8 + $0x80] sm:$0xff]  ;;  %v805_v2 = vld [vmem:[#allocation8 + $0x198] sm:$0xff]  ;;  %v835_v54 = vld [vmem:[#allocation8 + $0x288] sm:$0xff] }
  0xf2   :  { %5303 = vmatpush1.bf16.msra.mxu1 %v5302_v7  ;;  %v773_v7 = vld [vmem:[#allocation8 + $0x98] sm:$0xff] }
  0xf3   :  { %5369 = vmatprep.subr.bf16.mxu1 %v5368_v13  ;;  %v779_v13 = vld [vmem:[#allocation8 + $0xc8] sm:$0xff]  ;;  %v5376_v17 = vpack.c.bf16 %v777_v8, %v773_v7 }
  0xf4   :  { %v811_v8 = vld [vmem:[#allocation8 + $0x1c8] sm:$0xff] }
 0x186   :  { %v357_v22 = vpop.f32.mrb[0].mxu0 }
 0x187   :  { %v358_v24 = vadd.f32 %v357_v22, %v7606_v20  ;;  %v359_v25 = vpop.f32.mrb[1].mxu0  ;;  %v772_v22 = vld [vmem:[#allocation8 + $0x90] sm:$0xff] }
 0x188   :  { %v360_v27 = vadd.f32 %v359_v25, %v7610_v21  ;;  %v428_v29 = vpop.f32.mrb[0].mxu1  ;;  %v5314_v25 = vpack.c.bf16 %v774_v11, %v770_v10  ;;  %v804_v11 = vld [vmem:[#allocation8 + $0x190] sm:$0xff] }
 0x189   :  { %v433_v28 = vmul.f32 0.5, %v358_v24  ;;  %v429_v31 = vadd.f32 %v428_v29, %v7614_v23  ;;  %v430_v32 = vpop.f32.mrb[1].mxu1  ;;  %v776_v24 = vld [vmem:[#allocation8 + $0xb0] sm:$0xff]  ;;  %v5316_v29 = vpack.c.bf16 %v783_v14, %v779_v13  ;;  %v813_v14 = vld [vmem:[#allocation8 + $0x1d8] sm:$0xff] }
 0x18a   :  { %v437_v30 = vmul.f32 0.5, %v360_v27  ;;  %v431_v34 = vadd.f32 %v430_v32, %v7622_v33  ;;  %v781_v27 = vld [vmem:[#allocation8 + $0xd8] sm:$0xff]  ;;  %v5378_v32 = vpack.c.bf16 %v776_v24, %v772_v22  ;;  %v810_v24 = vld [vmem:[#allocation8 + $0x1c0] sm:$0xff] }
 0x18b   :  { %7136 = vtanh.f32 %v433_v28  ;;  %v785_v28 = vld [vmem:[#allocation8 + $0xf8] sm:$0xff] }
 0x18c   :  { %7138 = vtanh.f32 %v437_v30  ;;  %v442_v35 = vmul.f32 0.5, %v431_v34  ;;  %v778_v30 = vld [vmem:[#allocation8 + $0xc0] sm:$0xff]  ;;  %v787_v34 = vld [vmem:[#allocation8 + $0x108] sm:$0xff] }
 0x18d   :  { %7140 = vtanh.f32 %v429_v31  ;;  %v782_v31 = vld [vmem:[#allocation8 + $0xe0] sm:$0xff] }
 0x18e   :  { %7142 = vtanh.f32 %v442_v35  ;;  %v791_v35 = vld [vmem:[#allocation8 + $0x128] sm:$0xff] }
 0x195   :  { %v7137_v36 = vpop.eup %7136 }
 0x196   :  { %v7139_v37 = vpop.eup %7138  ;;  %v435_v38 = vmul.f32 0.5, %v7137_v36  ;;  %v5380_v36 = vpack.c.bf16 %v785_v28, %v781_v27  ;;  %v819_v28 = vld [vmem:[#allocation8 + $0x208] sm:$0xff] }
 0x197   :  { %v7141_v39 = vpop.eup %7140  ;;  %v439_v40 = vmul.f32 0.5, %v7139_v37  ;;  %v780_v37 = vld [vmem:[#allocation8 + $0xd0] sm:$0xff] }
 0x198   :  { %v436_v41 = vadd.f32 0.5, %v435_v38  ;;  %v7143_v46 = vpop.eup %7142  ;;  %v784_v38 = vld [vmem:[#allocation8 + $0xf0] sm:$0xff] }
 0x199   :  { %v440_v42 = vadd.f32 0.5, %v439_v40  ;;  %v444_v47 = vmul.f32 0.5, %v7143_v46  ;;  %v789_v40 = vld [vmem:[#allocation8 + $0x118] sm:$0xff]  ;;  %v5382_v46 = vpack.c.bf16 %v784_v38, %v780_v37  ;;  %v818_v38 = vld [vmem:[#allocation8 + $0x200] sm:$0xff] }
 0x19a   :  { %v448_v43 = vmul.f32 %v7141_v39, %v436_v41  ;;  %v5318_v39 = vpack.c.bf16 %v782_v31, %v778_v30  ;;  %v793_v41 = vld [vmem:[#allocation8 + $0x138] sm:$0xff]  ;;  %v812_v31 = vld [vmem:[#allocation8 + $0x1d0] sm:$0xff] }
 0x19b   :  { %v447_v44 = vmul.f32 0.0, %v440_v42  ;;  %v445_v52 = vadd.f32 0.5, %v444_v47  ;;  %v5320_v42 = vpack.c.bf16 %v791_v35, %v787_v34  ;;  %v795_v47 = vld [vmem:[#allocation8 + $0x148] sm:$0xff]  ;;  %v5384_v49 = vpack.c.bf16 %v793_v41, %v789_v40  ;;  %v821_v35 = vld [vmem:[#allocation8 + $0x218] sm:$0xff] }
 0x19c   :  { %v827_v41 = vld [vmem:[#allocation8 + $0x248] sm:$0xff] }
 0x19d   :  { %v7625_v45 = vadd.f32 %v448_v43, %v447_v44  ;;  %v786_v43 = vld [vmem:[#allocation8 + $0x100] sm:$0xff] }
 0x19e   :  { %v790_v44 = vld [vmem:[#allocation8 + $0x120] sm:$0xff] }
 0x19f   :  { %7144 = vtanh.f32 %v7625_v45 }
 0x1a9   :  { %v7145_v55 = vpop.eup %7144 }
 0x1aa   :  { %v451_v59 = vmul.f32 %v7145_v55, %v445_v52  ;;  %v5322_v52 = vpack.c.bf16 %v790_v44, %v786_v43  ;;  %v5324_v55 = vpack.c.bf16 %v799_v48, %v795_v47  ;;  %v820_v44 = vld [vmem:[#allocation8 + $0x210] sm:$0xff]  ;;  %v829_v48 = vld [vmem:[#allocation8 + $0x258] sm:$0xff] }
 0x1ac   :  { %650 = vmatmul.mubr.f32.vlgmr.msra.gmra.mrb[2].mxu0 %v451_v59  ;;  %721 = vmatmul.mubr.f32.vlgmr.msra.gmra.mrb[2].mxu1 %v451_v59 }
 0x1ad   :  { %5307 = vmatpush1.bf16.msra.mxu0 %v5306_v56  ;;  %946 = vmatprep.mubr.f32.mxu0 %v451_v59  ;;  %v794_v56 = vld [vmem:[#allocation8 + $0x140] sm:$0xff] }
 0x1ae   :  { %1017 = vmatprep.mubr.f32.mxu1 %v451_v59  ;;  %5309 = vmatprep.subr.bf16.mxu0 %v5308_v60  ;;  %v803_v59 = vld [vmem:[#allocation8 + $0x188] sm:$0xff]  ;;  %v5326_v1 = vpack.c.bf16 %v798_v57, %v794_v56  ;;  %v828_v57 = vld [vmem:[#allocation8 + $0x250] sm:$0xff] }
 0x1af   :  { %5371 = vmatpush1.bf16.msra.mxu1 %v5370_v63  ;;  %v807_v60 = vld [vmem:[#allocation8 + $0x1a8] sm:$0xff]  ;;  %v800_v63 = vld [vmem:[#allocation8 + $0x170] sm:$0xff] }
 0x1b0   :  { %5373 = vmatprep.subr.bf16.mxu1 %v5372_v3  ;;  %v809_v3 = vld [vmem:[#allocation8 + $0x1b8] sm:$0xff]  ;;  %v5328_v4 = vpack.c.bf16 %v807_v60, %v803_v59  ;;  %v5390_v7 = vpack.c.bf16 %v800_v63, %v796_v62  ;;  %v834_v63 = vld [vmem:[#allocation8 + $0x280] sm:$0xff] }
 0x1b1   :  { %5311 = vmatpush1.bf16.msra.mxu0 %v5310_v6  ;;  %v806_v6 = vld [vmem:[#allocation8 + $0x1a0] sm:$0xff]  ;;  %v5392_v10 = vpack.c.bf16 %v809_v3, %v805_v2  ;;  %v837_v60 = vld [vmem:[#allocation8 + $0x298] sm:$0xff]  ;;  %v843_v3 = vld [vmem:[#allocation8 + $0x2c8] sm:$0xff] }
 0x1b2   :  { %5313 = vmatprep.subr.bf16.mxu0 %v5312_v9  ;;  %v815_v9 = vld [vmem:[#allocation8 + $0x1e8] sm:$0xff]  ;;  %v5330_v13 = vpack.c.bf16 %v806_v6, %v802_v5  ;;  %v836_v6 = vld [vmem:[#allocation8 + $0x290] sm:$0xff] }
 0x1b3   :  { %5375 = vmatpush1.bf16.msra.mxu1 %v5374_v12  ;;  %v808_v12 = vld [vmem:[#allocation8 + $0x1b0] sm:$0xff]  ;;  %v5332_v22 = vpack.c.bf16 %v815_v9, %v811_v8  ;;  %v845_v9 = vld [vmem:[#allocation8 + $0x2d8] sm:$0xff] }
 0x1b4   :  { %5377 = vmatprep.subr.bf16.mxu1 %v5376_v17  ;;  %v817_v17 = vld [vmem:[#allocation8 + $0x1f8] sm:$0xff]  ;;  %v5394_v27 = vpack.c.bf16 %v808_v12, %v804_v11  ;;  %v842_v12 = vld [vmem:[#allocation8 + $0x2c0] sm:$0xff] }
 0x1b5   :  { %5315 = vmatpush1.bf16.msra.mxu0 %v5314_v25  ;;  %v814_v25 = vld [vmem:[#allocation8 + $0x1e0] sm:$0xff]  ;;  %v5396_v30 = vpack.c.bf16 %v817_v17, %v813_v14  ;;  %v851_v17 = vld [vmem:[#allocation8 + $0x308] sm:$0xff] }
 0x1b6   :  { %5317 = vmatprep.subr.bf16.mxu0 %v5316_v29  ;;  %v823_v29 = vld [vmem:[#allocation8 + $0x228] sm:$0xff]  ;;  %v5334_v34 = vpack.c.bf16 %v814_v25, %v810_v24  ;;  %v844_v25 = vld [vmem:[#allocation8 + $0x2d0] sm:$0xff] }
 0x1b7   :  { %5379 = vmatpush1.bf16.msra.mxu1 %v5378_v32  ;;  %v816_v32 = vld [vmem:[#allocation8 + $0x1f0] sm:$0xff]  ;;  %v5336_v37 = vpack.c.bf16 %v823_v29, %v819_v28  ;;  %v853_v29 = vld [vmem:[#allocation8 + $0x318] sm:$0xff] }
 0x1b8   :  { %5381 = vmatprep.subr.bf16.mxu1 %v5380_v36  ;;  %v825_v36 = vld [vmem:[#allocation8 + $0x238] sm:$0xff]  ;;  %v5398_v40 = vpack.c.bf16 %v816_v32, %v812_v31  ;;  %v850_v32 = vld [vmem:[#allocation8 + $0x300] sm:$0xff] }
 0x1b9   :  { %5319 = vmatpush1.bf16.msra.mxu0 %v5318_v39  ;;  %v822_v39 = vld [vmem:[#allocation8 + $0x220] sm:$0xff]  ;;  %v5400_v43 = vpack.c.bf16 %v825_v36, %v821_v35  ;;  %v859_v36 = vld [vmem:[#allocation8 + $0x348] sm:$0xff] }
 0x1ba   :  { %5321 = vmatprep.subr.bf16.mxu0 %v5320_v42  ;;  %v831_v42 = vld [vmem:[#allocation8 + $0x268] sm:$0xff]  ;;  %v5338_v47 = vpack.c.bf16 %v822_v39, %v818_v38  ;;  %v852_v39 = vld [vmem:[#allocation8 + $0x310] sm:$0xff] }
 0x1bb   :  { %5383 = vmatpush1.bf16.msra.mxu1 %v5382_v46  ;;  %v824_v46 = vld [vmem:[#allocation8 + $0x230] sm:$0xff]  ;;  %v5340_v50 = vpack.c.bf16 %v831_v42, %v827_v41  ;;  %v861_v42 = vld [vmem:[#allocation8 + $0x358] sm:$0xff] }
 0x1bc   :  { %5385 = vmatprep.subr.bf16.mxu1 %v5384_v49  ;;  %v833_v49 = vld [vmem:[#allocation8 + $0x278] sm:$0xff]  ;;  %v5402_v53 = vpack.c.bf16 %v824_v46, %v820_v44  ;;  %v858_v46 = vld [vmem:[#allocation8 + $0x340] sm:$0xff] }
 0x1bd   :  { %5323 = vmatpush1.bf16.msra.mxu0 %v5322_v52  ;;  %v830_v52 = vld [vmem:[#allocation8 + $0x260] sm:$0xff]  ;;  %v5404_v56 = vpack.c.bf16 %v833_v49, %v829_v48  ;;  %v867_v49 = vld [vmem:[#allocation8 + $0x388] sm:$0xff] }
 0x1be   :  { %5325 = vmatprep.subr.bf16.mxu0 %v5324_v55  ;;  %v839_v55 = vld [vmem:[#allocation8 + $0x2a8] sm:$0xff]  ;;  %v5342_v59 = vpack.c.bf16 %v830_v52, %v826_v51  ;;  %v860_v52 = vld [vmem:[#allocation8 + $0x350] sm:$0xff] }
 0x1bf   :  { %5387 = vmatpush1.bf16.msra.mxu1 %v5386_v58  ;;  %v832_v58 = vld [vmem:[#allocation8 + $0x270] sm:$0xff]  ;;  %v5344_v62 = vpack.c.bf16 %v839_v55, %v835_v54  ;;  %v869_v55 = vld [vmem:[#allocation8 + $0x398] sm:$0xff] }
 0x1c0   :  { %5389 = vmatprep.subr.bf16.mxu1 %v5388_v61  ;;  %v841_v61 = vld [vmem:[#allocation8 + $0x2b8] sm:$0xff]  ;;  %v5406_v2 = vpack.c.bf16 %v832_v58, %v828_v57  ;;  %v866_v58 = vld [vmem:[#allocation8 + $0x380] sm:$0xff] }
 0x1c1   :  { %5327 = vmatpush1.bf16.msra.mxu0 %v5326_v1  ;;  %v838_v1 = vld [vmem:[#allocation8 + $0x2a0] sm:$0xff]  ;;  %v5408_v5 = vpack.c.bf16 %v841_v61, %v837_v60  ;;  %v875_v61 = vld [vmem:[#allocation8 + $0x3c8] sm:$0xff] }
 0x1c2   :  { %5329 = vmatprep.subr.bf16.mxu0 %v5328_v4  ;;  %v847_v4 = vld [vmem:[#allocation8 + $0x2e8] sm:$0xff]  ;;  %v5346_v8 = vpack.c.bf16 %v838_v1, %v834_v63  ;;  %v868_v1 = vld [vmem:[#allocation8 + $0x390] sm:$0xff] }
 0x1c3   :  { %5391 = vmatpush1.bf16.msra.mxu1 %v5390_v7  ;;  %v840_v7 = vld [vmem:[#allocation8 + $0x2b0] sm:$0xff]  ;;  %v5348_v11 = vpack.c.bf16 %v847_v4, %v843_v3  ;;  %v877_v4 = vld [vmem:[#allocation8 + $0x3d8] sm:$0xff] }
 0x1c4   :  { %5393 = vmatprep.subr.bf16.mxu1 %v5392_v10  ;;  %v849_v10 = vld [vmem:[#allocation8 + $0x2f8] sm:$0xff]  ;;  %v5410_v14 = vpack.c.bf16 %v840_v7, %v836_v6  ;;  %v874_v7 = vld [vmem:[#allocation8 + $0x3c0] sm:$0xff] }
 0x1c5   :  { %5331 = vmatpush1.bf16.msra.mxu0 %v5330_v13  ;;  %v846_v13 = vld [vmem:[#allocation8 + $0x2e0] sm:$0xff]  ;;  %v5412_v24 = vpack.c.bf16 %v849_v10, %v845_v9 }
 0x1c6   :  { %5333 = vmatprep.subr.bf16.mxu0 %v5332_v22  ;;  %v855_v22 = vld [vmem:[#allocation8 + $0x328] sm:$0xff]  ;;  %v5350_v28 = vpack.c.bf16 %v846_v13, %v842_v12  ;;  %v880_v12 = vld [vmem:[#allocation8 + $0x3f0] sm:$0xff] }
 0x1c7   :  { %5395 = vmatpush1.bf16.msra.mxu1 %v5394_v27  ;;  %v848_v27 = vld [vmem:[#allocation8 + $0x2f0] sm:$0xff]  ;;  %v5352_v31 = vpack.c.bf16 %v855_v22, %v851_v17  ;;  %v750_v17 = vld [vmem:[#allocation5 + $0x8] sm:$0xff] }
 0x1c8   :  { %5397 = vmatprep.subr.bf16.mxu1 %v5396_v30  ;;  %v857_v30 = vld [vmem:[#allocation8 + $0x338] sm:$0xff]  ;;  %v5414_v35 = vpack.c.bf16 %v848_v27, %v844_v25  ;;  %v1049_v22 = vld [vmem:[#allocation10 + $0x8] sm:$0xff]  ;;  %v1048_v25 = vld [vmem:[#allocation10] sm:$0xff] }
 0x1c9   :  { %5335 = vmatpush1.bf16.msra.mxu0 %v5334_v34  ;;  %v854_v34 = vld [vmem:[#allocation8 + $0x320] sm:$0xff]  ;;  %v5416_v38 = vpack.c.bf16 %v857_v30, %v853_v29  ;;  %v1051_v29 = vld [vmem:[#allocation10 + $0x18] sm:$0xff] }
 0x1ca   :  { %5337 = vmatprep.subr.bf16.mxu0 %v5336_v37  ;;  %v863_v37 = vld [vmem:[#allocation8 + $0x368] sm:$0xff]  ;;  %v5354_v41 = vpack.c.bf16 %v854_v34, %v850_v32  ;;  %v1055_v30 = vld [vmem:[#allocation10 + $0x38] sm:$0xff]  ;;  %v1050_v34 = vld [vmem:[#allocation10 + $0x10] sm:$0xff] }
 0x1cb   :  { %5399 = vmatpush1.bf16.msra.mxu1 %v5398_v40  ;;  %v856_v40 = vld [vmem:[#allocation8 + $0x330] sm:$0xff]  ;;  %v5356_v44 = vpack.c.bf16 %v863_v37, %v859_v36  ;;  %v5496_v32 = vpack.c.bf16 %v1055_v30, %v1051_v29  ;;  %v1057_v37 = vld [vmem:[#allocation10 + $0x48] sm:$0xff] }
 0x1cc   :  { %5401 = vmatprep.subr.bf16.mxu1 %v5400_v43  ;;  %v865_v43 = vld [vmem:[#allocation8 + $0x378] sm:$0xff]  ;;  %v5418_v48 = vpack.c.bf16 %v856_v40, %v852_v39  ;;  %v1056_v39 = vld [vmem:[#allocation10 + $0x40] sm:$0xff]  ;;  %v1089_v29 = vld [vmem:[#allocation10 + $0x148] sm:$0xff] }
 0x1cd   :  { %5339 = vmatpush1.bf16.msra.mxu0 %v5338_v47  ;;  %v862_v47 = vld [vmem:[#allocation8 + $0x360] sm:$0xff]  ;;  %v5420_v51 = vpack.c.bf16 %v865_v43, %v861_v42  ;;  %v1059_v42 = vld [vmem:[#allocation10 + $0x58] sm:$0xff]  ;;  %v1093_v30 = vld [vmem:[#allocation10 + $0x168] sm:$0xff] }
 0x1ce   :  { %5341 = vmatprep.subr.bf16.mxu0 %v5340_v50  ;;  %v871_v50 = vld [vmem:[#allocation8 + $0x3a8] sm:$0xff]  ;;  %v5358_v54 = vpack.c.bf16 %v862_v47, %v858_v46  ;;  %v1063_v43 = vld [vmem:[#allocation10 + $0x78] sm:$0xff]  ;;  %v1058_v47 = vld [vmem:[#allocation10 + $0x50] sm:$0xff] }
 0x1cf   :  { %5403 = vmatpush1.bf16.msra.mxu1 %v5402_v53  ;;  %v864_v53 = vld [vmem:[#allocation8 + $0x370] sm:$0xff]  ;;  %v5360_v57 = vpack.c.bf16 %v871_v50, %v867_v49  ;;  %v5500_v46 = vpack.c.bf16 %v1063_v43, %v1059_v42  ;;  %v1065_v49 = vld [vmem:[#allocation10 + $0x88] sm:$0xff] }
 0x1d0   :  { %5405 = vmatprep.subr.bf16.mxu1 %v5404_v56  ;;  %v873_v56 = vld [vmem:[#allocation8 + $0x3b8] sm:$0xff]  ;;  %v5422_v60 = vpack.c.bf16 %v864_v53, %v860_v52  ;;  %v1064_v52 = vld [vmem:[#allocation10 + $0x80] sm:$0xff]  ;;  %v1097_v42 = vld [vmem:[#allocation10 + $0x188] sm:$0xff] }
 0x1d1   :  { %5343 = vmatpush1.bf16.msra.mxu0 %v5342_v59  ;;  %v870_v59 = vld [vmem:[#allocation8 + $0x3a0] sm:$0xff]  ;;  %v5424_v63 = vpack.c.bf16 %v873_v56, %v869_v55  ;;  %v1067_v56 = vld [vmem:[#allocation10 + $0x98] sm:$0xff]  ;;  %v1101_v43 = vld [vmem:[#allocation10 + $0x1a8] sm:$0xff] }
 0x1d2   :  { %5345 = vmatprep.subr.bf16.mxu0 %v5344_v62  ;;  %v879_v62 = vld [vmem:[#allocation8 + $0x3e8] sm:$0xff]  ;;  %v5362_v3 = vpack.c.bf16 %v870_v59, %v866_v58  ;;  %v1068_v53 = vld [vmem:[#allocation10 + $0xa0] sm:$0xff]  ;;  %v1066_v58 = vld [vmem:[#allocation10 + $0x90] sm:$0xff] }
 0x1d3   :  { %5407 = vmatpush1.bf16.msra.mxu1 %v5406_v2  ;;  %v872_v2 = vld [vmem:[#allocation8 + $0x3b0] sm:$0xff]  ;;  %v5364_v6 = vpack.c.bf16 %v879_v62, %v875_v61  ;;  %v5442_v55 = vpack.c.bf16 %v1068_v53, %v1064_v52  ;;  %v1073_v61 = vld [vmem:[#allocation10 + $0xc8] sm:$0xff] }
 0x1d4   :  { %5409 = vmatprep.subr.bf16.mxu1 %v5408_v5  ;;  %v881_v5 = vld [vmem:[#allocation8 + $0x3f8] sm:$0xff]  ;;  %v5426_v9 = vpack.c.bf16 %v872_v2, %v868_v1  ;;  %v1077_v62 = vld [vmem:[#allocation10 + $0xe8] sm:$0xff]  ;;  %v1072_v2 = vld [vmem:[#allocation10 + $0xc0] sm:$0xff] }
 0x1d5   :  { %5347 = vmatpush1.bf16.msra.mxu0 %v5346_v8  ;;  %v878_v8 = vld [vmem:[#allocation8 + $0x3e0] sm:$0xff]  ;;  %v5428_v10 = vpack.c.bf16 %v881_v5, %v877_v4  ;;  %v5444_v1 = vpack.c.bf16 %v1077_v62, %v1073_v61  ;;  %v1075_v4 = vld [vmem:[#allocation10 + $0xd8] sm:$0xff]  ;;  %v1098_v53 = vld [vmem:[#allocation10 + $0x190] sm:$0xff] }
 0x1d6   :  { %5349 = vmatprep.subr.bf16.mxu0 %v5348_v11  ;;  %v876_v11 = vld [vmem:[#allocation8 + $0x3d0] sm:$0xff]  ;;  %v5366_v13 = vpack.c.bf16 %v878_v8, %v874_v7  ;;  %v1079_v5 = vld [vmem:[#allocation10 + $0xf8] sm:$0xff]  ;;  %v1108_v61 = vld [vmem:[#allocation10 + $0x1e0] sm:$0xff] }
 0x1d7   :  { %5411 = vmatpush1.bf16.msra.mxu1 %v5410_v14  ;;  %v5430_v14 = vpack.c.bf16 %v880_v12, %v876_v11  ;;  %v1078_v7 = vld [vmem:[#allocation10 + $0xf0] sm:$0xff]  ;;  %v1085_v11 = vld [vmem:[#allocation10 + $0x128] sm:$0xff]  ;;  %v1080_v12 = vld [vmem:[#allocation10 + $0x100] sm:$0xff] }
 0x1d8   :  { %5413 = vmatprep.subr.bf16.mxu1 %v5412_v24  ;;  %v1053_v24 = vld [vmem:[#allocation10 + $0x28] sm:$0xff]  ;;  %v1107_v62 = vld [vmem:[#allocation10 + $0x1d8] sm:$0xff] }
 0x1d9   :  { %5351 = vmatpush1.bf16.msra.mxu0 %v5350_v28  ;;  %v5432_v27 = vpack.c.bf16 %v1053_v24, %v1049_v22  ;;  %v1052_v28 = vld [vmem:[#allocation10 + $0x20] sm:$0xff]  ;;  %v1083_v22 = vld [vmem:[#allocation10 + $0x118] sm:$0xff] }
 0x1da   :  { %5353 = vmatprep.subr.bf16.mxu0 %v5352_v31  ;;  %v5434_v31 = vpack.c.bf16 %v1052_v28, %v1048_v25  ;;  %v1087_v24 = vld [vmem:[#allocation10 + $0x138] sm:$0xff]  ;;  %v1086_v28 = vld [vmem:[#allocation10 + $0x130] sm:$0xff] }
 0x1db   :  { %5415 = vmatpush1.bf16.msra.mxu1 %v5414_v35  ;;  %v1054_v35 = vld [vmem:[#allocation10 + $0x30] sm:$0xff]  ;;  %v5512_v25 = vpack.c.bf16 %v1087_v24, %v1083_v22 }
 0x1dc   :  { %5417 = vmatprep.subr.bf16.mxu1 %v5416_v38  ;;  %v5498_v36 = vpack.c.bf16 %v1054_v35, %v1050_v34  ;;  %v1061_v38 = vld [vmem:[#allocation10 + $0x68] sm:$0xff]  ;;  %v1095_v34 = vld [vmem:[#allocation10 + $0x178] sm:$0xff] }
 0x1dd   :  { %5355 = vmatpush1.bf16.msra.mxu0 %v5354_v41  ;;  %v5436_v40 = vpack.c.bf16 %v1061_v38, %v1057_v37  ;;  %v1060_v41 = vld [vmem:[#allocation10 + $0x60] sm:$0xff] }
 0x1de   :  { %5357 = vmatprep.subr.bf16.mxu0 %v5356_v44  ;;  %v5438_v44 = vpack.c.bf16 %v1060_v41, %v1056_v39  ;;  %v1088_v37 = vld [vmem:[#allocation10 + $0x140] sm:$0xff]  ;;  %v1090_v39 = vld [vmem:[#allocation10 + $0x150] sm:$0xff] }
 0x1df   :  { %5419 = vmatpush1.bf16.msra.mxu1 %v5418_v48  ;;  %v1062_v48 = vld [vmem:[#allocation10 + $0x70] sm:$0xff]  ;;  %v1092_v38 = vld [vmem:[#allocation10 + $0x160] sm:$0xff] }
 0x1e0   :  { %5421 = vmatprep.subr.bf16.mxu1 %v5420_v51  ;;  %v5502_v50 = vpack.c.bf16 %v1062_v48, %v1058_v47  ;;  %v1069_v51 = vld [vmem:[#allocation10 + $0xa8] sm:$0xff]  ;;  %v1094_v41 = vld [vmem:[#allocation10 + $0x170] sm:$0xff]  ;;  %v5454_v47 = vpack.c.bf16 %v1092_v38, %v1088_v37 }
 0x1e1   :  { %5359 = vmatpush1.bf16.msra.mxu0 %v5358_v54  ;;  %v5440_v54 = vpack.c.bf16 %v1069_v51, %v1065_v49  ;;  %v5518_v48 = vpack.c.bf16 %v1094_v41, %v1090_v39  ;;  %v5456_v49 = vpack.c.bf16 %v1101_v43, %v1097_v42  ;;  %v1100_v51 = vld [vmem:[#allocation10 + $0x1a0] sm:$0xff]  ;;  %v1129_v39 = vld [vmem:[#allocation10 + $0x288] sm:$0xff] }
 0x1e2   :  { %5361 = vmatprep.subr.bf16.mxu0 %v5360_v57  ;;  %v1071_v57 = vld [vmem:[#allocation10 + $0xb8] sm:$0xff]  ;;  %v1128_v42 = vld [vmem:[#allocation10 + $0x280] sm:$0xff] }
 0x1e3   :  { %5423 = vmatpush1.bf16.msra.mxu1 %v5422_v60  ;;  %v5504_v59 = vpack.c.bf16 %v1071_v57, %v1067_v56  ;;  %v1070_v60 = vld [vmem:[#allocation10 + $0xb0] sm:$0xff]  ;;  %v1105_v57 = vld [vmem:[#allocation10 + $0x1c8] sm:$0xff]  ;;  %v1132_v43 = vld [vmem:[#allocation10 + $0x2a0] sm:$0xff] }
 0x1e4   :  { %5425 = vmatprep.subr.bf16.mxu1 %v5424_v63  ;;  %v5506_v63 = vpack.c.bf16 %v1070_v60, %v1066_v58  ;;  %v1109_v58 = vld [vmem:[#allocation10 + $0x1e8] sm:$0xff]  ;;  %v1104_v60 = vld [vmem:[#allocation10 + $0x1c0] sm:$0xff] }
 0x1e5   :  { %5363 = vmatpush1.bf16.msra.mxu0 %v5362_v3  ;;  %v1076_v3 = vld [vmem:[#allocation10 + $0xe0] sm:$0xff] }
 0x1e6   :  { %5365 = vmatprep.subr.bf16.mxu0 %v5364_v6  ;;  %v1074_v6 = vld [vmem:[#allocation10 + $0xd0] sm:$0xff]  ;;  %v5446_v8 = vpack.c.bf16 %v1076_v3, %v1072_v2 }
 0x1e7   :  { %5427 = vmatpush1.bf16.msra.mxu1 %v5426_v9  ;;  %v5508_v9 = vpack.c.bf16 %v1079_v5, %v1075_v4  ;;  %v1106_v2 = vld [vmem:[#allocation10 + $0x1d0] sm:$0xff] }
 0x1e8   :  { %5429 = vmatprep.subr.bf16.mxu1 %v5428_v10  ;;  %v1081_v10 = vld [vmem:[#allocation10 + $0x108] sm:$0xff]  ;;  %v1110_v3 = vld [vmem:[#allocation10 + $0x1f0] sm:$0xff] }
 0x1e9   :  { %5367 = vmatpush1.bf16.msra.mxu0 %v5366_v13  ;;  %v5510_v13 = vpack.c.bf16 %v1078_v7, %v1074_v6  ;;  %v5526_v5 = vpack.c.bf16 %v1110_v3, %v1106_v2  ;;  %v1113_v6 = vld [vmem:[#allocation10 + $0x208] sm:$0xff] }
 0x1ea   :  { %5433 = vmatprep.subr.bf16.mxu0 %v5432_v27  ;;  %v1082_v27 = vld [vmem:[#allocation10 + $0x110] sm:$0xff]  ;;  %v1117_v7 = vld [vmem:[#allocation10 + $0x228] sm:$0xff] }
 0x1eb   :  { %5431 = vmatpush1.bf16.msra.mxu1 %v5430_v14  ;;  %v5448_v14 = vpack.c.bf16 %v1085_v11, %v1081_v10  ;;  %v5514_v35 = vpack.c.bf16 %v1086_v28, %v1082_v27  ;;  %v1116_v10 = vld [vmem:[#allocation10 + $0x220] sm:$0xff]  ;;  %v1115_v11 = vld [vmem:[#allocation10 + $0x218] sm:$0xff]  ;;  %v1125_v27 = vld [vmem:[#allocation10 + $0x268] sm:$0xff] }
 0x1ec   :  { %947 = vmatmul.mubr.f32.vlgmr.msra.gmra.mrb[4].mxu0 %v750_v17  ;;  %5497 = vmatprep.subr.bf16.mxu1 %v5496_v32  ;;  %v1091_v32 = vld [vmem:[#allocation10 + $0x158] sm:$0xff]  ;;  %v1149_v2 = vld [vmem:[#allocation10 + $0x328] sm:$0xff] }
 0x1ed   :  { %5435 = vmatpush1.bf16.msra.mxu0 %v5434_v31 }
 0x1ee   :  { %1018 = vmatmul.mubr.f32.vlgmr.msra.gmra.mrb[4].mxu1 %v750_v17  ;;  %5437 = vmatprep.subr.bf16.mxu0 %v5436_v40  ;;  %v1084_v17 = vld [vmem:[#allocation10 + $0x120] sm:$0xff]  ;;  %v5516_v40 = vpack.c.bf16 %v1095_v34, %v1091_v32  ;;  %v1127_v34 = vld [vmem:[#allocation10 + $0x278] sm:$0xff] }
 0x1ef   :  { %5499 = vmatpush1.bf16.msra.mxu1 %v5498_v36  ;;  %v5450_v31 = vpack.c.bf16 %v1084_v17, %v1080_v12  ;;  %v5452_v36 = vpack.c.bf16 %v1093_v30, %v1089_v29  ;;  %v1118_v17 = vld [vmem:[#allocation10 + $0x230] sm:$0xff]  ;;  %v1120_v29 = vld [vmem:[#allocation10 + $0x240] sm:$0xff] }
 0x1f0   :  { %5501 = vmatprep.subr.bf16.mxu1 %v5500_v46  ;;  %v1103_v46 = vld [vmem:[#allocation10 + $0x1b8] sm:$0xff]  ;;  %v1124_v30 = vld [vmem:[#allocation10 + $0x260] sm:$0xff] }
 0x1f1   :  { %5439 = vmatpush1.bf16.msra.mxu0 %v5438_v44  ;;  %v1099_v44 = vld [vmem:[#allocation10 + $0x198] sm:$0xff]  ;;  %v5470_v32 = vpack.c.bf16 %v1124_v30, %v1120_v29  ;;  %v1154_v29 = vld [vmem:[#allocation10 + $0x350] sm:$0xff] }
 0x1f2   :  { %5441 = vmatprep.subr.bf16.mxu0 %v5440_v54  ;;  %v5520_v52 = vpack.c.bf16 %v1103_v46, %v1099_v44  ;;  %v1102_v54 = vld [vmem:[#allocation10 + $0x1b0] sm:$0xff]  ;;  %v1131_v44 = vld [vmem:[#allocation10 + $0x298] sm:$0xff]  ;;  %v5474_v46 = vpack.c.bf16 %v1132_v43, %v1128_v42 }
 0x1f3   :  { %5503 = vmatpush1.bf16.msra.mxu1 %v5502_v50  ;;  %v1096_v50 = vld [vmem:[#allocation10 + $0x180] sm:$0xff]  ;;  %v5522_v56 = vpack.c.bf16 %v1102_v54, %v1098_v53  ;;  %v1141_v53 = vld [vmem:[#allocation10 + $0x2e8] sm:$0xff]  ;;  %v1158_v30 = vld [vmem:[#allocation10 + $0x370] sm:$0xff] }
 0x1f4   :  { %5505 = vmatprep.subr.bf16.mxu1 %v5504_v59  ;;  %v5460_v59 = vpack.c.bf16 %v1109_v58, %v1105_v57  ;;  %v1139_v57 = vld [vmem:[#allocation10 + $0x2d8] sm:$0xff]  ;;  %v1162_v42 = vld [vmem:[#allocation10 + $0x390] sm:$0xff] }
 0x1f5   :  { %5443 = vmatpush1.bf16.msra.mxu0 %v5442_v55  ;;  %v5458_v55 = vpack.c.bf16 %v1100_v51, %v1096_v50  ;;  %v1166_v43 = vld [vmem:[#allocation10 + $0x3b0] sm:$0xff] }
 0x1f6   :  { %5445 = vmatprep.subr.bf16.mxu0 %v5444_v1  ;;  %v1111_v1 = vld [vmem:[#allocation10 + $0x1f8] sm:$0xff] }
 0x1f7   :  { %5507 = vmatpush1.bf16.msra.mxu1 %v5506_v63  ;;  %v5462_v63 = vpack.c.bf16 %v1108_v61, %v1104_v60  ;;  %v5524_v4 = vpack.c.bf16 %v1111_v1, %v1107_v62  ;;  %v1138_v60 = vld [vmem:[#allocation10 + $0x2d0] sm:$0xff]  ;;  %v1145_v1 = vld [vmem:[#allocation10 + $0x308] sm:$0xff] }
 0x1f8   :  { %5509 = vmatprep.subr.bf16.mxu1 %v5508_v9  ;;  %v1112_v9 = vld [vmem:[#allocation10 + $0x200] sm:$0xff]  ;;  %v1142_v61 = vld [vmem:[#allocation10 + $0x2f0] sm:$0xff]  ;;  %v5480_v3 = vpack.c.bf16 %v1149_v2, %v1145_v1 }
 0x1f9   :  { %5447 = vmatpush1.bf16.msra.mxu0 %v5446_v8  ;;  %v5464_v8 = vpack.c.bf16 %v1117_v7, %v1113_v6  ;;  %v5466_v12 = vpack.c.bf16 %v1116_v10, %v1112_v9  ;;  %v1147_v6 = vld [vmem:[#allocation10 + $0x318] sm:$0xff]  ;;  %v1146_v9 = vld [vmem:[#allocation10 + $0x310] sm:$0xff]  ;;  %v137_v2 = vld [vmem:[#allocation11 + $0x4] sm:$0xf] }
 0x1fa   :  { %5449 = vmatprep.subr.bf16.mxu0 %v5448_v14  ;;  %v1114_v14 = vld [vmem:[#allocation10 + $0x210] sm:$0xff] }
 0x1fb   :  { %5511 = vmatpush1.bf16.msra.mxu1 %v5510_v13  ;;  %v1119_v13 = vld [vmem:[#allocation10 + $0x238] sm:$0xff]  ;;  %v5530_v24 = vpack.c.bf16 %v1118_v17, %v1114_v14  ;;  %v1150_v10 = vld [vmem:[#allocation10 + $0x330] sm:$0xff]  ;;  %v1157_v14 = vld [vmem:[#allocation10 + $0x368] sm:$0xff] }
 0x1fc   :  { %5513 = vmatprep.subr.bf16.mxu1 %v5512_v25  ;;  %v5528_v22 = vpack.c.bf16 %v1119_v13, %v1115_v11  ;;  %v1121_v25 = vld [vmem:[#allocation10 + $0x248] sm:$0xff] }
 0x1fd   :  { %5451 = vmatpush1.bf16.msra.mxu0 %v5450_v31  ;;  %v5468_v28 = vpack.c.bf16 %v1125_v27, %v1121_v25  ;;  %v1123_v31 = vld [vmem:[#allocation10 + $0x258] sm:$0xff]  ;;  %v1153_v13 = vld [vmem:[#allocation10 + $0x348] sm:$0xff] }
 0x1fe   :  { %5453 = vmatprep.subr.bf16.mxu0 %v5452_v36  ;;  %v1126_v36 = vld [vmem:[#allocation10 + $0x270] sm:$0xff]  ;;  %v5532_v37 = vpack.c.bf16 %v1127_v34, %v1123_v31  ;;  %v5484_v17 = vpack.c.bf16 %v1157_v14, %v1153_v13  ;;  %v1155_v25 = vld [vmem:[#allocation10 + $0x358] sm:$0xff]  ;;  %v1161_v34 = vld [vmem:[#allocation10 + $0x388] sm:$0xff] }
 0x1ff   :  { %5515 = vmatpush1.bf16.msra.mxu1 %v5514_v35  ;;  %v1122_v35 = vld [vmem:[#allocation10 + $0x250] sm:$0xff] }
 0x200   :  { %5517 = vmatprep.subr.bf16.mxu1 %v5516_v40  ;;  %v5534_v38 = vpack.c.bf16 %v1126_v36, %v1122_v35  ;;  %v1133_v40 = vld [vmem:[#allocation10 + $0x2a8] sm:$0xff] }
 0x201   :  { %5455 = vmatpush1.bf16.msra.mxu0 %v5454_v47  ;;  %v5472_v41 = vpack.c.bf16 %v1133_v40, %v1129_v39  ;;  %v1135_v47 = vld [vmem:[#allocation10 + $0x2b8] sm:$0xff]  ;;  %v1165_v35 = vld [vmem:[#allocation10 + $0x3a8] sm:$0xff] }
 0x202   :  { %5457 = vmatprep.subr.bf16.mxu0 %v5456_v49  ;;  %v1134_v49 = vld [vmem:[#allocation10 + $0x2b0] sm:$0xff]  ;;  %v5536_v50 = vpack.c.bf16 %v1135_v47, %v1131_v44  ;;  %v5488_v36 = vpack.c.bf16 %v1165_v35, %v1161_v34  ;;  %v1163_v39 = vld [vmem:[#allocation10 + $0x398] sm:$0xff]  ;;  %v1169_v47 = vld [vmem:[#allocation10 + $0x3c8] sm:$0xff] }
 0x203   :  { %5519 = vmatpush1.bf16.msra.mxu1 %v5518_v48  ;;  %v1130_v48 = vld [vmem:[#allocation10 + $0x290] sm:$0xff] }
 0x204   :  { %5521 = vmatprep.subr.bf16.mxu1 %v5520_v52  ;;  %v5538_v51 = vpack.c.bf16 %v1134_v49, %v1130_v48  ;;  %v1137_v52 = vld [vmem:[#allocation10 + $0x2c8] sm:$0xff] }
 0x205   :  { %5459 = vmatpush1.bf16.msra.mxu0 %v5458_v55  ;;  %v5476_v54 = vpack.c.bf16 %v1141_v53, %v1137_v52  ;;  %v1136_v55 = vld [vmem:[#allocation10 + $0x2c0] sm:$0xff]  ;;  %v1173_v48 = vld [vmem:[#allocation10 + $0x3e8] sm:$0xff]  ;;  %v1171_v52 = vld [vmem:[#allocation10 + $0x3d8] sm:$0xff] }
 0x206   :  { %5461 = vmatprep.subr.bf16.mxu0 %v5460_v59  ;;  %v1143_v59 = vld [vmem:[#allocation10 + $0x2f8] sm:$0xff]  ;;  %v5492_v49 = vpack.c.bf16 %v1173_v48, %v1169_v47 }
 0x207   :  { %5523 = vmatpush1.bf16.msra.mxu1 %v5522_v56  ;;  %v1140_v56 = vld [vmem:[#allocation10 + $0x2e0] sm:$0xff]  ;;  %v5540_v62 = vpack.c.bf16 %v1143_v59, %v1139_v57  ;;  %v1345_v59 = vld [vmem:[#allocation8 + $0x8] sm:$0xff] }
 0x208   :  { %5525 = vmatprep.subr.bf16.mxu1 %v5524_v4  ;;  %v5478_v58 = vpack.c.bf16 %v1140_v56, %v1136_v55  ;;  %v1144_v4 = vld [vmem:[#allocation10 + $0x300] sm:$0xff]  ;;  %v1170_v55 = vld [vmem:[#allocation10 + $0x3d0] sm:$0xff] }
 0x209   :  { %5463 = vmatpush1.bf16.msra.mxu0 %v5462_v63  ;;  %v5542_v63 = vpack.c.bf16 %v1142_v61, %v1138_v60  ;;  %v1174_v56 = vld [vmem:[#allocation10 + $0x3f0] sm:$0xff]  ;;  %v1349_v60 = vld [vmem:[#allocation8 + $0x28] sm:$0xff] }
 0x20a   :  { %5465 = vmatprep.subr.bf16.mxu0 %v5464_v8  ;;  %v1151_v8 = vld [vmem:[#allocation10 + $0x338] sm:$0xff]  ;;  %v5560_v61 = vpack.c.bf16 %v1349_v60, %v1345_v59 }
 0x20b   :  { %5527 = vmatpush1.bf16.msra.mxu1 %v5526_v5  ;;  %v1148_v5 = vld [vmem:[#allocation10 + $0x320] sm:$0xff]  ;;  %v5544_v11 = vpack.c.bf16 %v1151_v8, %v1147_v6  ;;  %v7639_v8 = vrot.slane %v137_v2, %v126_v19 }
 0x20c   :  { %5529 = vmatprep.subr.bf16.mxu1 %v5528_v22  ;;  %v5482_v7 = vpack.c.bf16 %v1148_v5, %v1144_v4  ;;  %v1152_v22 = vld [vmem:[#allocation10 + $0x340] sm:$0xff]  ;;  %v7634_v4 = vrot.slane %v137_v2, %v122_v18  ;;  %v7645_v18 = vrot.slane %v137_v2, %v130_v26 }
 0x20d   :  { %5467 = vmatpush1.bf16.msra.mxu0 %v5466_v12  ;;  %v5546_v12 = vpack.c.bf16 %v1150_v10, %v1146_v9 }
 0x20e   :  { %5469 = vmatprep.subr.bf16.mxu0 %v5468_v28  ;;  %v1159_v28 = vld [vmem:[#allocation10 + $0x378] sm:$0xff] }
 0x20f   :  { %5531 = vmatpush1.bf16.msra.mxu1 %v5530_v24  ;;  %v1156_v24 = vld [vmem:[#allocation10 + $0x360] sm:$0xff]  ;;  %v5548_v31 = vpack.c.bf16 %v1159_v28, %v1155_v25 }
 0x210   :  { %5533 = vmatprep.subr.bf16.mxu1 %v5532_v37  ;;  %v5486_v27 = vpack.c.bf16 %v1156_v24, %v1152_v22  ;;  %v1160_v37 = vld [vmem:[#allocation10 + $0x380] sm:$0xff] }
 0x211   :  { %5471 = vmatpush1.bf16.msra.mxu0 %v5470_v32  ;;  %v5550_v32 = vpack.c.bf16 %v1158_v30, %v1154_v29 }
 0x212   :  { %5473 = vmatprep.subr.bf16.mxu0 %v5472_v41  ;;  %v1167_v41 = vld [vmem:[#allocation10 + $0x3b8] sm:$0xff] }
 0x213   :  { %5535 = vmatpush1.bf16.msra.mxu1 %v5534_v38  ;;  %v1164_v38 = vld [vmem:[#allocation10 + $0x3a0] sm:$0xff]  ;;  %v5552_v44 = vpack.c.bf16 %v1167_v41, %v1163_v39 }
 0x214   :  { %5537 = vmatprep.subr.bf16.mxu1 %v5536_v50  ;;  %v5490_v40 = vpack.c.bf16 %v1164_v38, %v1160_v37  ;;  %v1168_v50 = vld [vmem:[#allocation10 + $0x3c0] sm:$0xff] }
 0x215   :  { %5475 = vmatpush1.bf16.msra.mxu0 %v5474_v46  ;;  %v5554_v46 = vpack.c.bf16 %v1166_v43, %v1162_v42 }
 0x216   :  { %5477 = vmatprep.subr.bf16.mxu0 %v5476_v54  ;;  %v1175_v54 = vld [vmem:[#allocation10 + $0x3f8] sm:$0xff] }
 0x217   :  { %5539 = vmatpush1.bf16.msra.mxu1 %v5538_v51  ;;  %v1172_v51 = vld [vmem:[#allocation10 + $0x3e0] sm:$0xff]  ;;  %v5556_v57 = vpack.c.bf16 %v1175_v54, %v1171_v52 }
 0x218   :  { %5541 = vmatprep.subr.bf16.mxu1 %v5540_v62  ;;  %v5494_v53 = vpack.c.bf16 %v1172_v51, %v1168_v50  ;;  %v1347_v62 = vld [vmem:[#allocation8 + $0x18] sm:$0xff] }
 0x219   :  { %5479 = vmatpush1.bf16.msra.mxu0 %v5478_v58  ;;  %v5558_v58 = vpack.c.bf16 %v1174_v56, %v1170_v55 }
 0x21a   :  { %5481 = vmatprep.subr.bf16.mxu0 %v5480_v3  ;;  %v7630_v3 = vrot.slane %v137_v2, %v118_v16 }
 0x21b   :  { %5543 = vmatpush1.bf16.msra.mxu1 %v5542_v63  ;;  %v1351_v63 = vld [vmem:[#allocation8 + $0x38] sm:$0xff] }
 0x21c   :  { %5545 = vmatprep.subr.bf16.mxu1 %v5544_v11  ;;  %v5624_v1 = vpack.c.bf16 %v1351_v63, %v1347_v62  ;;  %v1348_v62 = vld [vmem:[#allocation8 + $0x20] sm:$0xff]  ;;  %v1353_v63 = vld [vmem:[#allocation8 + $0x48] sm:$0xff] }
 0x21d   :  { %5483 = vmatpush1.bf16.msra.mxu0 %v5482_v7 }
 0x21e   :  { %5485 = vmatprep.subr.bf16.mxu0 %v5484_v17 }
 0x21f   :  { %5547 = vmatpush1.bf16.msra.mxu1 %v5546_v12 }
 0x220   :  { %5549 = vmatprep.subr.bf16.mxu1 %v5548_v31 }
 0x221   :  { %5487 = vmatpush1.bf16.msra.mxu0 %v5486_v27 }
 0x222   :  { %5489 = vmatprep.subr.bf16.mxu0 %v5488_v36 }
 0x223   :  { %5551 = vmatpush1.bf16.msra.mxu1 %v5550_v32 }
 0x224   :  { %5553 = vmatprep.subr.bf16.mxu1 %v5552_v44 }
 0x225   :  { %5491 = vmatpush1.bf16.msra.mxu0 %v5490_v40 }
 0x226   :  { %5493 = vmatprep.subr.bf16.mxu0 %v5492_v49 }
 0x227   :  { %5555 = vmatpush1.bf16.msra.mxu1 %v5554_v46 }
 0x228   :  { %5557 = vmatprep.subr.bf16.mxu1 %v5556_v57 }
 0x229   :  { %5495 = vmatpush1.bf16.msra.mxu0 %v5494_v53 }
 0x22a   :  { %5561 = vmatprep.subr.bf16.mxu0 %v5560_v61  ;;  %v1344_v61 = vld [vmem:[#allocation8] sm:$0xff] }
 0x22b   :  { %5559 = vmatpush1.bf16.msra.mxu1 %v5558_v58 }
 0x22c   :  { %5625 = vmatprep.subr.bf16.mxu1 %v5624_v1  ;;  %v1357_v1 = vld [vmem:[#allocation8 + $0x68] sm:$0xff] }
 0x27f   :  { %v651_v5 = vpop.f32.mrb[2].mxu0  ;;  %v722_v6 = vpop.f32.mrb[2].mxu1 }
 0x280   :  { %v652_v7 = vadd.f32 %v651_v5, %v7630_v3  ;;  %v653_v9 = vpop.f32.mrb[3].mxu0  ;;  %v724_v10 = vpop.f32.mrb[3].mxu1  ;;  %v723_v16 = vadd.f32 %v722_v6, %v7639_v8  ;;  %v1346_v5 = vld [vmem:[#allocation8 + $0x10] sm:$0xff] }
 0x281   :  { %v654_v11 = vadd.f32 %v653_v9, %v7634_v4  ;;  %v725_v14 = vadd.f32 %v724_v10, %v7645_v18  ;;  %v1350_v6 = vld [vmem:[#allocation8 + $0x30] sm:$0xff]  ;;  %v5562_v9 = vpack.c.bf16 %v1348_v62, %v1344_v61  ;;  %v1355_v10 = vld [vmem:[#allocation8 + $0x58] sm:$0xff]  ;;  %v1389_v61 = vld [vmem:[#allocation8 + $0x168] sm:$0xff] }
 0x282   :  { %v727_v12 = vmul.f32 0.5, %v652_v7 }
 0x283   :  { %v731_v13 = vmul.f32 0.5, %v654_v11  ;;  %v736_v17 = vmul.f32 0.5, %v725_v14  ;;  %v1359_v11 = vld [vmem:[#allocation8 + $0x78] sm:$0xff]  ;;  %v5626_v14 = vpack.c.bf16 %v1350_v6, %v1346_v5 }
 0x284   :  { %7146 = vtanh.f32 %v727_v12  ;;  %v1387_v5 = vld [vmem:[#allocation8 + $0x158] sm:$0xff] }
 0x285   :  { %7148 = vtanh.f32 %v731_v13  ;;  %v5564_v13 = vpack.c.bf16 %v1357_v1, %v1353_v63  ;;  %v1378_v63 = vld [vmem:[#allocation8 + $0x110] sm:$0xff]  ;;  %v1391_v6 = vld [vmem:[#allocation8 + $0x178] sm:$0xff] }
 0x286   :  { %7150 = vtanh.f32 %v723_v16  ;;  %v1356_v16 = vld [vmem:[#allocation8 + $0x60] sm:$0xff]  ;;  %v1382_v1 = vld [vmem:[#allocation8 + $0x130] sm:$0xff] }
 0x287   :  { %7152 = vtanh.f32 %v736_v17  ;;  %v1361_v17 = vld [vmem:[#allocation8 + $0x88] sm:$0xff] }
 0x28e   :  { %v7147_v19 = vpop.eup %7146 }
 0x28f   :  { %v7149_v22 = vpop.eup %7148  ;;  %v729_v24 = vmul.f32 0.5, %v7147_v19  ;;  %v1365_v19 = vld [vmem:[#allocation8 + $0xa8] sm:$0xff] }
 0x290   :  { %v733_v25 = vmul.f32 0.5, %v7149_v22  ;;  %v7151_v28 = vpop.eup %7150  ;;  %v5628_v22 = vpack.c.bf16 %v1359_v11, %v1355_v10  ;;  %v1388_v10 = vld [vmem:[#allocation8 + $0x160] sm:$0xff]  ;;  %v5642_v11 = vpack.c.bf16 %v1382_v1, %v1378_v63 }
 0x291   :  { %v730_v27 = vadd.f32 0.5, %v729_v24  ;;  %v7153_v15 = vpop.eup %7152  ;;  %v1354_v24 = vld [vmem:[#allocation8 + $0x50] sm:$0xff]  ;;  %v1416_v1 = vld [vmem:[#allocation8 + $0x240] sm:$0xff] }
 0x292   :  { %v734_v29 = vadd.f32 0.5, %v733_v25  ;;  %v738_v26 = vmul.f32 0.5, %v7153_v15  ;;  %v1358_v25 = vld [vmem:[#allocation8 + $0x70] sm:$0xff]  ;;  %v1364_v15 = vld [vmem:[#allocation8 + $0xa0] sm:$0xff] }
 0x293   :  { %v743_v30 = vmul.f32 %v7151_v28, %v730_v27  ;;  %v1363_v28 = vld [vmem:[#allocation8 + $0x98] sm:$0xff] }
 0x294   :  { %v742_v31 = vmul.f32 0.0, %v734_v29  ;;  %v739_v34 = vadd.f32 0.5, %v738_v26  ;;  %v1367_v29 = vld [vmem:[#allocation8 + $0xb8] sm:$0xff]  ;;  %v5630_v26 = vpack.c.bf16 %v1358_v25, %v1354_v24  ;;  %v1392_v25 = vld [vmem:[#allocation8 + $0x180] sm:$0xff] }
 0x296   :  { %v7648_v32 = vadd.f32 %v743_v30, %v742_v31  ;;  %v5568_v30 = vpack.c.bf16 %v1365_v19, %v1361_v17  ;;  %v1360_v31 = vld [vmem:[#allocation8 + $0x80] sm:$0xff]  ;;  %v1395_v19 = vld [vmem:[#allocation8 + $0x198] sm:$0xff] }
 0x298   :  { %7154 = vtanh.f32 %v7648_v32 }
 0x2a2   :  { %v7155_v35 = vpop.eup %7154 }
 0x2a3   :  { %v746_v36 = vmul.f32 %v7155_v35, %v739_v34  ;;  %v1369_v34 = vld [vmem:[#allocation8 + $0xc8] sm:$0xff] }
 0x2a4   :  { %v1373_v35 = vld [vmem:[#allocation8 + $0xe8] sm:$0xff] }
 0x2a5   :  { %1240 = vmatprep.mubr.f32.mxu0 %v746_v36  ;;  %1311 = vmatprep.mubr.f32.mxu1 %v746_v36  ;;  %v5632_v36 = vpack.c.bf16 %v1367_v29, %v1363_v28  ;;  %v1401_v29 = vld [vmem:[#allocation8 + $0x1c8] sm:$0xff] }
 0x2bf   :  { %v948_v37 = vpop.f32.mrb[4].mxu0 }
 0x2c0   :  { %v949_v38 = vadd.f32 %v948_v37, %v7606_v20  ;;  %v950_v39 = vpop.f32.mrb[5].mxu0  ;;  %v1362_v37 = vld [vmem:[#allocation8 + $0x90] sm:$0xff] }
 0x2c1   :  { %v951_v40 = vadd.f32 %v950_v39, %v7610_v21  ;;  %v1019_v41 = vpop.f32.mrb[4].mxu1  ;;  %v5570_v39 = vpack.c.bf16 %v1364_v15, %v1360_v31  ;;  %v1394_v15 = vld [vmem:[#allocation8 + $0x190] sm:$0xff] }
 0x2c2   :  { %v1024_v42 = vmul.f32 0.5, %v949_v38  ;;  %v1020_v43 = vadd.f32 %v1019_v41, %v7614_v23  ;;  %v1021_v44 = vpop.f32.mrb[5].mxu1  ;;  %v1366_v38 = vld [vmem:[#allocation8 + $0xb0] sm:$0xff]  ;;  %v1375_v41 = vld [vmem:[#allocation8 + $0xf8] sm:$0xff] }
 0x2c3   :  { %v1028_v46 = vmul.f32 0.5, %v951_v40  ;;  %v1022_v47 = vadd.f32 %v1021_v44, %v7622_v33  ;;  %v1371_v40 = vld [vmem:[#allocation8 + $0xd8] sm:$0xff]  ;;  %v1372_v44 = vld [vmem:[#allocation8 + $0xe0] sm:$0xff] }
 0x2c4   :  { %7156 = vtanh.f32 %v1024_v42  ;;  %v5572_v42 = vpack.c.bf16 %v1373_v35, %v1369_v34  ;;  %v1403_v35 = vld [vmem:[#allocation8 + $0x1d8] sm:$0xff] }
 0x2c5   :  { %7158 = vtanh.f32 %v1028_v46  ;;  %v1033_v48 = vmul.f32 0.5, %v1022_v47  ;;  %v5634_v46 = vpack.c.bf16 %v1366_v38, %v1362_v37  ;;  %v1377_v47 = vld [vmem:[#allocation8 + $0x108] sm:$0xff]  ;;  %v1400_v38 = vld [vmem:[#allocation8 + $0x1c0] sm:$0xff] }
 0x2c6   :  { %7160 = vtanh.f32 %v1020_v43  ;;  %v1368_v43 = vld [vmem:[#allocation8 + $0xc0] sm:$0xff] }
 0x2c7   :  { %7162 = vtanh.f32 %v1033_v48  ;;  %v1381_v48 = vld [vmem:[#allocation8 + $0x128] sm:$0xff] }
 0x2ce   :  { %v7157_v49 = vpop.eup %7156 }
 0x2cf   :  { %v7159_v50 = vpop.eup %7158  ;;  %v1026_v51 = vmul.f32 0.5, %v7157_v49  ;;  %v5636_v49 = vpack.c.bf16 %v1375_v41, %v1371_v40  ;;  %v1409_v41 = vld [vmem:[#allocation8 + $0x208] sm:$0xff] }
 0x2d0   :  { %v7161_v52 = vpop.eup %7160  ;;  %v1030_v53 = vmul.f32 0.5, %v7159_v50  ;;  %v1370_v50 = vld [vmem:[#allocation8 + $0xd0] sm:$0xff] }
 0x2d1   :  { %v1027_v54 = vadd.f32 0.5, %v1026_v51  ;;  %v7163_v59 = vpop.eup %7162  ;;  %v1374_v51 = vld [vmem:[#allocation8 + $0xf0] sm:$0xff] }
 0x2d2   :  { %v1031_v55 = vadd.f32 0.5, %v1030_v53  ;;  %v1035_v60 = vmul.f32 0.5, %v7163_v59  ;;  %v1379_v53 = vld [vmem:[#allocation8 + $0x118] sm:$0xff]  ;;  %v5638_v59 = vpack.c.bf16 %v1374_v51, %v1370_v50  ;;  %v1408_v51 = vld [vmem:[#allocation8 + $0x200] sm:$0xff] }
 0x2d3   :  { %v1039_v56 = vmul.f32 %v7161_v52, %v1027_v54  ;;  %v5574_v52 = vpack.c.bf16 %v1372_v44, %v1368_v43  ;;  %v1383_v54 = vld [vmem:[#allocation8 + $0x138] sm:$0xff]  ;;  %v1402_v44 = vld [vmem:[#allocation8 + $0x1d0] sm:$0xff] }
 0x2d4   :  { %v1038_v57 = vmul.f32 %v1031_v55, %v7625_v45  ;;  %v1036_v2 = vadd.f32 0.5, %v1035_v60  ;;  %v1352_v45 = vld [vmem:[#allocation8 + $0x40] sm:$0xff]  ;;  %v5576_v55 = vpack.c.bf16 %v1381_v48, %v1377_v47  ;;  %v1385_v60 = vld [vmem:[#allocation8 + $0x148] sm:$0xff]  ;;  %v5640_v62 = vpack.c.bf16 %v1383_v54, %v1379_v53  ;;  %v1411_v48 = vld [vmem:[#allocation8 + $0x218] sm:$0xff] }
 0x2d5   :  { %v5566_v27 = vpack.c.bf16 %v1356_v16, %v1352_v45  ;;  %v5644_v45 = vpack.c.bf16 %v1391_v6, %v1387_v5  ;;  %v1386_v16 = vld [vmem:[#allocation8 + $0x150] sm:$0xff]  ;;  %v1417_v54 = vld [vmem:[#allocation8 + $0x248] sm:$0xff] }
 0x2d6   :  { %v7656_v58 = vadd.f32 %v1039_v56, %v1038_v57  ;;  %v1376_v56 = vld [vmem:[#allocation8 + $0x100] sm:$0xff]  ;;  %v1425_v6 = vld [vmem:[#allocation8 + $0x288] sm:$0xff] }
 0x2d7   :  { %v1380_v57 = vld [vmem:[#allocation8 + $0x120] sm:$0xff] }
 0x2d8   :  { %7164 = vtanh.f32 %v7656_v58 }
 0x2e2   :  { %v7165_v7 = vpop.eup %7164 }
 0x2e3   :  { %v1042_v12 = vmul.f32 %v7165_v7, %v1036_v2  ;;  %v5578_v2 = vpack.c.bf16 %v1380_v57, %v1376_v56  ;;  %v5580_v7 = vpack.c.bf16 %v1389_v61, %v1385_v60  ;;  %v1410_v57 = vld [vmem:[#allocation8 + $0x210] sm:$0xff]  ;;  %v1419_v61 = vld [vmem:[#allocation8 + $0x258] sm:$0xff] }
 0x2e5   :  { %1241 = vmatmul.mubr.f32.vlgmr.msra.gmra.mrb[6].mxu0 %v1042_v12  ;;  %1312 = vmatmul.mubr.f32.vlgmr.msra.gmra.mrb[6].mxu1 %v1042_v12 }
 0x2e6   :  { %5563 = vmatpush1.bf16.msra.mxu0 %v5562_v9  ;;  %1536 = vmatprep.mubr.f32.mxu0 %v1042_v12  ;;  %v1384_v9 = vld [vmem:[#allocation8 + $0x140] sm:$0xff] }
 0x2e7   :  { %1607 = vmatprep.mubr.f32.mxu1 %v1042_v12  ;;  %5565 = vmatprep.subr.bf16.mxu0 %v5564_v13  ;;  %v1393_v12 = vld [vmem:[#allocation8 + $0x188] sm:$0xff]  ;;  %v5582_v17 = vpack.c.bf16 %v1388_v10, %v1384_v9  ;;  %v1418_v10 = vld [vmem:[#allocation8 + $0x250] sm:$0xff] }
 0x2e8   :  { %5627 = vmatpush1.bf16.msra.mxu1 %v5626_v14  ;;  %v1397_v13 = vld [vmem:[#allocation8 + $0x1a8] sm:$0xff]  ;;  %v1390_v14 = vld [vmem:[#allocation8 + $0x170] sm:$0xff] }
 0x2e9   :  { %5629 = vmatprep.subr.bf16.mxu1 %v5628_v22  ;;  %v1399_v22 = vld [vmem:[#allocation8 + $0x1b8] sm:$0xff]  ;;  %v5584_v24 = vpack.c.bf16 %v1397_v13, %v1393_v12  ;;  %v5646_v28 = vpack.c.bf16 %v1390_v14, %v1386_v16  ;;  %v1424_v14 = vld [vmem:[#allocation8 + $0x280] sm:$0xff] }
 0x2ea   :  { %5567 = vmatpush1.bf16.msra.mxu0 %v5566_v27  ;;  %v1396_v27 = vld [vmem:[#allocation8 + $0x1a0] sm:$0xff]  ;;  %v5648_v31 = vpack.c.bf16 %v1399_v22, %v1395_v19  ;;  %v1427_v13 = vld [vmem:[#allocation8 + $0x298] sm:$0xff]  ;;  %v1433_v22 = vld [vmem:[#allocation8 + $0x2c8] sm:$0xff] }
 0x2eb   :  { %5569 = vmatprep.subr.bf16.mxu0 %v5568_v30  ;;  %v1405_v30 = vld [vmem:[#allocation8 + $0x1e8] sm:$0xff]  ;;  %v5586_v34 = vpack.c.bf16 %v1396_v27, %v1392_v25  ;;  %v1426_v27 = vld [vmem:[#allocation8 + $0x290] sm:$0xff] }
 0x2ec   :  { %5631 = vmatpush1.bf16.msra.mxu1 %v5630_v26  ;;  %v1398_v26 = vld [vmem:[#allocation8 + $0x1b0] sm:$0xff]  ;;  %v5588_v37 = vpack.c.bf16 %v1405_v30, %v1401_v29  ;;  %v1435_v30 = vld [vmem:[#allocation8 + $0x2d8] sm:$0xff] }
 0x2ed   :  { %5633 = vmatprep.subr.bf16.mxu1 %v5632_v36  ;;  %v1407_v36 = vld [vmem:[#allocation8 + $0x1f8] sm:$0xff]  ;;  %v5650_v40 = vpack.c.bf16 %v1398_v26, %v1394_v15  ;;  %v1432_v26 = vld [vmem:[#allocation8 + $0x2c0] sm:$0xff] }
 0x2ee   :  { %5571 = vmatpush1.bf16.msra.mxu0 %v5570_v39  ;;  %v1404_v39 = vld [vmem:[#allocation8 + $0x1e0] sm:$0xff]  ;;  %v5652_v43 = vpack.c.bf16 %v1407_v36, %v1403_v35  ;;  %v1441_v36 = vld [vmem:[#allocation8 + $0x308] sm:$0xff] }
 0x2ef   :  { %5573 = vmatprep.subr.bf16.mxu0 %v5572_v42  ;;  %v1413_v42 = vld [vmem:[#allocation8 + $0x228] sm:$0xff]  ;;  %v5590_v47 = vpack.c.bf16 %v1404_v39, %v1400_v38  ;;  %v1434_v39 = vld [vmem:[#allocation8 + $0x2d0] sm:$0xff] }
 0x2f0   :  { %5635 = vmatpush1.bf16.msra.mxu1 %v5634_v46  ;;  %v1406_v46 = vld [vmem:[#allocation8 + $0x1f0] sm:$0xff]  ;;  %v5592_v50 = vpack.c.bf16 %v1413_v42, %v1409_v41  ;;  %v1443_v42 = vld [vmem:[#allocation8 + $0x318] sm:$0xff] }
 0x2f1   :  { %5637 = vmatprep.subr.bf16.mxu1 %v5636_v49  ;;  %v1415_v49 = vld [vmem:[#allocation8 + $0x238] sm:$0xff]  ;;  %v5654_v53 = vpack.c.bf16 %v1406_v46, %v1402_v44  ;;  %v1440_v46 = vld [vmem:[#allocation8 + $0x300] sm:$0xff] }
 0x2f2   :  { %5575 = vmatpush1.bf16.msra.mxu0 %v5574_v52  ;;  %v1412_v52 = vld [vmem:[#allocation8 + $0x220] sm:$0xff]  ;;  %v5656_v56 = vpack.c.bf16 %v1415_v49, %v1411_v48  ;;  %v1449_v49 = vld [vmem:[#allocation8 + $0x348] sm:$0xff] }
 0x2f3   :  { %5577 = vmatprep.subr.bf16.mxu0 %v5576_v55  ;;  %v1421_v55 = vld [vmem:[#allocation8 + $0x268] sm:$0xff]  ;;  %v5594_v60 = vpack.c.bf16 %v1412_v52, %v1408_v51  ;;  %v1442_v52 = vld [vmem:[#allocation8 + $0x310] sm:$0xff] }
 0x2f4   :  { %5639 = vmatpush1.bf16.msra.mxu1 %v5638_v59  ;;  %v1414_v59 = vld [vmem:[#allocation8 + $0x230] sm:$0xff]  ;;  %v5596_v63 = vpack.c.bf16 %v1421_v55, %v1417_v54  ;;  %v1451_v55 = vld [vmem:[#allocation8 + $0x358] sm:$0xff] }
 0x2f5   :  { %5641 = vmatprep.subr.bf16.mxu1 %v5640_v62  ;;  %v1423_v62 = vld [vmem:[#allocation8 + $0x278] sm:$0xff]  ;;  %v5658_v5 = vpack.c.bf16 %v1414_v59, %v1410_v57  ;;  %v1448_v59 = vld [vmem:[#allocation8 + $0x340] sm:$0xff] }
 0x2f6   :  { %5579 = vmatpush1.bf16.msra.mxu0 %v5578_v2  ;;  %v1420_v2 = vld [vmem:[#allocation8 + $0x260] sm:$0xff]  ;;  %v5660_v9 = vpack.c.bf16 %v1423_v62, %v1419_v61  ;;  %v1457_v62 = vld [vmem:[#allocation8 + $0x388] sm:$0xff] }
 0x2f7   :  { %5581 = vmatprep.subr.bf16.mxu0 %v5580_v7  ;;  %v1429_v7 = vld [vmem:[#allocation8 + $0x2a8] sm:$0xff]  ;;  %v5598_v12 = vpack.c.bf16 %v1420_v2, %v1416_v1  ;;  %v1450_v2 = vld [vmem:[#allocation8 + $0x350] sm:$0xff] }
 0x2f8   :  { %5643 = vmatpush1.bf16.msra.mxu1 %v5642_v11  ;;  %v1422_v11 = vld [vmem:[#allocation8 + $0x270] sm:$0xff]  ;;  %v5600_v16 = vpack.c.bf16 %v1429_v7, %v1425_v6  ;;  %v1459_v7 = vld [vmem:[#allocation8 + $0x398] sm:$0xff] }
 0x2f9   :  { %5645 = vmatprep.subr.bf16.mxu1 %v5644_v45  ;;  %v1431_v45 = vld [vmem:[#allocation8 + $0x2b8] sm:$0xff]  ;;  %v5662_v19 = vpack.c.bf16 %v1422_v11, %v1418_v10  ;;  %v1456_v11 = vld [vmem:[#allocation8 + $0x380] sm:$0xff] }
 0x2fa   :  { %5583 = vmatpush1.bf16.msra.mxu0 %v5582_v17  ;;  %v1428_v17 = vld [vmem:[#allocation8 + $0x2a0] sm:$0xff]  ;;  %v5664_v25 = vpack.c.bf16 %v1431_v45, %v1427_v13  ;;  %v1465_v45 = vld [vmem:[#allocation8 + $0x3c8] sm:$0xff] }
 0x2fb   :  { %5585 = vmatprep.subr.bf16.mxu0 %v5584_v24  ;;  %v1437_v24 = vld [vmem:[#allocation8 + $0x2e8] sm:$0xff]  ;;  %v5602_v29 = vpack.c.bf16 %v1428_v17, %v1424_v14  ;;  %v1458_v17 = vld [vmem:[#allocation8 + $0x390] sm:$0xff] }
 0x2fc   :  { %5647 = vmatpush1.bf16.msra.mxu1 %v5646_v28  ;;  %v1430_v28 = vld [vmem:[#allocation8 + $0x2b0] sm:$0xff]  ;;  %v5604_v15 = vpack.c.bf16 %v1437_v24, %v1433_v22  ;;  %v1467_v24 = vld [vmem:[#allocation8 + $0x3d8] sm:$0xff] }
 0x2fd   :  { %5649 = vmatprep.subr.bf16.mxu1 %v5648_v31  ;;  %v1439_v31 = vld [vmem:[#allocation8 + $0x2f8] sm:$0xff]  ;;  %v5666_v35 = vpack.c.bf16 %v1430_v28, %v1426_v27  ;;  %v1464_v28 = vld [vmem:[#allocation8 + $0x3c0] sm:$0xff] }
 0x2fe   :  { %5587 = vmatpush1.bf16.msra.mxu0 %v5586_v34  ;;  %v1436_v34 = vld [vmem:[#allocation8 + $0x2e0] sm:$0xff]  ;;  %v5668_v38 = vpack.c.bf16 %v1439_v31, %v1435_v30 }
 0x2ff   :  { %5589 = vmatprep.subr.bf16.mxu0 %v5588_v37  ;;  %v1445_v37 = vld [vmem:[#allocation8 + $0x328] sm:$0xff]  ;;  %v5606_v41 = vpack.c.bf16 %v1436_v34, %v1432_v26  ;;  %v1470_v26 = vld [vmem:[#allocation8 + $0x3f0] sm:$0xff] }
 0x300   :  { %5651 = vmatpush1.bf16.msra.mxu1 %v5650_v40  ;;  %v1438_v40 = vld [vmem:[#allocation8 + $0x2f0] sm:$0xff]  ;;  %v5608_v44 = vpack.c.bf16 %v1445_v37, %v1441_v36  ;;  %v1639_v37 = vld [vmem:[#allocation10 + $0x8] sm:$0xff] }
 0x301   :  { %5653 = vmatprep.subr.bf16.mxu1 %v5652_v43  ;;  %v1447_v43 = vld [vmem:[#allocation8 + $0x338] sm:$0xff]  ;;  %v5670_v48 = vpack.c.bf16 %v1438_v40, %v1434_v39  ;;  %v1340_v36 = vld [vmem:[#allocation5 + $0x10] sm:$0xff]  ;;  %v1638_v39 = vld [vmem:[#allocation10] sm:$0xff] }
 0x302   :  { %5591 = vmatpush1.bf16.msra.mxu0 %v5590_v47  ;;  %v1444_v47 = vld [vmem:[#allocation8 + $0x320] sm:$0xff]  ;;  %v5672_v51 = vpack.c.bf16 %v1447_v43, %v1443_v42  ;;  %v1641_v42 = vld [vmem:[#allocation10 + $0x18] sm:$0xff] }
 0x303   :  { %5593 = vmatprep.subr.bf16.mxu0 %v5592_v50  ;;  %v1453_v50 = vld [vmem:[#allocation8 + $0x368] sm:$0xff]  ;;  %v5610_v54 = vpack.c.bf16 %v1444_v47, %v1440_v46  ;;  %v1645_v43 = vld [vmem:[#allocation10 + $0x38] sm:$0xff]  ;;  %v1640_v47 = vld [vmem:[#allocation10 + $0x10] sm:$0xff] }
 0x304   :  { %5655 = vmatpush1.bf16.msra.mxu1 %v5654_v53  ;;  %v1446_v53 = vld [vmem:[#allocation8 + $0x330] sm:$0xff]  ;;  %v5612_v57 = vpack.c.bf16 %v1453_v50, %v1449_v49  ;;  %v5752_v46 = vpack.c.bf16 %v1645_v43, %v1641_v42  ;;  %v1647_v50 = vld [vmem:[#allocation10 + $0x48] sm:$0xff] }
 0x305   :  { %5657 = vmatprep.subr.bf16.mxu1 %v5656_v56  ;;  %v1455_v56 = vld [vmem:[#allocation8 + $0x378] sm:$0xff]  ;;  %v5674_v61 = vpack.c.bf16 %v1446_v53, %v1442_v52  ;;  %v1646_v52 = vld [vmem:[#allocation10 + $0x40] sm:$0xff]  ;;  %v1679_v42 = vld [vmem:[#allocation10 + $0x148] sm:$0xff] }
 0x306   :  { %5595 = vmatpush1.bf16.msra.mxu0 %v5594_v60  ;;  %v1452_v60 = vld [vmem:[#allocation8 + $0x360] sm:$0xff]  ;;  %v5676_v1 = vpack.c.bf16 %v1455_v56, %v1451_v55  ;;  %v1649_v55 = vld [vmem:[#allocation10 + $0x58] sm:$0xff]  ;;  %v1683_v43 = vld [vmem:[#allocation10 + $0x168] sm:$0xff] }
 0x307   :  { %5597 = vmatprep.subr.bf16.mxu0 %v5596_v63  ;;  %v1461_v63 = vld [vmem:[#allocation8 + $0x3a8] sm:$0xff]  ;;  %v5614_v6 = vpack.c.bf16 %v1452_v60, %v1448_v59  ;;  %v1653_v56 = vld [vmem:[#allocation10 + $0x78] sm:$0xff]  ;;  %v1648_v60 = vld [vmem:[#allocation10 + $0x50] sm:$0xff] }
 0x308   :  { %5659 = vmatpush1.bf16.msra.mxu1 %v5658_v5  ;;  %v1454_v5 = vld [vmem:[#allocation8 + $0x370] sm:$0xff]  ;;  %v5616_v10 = vpack.c.bf16 %v1461_v63, %v1457_v62  ;;  %v5756_v59 = vpack.c.bf16 %v1653_v56, %v1649_v55  ;;  %v1655_v62 = vld [vmem:[#allocation10 + $0x88] sm:$0xff] }
 0x309   :  { %5661 = vmatprep.subr.bf16.mxu1 %v5660_v9  ;;  %v1463_v9 = vld [vmem:[#allocation8 + $0x3b8] sm:$0xff]  ;;  %v5678_v13 = vpack.c.bf16 %v1454_v5, %v1450_v2  ;;  %v1654_v2 = vld [vmem:[#allocation10 + $0x80] sm:$0xff]  ;;  %v1687_v55 = vld [vmem:[#allocation10 + $0x188] sm:$0xff] }
 0x30a   :  { %5599 = vmatpush1.bf16.msra.mxu0 %v5598_v12  ;;  %v1460_v12 = vld [vmem:[#allocation8 + $0x3a0] sm:$0xff]  ;;  %v5680_v14 = vpack.c.bf16 %v1463_v9, %v1459_v7  ;;  %v1657_v9 = vld [vmem:[#allocation10 + $0x98] sm:$0xff]  ;;  %v1691_v56 = vld [vmem:[#allocation10 + $0x1a8] sm:$0xff] }
 0x30b   :  { %5601 = vmatprep.subr.bf16.mxu0 %v5600_v16  ;;  %v1469_v16 = vld [vmem:[#allocation8 + $0x3e8] sm:$0xff]  ;;  %v5618_v22 = vpack.c.bf16 %v1460_v12, %v1456_v11  ;;  %v1658_v5 = vld [vmem:[#allocation10 + $0xa0] sm:$0xff]  ;;  %v1656_v11 = vld [vmem:[#allocation10 + $0x90] sm:$0xff] }
 0x30c   :  { %5663 = vmatpush1.bf16.msra.mxu1 %v5662_v19  ;;  %v1462_v19 = vld [vmem:[#allocation8 + $0x3b0] sm:$0xff]  ;;  %v5620_v27 = vpack.c.bf16 %v1469_v16, %v1465_v45  ;;  %v5698_v7 = vpack.c.bf16 %v1658_v5, %v1654_v2  ;;  %v1663_v45 = vld [vmem:[#allocation10 + $0xc8] sm:$0xff] }
 0x30d   :  { %5665 = vmatprep.subr.bf16.mxu1 %v5664_v25  ;;  %v1471_v25 = vld [vmem:[#allocation8 + $0x3f8] sm:$0xff]  ;;  %v5682_v30 = vpack.c.bf16 %v1462_v19, %v1458_v17  ;;  %v1667_v16 = vld [vmem:[#allocation10 + $0xe8] sm:$0xff]  ;;  %v1662_v19 = vld [vmem:[#allocation10 + $0xc0] sm:$0xff] }
 0x30e   :  { %5603 = vmatpush1.bf16.msra.mxu0 %v5602_v29  ;;  %v1468_v29 = vld [vmem:[#allocation8 + $0x3e0] sm:$0xff]  ;;  %v5684_v31 = vpack.c.bf16 %v1471_v25, %v1467_v24  ;;  %v5700_v17 = vpack.c.bf16 %v1667_v16, %v1663_v45  ;;  %v1665_v24 = vld [vmem:[#allocation10 + $0xd8] sm:$0xff]  ;;  %v1688_v5 = vld [vmem:[#allocation10 + $0x190] sm:$0xff] }
 0x30f   :  { %5605 = vmatprep.subr.bf16.mxu0 %v5604_v15  ;;  %v1466_v15 = vld [vmem:[#allocation8 + $0x3d0] sm:$0xff]  ;;  %v5622_v34 = vpack.c.bf16 %v1468_v29, %v1464_v28  ;;  %v1669_v25 = vld [vmem:[#allocation10 + $0xf8] sm:$0xff]  ;;  %v1698_v45 = vld [vmem:[#allocation10 + $0x1e0] sm:$0xff] }
 0x310   :  { %5667 = vmatpush1.bf16.msra.mxu1 %v5666_v35  ;;  %v5686_v35 = vpack.c.bf16 %v1470_v26, %v1466_v15  ;;  %v1668_v28 = vld [vmem:[#allocation10 + $0xf0] sm:$0xff]  ;;  %v1675_v15 = vld [vmem:[#allocation10 + $0x128] sm:$0xff]  ;;  %v1670_v26 = vld [vmem:[#allocation10 + $0x100] sm:$0xff] }
 0x311   :  { %5669 = vmatprep.subr.bf16.mxu1 %v5668_v38  ;;  %v1643_v38 = vld [vmem:[#allocation10 + $0x28] sm:$0xff]  ;;  %v1697_v16 = vld [vmem:[#allocation10 + $0x1d8] sm:$0xff] }
 0x312   :  { %5607 = vmatpush1.bf16.msra.mxu0 %v5606_v41  ;;  %v5688_v40 = vpack.c.bf16 %v1643_v38, %v1639_v37  ;;  %v1642_v41 = vld [vmem:[#allocation10 + $0x20] sm:$0xff]  ;;  %v1673_v37 = vld [vmem:[#allocation10 + $0x118] sm:$0xff] }
 0x313   :  { %5609 = vmatprep.subr.bf16.mxu0 %v5608_v44  ;;  %v5690_v44 = vpack.c.bf16 %v1642_v41, %v1638_v39  ;;  %v1677_v38 = vld [vmem:[#allocation10 + $0x138] sm:$0xff]  ;;  %v1676_v41 = vld [vmem:[#allocation10 + $0x130] sm:$0xff] }
 0x314   :  { %5671 = vmatpush1.bf16.msra.mxu1 %v5670_v48  ;;  %v1644_v48 = vld [vmem:[#allocation10 + $0x30] sm:$0xff]  ;;  %v5768_v39 = vpack.c.bf16 %v1677_v38, %v1673_v37 }
 0x315   :  { %5673 = vmatprep.subr.bf16.mxu1 %v5672_v51  ;;  %v5754_v49 = vpack.c.bf16 %v1644_v48, %v1640_v47  ;;  %v1651_v51 = vld [vmem:[#allocation10 + $0x68] sm:$0xff]  ;;  %v1685_v47 = vld [vmem:[#allocation10 + $0x178] sm:$0xff] }
 0x316   :  { %5611 = vmatpush1.bf16.msra.mxu0 %v5610_v54  ;;  %v5692_v53 = vpack.c.bf16 %v1651_v51, %v1647_v50  ;;  %v1650_v54 = vld [vmem:[#allocation10 + $0x60] sm:$0xff] }
 0x317   :  { %5613 = vmatprep.subr.bf16.mxu0 %v5612_v57  ;;  %v5694_v57 = vpack.c.bf16 %v1650_v54, %v1646_v52  ;;  %v1678_v50 = vld [vmem:[#allocation10 + $0x140] sm:$0xff]  ;;  %v1680_v52 = vld [vmem:[#allocation10 + $0x150] sm:$0xff] }
 0x318   :  { %5675 = vmatpush1.bf16.msra.mxu1 %v5674_v61  ;;  %v1652_v61 = vld [vmem:[#allocation10 + $0x70] sm:$0xff]  ;;  %v1682_v51 = vld [vmem:[#allocation10 + $0x160] sm:$0xff] }
 0x319   :  { %5677 = vmatprep.subr.bf16.mxu1 %v5676_v1  ;;  %v5758_v63 = vpack.c.bf16 %v1652_v61, %v1648_v60  ;;  %v1659_v1 = vld [vmem:[#allocation10 + $0xa8] sm:$0xff]  ;;  %v1684_v54 = vld [vmem:[#allocation10 + $0x170] sm:$0xff]  ;;  %v5710_v60 = vpack.c.bf16 %v1682_v51, %v1678_v50 }
 0x31a   :  { %5615 = vmatpush1.bf16.msra.mxu0 %v5614_v6  ;;  %v5696_v6 = vpack.c.bf16 %v1659_v1, %v1655_v62  ;;  %v5774_v61 = vpack.c.bf16 %v1684_v54, %v1680_v52  ;;  %v5712_v62 = vpack.c.bf16 %v1691_v56, %v1687_v55  ;;  %v1690_v1 = vld [vmem:[#allocation10 + $0x1a0] sm:$0xff]  ;;  %v1719_v52 = vld [vmem:[#allocation10 + $0x288] sm:$0xff] }
 0x31b   :  { %5617 = vmatprep.subr.bf16.mxu0 %v5616_v10  ;;  %v1661_v10 = vld [vmem:[#allocation10 + $0xb8] sm:$0xff]  ;;  %v1718_v55 = vld [vmem:[#allocation10 + $0x280] sm:$0xff] }
 0x31c   :  { %5679 = vmatpush1.bf16.msra.mxu1 %v5678_v13  ;;  %v5760_v12 = vpack.c.bf16 %v1661_v10, %v1657_v9  ;;  %v1660_v13 = vld [vmem:[#allocation10 + $0xb0] sm:$0xff]  ;;  %v1695_v10 = vld [vmem:[#allocation10 + $0x1c8] sm:$0xff]  ;;  %v1722_v56 = vld [vmem:[#allocation10 + $0x2a0] sm:$0xff] }
 0x31d   :  { %5681 = vmatprep.subr.bf16.mxu1 %v5680_v14  ;;  %v5762_v14 = vpack.c.bf16 %v1660_v13, %v1656_v11  ;;  %v1699_v11 = vld [vmem:[#allocation10 + $0x1e8] sm:$0xff]  ;;  %v1694_v13 = vld [vmem:[#allocation10 + $0x1c0] sm:$0xff] }
 0x31e   :  { %5619 = vmatpush1.bf16.msra.mxu0 %v5618_v22  ;;  %v1666_v22 = vld [vmem:[#allocation10 + $0xe0] sm:$0xff] }
 0x31f   :  { %5621 = vmatprep.subr.bf16.mxu0 %v5620_v27  ;;  %v1664_v27 = vld [vmem:[#allocation10 + $0xd0] sm:$0xff]  ;;  %v5702_v29 = vpack.c.bf16 %v1666_v22, %v1662_v19 }
 0x320   :  { %5683 = vmatpush1.bf16.msra.mxu1 %v5682_v30  ;;  %v5764_v30 = vpack.c.bf16 %v1669_v25, %v1665_v24  ;;  %v1696_v19 = vld [vmem:[#allocation10 + $0x1d0] sm:$0xff] }
 0x321   :  { %5685 = vmatprep.subr.bf16.mxu1 %v5684_v31  ;;  %v1671_v31 = vld [vmem:[#allocation10 + $0x108] sm:$0xff]  ;;  %v1700_v22 = vld [vmem:[#allocation10 + $0x1f0] sm:$0xff] }
 0x322   :  { %5623 = vmatpush1.bf16.msra.mxu0 %v5622_v34  ;;  %v5766_v34 = vpack.c.bf16 %v1668_v28, %v1664_v27  ;;  %v5782_v25 = vpack.c.bf16 %v1700_v22, %v1696_v19  ;;  %v1703_v27 = vld [vmem:[#allocation10 + $0x208] sm:$0xff] }
 0x323   :  { %5689 = vmatprep.subr.bf16.mxu0 %v5688_v40  ;;  %v1672_v40 = vld [vmem:[#allocation10 + $0x110] sm:$0xff]  ;;  %v1707_v28 = vld [vmem:[#allocation10 + $0x228] sm:$0xff] }
 0x324   :  { %5687 = vmatpush1.bf16.msra.mxu1 %v5686_v35  ;;  %v5704_v35 = vpack.c.bf16 %v1675_v15, %v1671_v31  ;;  %v5770_v48 = vpack.c.bf16 %v1676_v41, %v1672_v40  ;;  %v1706_v31 = vld [vmem:[#allocation10 + $0x220] sm:$0xff]  ;;  %v1705_v15 = vld [vmem:[#allocation10 + $0x218] sm:$0xff]  ;;  %v1715_v40 = vld [vmem:[#allocation10 + $0x268] sm:$0xff] }
 0x325   :  { %1537 = vmatmul.mubr.f32.vlgmr.msra.gmra.mrb[8].mxu0 %v1340_v36  ;;  %5753 = vmatprep.subr.bf16.mxu1 %v5752_v46  ;;  %v1681_v46 = vld [vmem:[#allocation10 + $0x158] sm:$0xff]  ;;  %v1739_v19 = vld [vmem:[#allocation10 + $0x328] sm:$0xff] }
 0x326   :  { %5691 = vmatpush1.bf16.msra.mxu0 %v5690_v44 }
 0x327   :  { %1608 = vmatmul.mubr.f32.vlgmr.msra.gmra.mrb[8].mxu1 %v1340_v36  ;;  %5693 = vmatprep.subr.bf16.mxu0 %v5692_v53  ;;  %v1674_v36 = vld [vmem:[#allocation10 + $0x120] sm:$0xff]  ;;  %v5772_v53 = vpack.c.bf16 %v1685_v47, %v1681_v46  ;;  %v1717_v47 = vld [vmem:[#allocation10 + $0x278] sm:$0xff] }
 0x328   :  { %5755 = vmatpush1.bf16.msra.mxu1 %v5754_v49  ;;  %v5706_v44 = vpack.c.bf16 %v1674_v36, %v1670_v26  ;;  %v5708_v49 = vpack.c.bf16 %v1683_v43, %v1679_v42  ;;  %v1708_v36 = vld [vmem:[#allocation10 + $0x230] sm:$0xff]  ;;  %v1710_v42 = vld [vmem:[#allocation10 + $0x240] sm:$0xff] }
 0x329   :  { %5757 = vmatprep.subr.bf16.mxu1 %v5756_v59  ;;  %v1693_v59 = vld [vmem:[#allocation10 + $0x1b8] sm:$0xff]  ;;  %v1714_v43 = vld [vmem:[#allocation10 + $0x260] sm:$0xff] }
 0x32a   :  { %5695 = vmatpush1.bf16.msra.mxu0 %v5694_v57  ;;  %v1689_v57 = vld [vmem:[#allocation10 + $0x198] sm:$0xff]  ;;  %v5726_v46 = vpack.c.bf16 %v1714_v43, %v1710_v42  ;;  %v1744_v42 = vld [vmem:[#allocation10 + $0x350] sm:$0xff] }
 0x32b   :  { %5697 = vmatprep.subr.bf16.mxu0 %v5696_v6  ;;  %v5776_v2 = vpack.c.bf16 %v1693_v59, %v1689_v57  ;;  %v1692_v6 = vld [vmem:[#allocation10 + $0x1b0] sm:$0xff]  ;;  %v1721_v57 = vld [vmem:[#allocation10 + $0x298] sm:$0xff]  ;;  %v5730_v59 = vpack.c.bf16 %v1722_v56, %v1718_v55 }
 0x32c   :  { %5759 = vmatpush1.bf16.msra.mxu1 %v5758_v63  ;;  %v1686_v63 = vld [vmem:[#allocation10 + $0x180] sm:$0xff]  ;;  %v5778_v9 = vpack.c.bf16 %v1692_v6, %v1688_v5  ;;  %v1731_v5 = vld [vmem:[#allocation10 + $0x2e8] sm:$0xff]  ;;  %v1748_v43 = vld [vmem:[#allocation10 + $0x370] sm:$0xff] }
 0x32d   :  { %5761 = vmatprep.subr.bf16.mxu1 %v5760_v12  ;;  %v5716_v12 = vpack.c.bf16 %v1699_v11, %v1695_v10  ;;  %v1729_v10 = vld [vmem:[#allocation10 + $0x2d8] sm:$0xff]  ;;  %v1752_v55 = vld [vmem:[#allocation10 + $0x390] sm:$0xff] }
 0x32e   :  { %5699 = vmatpush1.bf16.msra.mxu0 %v5698_v7  ;;  %v5714_v7 = vpack.c.bf16 %v1690_v1, %v1686_v63  ;;  %v1756_v56 = vld [vmem:[#allocation10 + $0x3b0] sm:$0xff] }
 0x32f   :  { %5701 = vmatprep.subr.bf16.mxu0 %v5700_v17  ;;  %v1701_v17 = vld [vmem:[#allocation10 + $0x1f8] sm:$0xff] }
 0x330   :  { %5763 = vmatpush1.bf16.msra.mxu1 %v5762_v14  ;;  %v5718_v14 = vpack.c.bf16 %v1698_v45, %v1694_v13  ;;  %v5780_v24 = vpack.c.bf16 %v1701_v17, %v1697_v16  ;;  %v1728_v13 = vld [vmem:[#allocation10 + $0x2d0] sm:$0xff]  ;;  %v1735_v17 = vld [vmem:[#allocation10 + $0x308] sm:$0xff] }
 0x331   :  { %5765 = vmatprep.subr.bf16.mxu1 %v5764_v30  ;;  %v1702_v30 = vld [vmem:[#allocation10 + $0x200] sm:$0xff]  ;;  %v1732_v45 = vld [vmem:[#allocation10 + $0x2f0] sm:$0xff]  ;;  %v5736_v22 = vpack.c.bf16 %v1739_v19, %v1735_v17 }
 0x332   :  { %5703 = vmatpush1.bf16.msra.mxu0 %v5702_v29  ;;  %v5720_v29 = vpack.c.bf16 %v1707_v28, %v1703_v27  ;;  %v5722_v26 = vpack.c.bf16 %v1706_v31, %v1702_v30  ;;  %v1737_v27 = vld [vmem:[#allocation10 + $0x318] sm:$0xff]  ;;  %v1736_v30 = vld [vmem:[#allocation10 + $0x310] sm:$0xff] }
 0x333   :  { %5705 = vmatprep.subr.bf16.mxu0 %v5704_v35  ;;  %v1704_v35 = vld [vmem:[#allocation10 + $0x210] sm:$0xff] }
 0x334   :  { %5767 = vmatpush1.bf16.msra.mxu1 %v5766_v34  ;;  %v1709_v34 = vld [vmem:[#allocation10 + $0x238] sm:$0xff]  ;;  %v5786_v38 = vpack.c.bf16 %v1708_v36, %v1704_v35  ;;  %v1740_v31 = vld [vmem:[#allocation10 + $0x330] sm:$0xff]  ;;  %v1747_v35 = vld [vmem:[#allocation10 + $0x368] sm:$0xff] }
 0x335   :  { %5769 = vmatprep.subr.bf16.mxu1 %v5768_v39  ;;  %v5784_v37 = vpack.c.bf16 %v1709_v34, %v1705_v15  ;;  %v1711_v39 = vld [vmem:[#allocation10 + $0x248] sm:$0xff] }
 0x336   :  { %5707 = vmatpush1.bf16.msra.mxu0 %v5706_v44  ;;  %v5724_v41 = vpack.c.bf16 %v1715_v40, %v1711_v39  ;;  %v1713_v44 = vld [vmem:[#allocation10 + $0x258] sm:$0xff]  ;;  %v1743_v34 = vld [vmem:[#allocation10 + $0x348] sm:$0xff] }
 0x337   :  { %5709 = vmatprep.subr.bf16.mxu0 %v5708_v49  ;;  %v1716_v49 = vld [vmem:[#allocation10 + $0x270] sm:$0xff]  ;;  %v5788_v50 = vpack.c.bf16 %v1717_v47, %v1713_v44  ;;  %v5740_v36 = vpack.c.bf16 %v1747_v35, %v1743_v34  ;;  %v1745_v39 = vld [vmem:[#allocation10 + $0x358] sm:$0xff]  ;;  %v1751_v47 = vld [vmem:[#allocation10 + $0x388] sm:$0xff] }
 0x338   :  { %5771 = vmatpush1.bf16.msra.mxu1 %v5770_v48  ;;  %v1712_v48 = vld [vmem:[#allocation10 + $0x250] sm:$0xff] }
 0x339   :  { %5773 = vmatprep.subr.bf16.mxu1 %v5772_v53  ;;  %v5790_v51 = vpack.c.bf16 %v1716_v49, %v1712_v48  ;;  %v1723_v53 = vld [vmem:[#allocation10 + $0x2a8] sm:$0xff] }
 0x33a   :  { %5711 = vmatpush1.bf16.msra.mxu0 %v5710_v60  ;;  %v5728_v54 = vpack.c.bf16 %v1723_v53, %v1719_v52  ;;  %v1725_v60 = vld [vmem:[#allocation10 + $0x2b8] sm:$0xff]  ;;  %v1755_v48 = vld [vmem:[#allocation10 + $0x3a8] sm:$0xff] }
 0x33b   :  { %5713 = vmatprep.subr.bf16.mxu0 %v5712_v62  ;;  %v1724_v62 = vld [vmem:[#allocation10 + $0x2b0] sm:$0xff]  ;;  %v5792_v63 = vpack.c.bf16 %v1725_v60, %v1721_v57  ;;  %v5744_v49 = vpack.c.bf16 %v1755_v48, %v1751_v47  ;;  %v1753_v52 = vld [vmem:[#allocation10 + $0x398] sm:$0xff]  ;;  %v1759_v60 = vld [vmem:[#allocation10 + $0x3c8] sm:$0xff] }
 0x33c   :  { %5775 = vmatpush1.bf16.msra.mxu1 %v5774_v61  ;;  %v1720_v61 = vld [vmem:[#allocation10 + $0x290] sm:$0xff] }
 0x33d   :  { %5777 = vmatprep.subr.bf16.mxu1 %v5776_v2  ;;  %v5794_v1 = vpack.c.bf16 %v1724_v62, %v1720_v61  ;;  %v1727_v2 = vld [vmem:[#allocation10 + $0x2c8] sm:$0xff] }
 0x33e   :  { %5715 = vmatpush1.bf16.msra.mxu0 %v5714_v7  ;;  %v5732_v6 = vpack.c.bf16 %v1731_v5, %v1727_v2  ;;  %v1726_v7 = vld [vmem:[#allocation10 + $0x2c0] sm:$0xff]  ;;  %v1763_v61 = vld [vmem:[#allocation10 + $0x3e8] sm:$0xff]  ;;  %v1761_v2 = vld [vmem:[#allocation10 + $0x3d8] sm:$0xff] }
 0x33f   :  { %5717 = vmatprep.subr.bf16.mxu0 %v5716_v12  ;;  %v1733_v12 = vld [vmem:[#allocation10 + $0x2f8] sm:$0xff]  ;;  %v5748_v62 = vpack.c.bf16 %v1763_v61, %v1759_v60 }
 0x340   :  { %5779 = vmatpush1.bf16.msra.mxu1 %v5778_v9  ;;  %v1730_v9 = vld [vmem:[#allocation10 + $0x2e0] sm:$0xff]  ;;  %v5796_v16 = vpack.c.bf16 %v1733_v12, %v1729_v10  ;;  %v1935_v12 = vld [vmem:[#allocation8 + $0x8] sm:$0xff] }
 0x341   :  { %5781 = vmatprep.subr.bf16.mxu1 %v5780_v24  ;;  %v5734_v11 = vpack.c.bf16 %v1730_v9, %v1726_v7  ;;  %v1734_v24 = vld [vmem:[#allocation10 + $0x300] sm:$0xff]  ;;  %v1760_v7 = vld [vmem:[#allocation10 + $0x3d0] sm:$0xff] }
 0x342   :  { %5719 = vmatpush1.bf16.msra.mxu0 %v5718_v14  ;;  %v5798_v14 = vpack.c.bf16 %v1732_v45, %v1728_v13  ;;  %v1764_v9 = vld [vmem:[#allocation10 + $0x3f0] sm:$0xff]  ;;  %v1939_v13 = vld [vmem:[#allocation8 + $0x28] sm:$0xff] }
 0x343   :  { %5721 = vmatprep.subr.bf16.mxu0 %v5720_v29  ;;  %v1741_v29 = vld [vmem:[#allocation10 + $0x338] sm:$0xff]  ;;  %v5816_v45 = vpack.c.bf16 %v1939_v13, %v1935_v12  ;;  %v1934_v13 = vld [vmem:[#allocation8] sm:$0xff] }
 0x344   :  { %5783 = vmatpush1.bf16.msra.mxu1 %v5782_v25  ;;  %v1738_v25 = vld [vmem:[#allocation10 + $0x320] sm:$0xff]  ;;  %v5800_v15 = vpack.c.bf16 %v1741_v29, %v1737_v27 }
 0x345   :  { %5785 = vmatprep.subr.bf16.mxu1 %v5784_v37  ;;  %v5738_v28 = vpack.c.bf16 %v1738_v25, %v1734_v24  ;;  %v1742_v37 = vld [vmem:[#allocation10 + $0x340] sm:$0xff] }
 0x346   :  { %5723 = vmatpush1.bf16.msra.mxu0 %v5722_v26  ;;  %v5802_v26 = vpack.c.bf16 %v1740_v31, %v1736_v30 }
 0x347   :  { %5725 = vmatprep.subr.bf16.mxu0 %v5724_v41  ;;  %v1749_v41 = vld [vmem:[#allocation10 + $0x378] sm:$0xff] }
 0x348   :  { %5787 = vmatpush1.bf16.msra.mxu1 %v5786_v38  ;;  %v1746_v38 = vld [vmem:[#allocation10 + $0x360] sm:$0xff]  ;;  %v5804_v44 = vpack.c.bf16 %v1749_v41, %v1745_v39 }
 0x349   :  { %5789 = vmatprep.subr.bf16.mxu1 %v5788_v50  ;;  %v5742_v40 = vpack.c.bf16 %v1746_v38, %v1742_v37  ;;  %v1750_v50 = vld [vmem:[#allocation10 + $0x380] sm:$0xff] }
 0x34a   :  { %5727 = vmatpush1.bf16.msra.mxu0 %v5726_v46  ;;  %v5806_v46 = vpack.c.bf16 %v1748_v43, %v1744_v42 }
 0x34b   :  { %5729 = vmatprep.subr.bf16.mxu0 %v5728_v54  ;;  %v1757_v54 = vld [vmem:[#allocation10 + $0x3b8] sm:$0xff] }
 0x34c   :  { %5791 = vmatpush1.bf16.msra.mxu1 %v5790_v51  ;;  %v1754_v51 = vld [vmem:[#allocation10 + $0x3a0] sm:$0xff]  ;;  %v5808_v57 = vpack.c.bf16 %v1757_v54, %v1753_v52 }
 0x34d   :  { %5793 = vmatprep.subr.bf16.mxu1 %v5792_v63  ;;  %v5746_v53 = vpack.c.bf16 %v1754_v51, %v1750_v50  ;;  %v1758_v63 = vld [vmem:[#allocation10 + $0x3c0] sm:$0xff] }
 0x34e   :  { %5731 = vmatpush1.bf16.msra.mxu0 %v5730_v59  ;;  %v5810_v59 = vpack.c.bf16 %v1756_v56, %v1752_v55 }
 0x34f   :  { %5733 = vmatprep.subr.bf16.mxu0 %v5732_v6  ;;  %v1765_v6 = vld [vmem:[#allocation10 + $0x3f8] sm:$0xff] }
 0x350   :  { %5795 = vmatpush1.bf16.msra.mxu1 %v5794_v1  ;;  %v1762_v1 = vld [vmem:[#allocation10 + $0x3e0] sm:$0xff]  ;;  %v5812_v10 = vpack.c.bf16 %v1765_v6, %v1761_v2 }
 0x351   :  { %5797 = vmatprep.subr.bf16.mxu1 %v5796_v16  ;;  %v5750_v5 = vpack.c.bf16 %v1762_v1, %v1758_v63  ;;  %v1937_v16 = vld [vmem:[#allocation8 + $0x18] sm:$0xff] }
 0x352   :  { %5735 = vmatpush1.bf16.msra.mxu0 %v5734_v11  ;;  %v5814_v11 = vpack.c.bf16 %v1764_v9, %v1760_v7 }
 0x353   :  { %5737 = vmatprep.subr.bf16.mxu0 %v5736_v22 }
 0x354   :  { %5799 = vmatpush1.bf16.msra.mxu1 %v5798_v14  ;;  %v1941_v14 = vld [vmem:[#allocation8 + $0x38] sm:$0xff] }
 0x355   :  { %5801 = vmatprep.subr.bf16.mxu1 %v5800_v15  ;;  %v5880_v17 = vpack.c.bf16 %v1941_v14, %v1937_v16  ;;  %v1943_v16 = vld [vmem:[#allocation8 + $0x48] sm:$0xff] }
 0x356   :  { %5739 = vmatpush1.bf16.msra.mxu0 %v5738_v28  ;;  %v1947_v14 = vld [vmem:[#allocation8 + $0x68] sm:$0xff] }
 0x357   :  { %5741 = vmatprep.subr.bf16.mxu0 %v5740_v36 }
 0x358   :  { %5803 = vmatpush1.bf16.msra.mxu1 %v5802_v26 }
 0x359   :  { %5805 = vmatprep.subr.bf16.mxu1 %v5804_v44 }
 0x35a   :  { %5743 = vmatpush1.bf16.msra.mxu0 %v5742_v40 }
 0x35b   :  { %5745 = vmatprep.subr.bf16.mxu0 %v5744_v49 }
 0x35c   :  { %5807 = vmatpush1.bf16.msra.mxu1 %v5806_v46 }
 0x35d   :  { %5809 = vmatprep.subr.bf16.mxu1 %v5808_v57 }
 0x35e   :  { %5747 = vmatpush1.bf16.msra.mxu0 %v5746_v53 }
 0x35f   :  { %5749 = vmatprep.subr.bf16.mxu0 %v5748_v62 }
 0x360   :  { %5811 = vmatpush1.bf16.msra.mxu1 %v5810_v59 }
 0x361   :  { %5813 = vmatprep.subr.bf16.mxu1 %v5812_v10 }
 0x362   :  { %5751 = vmatpush1.bf16.msra.mxu0 %v5750_v5 }
 0x363   :  { %5817 = vmatprep.subr.bf16.mxu0 %v5816_v45  ;;  %v1938_v45 = vld [vmem:[#allocation8 + $0x20] sm:$0xff] }
 0x364   :  { %5815 = vmatpush1.bf16.msra.mxu1 %v5814_v11 }
 0x365   :  { %5881 = vmatprep.subr.bf16.mxu1 %v5880_v17 }
 0x3b8   :  { %v1242_v19 = vpop.f32.mrb[6].mxu0  ;;  %v1313_v22 = vpop.f32.mrb[6].mxu1 }
 0x3b9   :  { %v1243_v24 = vadd.f32 %v1242_v19, %v7630_v3  ;;  %v1244_v25 = vpop.f32.mrb[7].mxu0  ;;  %v1315_v27 = vpop.f32.mrb[7].mxu1  ;;  %v1314_v31 = vadd.f32 %v1313_v22, %v7639_v8  ;;  %v1936_v19 = vld [vmem:[#allocation8 + $0x10] sm:$0xff] }
 0x3ba   :  { %v1245_v28 = vadd.f32 %v1244_v25, %v7634_v4  ;;  %v1316_v15 = vadd.f32 %v1315_v27, %v7645_v18  ;;  %v1940_v22 = vld [vmem:[#allocation8 + $0x30] sm:$0xff]  ;;  %v5818_v25 = vpack.c.bf16 %v1938_v45, %v1934_v13  ;;  %v1945_v27 = vld [vmem:[#allocation8 + $0x58] sm:$0xff]  ;;  %v1979_v13 = vld [vmem:[#allocation8 + $0x168] sm:$0xff] }
 0x3bb   :  { %v1318_v29 = vmul.f32 0.5, %v1243_v24 }
 0x3bc   :  { %v1322_v30 = vmul.f32 0.5, %v1245_v28  ;;  %v1327_v26 = vmul.f32 0.5, %v1316_v15  ;;  %v1949_v28 = vld [vmem:[#allocation8 + $0x78] sm:$0xff]  ;;  %v5882_v15 = vpack.c.bf16 %v1940_v22, %v1936_v19 }
 0x3bd   :  { %7166 = vtanh.f32 %v1318_v29  ;;  %v1977_v19 = vld [vmem:[#allocation8 + $0x158] sm:$0xff] }
 0x3be   :  { %7168 = vtanh.f32 %v1322_v30  ;;  %v5820_v30 = vpack.c.bf16 %v1947_v14, %v1943_v16  ;;  %v1968_v16 = vld [vmem:[#allocation8 + $0x110] sm:$0xff]  ;;  %v1981_v22 = vld [vmem:[#allocation8 + $0x178] sm:$0xff] }
 0x3bf   :  { %7170 = vtanh.f32 %v1314_v31  ;;  %v1946_v31 = vld [vmem:[#allocation8 + $0x60] sm:$0xff]  ;;  %v1972_v14 = vld [vmem:[#allocation8 + $0x130] sm:$0xff] }
 0x3c0   :  { %7172 = vtanh.f32 %v1327_v26  ;;  %v1951_v26 = vld [vmem:[#allocation8 + $0x88] sm:$0xff] }
 0x3c7   :  { %v7167_v34 = vpop.eup %7166 }
 0x3c8   :  { %v7169_v35 = vpop.eup %7168  ;;  %v1320_v36 = vmul.f32 0.5, %v7167_v34  ;;  %v1955_v34 = vld [vmem:[#allocation8 + $0xa8] sm:$0xff] }
 0x3c9   :  { %v1324_v37 = vmul.f32 0.5, %v7169_v35  ;;  %v7171_v39 = vpop.eup %7170  ;;  %v5884_v35 = vpack.c.bf16 %v1949_v28, %v1945_v27  ;;  %v1978_v27 = vld [vmem:[#allocation8 + $0x160] sm:$0xff]  ;;  %v5898_v28 = vpack.c.bf16 %v1972_v14, %v1968_v16 }
 0x3ca   :  { %v1321_v38 = vadd.f32 0.5, %v1320_v36  ;;  %v7173_v44 = vpop.eup %7172  ;;  %v1944_v36 = vld [vmem:[#allocation8 + $0x50] sm:$0xff]  ;;  %v2006_v14 = vld [vmem:[#allocation8 + $0x240] sm:$0xff] }
 0x3cb   :  { %v1325_v40 = vadd.f32 0.5, %v1324_v37  ;;  %v1329_v46 = vmul.f32 0.5, %v7173_v44  ;;  %v1948_v37 = vld [vmem:[#allocation8 + $0x70] sm:$0xff]  ;;  %v1954_v44 = vld [vmem:[#allocation8 + $0xa0] sm:$0xff] }
 0x3cc   :  { %v1333_v41 = vmul.f32 %v7171_v39, %v1321_v38  ;;  %v1953_v39 = vld [vmem:[#allocation8 + $0x98] sm:$0xff] }
 0x3cd   :  { %v1332_v42 = vmul.f32 %v1325_v40, %v7648_v32  ;;  %v1330_v47 = vadd.f32 0.5, %v1329_v46  ;;  %v1957_v40 = vld [vmem:[#allocation8 + $0xb8] sm:$0xff]  ;;  %v5886_v46 = vpack.c.bf16 %v1948_v37, %v1944_v36  ;;  %v1982_v37 = vld [vmem:[#allocation8 + $0x180] sm:$0xff] }
 0x3cf   :  { %v7664_v43 = vadd.f32 %v1333_v41, %v1332_v42  ;;  %v5824_v41 = vpack.c.bf16 %v1955_v34, %v1951_v26  ;;  %v1950_v42 = vld [vmem:[#allocation8 + $0x80] sm:$0xff]  ;;  %v1985_v34 = vld [vmem:[#allocation8 + $0x198] sm:$0xff] }
 0x3d1   :  { %7174 = vtanh.f32 %v7664_v43 }
 0x3db   :  { %v7175_v48 = vpop.eup %7174 }
 0x3dc   :  { %v1336_v49 = vmul.f32 %v7175_v48, %v1330_v47  ;;  %v1959_v47 = vld [vmem:[#allocation8 + $0xc8] sm:$0xff] }
 0x3dd   :  { %v1963_v48 = vld [vmem:[#allocation8 + $0xe8] sm:$0xff] }
 0x3de   :  { %1830 = vmatprep.mubr.f32.mxu0 %v1336_v49  ;;  %1901 = vmatprep.mubr.f32.mxu1 %v1336_v49  ;;  %v5888_v49 = vpack.c.bf16 %v1957_v40, %v1953_v39  ;;  %v1991_v40 = vld [vmem:[#allocation8 + $0x1c8] sm:$0xff] }
 0x3f8   :  { %v1538_v50 = vpop.f32.mrb[8].mxu0 }
 0x3f9   :  { %v1539_v51 = vadd.f32 %v1538_v50, %v7606_v20  ;;  %v1540_v52 = vpop.f32.mrb[9].mxu0  ;;  %v1952_v50 = vld [vmem:[#allocation8 + $0x90] sm:$0xff] }
 0x3fa   :  { %v1541_v53 = vadd.f32 %v1540_v52, %v7610_v21  ;;  %v1609_v54 = vpop.f32.mrb[8].mxu1  ;;  %v5826_v52 = vpack.c.bf16 %v1954_v44, %v1950_v42  ;;  %v1984_v44 = vld [vmem:[#allocation8 + $0x190] sm:$0xff] }
 0x3fb   :  { %v1614_v55 = vmul.f32 0.5, %v1539_v51  ;;  %v1610_v32 = vadd.f32 %v1609_v54, %v7614_v23  ;;  %v1611_v56 = vpop.f32.mrb[9].mxu1  ;;  %v1956_v51 = vld [vmem:[#allocation8 + $0xb0] sm:$0xff]  ;;  %v1965_v54 = vld [vmem:[#allocation8 + $0xf8] sm:$0xff] }
 0x3fc   :  { %v1618_v57 = vmul.f32 0.5, %v1541_v53  ;;  %v1612_v59 = vadd.f32 %v1611_v56, %v7622_v33  ;;  %v1961_v53 = vld [vmem:[#allocation8 + $0xd8] sm:$0xff]  ;;  %v1962_v56 = vld [vmem:[#allocation8 + $0xe0] sm:$0xff] }
 0x3fd   :  { %7176 = vtanh.f32 %v1614_v55  ;;  %v5828_v55 = vpack.c.bf16 %v1963_v48, %v1959_v47  ;;  %v1993_v48 = vld [vmem:[#allocation8 + $0x1d8] sm:$0xff] }
 0x3fe   :  { %7178 = vtanh.f32 %v1618_v57  ;;  %v1623_v60 = vmul.f32 0.5, %v1612_v59  ;;  %v5890_v57 = vpack.c.bf16 %v1956_v51, %v1952_v50  ;;  %v1967_v59 = vld [vmem:[#allocation8 + $0x108] sm:$0xff]  ;;  %v1990_v51 = vld [vmem:[#allocation8 + $0x1c0] sm:$0xff] }
 0x3ff   :  { %7180 = vtanh.f32 %v1610_v32  ;;  %v1958_v32 = vld [vmem:[#allocation8 + $0xc0] sm:$0xff] }
 0x400   :  { %7182 = vtanh.f32 %v1623_v60  ;;  %v1971_v60 = vld [vmem:[#allocation8 + $0x128] sm:$0xff] }
 0x407   :  { %v7177_v61 = vpop.eup %7176 }
 0x408   :  { %v7179_v62 = vpop.eup %7178  ;;  %v1616_v63 = vmul.f32 0.5, %v7177_v61  ;;  %v5892_v61 = vpack.c.bf16 %v1965_v54, %v1961_v53  ;;  %v1999_v54 = vld [vmem:[#allocation8 + $0x208] sm:$0xff] }
 0x409   :  { %v7181_v1 = vpop.eup %7180  ;;  %v1620_v2 = vmul.f32 0.5, %v7179_v62  ;;  %v1960_v62 = vld [vmem:[#allocation8 + $0xd0] sm:$0xff] }
 0x40a   :  { %v1617_v5 = vadd.f32 0.5, %v1616_v63  ;;  %v7183_v11 = vpop.eup %7182  ;;  %v1964_v63 = vld [vmem:[#allocation8 + $0xf0] sm:$0xff] }
 0x40b   :  { %v1621_v6 = vadd.f32 0.5, %v1620_v2  ;;  %v1625_v12 = vmul.f32 0.5, %v7183_v11  ;;  %v1969_v2 = vld [vmem:[#allocation8 + $0x118] sm:$0xff]  ;;  %v5894_v11 = vpack.c.bf16 %v1964_v63, %v1960_v62  ;;  %v1998_v63 = vld [vmem:[#allocation8 + $0x200] sm:$0xff] }
 0x40c   :  { %v1629_v7 = vmul.f32 %v7181_v1, %v1617_v5  ;;  %v5830_v1 = vpack.c.bf16 %v1962_v56, %v1958_v32  ;;  %v1973_v5 = vld [vmem:[#allocation8 + $0x138] sm:$0xff]  ;;  %v1992_v56 = vld [vmem:[#allocation8 + $0x1d0] sm:$0xff] }
 0x40d   :  { %v1628_v9 = vmul.f32 %v1621_v6, %v7656_v58  ;;  %v1626_v17 = vadd.f32 0.5, %v1625_v12  ;;  %v1942_v58 = vld [vmem:[#allocation8 + $0x40] sm:$0xff]  ;;  %v5832_v6 = vpack.c.bf16 %v1971_v60, %v1967_v59  ;;  %v1975_v12 = vld [vmem:[#allocation8 + $0x148] sm:$0xff]  ;;  %v5896_v45 = vpack.c.bf16 %v1973_v5, %v1969_v2  ;;  %v2001_v60 = vld [vmem:[#allocation8 + $0x218] sm:$0xff] }
 0x40e   :  { %v5822_v38 = vpack.c.bf16 %v1946_v31, %v1942_v58  ;;  %v5900_v58 = vpack.c.bf16 %v1981_v22, %v1977_v19  ;;  %v1976_v31 = vld [vmem:[#allocation8 + $0x150] sm:$0xff]  ;;  %v2007_v5 = vld [vmem:[#allocation8 + $0x248] sm:$0xff] }
 0x40f   :  { %v7672_v10 = vadd.f32 %v1629_v7, %v1628_v9  ;;  %v1966_v7 = vld [vmem:[#allocation8 + $0x100] sm:$0xff]  ;;  %v2015_v22 = vld [vmem:[#allocation8 + $0x288] sm:$0xff] }
 0x410   :  { %v1970_v9 = vld [vmem:[#allocation8 + $0x120] sm:$0xff] }
 0x411   :  { %7184 = vtanh.f32 %v7672_v10 }
 0x41b   :  { %v7185_v24 = vpop.eup %7184 }
 0x41c   :  { %v1632_v29 = vmul.f32 %v7185_v24, %v1626_v17  ;;  %v5834_v17 = vpack.c.bf16 %v1970_v9, %v1966_v7  ;;  %v5836_v24 = vpack.c.bf16 %v1979_v13, %v1975_v12  ;;  %v2000_v9 = vld [vmem:[#allocation8 + $0x210] sm:$0xff]  ;;  %v2009_v13 = vld [vmem:[#allocation8 + $0x258] sm:$0xff] }
 0x41e   :  { %1831 = vmatmul.mubr.f32.vlgmr.msra.gmra.mrb[10].mxu0 %v1632_v29  ;;  %1902 = vmatmul.mubr.f32.vlgmr.msra.gmra.mrb[10].mxu1 %v1632_v29 }
 0x41f   :  { %5819 = vmatpush1.bf16.msra.mxu0 %v5818_v25  ;;  %2126 = vmatprep.mubr.f32.mxu0 %v1632_v29  ;;  %v1974_v25 = vld [vmem:[#allocation8 + $0x140] sm:$0xff] }
 0x420   :  { %2197 = vmatprep.mubr.f32.mxu1 %v1632_v29  ;;  %5821 = vmatprep.subr.bf16.mxu0 %v5820_v30  ;;  %v1983_v29 = vld [vmem:[#allocation8 + $0x188] sm:$0xff]  ;;  %v5838_v26 = vpack.c.bf16 %v1978_v27, %v1974_v25  ;;  %v2008_v27 = vld [vmem:[#allocation8 + $0x250] sm:$0xff] }
 0x421   :  { %5883 = vmatpush1.bf16.msra.mxu1 %v5882_v15  ;;  %v1987_v30 = vld [vmem:[#allocation8 + $0x1a8] sm:$0xff]  ;;  %v1980_v15 = vld [vmem:[#allocation8 + $0x170] sm:$0xff] }
 0x422   :  { %5885 = vmatprep.subr.bf16.mxu1 %v5884_v35  ;;  %v1989_v35 = vld [vmem:[#allocation8 + $0x1b8] sm:$0xff]  ;;  %v5840_v36 = vpack.c.bf16 %v1987_v30, %v1983_v29  ;;  %v5902_v39 = vpack.c.bf16 %v1980_v15, %v1976_v31  ;;  %v2014_v15 = vld [vmem:[#allocation8 + $0x280] sm:$0xff] }
 0x423   :  { %5823 = vmatpush1.bf16.msra.mxu0 %v5822_v38  ;;  %v1986_v38 = vld [vmem:[#allocation8 + $0x1a0] sm:$0xff]  ;;  %v5904_v42 = vpack.c.bf16 %v1989_v35, %v1985_v34  ;;  %v2017_v30 = vld [vmem:[#allocation8 + $0x298] sm:$0xff]  ;;  %v2023_v35 = vld [vmem:[#allocation8 + $0x2c8] sm:$0xff] }
 0x424   :  { %5825 = vmatprep.subr.bf16.mxu0 %v5824_v41  ;;  %v1995_v41 = vld [vmem:[#allocation8 + $0x1e8] sm:$0xff]  ;;  %v5842_v47 = vpack.c.bf16 %v1986_v38, %v1982_v37  ;;  %v2016_v38 = vld [vmem:[#allocation8 + $0x290] sm:$0xff] }
 0x425   :  { %5887 = vmatpush1.bf16.msra.mxu1 %v5886_v46  ;;  %v1988_v46 = vld [vmem:[#allocation8 + $0x1b0] sm:$0xff]  ;;  %v5844_v50 = vpack.c.bf16 %v1995_v41, %v1991_v40  ;;  %v2025_v41 = vld [vmem:[#allocation8 + $0x2d8] sm:$0xff] }
 0x426   :  { %5889 = vmatprep.subr.bf16.mxu1 %v5888_v49  ;;  %v1997_v49 = vld [vmem:[#allocation8 + $0x1f8] sm:$0xff]  ;;  %v5906_v53 = vpack.c.bf16 %v1988_v46, %v1984_v44  ;;  %v2022_v46 = vld [vmem:[#allocation8 + $0x2c0] sm:$0xff] }
 0x427   :  { %5827 = vmatpush1.bf16.msra.mxu0 %v5826_v52  ;;  %v1994_v52 = vld [vmem:[#allocation8 + $0x1e0] sm:$0xff]  ;;  %v5908_v32 = vpack.c.bf16 %v1997_v49, %v1993_v48  ;;  %v2031_v49 = vld [vmem:[#allocation8 + $0x308] sm:$0xff] }
 0x428   :  { %5829 = vmatprep.subr.bf16.mxu0 %v5828_v55  ;;  %v2003_v55 = vld [vmem:[#allocation8 + $0x228] sm:$0xff]  ;;  %v5846_v59 = vpack.c.bf16 %v1994_v52, %v1990_v51  ;;  %v2024_v52 = vld [vmem:[#allocation8 + $0x2d0] sm:$0xff] }
 0x429   :  { %5891 = vmatpush1.bf16.msra.mxu1 %v5890_v57  ;;  %v1996_v57 = vld [vmem:[#allocation8 + $0x1f0] sm:$0xff]  ;;  %v5848_v62 = vpack.c.bf16 %v2003_v55, %v1999_v54  ;;  %v2033_v55 = vld [vmem:[#allocation8 + $0x318] sm:$0xff] }
 0x42a   :  { %5893 = vmatprep.subr.bf16.mxu1 %v5892_v61  ;;  %v2005_v61 = vld [vmem:[#allocation8 + $0x238] sm:$0xff]  ;;  %v5910_v2 = vpack.c.bf16 %v1996_v57, %v1992_v56  ;;  %v2030_v57 = vld [vmem:[#allocation8 + $0x300] sm:$0xff] }
 0x42b   :  { %5831 = vmatpush1.bf16.msra.mxu0 %v5830_v1  ;;  %v2002_v1 = vld [vmem:[#allocation8 + $0x220] sm:$0xff]  ;;  %v5912_v7 = vpack.c.bf16 %v2005_v61, %v2001_v60  ;;  %v2039_v61 = vld [vmem:[#allocation8 + $0x348] sm:$0xff] }
 0x42c   :  { %5833 = vmatprep.subr.bf16.mxu0 %v5832_v6  ;;  %v2011_v6 = vld [vmem:[#allocation8 + $0x268] sm:$0xff]  ;;  %v5850_v12 = vpack.c.bf16 %v2002_v1, %v1998_v63  ;;  %v2032_v1 = vld [vmem:[#allocation8 + $0x310] sm:$0xff] }
 0x42d   :  { %5895 = vmatpush1.bf16.msra.mxu1 %v5894_v11  ;;  %v2004_v11 = vld [vmem:[#allocation8 + $0x230] sm:$0xff]  ;;  %v5852_v16 = vpack.c.bf16 %v2011_v6, %v2007_v5  ;;  %v2041_v6 = vld [vmem:[#allocation8 + $0x358] sm:$0xff] }
 0x42e   :  { %5897 = vmatprep.subr.bf16.mxu1 %v5896_v45  ;;  %v2013_v45 = vld [vmem:[#allocation8 + $0x278] sm:$0xff]  ;;  %v5914_v19 = vpack.c.bf16 %v2004_v11, %v2000_v9  ;;  %v2038_v11 = vld [vmem:[#allocation8 + $0x340] sm:$0xff] }
 0x42f   :  { %5835 = vmatpush1.bf16.msra.mxu0 %v5834_v17  ;;  %v2010_v17 = vld [vmem:[#allocation8 + $0x260] sm:$0xff]  ;;  %v5916_v25 = vpack.c.bf16 %v2013_v45, %v2009_v13  ;;  %v2047_v45 = vld [vmem:[#allocation8 + $0x388] sm:$0xff] }
 0x430   :  { %5837 = vmatprep.subr.bf16.mxu0 %v5836_v24  ;;  %v2019_v24 = vld [vmem:[#allocation8 + $0x2a8] sm:$0xff]  ;;  %v5854_v29 = vpack.c.bf16 %v2010_v17, %v2006_v14  ;;  %v2040_v17 = vld [vmem:[#allocation8 + $0x350] sm:$0xff] }
 0x431   :  { %5899 = vmatpush1.bf16.msra.mxu1 %v5898_v28  ;;  %v2012_v28 = vld [vmem:[#allocation8 + $0x270] sm:$0xff]  ;;  %v5856_v31 = vpack.c.bf16 %v2019_v24, %v2015_v22  ;;  %v2049_v24 = vld [vmem:[#allocation8 + $0x398] sm:$0xff] }
 0x432   :  { %5901 = vmatprep.subr.bf16.mxu1 %v5900_v58  ;;  %v2021_v58 = vld [vmem:[#allocation8 + $0x2b8] sm:$0xff]  ;;  %v5918_v34 = vpack.c.bf16 %v2012_v28, %v2008_v27  ;;  %v2046_v28 = vld [vmem:[#allocation8 + $0x380] sm:$0xff] }
 0x433   :  { %5839 = vmatpush1.bf16.msra.mxu0 %v5838_v26  ;;  %v2018_v26 = vld [vmem:[#allocation8 + $0x2a0] sm:$0xff]  ;;  %v5920_v37 = vpack.c.bf16 %v2021_v58, %v2017_v30  ;;  %v2055_v58 = vld [vmem:[#allocation8 + $0x3c8] sm:$0xff] }
 0x434   :  { %5841 = vmatprep.subr.bf16.mxu0 %v5840_v36  ;;  %v2027_v36 = vld [vmem:[#allocation8 + $0x2e8] sm:$0xff]  ;;  %v5858_v40 = vpack.c.bf16 %v2018_v26, %v2014_v15  ;;  %v2048_v26 = vld [vmem:[#allocation8 + $0x390] sm:$0xff] }
 0x435   :  { %5903 = vmatpush1.bf16.msra.mxu1 %v5902_v39  ;;  %v2020_v39 = vld [vmem:[#allocation8 + $0x2b0] sm:$0xff]  ;;  %v5860_v44 = vpack.c.bf16 %v2027_v36, %v2023_v35  ;;  %v2057_v36 = vld [vmem:[#allocation8 + $0x3d8] sm:$0xff] }
 0x436   :  { %5905 = vmatprep.subr.bf16.mxu1 %v5904_v42  ;;  %v2029_v42 = vld [vmem:[#allocation8 + $0x2f8] sm:$0xff]  ;;  %v5922_v48 = vpack.c.bf16 %v2020_v39, %v2016_v38  ;;  %v2054_v39 = vld [vmem:[#allocation8 + $0x3c0] sm:$0xff] }
 0x437   :  { %5843 = vmatpush1.bf16.msra.mxu0 %v5842_v47  ;;  %v2026_v47 = vld [vmem:[#allocation8 + $0x2e0] sm:$0xff]  ;;  %v5924_v51 = vpack.c.bf16 %v2029_v42, %v2025_v41 }
 0x438   :  { %5845 = vmatprep.subr.bf16.mxu0 %v5844_v50  ;;  %v2035_v50 = vld [vmem:[#allocation8 + $0x328] sm:$0xff]  ;;  %v5862_v54 = vpack.c.bf16 %v2026_v47, %v2022_v46  ;;  %v2060_v46 = vld [vmem:[#allocation8 + $0x3f0] sm:$0xff] }
 0x439   :  { %5907 = vmatpush1.bf16.msra.mxu1 %v5906_v53  ;;  %v2028_v53 = vld [vmem:[#allocation8 + $0x2f0] sm:$0xff]  ;;  %v5864_v56 = vpack.c.bf16 %v2035_v50, %v2031_v49  ;;  %v1930_v49 = vld [vmem:[#allocation5 + $0x18] sm:$0xff]  ;;  %v2229_v50 = vld [vmem:[#allocation10 + $0x8] sm:$0xff] }
 0x43a   :  { %5909 = vmatprep.subr.bf16.mxu1 %v5908_v32  ;;  %v2037_v32 = vld [vmem:[#allocation8 + $0x338] sm:$0xff]  ;;  %v5926_v60 = vpack.c.bf16 %v2028_v53, %v2024_v52  ;;  %v2228_v52 = vld [vmem:[#allocation10] sm:$0xff] }
 0x43b   :  { %5847 = vmatpush1.bf16.msra.mxu0 %v5846_v59  ;;  %v2034_v59 = vld [vmem:[#allocation8 + $0x320] sm:$0xff]  ;;  %v5928_v63 = vpack.c.bf16 %v2037_v32, %v2033_v55  ;;  %v2231_v55 = vld [vmem:[#allocation10 + $0x18] sm:$0xff] }
 0x43c   :  { %5849 = vmatprep.subr.bf16.mxu0 %v5848_v62  ;;  %v2043_v62 = vld [vmem:[#allocation8 + $0x368] sm:$0xff]  ;;  %v5866_v5 = vpack.c.bf16 %v2034_v59, %v2030_v57  ;;  %v2235_v32 = vld [vmem:[#allocation10 + $0x38] sm:$0xff]  ;;  %v2230_v59 = vld [vmem:[#allocation10 + $0x10] sm:$0xff] }
 0x43d   :  { %5911 = vmatpush1.bf16.msra.mxu1 %v5910_v2  ;;  %v2036_v2 = vld [vmem:[#allocation8 + $0x330] sm:$0xff]  ;;  %v5868_v9 = vpack.c.bf16 %v2043_v62, %v2039_v61  ;;  %v6008_v57 = vpack.c.bf16 %v2235_v32, %v2231_v55  ;;  %v2237_v62 = vld [vmem:[#allocation10 + $0x48] sm:$0xff] }
 0x43e   :  { %5913 = vmatprep.subr.bf16.mxu1 %v5912_v7  ;;  %v2045_v7 = vld [vmem:[#allocation8 + $0x378] sm:$0xff]  ;;  %v5930_v13 = vpack.c.bf16 %v2036_v2, %v2032_v1  ;;  %v2236_v1 = vld [vmem:[#allocation10 + $0x40] sm:$0xff]  ;;  %v2269_v55 = vld [vmem:[#allocation10 + $0x148] sm:$0xff] }
 0x43f   :  { %5851 = vmatpush1.bf16.msra.mxu0 %v5850_v12  ;;  %v2042_v12 = vld [vmem:[#allocation8 + $0x360] sm:$0xff]  ;;  %v5932_v14 = vpack.c.bf16 %v2045_v7, %v2041_v6  ;;  %v2239_v6 = vld [vmem:[#allocation10 + $0x58] sm:$0xff]  ;;  %v2273_v32 = vld [vmem:[#allocation10 + $0x168] sm:$0xff] }
 0x440   :  { %5853 = vmatprep.subr.bf16.mxu0 %v5852_v16  ;;  %v2051_v16 = vld [vmem:[#allocation8 + $0x3a8] sm:$0xff]  ;;  %v5870_v22 = vpack.c.bf16 %v2042_v12, %v2038_v11  ;;  %v2243_v7 = vld [vmem:[#allocation10 + $0x78] sm:$0xff]  ;;  %v2238_v12 = vld [vmem:[#allocation10 + $0x50] sm:$0xff] }
 0x441   :  { %5915 = vmatpush1.bf16.msra.mxu1 %v5914_v19  ;;  %v2044_v19 = vld [vmem:[#allocation8 + $0x370] sm:$0xff]  ;;  %v5872_v27 = vpack.c.bf16 %v2051_v16, %v2047_v45  ;;  %v6012_v11 = vpack.c.bf16 %v2243_v7, %v2239_v6  ;;  %v2245_v45 = vld [vmem:[#allocation10 + $0x88] sm:$0xff] }
 0x442   :  { %5917 = vmatprep.subr.bf16.mxu1 %v5916_v25  ;;  %v2053_v25 = vld [vmem:[#allocation8 + $0x3b8] sm:$0xff]  ;;  %v5934_v30 = vpack.c.bf16 %v2044_v19, %v2040_v17  ;;  %v2244_v17 = vld [vmem:[#allocation10 + $0x80] sm:$0xff]  ;;  %v2277_v6 = vld [vmem:[#allocation10 + $0x188] sm:$0xff] }
 0x443   :  { %5855 = vmatpush1.bf16.msra.mxu0 %v5854_v29  ;;  %v2050_v29 = vld [vmem:[#allocation8 + $0x3a0] sm:$0xff]  ;;  %v5936_v15 = vpack.c.bf16 %v2053_v25, %v2049_v24  ;;  %v2247_v25 = vld [vmem:[#allocation10 + $0x98] sm:$0xff]  ;;  %v2281_v7 = vld [vmem:[#allocation10 + $0x1a8] sm:$0xff] }
 0x444   :  { %5857 = vmatprep.subr.bf16.mxu0 %v5856_v31  ;;  %v2059_v31 = vld [vmem:[#allocation8 + $0x3e8] sm:$0xff]  ;;  %v5874_v35 = vpack.c.bf16 %v2050_v29, %v2046_v28  ;;  %v2248_v19 = vld [vmem:[#allocation10 + $0xa0] sm:$0xff]  ;;  %v2246_v28 = vld [vmem:[#allocation10 + $0x90] sm:$0xff] }
 0x445   :  { %5919 = vmatpush1.bf16.msra.mxu1 %v5918_v34  ;;  %v2052_v34 = vld [vmem:[#allocation8 + $0x3b0] sm:$0xff]  ;;  %v5876_v38 = vpack.c.bf16 %v2059_v31, %v2055_v58  ;;  %v5954_v24 = vpack.c.bf16 %v2248_v19, %v2244_v17  ;;  %v2253_v58 = vld [vmem:[#allocation10 + $0xc8] sm:$0xff] }
 0x446   :  { %5921 = vmatprep.subr.bf16.mxu1 %v5920_v37  ;;  %v2061_v37 = vld [vmem:[#allocation8 + $0x3f8] sm:$0xff]  ;;  %v5938_v41 = vpack.c.bf16 %v2052_v34, %v2048_v26  ;;  %v2257_v31 = vld [vmem:[#allocation10 + $0xe8] sm:$0xff]  ;;  %v2252_v34 = vld [vmem:[#allocation10 + $0xc0] sm:$0xff] }
 0x447   :  { %5859 = vmatpush1.bf16.msra.mxu0 %v5858_v40  ;;  %v2058_v40 = vld [vmem:[#allocation8 + $0x3e0] sm:$0xff]  ;;  %v5940_v42 = vpack.c.bf16 %v2061_v37, %v2057_v36  ;;  %v5956_v26 = vpack.c.bf16 %v2257_v31, %v2253_v58  ;;  %v2255_v36 = vld [vmem:[#allocation10 + $0xd8] sm:$0xff]  ;;  %v2278_v19 = vld [vmem:[#allocation10 + $0x190] sm:$0xff] }
 0x448   :  { %5861 = vmatprep.subr.bf16.mxu0 %v5860_v44  ;;  %v2056_v44 = vld [vmem:[#allocation8 + $0x3d0] sm:$0xff]  ;;  %v5878_v47 = vpack.c.bf16 %v2058_v40, %v2054_v39  ;;  %v2259_v37 = vld [vmem:[#allocation10 + $0xf8] sm:$0xff]  ;;  %v2288_v58 = vld [vmem:[#allocation10 + $0x1e0] sm:$0xff] }
 0x449   :  { %5923 = vmatpush1.bf16.msra.mxu1 %v5922_v48  ;;  %v5942_v48 = vpack.c.bf16 %v2060_v46, %v2056_v44  ;;  %v2258_v39 = vld [vmem:[#allocation10 + $0xf0] sm:$0xff]  ;;  %v2265_v44 = vld [vmem:[#allocation10 + $0x128] sm:$0xff]  ;;  %v2260_v46 = vld [vmem:[#allocation10 + $0x100] sm:$0xff] }
 0x44a   :  { %5925 = vmatprep.subr.bf16.mxu1 %v5924_v51  ;;  %v2233_v51 = vld [vmem:[#allocation10 + $0x28] sm:$0xff]  ;;  %v2287_v31 = vld [vmem:[#allocation10 + $0x1d8] sm:$0xff] }
 0x44b   :  { %5863 = vmatpush1.bf16.msra.mxu0 %v5862_v54  ;;  %v5944_v53 = vpack.c.bf16 %v2233_v51, %v2229_v50  ;;  %v2232_v54 = vld [vmem:[#allocation10 + $0x20] sm:$0xff]  ;;  %v2263_v50 = vld [vmem:[#allocation10 + $0x118] sm:$0xff] }
 0x44c   :  { %5865 = vmatprep.subr.bf16.mxu0 %v5864_v56  ;;  %v5946_v56 = vpack.c.bf16 %v2232_v54, %v2228_v52  ;;  %v2267_v51 = vld [vmem:[#allocation10 + $0x138] sm:$0xff]  ;;  %v2266_v54 = vld [vmem:[#allocation10 + $0x130] sm:$0xff] }
 0x44d   :  { %5927 = vmatpush1.bf16.msra.mxu1 %v5926_v60  ;;  %v2234_v60 = vld [vmem:[#allocation10 + $0x30] sm:$0xff]  ;;  %v6024_v52 = vpack.c.bf16 %v2267_v51, %v2263_v50 }
 0x44e   :  { %5929 = vmatprep.subr.bf16.mxu1 %v5928_v63  ;;  %v6010_v61 = vpack.c.bf16 %v2234_v60, %v2230_v59  ;;  %v2241_v63 = vld [vmem:[#allocation10 + $0x68] sm:$0xff]  ;;  %v2275_v59 = vld [vmem:[#allocation10 + $0x178] sm:$0xff] }
 0x44f   :  { %5867 = vmatpush1.bf16.msra.mxu0 %v5866_v5  ;;  %v5948_v2 = vpack.c.bf16 %v2241_v63, %v2237_v62  ;;  %v2240_v5 = vld [vmem:[#allocation10 + $0x60] sm:$0xff] }
 0x450   :  { %5869 = vmatprep.subr.bf16.mxu0 %v5868_v9  ;;  %v5950_v9 = vpack.c.bf16 %v2240_v5, %v2236_v1  ;;  %v2268_v62 = vld [vmem:[#allocation10 + $0x140] sm:$0xff]  ;;  %v2270_v1 = vld [vmem:[#allocation10 + $0x150] sm:$0xff] }
 0x451   :  { %5931 = vmatpush1.bf16.msra.mxu1 %v5930_v13  ;;  %v2242_v13 = vld [vmem:[#allocation10 + $0x70] sm:$0xff]  ;;  %v2272_v63 = vld [vmem:[#allocation10 + $0x160] sm:$0xff] }
 0x452   :  { %5933 = vmatprep.subr.bf16.mxu1 %v5932_v14  ;;  %v6014_v16 = vpack.c.bf16 %v2242_v13, %v2238_v12  ;;  %v2249_v14 = vld [vmem:[#allocation10 + $0xa8] sm:$0xff]  ;;  %v2274_v5 = vld [vmem:[#allocation10 + $0x170] sm:$0xff]  ;;  %v5966_v12 = vpack.c.bf16 %v2272_v63, %v2268_v62 }
 0x453   :  { %5871 = vmatpush1.bf16.msra.mxu0 %v5870_v22  ;;  %v5952_v22 = vpack.c.bf16 %v2249_v14, %v2245_v45  ;;  %v6030_v13 = vpack.c.bf16 %v2274_v5, %v2270_v1  ;;  %v5968_v45 = vpack.c.bf16 %v2281_v7, %v2277_v6  ;;  %v2280_v14 = vld [vmem:[#allocation10 + $0x1a0] sm:$0xff]  ;;  %v2309_v1 = vld [vmem:[#allocation10 + $0x288] sm:$0xff] }
 0x454   :  { %5873 = vmatprep.subr.bf16.mxu0 %v5872_v27  ;;  %v2251_v27 = vld [vmem:[#allocation10 + $0xb8] sm:$0xff]  ;;  %v2308_v6 = vld [vmem:[#allocation10 + $0x280] sm:$0xff] }
 0x455   :  { %5935 = vmatpush1.bf16.msra.mxu1 %v5934_v30  ;;  %v6016_v29 = vpack.c.bf16 %v2251_v27, %v2247_v25  ;;  %v2250_v30 = vld [vmem:[#allocation10 + $0xb0] sm:$0xff]  ;;  %v2285_v27 = vld [vmem:[#allocation10 + $0x1c8] sm:$0xff]  ;;  %v2312_v7 = vld [vmem:[#allocation10 + $0x2a0] sm:$0xff] }
 0x456   :  { %5937 = vmatprep.subr.bf16.mxu1 %v5936_v15  ;;  %v6018_v15 = vpack.c.bf16 %v2250_v30, %v2246_v28  ;;  %v2289_v28 = vld [vmem:[#allocation10 + $0x1e8] sm:$0xff]  ;;  %v2284_v30 = vld [vmem:[#allocation10 + $0x1c0] sm:$0xff] }
 0x457   :  { %5875 = vmatpush1.bf16.msra.mxu0 %v5874_v35  ;;  %v2256_v35 = vld [vmem:[#allocation10 + $0xe0] sm:$0xff] }
 0x458   :  { %5877 = vmatprep.subr.bf16.mxu0 %v5876_v38  ;;  %v2254_v38 = vld [vmem:[#allocation10 + $0xd0] sm:$0xff]  ;;  %v5958_v40 = vpack.c.bf16 %v2256_v35, %v2252_v34 }
 0x459   :  { %5939 = vmatpush1.bf16.msra.mxu1 %v5938_v41  ;;  %v6020_v41 = vpack.c.bf16 %v2259_v37, %v2255_v36  ;;  %v2286_v34 = vld [vmem:[#allocation10 + $0x1d0] sm:$0xff] }
 0x45a   :  { %5941 = vmatprep.subr.bf16.mxu1 %v5940_v42  ;;  %v2261_v42 = vld [vmem:[#allocation10 + $0x108] sm:$0xff]  ;;  %v2290_v35 = vld [vmem:[#allocation10 + $0x1f0] sm:$0xff] }
 0x45b   :  { %5879 = vmatpush1.bf16.msra.mxu0 %v5878_v47  ;;  %v6022_v47 = vpack.c.bf16 %v2258_v39, %v2254_v38  ;;  %v6038_v37 = vpack.c.bf16 %v2290_v35, %v2286_v34  ;;  %v2293_v38 = vld [vmem:[#allocation10 + $0x208] sm:$0xff] }
 0x45c   :  { %5945 = vmatprep.subr.bf16.mxu0 %v5944_v53  ;;  %v2262_v53 = vld [vmem:[#allocation10 + $0x110] sm:$0xff]  ;;  %v2297_v39 = vld [vmem:[#allocation10 + $0x228] sm:$0xff] }
 0x45d   :  { %5943 = vmatpush1.bf16.msra.mxu1 %v5942_v48  ;;  %v5960_v48 = vpack.c.bf16 %v2265_v44, %v2261_v42  ;;  %v6026_v60 = vpack.c.bf16 %v2266_v54, %v2262_v53  ;;  %v2296_v42 = vld [vmem:[#allocation10 + $0x220] sm:$0xff]  ;;  %v2295_v44 = vld [vmem:[#allocation10 + $0x218] sm:$0xff]  ;;  %v2305_v53 = vld [vmem:[#allocation10 + $0x268] sm:$0xff] }
 0x45e   :  { %2127 = vmatmul.mubr.f32.vlgmr.msra.gmra.mrb[12].mxu0 %v1930_v49  ;;  %6009 = vmatprep.subr.bf16.mxu1 %v6008_v57  ;;  %v2271_v57 = vld [vmem:[#allocation10 + $0x158] sm:$0xff]  ;;  %v2329_v34 = vld [vmem:[#allocation10 + $0x328] sm:$0xff] }
 0x45f   :  { %5947 = vmatpush1.bf16.msra.mxu0 %v5946_v56 }
 0x460   :  { %2198 = vmatmul.mubr.f32.vlgmr.msra.gmra.mrb[12].mxu1 %v1930_v49  ;;  %5949 = vmatprep.subr.bf16.mxu0 %v5948_v2  ;;  %v2264_v49 = vld [vmem:[#allocation10 + $0x120] sm:$0xff]  ;;  %v6028_v2 = vpack.c.bf16 %v2275_v59, %v2271_v57  ;;  %v2307_v59 = vld [vmem:[#allocation10 + $0x278] sm:$0xff] }
 0x461   :  { %6011 = vmatpush1.bf16.msra.mxu1 %v6010_v61  ;;  %v5962_v56 = vpack.c.bf16 %v2264_v49, %v2260_v46  ;;  %v5964_v61 = vpack.c.bf16 %v2273_v32, %v2269_v55  ;;  %v2298_v49 = vld [vmem:[#allocation10 + $0x230] sm:$0xff]  ;;  %v2300_v55 = vld [vmem:[#allocation10 + $0x240] sm:$0xff] }
 0x462   :  { %6013 = vmatprep.subr.bf16.mxu1 %v6012_v11  ;;  %v2283_v11 = vld [vmem:[#allocation10 + $0x1b8] sm:$0xff]  ;;  %v2304_v32 = vld [vmem:[#allocation10 + $0x260] sm:$0xff] }
 0x463   :  { %5951 = vmatpush1.bf16.msra.mxu0 %v5950_v9  ;;  %v2279_v9 = vld [vmem:[#allocation10 + $0x198] sm:$0xff]  ;;  %v5982_v57 = vpack.c.bf16 %v2304_v32, %v2300_v55  ;;  %v2334_v55 = vld [vmem:[#allocation10 + $0x350] sm:$0xff] }
 0x464   :  { %5953 = vmatprep.subr.bf16.mxu0 %v5952_v22  ;;  %v6032_v17 = vpack.c.bf16 %v2283_v11, %v2279_v9  ;;  %v2282_v22 = vld [vmem:[#allocation10 + $0x1b0] sm:$0xff]  ;;  %v2311_v9 = vld [vmem:[#allocation10 + $0x298] sm:$0xff]  ;;  %v5986_v11 = vpack.c.bf16 %v2312_v7, %v2308_v6 }
 0x465   :  { %6015 = vmatpush1.bf16.msra.mxu1 %v6014_v16  ;;  %v2276_v16 = vld [vmem:[#allocation10 + $0x180] sm:$0xff]  ;;  %v6034_v25 = vpack.c.bf16 %v2282_v22, %v2278_v19  ;;  %v2321_v19 = vld [vmem:[#allocation10 + $0x2e8] sm:$0xff]  ;;  %v2338_v32 = vld [vmem:[#allocation10 + $0x370] sm:$0xff] }
 0x466   :  { %6017 = vmatprep.subr.bf16.mxu1 %v6016_v29  ;;  %v5972_v29 = vpack.c.bf16 %v2289_v28, %v2285_v27  ;;  %v2319_v27 = vld [vmem:[#allocation10 + $0x2d8] sm:$0xff]  ;;  %v2342_v6 = vld [vmem:[#allocation10 + $0x390] sm:$0xff] }
 0x467   :  { %5955 = vmatpush1.bf16.msra.mxu0 %v5954_v24  ;;  %v5970_v24 = vpack.c.bf16 %v2280_v14, %v2276_v16  ;;  %v2346_v7 = vld [vmem:[#allocation10 + $0x3b0] sm:$0xff] }
 0x468   :  { %5957 = vmatprep.subr.bf16.mxu0 %v5956_v26  ;;  %v2291_v26 = vld [vmem:[#allocation10 + $0x1f8] sm:$0xff] }
 0x469   :  { %6019 = vmatpush1.bf16.msra.mxu1 %v6018_v15  ;;  %v5974_v15 = vpack.c.bf16 %v2288_v58, %v2284_v30  ;;  %v6036_v36 = vpack.c.bf16 %v2291_v26, %v2287_v31  ;;  %v2318_v30 = vld [vmem:[#allocation10 + $0x2d0] sm:$0xff]  ;;  %v2325_v26 = vld [vmem:[#allocation10 + $0x308] sm:$0xff] }
 0x46a   :  { %6021 = vmatprep.subr.bf16.mxu1 %v6020_v41  ;;  %v2292_v41 = vld [vmem:[#allocation10 + $0x200] sm:$0xff]  ;;  %v2322_v58 = vld [vmem:[#allocation10 + $0x2f0] sm:$0xff]  ;;  %v5992_v35 = vpack.c.bf16 %v2329_v34, %v2325_v26 }
 0x46b   :  { %5959 = vmatpush1.bf16.msra.mxu0 %v5958_v40  ;;  %v5976_v40 = vpack.c.bf16 %v2297_v39, %v2293_v38  ;;  %v5978_v46 = vpack.c.bf16 %v2296_v42, %v2292_v41  ;;  %v2327_v38 = vld [vmem:[#allocation10 + $0x318] sm:$0xff]  ;;  %v2326_v41 = vld [vmem:[#allocation10 + $0x310] sm:$0xff] }
 0x46c   :  { %5961 = vmatprep.subr.bf16.mxu0 %v5960_v48  ;;  %v2294_v48 = vld [vmem:[#allocation10 + $0x210] sm:$0xff] }
 0x46d   :  { %6023 = vmatpush1.bf16.msra.mxu1 %v6022_v47  ;;  %v2299_v47 = vld [vmem:[#allocation10 + $0x238] sm:$0xff]  ;;  %v6042_v51 = vpack.c.bf16 %v2298_v49, %v2294_v48  ;;  %v2330_v42 = vld [vmem:[#allocation10 + $0x330] sm:$0xff]  ;;  %v2337_v48 = vld [vmem:[#allocation10 + $0x368] sm:$0xff] }
 0x46e   :  { %6025 = vmatprep.subr.bf16.mxu1 %v6024_v52  ;;  %v6040_v50 = vpack.c.bf16 %v2299_v47, %v2295_v44  ;;  %v2301_v52 = vld [vmem:[#allocation10 + $0x248] sm:$0xff] }
 0x46f   :  { %5963 = vmatpush1.bf16.msra.mxu0 %v5962_v56  ;;  %v5980_v54 = vpack.c.bf16 %v2305_v53, %v2301_v52  ;;  %v2303_v56 = vld [vmem:[#allocation10 + $0x258] sm:$0xff]  ;;  %v2333_v47 = vld [vmem:[#allocation10 + $0x348] sm:$0xff] }
 0x470   :  { %5965 = vmatprep.subr.bf16.mxu0 %v5964_v61  ;;  %v2306_v61 = vld [vmem:[#allocation10 + $0x270] sm:$0xff]  ;;  %v6044_v62 = vpack.c.bf16 %v2307_v59, %v2303_v56  ;;  %v5996_v49 = vpack.c.bf16 %v2337_v48, %v2333_v47  ;;  %v2335_v52 = vld [vmem:[#allocation10 + $0x358] sm:$0xff]  ;;  %v2341_v59 = vld [vmem:[#allocation10 + $0x388] sm:$0xff] }
 0x471   :  { %6027 = vmatpush1.bf16.msra.mxu1 %v6026_v60  ;;  %v2302_v60 = vld [vmem:[#allocation10 + $0x250] sm:$0xff] }
 0x472   :  { %6029 = vmatprep.subr.bf16.mxu1 %v6028_v2  ;;  %v6046_v63 = vpack.c.bf16 %v2306_v61, %v2302_v60  ;;  %v2313_v2 = vld [vmem:[#allocation10 + $0x2a8] sm:$0xff] }
 0x473   :  { %5967 = vmatpush1.bf16.msra.mxu0 %v5966_v12  ;;  %v5984_v5 = vpack.c.bf16 %v2313_v2, %v2309_v1  ;;  %v2315_v12 = vld [vmem:[#allocation10 + $0x2b8] sm:$0xff]  ;;  %v2345_v60 = vld [vmem:[#allocation10 + $0x3a8] sm:$0xff] }
 0x474   :  { %5969 = vmatprep.subr.bf16.mxu0 %v5968_v45  ;;  %v2314_v45 = vld [vmem:[#allocation10 + $0x2b0] sm:$0xff]  ;;  %v6048_v16 = vpack.c.bf16 %v2315_v12, %v2311_v9  ;;  %v6000_v61 = vpack.c.bf16 %v2345_v60, %v2341_v59  ;;  %v2343_v1 = vld [vmem:[#allocation10 + $0x398] sm:$0xff]  ;;  %v2349_v12 = vld [vmem:[#allocation10 + $0x3c8] sm:$0xff] }
 0x475   :  { %6031 = vmatpush1.bf16.msra.mxu1 %v6030_v13  ;;  %v2310_v13 = vld [vmem:[#allocation10 + $0x290] sm:$0xff] }
 0x476   :  { %6033 = vmatprep.subr.bf16.mxu1 %v6032_v17  ;;  %v6050_v14 = vpack.c.bf16 %v2314_v45, %v2310_v13  ;;  %v2317_v17 = vld [vmem:[#allocation10 + $0x2c8] sm:$0xff] }
 0x477   :  { %5971 = vmatpush1.bf16.msra.mxu0 %v5970_v24  ;;  %v5988_v22 = vpack.c.bf16 %v2321_v19, %v2317_v17  ;;  %v2316_v24 = vld [vmem:[#allocation10 + $0x2c0] sm:$0xff]  ;;  %v2353_v13 = vld [vmem:[#allocation10 + $0x3e8] sm:$0xff]  ;;  %v2351_v17 = vld [vmem:[#allocation10 + $0x3d8] sm:$0xff] }
 0x478   :  { %5973 = vmatprep.subr.bf16.mxu0 %v5972_v29  ;;  %v2323_v29 = vld [vmem:[#allocation10 + $0x2f8] sm:$0xff]  ;;  %v6004_v45 = vpack.c.bf16 %v2353_v13, %v2349_v12 }
 0x479   :  { %6035 = vmatpush1.bf16.msra.mxu1 %v6034_v25  ;;  %v2320_v25 = vld [vmem:[#allocation10 + $0x2e0] sm:$0xff]  ;;  %v6052_v31 = vpack.c.bf16 %v2323_v29, %v2319_v27  ;;  %v2525_v29 = vld [vmem:[#allocation8 + $0x8] sm:$0xff] }
 0x47a   :  { %6037 = vmatprep.subr.bf16.mxu1 %v6036_v36  ;;  %v5990_v28 = vpack.c.bf16 %v2320_v25, %v2316_v24  ;;  %v2324_v36 = vld [vmem:[#allocation10 + $0x300] sm:$0xff]  ;;  %v2350_v24 = vld [vmem:[#allocation10 + $0x3d0] sm:$0xff] }
 0x47b   :  { %5975 = vmatpush1.bf16.msra.mxu0 %v5974_v15  ;;  %v6054_v15 = vpack.c.bf16 %v2322_v58, %v2318_v30  ;;  %v2354_v25 = vld [vmem:[#allocation10 + $0x3f0] sm:$0xff]  ;;  %v2529_v30 = vld [vmem:[#allocation8 + $0x28] sm:$0xff] }
 0x47c   :  { %5977 = vmatprep.subr.bf16.mxu0 %v5976_v40  ;;  %v2331_v40 = vld [vmem:[#allocation10 + $0x338] sm:$0xff]  ;;  %v6072_v58 = vpack.c.bf16 %v2529_v30, %v2525_v29  ;;  %v2524_v30 = vld [vmem:[#allocation8] sm:$0xff] }
 0x47d   :  { %6039 = vmatpush1.bf16.msra.mxu1 %v6038_v37  ;;  %v2328_v37 = vld [vmem:[#allocation10 + $0x320] sm:$0xff]  ;;  %v6056_v44 = vpack.c.bf16 %v2331_v40, %v2327_v38 }
 0x47e   :  { %6041 = vmatprep.subr.bf16.mxu1 %v6040_v50  ;;  %v5994_v39 = vpack.c.bf16 %v2328_v37, %v2324_v36  ;;  %v2332_v50 = vld [vmem:[#allocation10 + $0x340] sm:$0xff] }
 0x47f   :  { %5979 = vmatpush1.bf16.msra.mxu0 %v5978_v46  ;;  %v6058_v46 = vpack.c.bf16 %v2330_v42, %v2326_v41 }
 0x480   :  { %5981 = vmatprep.subr.bf16.mxu0 %v5980_v54  ;;  %v2339_v54 = vld [vmem:[#allocation10 + $0x378] sm:$0xff] }
 0x481   :  { %6043 = vmatpush1.bf16.msra.mxu1 %v6042_v51  ;;  %v2336_v51 = vld [vmem:[#allocation10 + $0x360] sm:$0xff]  ;;  %v6060_v56 = vpack.c.bf16 %v2339_v54, %v2335_v52 }
 0x482   :  { %6045 = vmatprep.subr.bf16.mxu1 %v6044_v62  ;;  %v5998_v53 = vpack.c.bf16 %v2336_v51, %v2332_v50  ;;  %v2340_v62 = vld [vmem:[#allocation10 + $0x380] sm:$0xff] }
 0x483   :  { %5983 = vmatpush1.bf16.msra.mxu0 %v5982_v57  ;;  %v6062_v57 = vpack.c.bf16 %v2338_v32, %v2334_v55 }
 0x484   :  { %5985 = vmatprep.subr.bf16.mxu0 %v5984_v5  ;;  %v2347_v5 = vld [vmem:[#allocation10 + $0x3b8] sm:$0xff] }
 0x485   :  { %6047 = vmatpush1.bf16.msra.mxu1 %v6046_v63  ;;  %v2344_v63 = vld [vmem:[#allocation10 + $0x3a0] sm:$0xff]  ;;  %v6064_v9 = vpack.c.bf16 %v2347_v5, %v2343_v1 }
 0x486   :  { %6049 = vmatprep.subr.bf16.mxu1 %v6048_v16  ;;  %v6002_v2 = vpack.c.bf16 %v2344_v63, %v2340_v62  ;;  %v2348_v16 = vld [vmem:[#allocation10 + $0x3c0] sm:$0xff] }
 0x487   :  { %5987 = vmatpush1.bf16.msra.mxu0 %v5986_v11  ;;  %v6066_v11 = vpack.c.bf16 %v2346_v7, %v2342_v6 }
 0x488   :  { %5989 = vmatprep.subr.bf16.mxu0 %v5988_v22  ;;  %v2355_v22 = vld [vmem:[#allocation10 + $0x3f8] sm:$0xff] }
 0x489   :  { %6051 = vmatpush1.bf16.msra.mxu1 %v6050_v14  ;;  %v2352_v14 = vld [vmem:[#allocation10 + $0x3e0] sm:$0xff]  ;;  %v6068_v27 = vpack.c.bf16 %v2355_v22, %v2351_v17 }
 0x48a   :  { %6053 = vmatprep.subr.bf16.mxu1 %v6052_v31  ;;  %v6006_v19 = vpack.c.bf16 %v2352_v14, %v2348_v16  ;;  %v2527_v31 = vld [vmem:[#allocation8 + $0x18] sm:$0xff] }
 0x48b   :  { %5991 = vmatpush1.bf16.msra.mxu0 %v5990_v28  ;;  %v6070_v28 = vpack.c.bf16 %v2354_v25, %v2350_v24 }
 0x48c   :  { %5993 = vmatprep.subr.bf16.mxu0 %v5992_v35 }
 0x48d   :  { %6055 = vmatpush1.bf16.msra.mxu1 %v6054_v15  ;;  %v2531_v15 = vld [vmem:[#allocation8 + $0x38] sm:$0xff] }
 0x48e   :  { %6057 = vmatprep.subr.bf16.mxu1 %v6056_v44  ;;  %v6136_v26 = vpack.c.bf16 %v2531_v15, %v2527_v31  ;;  %v2533_v31 = vld [vmem:[#allocation8 + $0x48] sm:$0xff] }
 0x48f   :  { %5995 = vmatpush1.bf16.msra.mxu0 %v5994_v39  ;;  %v2537_v15 = vld [vmem:[#allocation8 + $0x68] sm:$0xff] }
 0x490   :  { %5997 = vmatprep.subr.bf16.mxu0 %v5996_v49 }
 0x491   :  { %6059 = vmatpush1.bf16.msra.mxu1 %v6058_v46 }
 0x492   :  { %6061 = vmatprep.subr.bf16.mxu1 %v6060_v56 }
 0x493   :  { %5999 = vmatpush1.bf16.msra.mxu0 %v5998_v53 }
 0x494   :  { %6001 = vmatprep.subr.bf16.mxu0 %v6000_v61 }
 0x495   :  { %6063 = vmatpush1.bf16.msra.mxu1 %v6062_v57 }
 0x496   :  { %6065 = vmatprep.subr.bf16.mxu1 %v6064_v9 }
 0x497   :  { %6003 = vmatpush1.bf16.msra.mxu0 %v6002_v2 }
 0x498   :  { %6005 = vmatprep.subr.bf16.mxu0 %v6004_v45 }
 0x499   :  { %6067 = vmatpush1.bf16.msra.mxu1 %v6066_v11 }
 0x49a   :  { %6069 = vmatprep.subr.bf16.mxu1 %v6068_v27 }
 0x49b   :  { %6007 = vmatpush1.bf16.msra.mxu0 %v6006_v19 }
 0x49c   :  { %6073 = vmatprep.subr.bf16.mxu0 %v6072_v58  ;;  %v2528_v58 = vld [vmem:[#allocation8 + $0x20] sm:$0xff] }
 0x49d   :  { %6071 = vmatpush1.bf16.msra.mxu1 %v6070_v28 }
 0x49e   :  { %6137 = vmatprep.subr.bf16.mxu1 %v6136_v26 }
 0x4f1   :  { %v1832_v34 = vpop.f32.mrb[10].mxu0  ;;  %v1903_v35 = vpop.f32.mrb[10].mxu1 }
 0x4f2   :  { %v1833_v36 = vadd.f32 %v1832_v34, %v7630_v3  ;;  %v1834_v37 = vpop.f32.mrb[11].mxu0  ;;  %v1905_v38 = vpop.f32.mrb[11].mxu1  ;;  %v1904_v42 = vadd.f32 %v1903_v35, %v7639_v8  ;;  %v2526_v34 = vld [vmem:[#allocation8 + $0x10] sm:$0xff] }
 0x4f3   :  { %v1835_v39 = vadd.f32 %v1834_v37, %v7634_v4  ;;  %v1906_v44 = vadd.f32 %v1905_v38, %v7645_v18  ;;  %v2530_v35 = vld [vmem:[#allocation8 + $0x30] sm:$0xff]  ;;  %v6074_v37 = vpack.c.bf16 %v2528_v58, %v2524_v30  ;;  %v2535_v38 = vld [vmem:[#allocation8 + $0x58] sm:$0xff]  ;;  %v2569_v30 = vld [vmem:[#allocation8 + $0x168] sm:$0xff] }
 0x4f4   :  { %v1908_v40 = vmul.f32 0.5, %v1833_v36 }
 0x4f5   :  { %v1912_v41 = vmul.f32 0.5, %v1835_v39  ;;  %v1917_v46 = vmul.f32 0.5, %v1906_v44  ;;  %v2539_v39 = vld [vmem:[#allocation8 + $0x78] sm:$0xff]  ;;  %v6138_v44 = vpack.c.bf16 %v2530_v35, %v2526_v34 }
 0x4f6   :  { %7186 = vtanh.f32 %v1908_v40  ;;  %v2567_v34 = vld [vmem:[#allocation8 + $0x158] sm:$0xff] }
 0x4f7   :  { %7188 = vtanh.f32 %v1912_v41  ;;  %v6076_v41 = vpack.c.bf16 %v2537_v15, %v2533_v31  ;;  %v2558_v31 = vld [vmem:[#allocation8 + $0x110] sm:$0xff]  ;;  %v2571_v35 = vld [vmem:[#allocation8 + $0x178] sm:$0xff] }
 0x4f8   :  { %7190 = vtanh.f32 %v1904_v42  ;;  %v2536_v42 = vld [vmem:[#allocation8 + $0x60] sm:$0xff]  ;;  %v2562_v15 = vld [vmem:[#allocation8 + $0x130] sm:$0xff] }
 0x4f9   :  { %7192 = vtanh.f32 %v1917_v46  ;;  %v2541_v46 = vld [vmem:[#allocation8 + $0x88] sm:$0xff] }
 0x500   :  { %v7187_v47 = vpop.eup %7186 }
 0x501   :  { %v7189_v48 = vpop.eup %7188  ;;  %v1910_v49 = vmul.f32 0.5, %v7187_v47  ;;  %v2545_v47 = vld [vmem:[#allocation8 + $0xa8] sm:$0xff] }
 0x502   :  { %v1914_v50 = vmul.f32 0.5, %v7189_v48  ;;  %v7191_v52 = vpop.eup %7190  ;;  %v6140_v48 = vpack.c.bf16 %v2539_v39, %v2535_v38  ;;  %v2568_v38 = vld [vmem:[#allocation8 + $0x160] sm:$0xff]  ;;  %v6154_v39 = vpack.c.bf16 %v2562_v15, %v2558_v31 }
 0x503   :  { %v1911_v51 = vadd.f32 0.5, %v1910_v49  ;;  %v7193_v56 = vpop.eup %7192  ;;  %v2534_v49 = vld [vmem:[#allocation8 + $0x50] sm:$0xff]  ;;  %v2596_v15 = vld [vmem:[#allocation8 + $0x240] sm:$0xff] }
 0x504   :  { %v1915_v53 = vadd.f32 0.5, %v1914_v50  ;;  %v1919_v57 = vmul.f32 0.5, %v7193_v56  ;;  %v2538_v50 = vld [vmem:[#allocation8 + $0x70] sm:$0xff]  ;;  %v2544_v56 = vld [vmem:[#allocation8 + $0xa0] sm:$0xff] }
 0x505   :  { %v1923_v54 = vmul.f32 %v7191_v52, %v1911_v51  ;;  %v2543_v52 = vld [vmem:[#allocation8 + $0x98] sm:$0xff] }
 0x506   :  { %v1922_v55 = vmul.f32 %v1915_v53, %v7664_v43  ;;  %v1920_v59 = vadd.f32 0.5, %v1919_v57  ;;  %v2547_v53 = vld [vmem:[#allocation8 + $0xb8] sm:$0xff]  ;;  %v6142_v57 = vpack.c.bf16 %v2538_v50, %v2534_v49  ;;  %v2572_v50 = vld [vmem:[#allocation8 + $0x180] sm:$0xff] }
 0x508   :  { %v7680_v32 = vadd.f32 %v1923_v54, %v1922_v55  ;;  %v6080_v54 = vpack.c.bf16 %v2545_v47, %v2541_v46  ;;  %v2540_v55 = vld [vmem:[#allocation8 + $0x80] sm:$0xff]  ;;  %v2575_v47 = vld [vmem:[#allocation8 + $0x198] sm:$0xff] }
 0x50a   :  { %7194 = vtanh.f32 %v7680_v32 }
 0x514   :  { %v7195_v60 = vpop.eup %7194 }
 0x515   :  { %v1926_v61 = vmul.f32 %v7195_v60, %v1920_v59  ;;  %v2549_v59 = vld [vmem:[#allocation8 + $0xc8] sm:$0xff] }
 0x516   :  { %v2553_v60 = vld [vmem:[#allocation8 + $0xe8] sm:$0xff] }
 0x517   :  { %2420 = vmatprep.mubr.f32.mxu0 %v1926_v61  ;;  %2491 = vmatprep.mubr.f32.mxu1 %v1926_v61  ;;  %v6144_v61 = vpack.c.bf16 %v2547_v53, %v2543_v52  ;;  %v2581_v53 = vld [vmem:[#allocation8 + $0x1c8] sm:$0xff] }
 0x531   :  { %v2128_v62 = vpop.f32.mrb[12].mxu0 }
 0x532   :  { %v2129_v63 = vadd.f32 %v2128_v62, %v7606_v20  ;;  %v2130_v1 = vpop.f32.mrb[13].mxu0  ;;  %v2542_v62 = vld [vmem:[#allocation8 + $0x90] sm:$0xff] }
 0x533   :  { %v2131_v2 = vadd.f32 %v2130_v1, %v7610_v21  ;;  %v2199_v5 = vpop.f32.mrb[12].mxu1  ;;  %v6082_v1 = vpack.c.bf16 %v2544_v56, %v2540_v55  ;;  %v2574_v56 = vld [vmem:[#allocation8 + $0x190] sm:$0xff] }
 0x534   :  { %v2204_v6 = vmul.f32 0.5, %v2129_v63  ;;  %v2200_v43 = vadd.f32 %v2199_v5, %v7614_v23  ;;  %v2201_v7 = vpop.f32.mrb[13].mxu1  ;;  %v2546_v63 = vld [vmem:[#allocation8 + $0xb0] sm:$0xff]  ;;  %v2555_v5 = vld [vmem:[#allocation8 + $0xf8] sm:$0xff] }
 0x535   :  { %v2208_v9 = vmul.f32 0.5, %v2131_v2  ;;  %v2202_v11 = vadd.f32 %v2201_v7, %v7622_v33  ;;  %v2551_v2 = vld [vmem:[#allocation8 + $0xd8] sm:$0xff]  ;;  %v2552_v7 = vld [vmem:[#allocation8 + $0xe0] sm:$0xff] }
 0x536   :  { %7196 = vtanh.f32 %v2204_v6  ;;  %v6084_v6 = vpack.c.bf16 %v2553_v60, %v2549_v59  ;;  %v2583_v60 = vld [vmem:[#allocation8 + $0x1d8] sm:$0xff] }
 0x537   :  { %7198 = vtanh.f32 %v2208_v9  ;;  %v2213_v12 = vmul.f32 0.5, %v2202_v11  ;;  %v6146_v9 = vpack.c.bf16 %v2546_v63, %v2542_v62  ;;  %v2557_v11 = vld [vmem:[#allocation8 + $0x108] sm:$0xff]  ;;  %v2580_v63 = vld [vmem:[#allocation8 + $0x1c0] sm:$0xff] }
 0x538   :  { %7200 = vtanh.f32 %v2200_v43  ;;  %v2548_v43 = vld [vmem:[#allocation8 + $0xc0] sm:$0xff] }
 0x539   :  { %7202 = vtanh.f32 %v2213_v12  ;;  %v2561_v12 = vld [vmem:[#allocation8 + $0x128] sm:$0xff] }
 0x540   :  { %v7197_v13 = vpop.eup %7196 }
 0x541   :  { %v7199_v45 = vpop.eup %7198  ;;  %v2206_v16 = vmul.f32 0.5, %v7197_v13  ;;  %v6148_v13 = vpack.c.bf16 %v2555_v5, %v2551_v2  ;;  %v2589_v5 = vld [vmem:[#allocation8 + $0x208] sm:$0xff] }
 0x542   :  { %v7201_v14 = vpop.eup %7200  ;;  %v2210_v17 = vmul.f32 0.5, %v7199_v45  ;;  %v2550_v45 = vld [vmem:[#allocation8 + $0xd0] sm:$0xff] }
 0x543   :  { %v2207_v19 = vadd.f32 0.5, %v2206_v16  ;;  %v7203_v28 = vpop.eup %7202  ;;  %v2554_v16 = vld [vmem:[#allocation8 + $0xf0] sm:$0xff] }
 0x544   :  { %v2211_v22 = vadd.f32 0.5, %v2210_v17  ;;  %v2215_v29 = vmul.f32 0.5, %v7203_v28  ;;  %v2559_v17 = vld [vmem:[#allocation8 + $0x118] sm:$0xff]  ;;  %v6150_v28 = vpack.c.bf16 %v2554_v16, %v2550_v45  ;;  %v2588_v16 = vld [vmem:[#allocation8 + $0x200] sm:$0xff] }
 0x545   :  { %v2219_v24 = vmul.f32 %v7201_v14, %v2207_v19  ;;  %v6086_v14 = vpack.c.bf16 %v2552_v7, %v2548_v43  ;;  %v2563_v19 = vld [vmem:[#allocation8 + $0x138] sm:$0xff]  ;;  %v2582_v7 = vld [vmem:[#allocation8 + $0x1d0] sm:$0xff] }
 0x546   :  { %v2218_v25 = vmul.f32 %v2211_v22, %v7672_v10  ;;  %v2216_v26 = vadd.f32 0.5, %v2215_v29  ;;  %v2532_v10 = vld [vmem:[#allocation8 + $0x40] sm:$0xff]  ;;  %v6088_v22 = vpack.c.bf16 %v2561_v12, %v2557_v11  ;;  %v2565_v29 = vld [vmem:[#allocation8 + $0x148] sm:$0xff]  ;;  %v6152_v58 = vpack.c.bf16 %v2563_v19, %v2559_v17  ;;  %v2591_v12 = vld [vmem:[#allocation8 + $0x218] sm:$0xff] }
 0x547   :  { %v6078_v51 = vpack.c.bf16 %v2536_v42, %v2532_v10  ;;  %v6156_v10 = vpack.c.bf16 %v2571_v35, %v2567_v34  ;;  %v2566_v42 = vld [vmem:[#allocation8 + $0x150] sm:$0xff]  ;;  %v2597_v19 = vld [vmem:[#allocation8 + $0x248] sm:$0xff] }
 0x548   :  { %v7688_v27 = vadd.f32 %v2219_v24, %v2218_v25  ;;  %v2556_v24 = vld [vmem:[#allocation8 + $0x100] sm:$0xff]  ;;  %v2605_v35 = vld [vmem:[#allocation8 + $0x288] sm:$0xff] }
 0x549   :  { %v2560_v25 = vld [vmem:[#allocation8 + $0x120] sm:$0xff] }
 0x54a   :  { %7204 = vtanh.f32 %v7688_v27 }
 0x554   :  { %v7205_v36 = vpop.eup %7204 }
 0x555   :  { %v2222_v40 = vmul.f32 %v7205_v36, %v2216_v26  ;;  %v6090_v26 = vpack.c.bf16 %v2560_v25, %v2556_v24  ;;  %v6092_v36 = vpack.c.bf16 %v2569_v30, %v2565_v29  ;;  %v2590_v25 = vld [vmem:[#allocation8 + $0x210] sm:$0xff]  ;;  %v2599_v30 = vld [vmem:[#allocation8 + $0x258] sm:$0xff] }
 0x557   :  { %2421 = vmatmul.mubr.f32.vlgmr.msra.gmra.mrb[14].mxu0 %v2222_v40  ;;  %2492 = vmatmul.mubr.f32.vlgmr.msra.gmra.mrb[14].mxu1 %v2222_v40 }
 0x558   :  { %6075 = vmatpush1.bf16.msra.mxu0 %v6074_v37  ;;  %2716 = vmatprep.mubr.f32.mxu0 %v2222_v40  ;;  %v2564_v37 = vld [vmem:[#allocation8 + $0x140] sm:$0xff] }
 0x559   :  { %2787 = vmatprep.mubr.f32.mxu1 %v2222_v40  ;;  %6077 = vmatprep.subr.bf16.mxu0 %v6076_v41  ;;  %v2573_v40 = vld [vmem:[#allocation8 + $0x188] sm:$0xff]  ;;  %v6094_v46 = vpack.c.bf16 %v2568_v38, %v2564_v37  ;;  %v2598_v38 = vld [vmem:[#allocation8 + $0x250] sm:$0xff] }
 0x55a   :  { %6139 = vmatpush1.bf16.msra.mxu1 %v6138_v44  ;;  %v2577_v41 = vld [vmem:[#allocation8 + $0x1a8] sm:$0xff]  ;;  %v2570_v44 = vld [vmem:[#allocation8 + $0x170] sm:$0xff] }
 0x55b   :  { %6141 = vmatprep.subr.bf16.mxu1 %v6140_v48  ;;  %v2579_v48 = vld [vmem:[#allocation8 + $0x1b8] sm:$0xff]  ;;  %v6096_v49 = vpack.c.bf16 %v2577_v41, %v2573_v40  ;;  %v6158_v52 = vpack.c.bf16 %v2570_v44, %v2566_v42  ;;  %v2604_v44 = vld [vmem:[#allocation8 + $0x280] sm:$0xff] }
 0x55c   :  { %6079 = vmatpush1.bf16.msra.mxu0 %v6078_v51  ;;  %v2576_v51 = vld [vmem:[#allocation8 + $0x1a0] sm:$0xff]  ;;  %v6160_v55 = vpack.c.bf16 %v2579_v48, %v2575_v47  ;;  %v2607_v41 = vld [vmem:[#allocation8 + $0x298] sm:$0xff]  ;;  %v2613_v48 = vld [vmem:[#allocation8 + $0x2c8] sm:$0xff] }
 0x55d   :  { %6081 = vmatprep.subr.bf16.mxu0 %v6080_v54  ;;  %v2585_v54 = vld [vmem:[#allocation8 + $0x1e8] sm:$0xff]  ;;  %v6098_v59 = vpack.c.bf16 %v2576_v51, %v2572_v50  ;;  %v2606_v51 = vld [vmem:[#allocation8 + $0x290] sm:$0xff] }
 0x55e   :  { %6143 = vmatpush1.bf16.msra.mxu1 %v6142_v57  ;;  %v2578_v57 = vld [vmem:[#allocation8 + $0x1b0] sm:$0xff]  ;;  %v6100_v62 = vpack.c.bf16 %v2585_v54, %v2581_v53  ;;  %v2615_v54 = vld [vmem:[#allocation8 + $0x2d8] sm:$0xff] }
 0x55f   :  { %6145 = vmatprep.subr.bf16.mxu1 %v6144_v61  ;;  %v2587_v61 = vld [vmem:[#allocation8 + $0x1f8] sm:$0xff]  ;;  %v6162_v2 = vpack.c.bf16 %v2578_v57, %v2574_v56  ;;  %v2612_v57 = vld [vmem:[#allocation8 + $0x2c0] sm:$0xff] }
 0x560   :  { %6083 = vmatpush1.bf16.msra.mxu0 %v6082_v1  ;;  %v2584_v1 = vld [vmem:[#allocation8 + $0x1e0] sm:$0xff]  ;;  %v6164_v43 = vpack.c.bf16 %v2587_v61, %v2583_v60  ;;  %v2621_v61 = vld [vmem:[#allocation8 + $0x308] sm:$0xff] }
 0x561   :  { %6085 = vmatprep.subr.bf16.mxu0 %v6084_v6  ;;  %v2593_v6 = vld [vmem:[#allocation8 + $0x228] sm:$0xff]  ;;  %v6102_v11 = vpack.c.bf16 %v2584_v1, %v2580_v63  ;;  %v2614_v1 = vld [vmem:[#allocation8 + $0x2d0] sm:$0xff] }
 0x562   :  { %6147 = vmatpush1.bf16.msra.mxu1 %v6146_v9  ;;  %v2586_v9 = vld [vmem:[#allocation8 + $0x1f0] sm:$0xff]  ;;  %v6104_v45 = vpack.c.bf16 %v2593_v6, %v2589_v5  ;;  %v2623_v6 = vld [vmem:[#allocation8 + $0x318] sm:$0xff] }
 0x563   :  { %6149 = vmatprep.subr.bf16.mxu1 %v6148_v13  ;;  %v2595_v13 = vld [vmem:[#allocation8 + $0x238] sm:$0xff]  ;;  %v6166_v17 = vpack.c.bf16 %v2586_v9, %v2582_v7  ;;  %v2620_v9 = vld [vmem:[#allocation8 + $0x300] sm:$0xff] }
 0x564   :  { %6087 = vmatpush1.bf16.msra.mxu0 %v6086_v14  ;;  %v2592_v14 = vld [vmem:[#allocation8 + $0x220] sm:$0xff]  ;;  %v6168_v24 = vpack.c.bf16 %v2595_v13, %v2591_v12  ;;  %v2629_v13 = vld [vmem:[#allocation8 + $0x348] sm:$0xff] }
 0x565   :  { %6089 = vmatprep.subr.bf16.mxu0 %v6088_v22  ;;  %v2601_v22 = vld [vmem:[#allocation8 + $0x268] sm:$0xff]  ;;  %v6106_v29 = vpack.c.bf16 %v2592_v14, %v2588_v16  ;;  %v2622_v14 = vld [vmem:[#allocation8 + $0x310] sm:$0xff] }
 0x566   :  { %6151 = vmatpush1.bf16.msra.mxu1 %v6150_v28  ;;  %v2594_v28 = vld [vmem:[#allocation8 + $0x230] sm:$0xff]  ;;  %v6108_v31 = vpack.c.bf16 %v2601_v22, %v2597_v19  ;;  %v2631_v22 = vld [vmem:[#allocation8 + $0x358] sm:$0xff] }
 0x567   :  { %6153 = vmatprep.subr.bf16.mxu1 %v6152_v58  ;;  %v2603_v58 = vld [vmem:[#allocation8 + $0x278] sm:$0xff]  ;;  %v6170_v34 = vpack.c.bf16 %v2594_v28, %v2590_v25  ;;  %v2628_v28 = vld [vmem:[#allocation8 + $0x340] sm:$0xff] }
 0x568   :  { %6091 = vmatpush1.bf16.msra.mxu0 %v6090_v26  ;;  %v2600_v26 = vld [vmem:[#allocation8 + $0x260] sm:$0xff]  ;;  %v6172_v37 = vpack.c.bf16 %v2603_v58, %v2599_v30  ;;  %v2637_v58 = vld [vmem:[#allocation8 + $0x388] sm:$0xff] }
 0x569   :  { %6093 = vmatprep.subr.bf16.mxu0 %v6092_v36  ;;  %v2609_v36 = vld [vmem:[#allocation8 + $0x2a8] sm:$0xff]  ;;  %v6110_v40 = vpack.c.bf16 %v2600_v26, %v2596_v15  ;;  %v2630_v26 = vld [vmem:[#allocation8 + $0x350] sm:$0xff] }
 0x56a   :  { %6155 = vmatpush1.bf16.msra.mxu1 %v6154_v39  ;;  %v2602_v39 = vld [vmem:[#allocation8 + $0x270] sm:$0xff]  ;;  %v6112_v42 = vpack.c.bf16 %v2609_v36, %v2605_v35  ;;  %v2639_v36 = vld [vmem:[#allocation8 + $0x398] sm:$0xff] }
 0x56b   :  { %6157 = vmatprep.subr.bf16.mxu1 %v6156_v10  ;;  %v2611_v10 = vld [vmem:[#allocation8 + $0x2b8] sm:$0xff]  ;;  %v6174_v47 = vpack.c.bf16 %v2602_v39, %v2598_v38  ;;  %v2636_v39 = vld [vmem:[#allocation8 + $0x380] sm:$0xff] }
 0x56c   :  { %6095 = vmatpush1.bf16.msra.mxu0 %v6094_v46  ;;  %v2608_v46 = vld [vmem:[#allocation8 + $0x2a0] sm:$0xff]  ;;  %v6176_v50 = vpack.c.bf16 %v2611_v10, %v2607_v41  ;;  %v2645_v10 = vld [vmem:[#allocation8 + $0x3c8] sm:$0xff] }
 0x56d   :  { %6097 = vmatprep.subr.bf16.mxu0 %v6096_v49  ;;  %v2617_v49 = vld [vmem:[#allocation8 + $0x2e8] sm:$0xff]  ;;  %v6114_v53 = vpack.c.bf16 %v2608_v46, %v2604_v44  ;;  %v2638_v46 = vld [vmem:[#allocation8 + $0x390] sm:$0xff] }
 0x56e   :  { %6159 = vmatpush1.bf16.msra.mxu1 %v6158_v52  ;;  %v2610_v52 = vld [vmem:[#allocation8 + $0x2b0] sm:$0xff]  ;;  %v6116_v56 = vpack.c.bf16 %v2617_v49, %v2613_v48  ;;  %v2647_v49 = vld [vmem:[#allocation8 + $0x3d8] sm:$0xff] }
 0x56f   :  { %6161 = vmatprep.subr.bf16.mxu1 %v6160_v55  ;;  %v2619_v55 = vld [vmem:[#allocation8 + $0x2f8] sm:$0xff]  ;;  %v6178_v60 = vpack.c.bf16 %v2610_v52, %v2606_v51  ;;  %v2644_v52 = vld [vmem:[#allocation8 + $0x3c0] sm:$0xff] }
 0x570   :  { %6099 = vmatpush1.bf16.msra.mxu0 %v6098_v59  ;;  %v2616_v59 = vld [vmem:[#allocation8 + $0x2e0] sm:$0xff]  ;;  %v6180_v63 = vpack.c.bf16 %v2619_v55, %v2615_v54 }
 0x571   :  { %6101 = vmatprep.subr.bf16.mxu0 %v6100_v62  ;;  %v2625_v62 = vld [vmem:[#allocation8 + $0x328] sm:$0xff]  ;;  %v6118_v5 = vpack.c.bf16 %v2616_v59, %v2612_v57  ;;  %v2650_v57 = vld [vmem:[#allocation8 + $0x3f0] sm:$0xff] }
 0x572   :  { %6163 = vmatpush1.bf16.msra.mxu1 %v6162_v2  ;;  %v2618_v2 = vld [vmem:[#allocation8 + $0x2f0] sm:$0xff]  ;;  %v6120_v7 = vpack.c.bf16 %v2625_v62, %v2621_v61  ;;  %v2520_v61 = vld [vmem:[#allocation5 + $0x20] sm:$0xff]  ;;  %v2819_v62 = vld [vmem:[#allocation10 + $0x8] sm:$0xff] }
 0x573   :  { %6165 = vmatprep.subr.bf16.mxu1 %v6164_v43  ;;  %v2627_v43 = vld [vmem:[#allocation8 + $0x338] sm:$0xff]  ;;  %v6182_v12 = vpack.c.bf16 %v2618_v2, %v2614_v1  ;;  %v2818_v1 = vld [vmem:[#allocation10] sm:$0xff] }
 0x574   :  { %6103 = vmatpush1.bf16.msra.mxu0 %v6102_v11  ;;  %v2624_v11 = vld [vmem:[#allocation8 + $0x320] sm:$0xff]  ;;  %v6184_v16 = vpack.c.bf16 %v2627_v43, %v2623_v6  ;;  %v2821_v6 = vld [vmem:[#allocation10 + $0x18] sm:$0xff] }
 0x575   :  { %6105 = vmatprep.subr.bf16.mxu0 %v6104_v45  ;;  %v2633_v45 = vld [vmem:[#allocation8 + $0x368] sm:$0xff]  ;;  %v6122_v19 = vpack.c.bf16 %v2624_v11, %v2620_v9  ;;  %v2825_v43 = vld [vmem:[#allocation10 + $0x38] sm:$0xff]  ;;  %v2820_v11 = vld [vmem:[#allocation10 + $0x10] sm:$0xff] }
 0x576   :  { %6167 = vmatpush1.bf16.msra.mxu1 %v6166_v17  ;;  %v2626_v17 = vld [vmem:[#allocation8 + $0x330] sm:$0xff]  ;;  %v6124_v25 = vpack.c.bf16 %v2633_v45, %v2629_v13  ;;  %v6264_v9 = vpack.c.bf16 %v2825_v43, %v2821_v6  ;;  %v2827_v45 = vld [vmem:[#allocation10 + $0x48] sm:$0xff] }
 0x577   :  { %6169 = vmatprep.subr.bf16.mxu1 %v6168_v24  ;;  %v2635_v24 = vld [vmem:[#allocation8 + $0x378] sm:$0xff]  ;;  %v6186_v30 = vpack.c.bf16 %v2626_v17, %v2622_v14  ;;  %v2826_v14 = vld [vmem:[#allocation10 + $0x40] sm:$0xff]  ;;  %v2859_v6 = vld [vmem:[#allocation10 + $0x148] sm:$0xff] }
 0x578   :  { %6107 = vmatpush1.bf16.msra.mxu0 %v6106_v29  ;;  %v2632_v29 = vld [vmem:[#allocation8 + $0x360] sm:$0xff]  ;;  %v6188_v15 = vpack.c.bf16 %v2635_v24, %v2631_v22  ;;  %v2829_v22 = vld [vmem:[#allocation10 + $0x58] sm:$0xff]  ;;  %v2863_v43 = vld [vmem:[#allocation10 + $0x168] sm:$0xff] }
 0x579   :  { %6109 = vmatprep.subr.bf16.mxu0 %v6108_v31  ;;  %v2641_v31 = vld [vmem:[#allocation8 + $0x3a8] sm:$0xff]  ;;  %v6126_v35 = vpack.c.bf16 %v2632_v29, %v2628_v28  ;;  %v2833_v24 = vld [vmem:[#allocation10 + $0x78] sm:$0xff]  ;;  %v2828_v29 = vld [vmem:[#allocation10 + $0x50] sm:$0xff] }
 0x57a   :  { %6171 = vmatpush1.bf16.msra.mxu1 %v6170_v34  ;;  %v2634_v34 = vld [vmem:[#allocation8 + $0x370] sm:$0xff]  ;;  %v6128_v38 = vpack.c.bf16 %v2641_v31, %v2637_v58  ;;  %v6268_v28 = vpack.c.bf16 %v2833_v24, %v2829_v22  ;;  %v2835_v58 = vld [vmem:[#allocation10 + $0x88] sm:$0xff] }
 0x57b   :  { %6173 = vmatprep.subr.bf16.mxu1 %v6172_v37  ;;  %v2643_v37 = vld [vmem:[#allocation8 + $0x3b8] sm:$0xff]  ;;  %v6190_v41 = vpack.c.bf16 %v2634_v34, %v2630_v26  ;;  %v2834_v26 = vld [vmem:[#allocation10 + $0x80] sm:$0xff]  ;;  %v2867_v22 = vld [vmem:[#allocation10 + $0x188] sm:$0xff] }
 0x57c   :  { %6111 = vmatpush1.bf16.msra.mxu0 %v6110_v40  ;;  %v2640_v40 = vld [vmem:[#allocation8 + $0x3a0] sm:$0xff]  ;;  %v6192_v44 = vpack.c.bf16 %v2643_v37, %v2639_v36  ;;  %v2837_v37 = vld [vmem:[#allocation10 + $0x98] sm:$0xff]  ;;  %v2871_v24 = vld [vmem:[#allocation10 + $0x1a8] sm:$0xff] }
 0x57d   :  { %6113 = vmatprep.subr.bf16.mxu0 %v6112_v42  ;;  %v2649_v42 = vld [vmem:[#allocation8 + $0x3e8] sm:$0xff]  ;;  %v6130_v48 = vpack.c.bf16 %v2640_v40, %v2636_v39  ;;  %v2838_v34 = vld [vmem:[#allocation10 + $0xa0] sm:$0xff]  ;;  %v2836_v39 = vld [vmem:[#allocation10 + $0x90] sm:$0xff] }
 0x57e   :  { %6175 = vmatpush1.bf16.msra.mxu1 %v6174_v47  ;;  %v2642_v47 = vld [vmem:[#allocation8 + $0x3b0] sm:$0xff]  ;;  %v6132_v51 = vpack.c.bf16 %v2649_v42, %v2645_v10  ;;  %v6210_v36 = vpack.c.bf16 %v2838_v34, %v2834_v26  ;;  %v2843_v10 = vld [vmem:[#allocation10 + $0xc8] sm:$0xff] }
 0x57f   :  { %6177 = vmatprep.subr.bf16.mxu1 %v6176_v50  ;;  %v2651_v50 = vld [vmem:[#allocation8 + $0x3f8] sm:$0xff]  ;;  %v6194_v54 = vpack.c.bf16 %v2642_v47, %v2638_v46  ;;  %v2847_v42 = vld [vmem:[#allocation10 + $0xe8] sm:$0xff]  ;;  %v2842_v47 = vld [vmem:[#allocation10 + $0xc0] sm:$0xff] }
 0x580   :  { %6115 = vmatpush1.bf16.msra.mxu0 %v6114_v53  ;;  %v2648_v53 = vld [vmem:[#allocation8 + $0x3e0] sm:$0xff]  ;;  %v6196_v55 = vpack.c.bf16 %v2651_v50, %v2647_v49  ;;  %v6212_v46 = vpack.c.bf16 %v2847_v42, %v2843_v10  ;;  %v2845_v49 = vld [vmem:[#allocation10 + $0xd8] sm:$0xff]  ;;  %v2868_v34 = vld [vmem:[#allocation10 + $0x190] sm:$0xff] }
 0x581   :  { %6117 = vmatprep.subr.bf16.mxu0 %v6116_v56  ;;  %v2646_v56 = vld [vmem:[#allocation8 + $0x3d0] sm:$0xff]  ;;  %v6134_v59 = vpack.c.bf16 %v2648_v53, %v2644_v52  ;;  %v2849_v50 = vld [vmem:[#allocation10 + $0xf8] sm:$0xff]  ;;  %v2878_v10 = vld [vmem:[#allocation10 + $0x1e0] sm:$0xff] }
 0x582   :  { %6179 = vmatpush1.bf16.msra.mxu1 %v6178_v60  ;;  %v6198_v60 = vpack.c.bf16 %v2650_v57, %v2646_v56  ;;  %v2848_v52 = vld [vmem:[#allocation10 + $0xf0] sm:$0xff]  ;;  %v2855_v56 = vld [vmem:[#allocation10 + $0x128] sm:$0xff]  ;;  %v2850_v57 = vld [vmem:[#allocation10 + $0x100] sm:$0xff] }
 0x583   :  { %6181 = vmatprep.subr.bf16.mxu1 %v6180_v63  ;;  %v2823_v63 = vld [vmem:[#allocation10 + $0x28] sm:$0xff]  ;;  %v2877_v42 = vld [vmem:[#allocation10 + $0x1d8] sm:$0xff] }
 0x584   :  { %6119 = vmatpush1.bf16.msra.mxu0 %v6118_v5  ;;  %v6200_v2 = vpack.c.bf16 %v2823_v63, %v2819_v62  ;;  %v2822_v5 = vld [vmem:[#allocation10 + $0x20] sm:$0xff]  ;;  %v2853_v62 = vld [vmem:[#allocation10 + $0x118] sm:$0xff] }
 0x585   :  { %6121 = vmatprep.subr.bf16.mxu0 %v6120_v7  ;;  %v6202_v7 = vpack.c.bf16 %v2822_v5, %v2818_v1  ;;  %v2857_v63 = vld [vmem:[#allocation10 + $0x138] sm:$0xff]  ;;  %v2856_v5 = vld [vmem:[#allocation10 + $0x130] sm:$0xff] }
 0x586   :  { %6183 = vmatpush1.bf16.msra.mxu1 %v6182_v12  ;;  %v2824_v12 = vld [vmem:[#allocation10 + $0x30] sm:$0xff]  ;;  %v6280_v1 = vpack.c.bf16 %v2857_v63, %v2853_v62 }
 0x587   :  { %6185 = vmatprep.subr.bf16.mxu1 %v6184_v16  ;;  %v6266_v13 = vpack.c.bf16 %v2824_v12, %v2820_v11  ;;  %v2831_v16 = vld [vmem:[#allocation10 + $0x68] sm:$0xff]  ;;  %v2865_v11 = vld [vmem:[#allocation10 + $0x178] sm:$0xff] }
 0x588   :  { %6123 = vmatpush1.bf16.msra.mxu0 %v6122_v19  ;;  %v6204_v17 = vpack.c.bf16 %v2831_v16, %v2827_v45  ;;  %v2830_v19 = vld [vmem:[#allocation10 + $0x60] sm:$0xff] }
 0x589   :  { %6125 = vmatprep.subr.bf16.mxu0 %v6124_v25  ;;  %v6206_v25 = vpack.c.bf16 %v2830_v19, %v2826_v14  ;;  %v2858_v45 = vld [vmem:[#allocation10 + $0x140] sm:$0xff]  ;;  %v2860_v14 = vld [vmem:[#allocation10 + $0x150] sm:$0xff] }
 0x58a   :  { %6187 = vmatpush1.bf16.msra.mxu1 %v6186_v30  ;;  %v2832_v30 = vld [vmem:[#allocation10 + $0x70] sm:$0xff]  ;;  %v2862_v16 = vld [vmem:[#allocation10 + $0x160] sm:$0xff] }
 0x58b   :  { %6189 = vmatprep.subr.bf16.mxu1 %v6188_v15  ;;  %v6270_v31 = vpack.c.bf16 %v2832_v30, %v2828_v29  ;;  %v2839_v15 = vld [vmem:[#allocation10 + $0xa8] sm:$0xff]  ;;  %v2864_v19 = vld [vmem:[#allocation10 + $0x170] sm:$0xff]  ;;  %v6222_v29 = vpack.c.bf16 %v2862_v16, %v2858_v45 }
 0x58c   :  { %6127 = vmatpush1.bf16.msra.mxu0 %v6126_v35  ;;  %v6208_v35 = vpack.c.bf16 %v2839_v15, %v2835_v58  ;;  %v6286_v30 = vpack.c.bf16 %v2864_v19, %v2860_v14  ;;  %v6224_v58 = vpack.c.bf16 %v2871_v24, %v2867_v22  ;;  %v2870_v15 = vld [vmem:[#allocation10 + $0x1a0] sm:$0xff]  ;;  %v2899_v14 = vld [vmem:[#allocation10 + $0x288] sm:$0xff] }
 0x58d   :  { %6129 = vmatprep.subr.bf16.mxu0 %v6128_v38  ;;  %v2841_v38 = vld [vmem:[#allocation10 + $0xb8] sm:$0xff]  ;;  %v2898_v22 = vld [vmem:[#allocation10 + $0x280] sm:$0xff] }
 0x58e   :  { %6191 = vmatpush1.bf16.msra.mxu1 %v6190_v41  ;;  %v6272_v40 = vpack.c.bf16 %v2841_v38, %v2837_v37  ;;  %v2840_v41 = vld [vmem:[#allocation10 + $0xb0] sm:$0xff]  ;;  %v2875_v38 = vld [vmem:[#allocation10 + $0x1c8] sm:$0xff]  ;;  %v2902_v24 = vld [vmem:[#allocation10 + $0x2a0] sm:$0xff] }
 0x58f   :  { %6193 = vmatprep.subr.bf16.mxu1 %v6192_v44  ;;  %v6274_v44 = vpack.c.bf16 %v2840_v41, %v2836_v39  ;;  %v2879_v39 = vld [vmem:[#allocation10 + $0x1e8] sm:$0xff]  ;;  %v2874_v41 = vld [vmem:[#allocation10 + $0x1c0] sm:$0xff] }
 0x590   :  { %6131 = vmatpush1.bf16.msra.mxu0 %v6130_v48  ;;  %v2846_v48 = vld [vmem:[#allocation10 + $0xe0] sm:$0xff] }
 0x591   :  { %6133 = vmatprep.subr.bf16.mxu0 %v6132_v51  ;;  %v2844_v51 = vld [vmem:[#allocation10 + $0xd0] sm:$0xff]  ;;  %v6214_v53 = vpack.c.bf16 %v2846_v48, %v2842_v47 }
 0x592   :  { %6195 = vmatpush1.bf16.msra.mxu1 %v6194_v54  ;;  %v6276_v54 = vpack.c.bf16 %v2849_v50, %v2845_v49  ;;  %v2876_v47 = vld [vmem:[#allocation10 + $0x1d0] sm:$0xff] }
 0x593   :  { %6197 = vmatprep.subr.bf16.mxu1 %v6196_v55  ;;  %v2851_v55 = vld [vmem:[#allocation10 + $0x108] sm:$0xff]  ;;  %v2880_v48 = vld [vmem:[#allocation10 + $0x1f0] sm:$0xff] }
 0x594   :  { %6135 = vmatpush1.bf16.msra.mxu0 %v6134_v59  ;;  %v6278_v59 = vpack.c.bf16 %v2848_v52, %v2844_v51  ;;  %v6294_v50 = vpack.c.bf16 %v2880_v48, %v2876_v47  ;;  %v2883_v51 = vld [vmem:[#allocation10 + $0x208] sm:$0xff] }
 0x595   :  { %6201 = vmatprep.subr.bf16.mxu0 %v6200_v2  ;;  %v2852_v2 = vld [vmem:[#allocation10 + $0x110] sm:$0xff]  ;;  %v2887_v52 = vld [vmem:[#allocation10 + $0x228] sm:$0xff] }
 0x596   :  { %6199 = vmatpush1.bf16.msra.mxu1 %v6198_v60  ;;  %v6216_v60 = vpack.c.bf16 %v2855_v56, %v2851_v55  ;;  %v6282_v12 = vpack.c.bf16 %v2856_v5, %v2852_v2  ;;  %v2886_v55 = vld [vmem:[#allocation10 + $0x220] sm:$0xff]  ;;  %v2885_v56 = vld [vmem:[#allocation10 + $0x218] sm:$0xff]  ;;  %v2895_v2 = vld [vmem:[#allocation10 + $0x268] sm:$0xff] }
 0x597   :  { %2717 = vmatmul.mubr.f32.vlgmr.msra.gmra.mrb[16].mxu0 %v2520_v61  ;;  %6265 = vmatprep.subr.bf16.mxu1 %v6264_v9  ;;  %v2861_v9 = vld [vmem:[#allocation10 + $0x158] sm:$0xff]  ;;  %v2919_v47 = vld [vmem:[#allocation10 + $0x328] sm:$0xff] }
 0x598   :  { %6203 = vmatpush1.bf16.msra.mxu0 %v6202_v7 }
 0x599   :  { %2788 = vmatmul.mubr.f32.vlgmr.msra.gmra.mrb[16].mxu1 %v2520_v61  ;;  %6205 = vmatprep.subr.bf16.mxu0 %v6204_v17  ;;  %v2854_v61 = vld [vmem:[#allocation10 + $0x120] sm:$0xff]  ;;  %v6284_v17 = vpack.c.bf16 %v2865_v11, %v2861_v9  ;;  %v2897_v11 = vld [vmem:[#allocation10 + $0x278] sm:$0xff] }
 0x59a   :  { %6267 = vmatpush1.bf16.msra.mxu1 %v6266_v13  ;;  %v6218_v7 = vpack.c.bf16 %v2854_v61, %v2850_v57  ;;  %v6220_v13 = vpack.c.bf16 %v2863_v43, %v2859_v6  ;;  %v2888_v61 = vld [vmem:[#allocation10 + $0x230] sm:$0xff]  ;;  %v2890_v6 = vld [vmem:[#allocation10 + $0x240] sm:$0xff] }
 0x59b   :  { %6269 = vmatprep.subr.bf16.mxu1 %v6268_v28  ;;  %v2873_v28 = vld [vmem:[#allocation10 + $0x1b8] sm:$0xff]  ;;  %v2894_v43 = vld [vmem:[#allocation10 + $0x260] sm:$0xff] }
 0x59c   :  { %6207 = vmatpush1.bf16.msra.mxu0 %v6206_v25  ;;  %v2869_v25 = vld [vmem:[#allocation10 + $0x198] sm:$0xff]  ;;  %v6238_v9 = vpack.c.bf16 %v2894_v43, %v2890_v6  ;;  %v2924_v6 = vld [vmem:[#allocation10 + $0x350] sm:$0xff] }
 0x59d   :  { %6209 = vmatprep.subr.bf16.mxu0 %v6208_v35  ;;  %v6288_v26 = vpack.c.bf16 %v2873_v28, %v2869_v25  ;;  %v2872_v35 = vld [vmem:[#allocation10 + $0x1b0] sm:$0xff]  ;;  %v2901_v25 = vld [vmem:[#allocation10 + $0x298] sm:$0xff]  ;;  %v6242_v28 = vpack.c.bf16 %v2902_v24, %v2898_v22 }
 0x59e   :  { %6271 = vmatpush1.bf16.msra.mxu1 %v6270_v31  ;;  %v2866_v31 = vld [vmem:[#allocation10 + $0x180] sm:$0xff]  ;;  %v6290_v37 = vpack.c.bf16 %v2872_v35, %v2868_v34  ;;  %v2911_v34 = vld [vmem:[#allocation10 + $0x2e8] sm:$0xff]  ;;  %v2928_v43 = vld [vmem:[#allocation10 + $0x370] sm:$0xff] }
 0x59f   :  { %6273 = vmatprep.subr.bf16.mxu1 %v6272_v40  ;;  %v6228_v40 = vpack.c.bf16 %v2879_v39, %v2875_v38  ;;  %v2909_v38 = vld [vmem:[#allocation10 + $0x2d8] sm:$0xff]  ;;  %v2932_v22 = vld [vmem:[#allocation10 + $0x390] sm:$0xff] }
 0x5a0   :  { %6211 = vmatpush1.bf16.msra.mxu0 %v6210_v36  ;;  %v6226_v36 = vpack.c.bf16 %v2870_v15, %v2866_v31  ;;  %v2936_v24 = vld [vmem:[#allocation10 + $0x3b0] sm:$0xff] }
 0x5a1   :  { %6213 = vmatprep.subr.bf16.mxu0 %v6212_v46  ;;  %v2881_v46 = vld [vmem:[#allocation10 + $0x1f8] sm:$0xff] }
 0x5a2   :  { %6275 = vmatpush1.bf16.msra.mxu1 %v6274_v44  ;;  %v6230_v44 = vpack.c.bf16 %v2878_v10, %v2874_v41  ;;  %v6292_v49 = vpack.c.bf16 %v2881_v46, %v2877_v42  ;;  %v2908_v41 = vld [vmem:[#allocation10 + $0x2d0] sm:$0xff]  ;;  %v2915_v46 = vld [vmem:[#allocation10 + $0x308] sm:$0xff] }
 0x5a3   :  { %6277 = vmatprep.subr.bf16.mxu1 %v6276_v54  ;;  %v2882_v54 = vld [vmem:[#allocation10 + $0x200] sm:$0xff]  ;;  %v2912_v10 = vld [vmem:[#allocation10 + $0x2f0] sm:$0xff]  ;;  %v6248_v48 = vpack.c.bf16 %v2919_v47, %v2915_v46 }
 0x5a4   :  { %6215 = vmatpush1.bf16.msra.mxu0 %v6214_v53  ;;  %v6232_v53 = vpack.c.bf16 %v2887_v52, %v2883_v51  ;;  %v6234_v57 = vpack.c.bf16 %v2886_v55, %v2882_v54  ;;  %v2917_v51 = vld [vmem:[#allocation10 + $0x318] sm:$0xff]  ;;  %v2916_v54 = vld [vmem:[#allocation10 + $0x310] sm:$0xff] }
 0x5a5   :  { %6217 = vmatprep.subr.bf16.mxu0 %v6216_v60  ;;  %v2884_v60 = vld [vmem:[#allocation10 + $0x210] sm:$0xff] }
 0x5a6   :  { %6279 = vmatpush1.bf16.msra.mxu1 %v6278_v59  ;;  %v2889_v59 = vld [vmem:[#allocation10 + $0x238] sm:$0xff]  ;;  %v6298_v63 = vpack.c.bf16 %v2888_v61, %v2884_v60  ;;  %v2920_v55 = vld [vmem:[#allocation10 + $0x330] sm:$0xff]  ;;  %v2927_v60 = vld [vmem:[#allocation10 + $0x368] sm:$0xff] }
 0x5a7   :  { %6281 = vmatprep.subr.bf16.mxu1 %v6280_v1  ;;  %v6296_v62 = vpack.c.bf16 %v2889_v59, %v2885_v56  ;;  %v2891_v1 = vld [vmem:[#allocation10 + $0x248] sm:$0xff] }
 0x5a8   :  { %6219 = vmatpush1.bf16.msra.mxu0 %v6218_v7  ;;  %v6236_v5 = vpack.c.bf16 %v2895_v2, %v2891_v1  ;;  %v2893_v7 = vld [vmem:[#allocation10 + $0x258] sm:$0xff]  ;;  %v2923_v59 = vld [vmem:[#allocation10 + $0x348] sm:$0xff] }
 0x5a9   :  { %6221 = vmatprep.subr.bf16.mxu0 %v6220_v13  ;;  %v2896_v13 = vld [vmem:[#allocation10 + $0x270] sm:$0xff]  ;;  %v6300_v45 = vpack.c.bf16 %v2897_v11, %v2893_v7  ;;  %v6252_v61 = vpack.c.bf16 %v2927_v60, %v2923_v59  ;;  %v2925_v1 = vld [vmem:[#allocation10 + $0x358] sm:$0xff]  ;;  %v2931_v11 = vld [vmem:[#allocation10 + $0x388] sm:$0xff] }
 0x5aa   :  { %6283 = vmatpush1.bf16.msra.mxu1 %v6282_v12  ;;  %v2892_v12 = vld [vmem:[#allocation10 + $0x250] sm:$0xff] }
 0x5ab   :  { %6285 = vmatprep.subr.bf16.mxu1 %v6284_v17  ;;  %v6302_v16 = vpack.c.bf16 %v2896_v13, %v2892_v12  ;;  %v2903_v17 = vld [vmem:[#allocation10 + $0x2a8] sm:$0xff] }
 0x5ac   :  { %6223 = vmatpush1.bf16.msra.mxu0 %v6222_v29  ;;  %v6240_v19 = vpack.c.bf16 %v2903_v17, %v2899_v14  ;;  %v2905_v29 = vld [vmem:[#allocation10 + $0x2b8] sm:$0xff]  ;;  %v2935_v12 = vld [vmem:[#allocation10 + $0x3a8] sm:$0xff] }
 0x5ad   :  { %6225 = vmatprep.subr.bf16.mxu0 %v6224_v58  ;;  %v2904_v58 = vld [vmem:[#allocation10 + $0x2b0] sm:$0xff]  ;;  %v6304_v31 = vpack.c.bf16 %v2905_v29, %v2901_v25  ;;  %v6256_v13 = vpack.c.bf16 %v2935_v12, %v2931_v11  ;;  %v2933_v14 = vld [vmem:[#allocation10 + $0x398] sm:$0xff]  ;;  %v2939_v29 = vld [vmem:[#allocation10 + $0x3c8] sm:$0xff] }
 0x5ae   :  { %6287 = vmatpush1.bf16.msra.mxu1 %v6286_v30  ;;  %v2900_v30 = vld [vmem:[#allocation10 + $0x290] sm:$0xff] }
 0x5af   :  { %6289 = vmatprep.subr.bf16.mxu1 %v6288_v26  ;;  %v6306_v15 = vpack.c.bf16 %v2904_v58, %v2900_v30  ;;  %v2907_v26 = vld [vmem:[#allocation10 + $0x2c8] sm:$0xff] }
 0x5b0   :  { %6227 = vmatpush1.bf16.msra.mxu0 %v6226_v36  ;;  %v6244_v35 = vpack.c.bf16 %v2911_v34, %v2907_v26  ;;  %v2906_v36 = vld [vmem:[#allocation10 + $0x2c0] sm:$0xff]  ;;  %v2943_v30 = vld [vmem:[#allocation10 + $0x3e8] sm:$0xff]  ;;  %v2941_v26 = vld [vmem:[#allocation10 + $0x3d8] sm:$0xff] }
 0x5b1   :  { %6229 = vmatprep.subr.bf16.mxu0 %v6228_v40  ;;  %v2913_v40 = vld [vmem:[#allocation10 + $0x2f8] sm:$0xff]  ;;  %v6260_v58 = vpack.c.bf16 %v2943_v30, %v2939_v29 }
 0x5b2   :  { %6291 = vmatpush1.bf16.msra.mxu1 %v6290_v37  ;;  %v2910_v37 = vld [vmem:[#allocation10 + $0x2e0] sm:$0xff]  ;;  %v6308_v42 = vpack.c.bf16 %v2913_v40, %v2909_v38  ;;  %v3115_v40 = vld [vmem:[#allocation8 + $0x8] sm:$0xff] }
 0x5b3   :  { %6293 = vmatprep.subr.bf16.mxu1 %v6292_v49  ;;  %v6246_v39 = vpack.c.bf16 %v2910_v37, %v2906_v36  ;;  %v2914_v49 = vld [vmem:[#allocation10 + $0x300] sm:$0xff]  ;;  %v2940_v36 = vld [vmem:[#allocation10 + $0x3d0] sm:$0xff] }
 0x5b4   :  { %6231 = vmatpush1.bf16.msra.mxu0 %v6230_v44  ;;  %v6310_v44 = vpack.c.bf16 %v2912_v10, %v2908_v41  ;;  %v2944_v37 = vld [vmem:[#allocation10 + $0x3f0] sm:$0xff]  ;;  %v3119_v41 = vld [vmem:[#allocation8 + $0x28] sm:$0xff] }
 0x5b5   :  { %6233 = vmatprep.subr.bf16.mxu0 %v6232_v53  ;;  %v2921_v53 = vld [vmem:[#allocation10 + $0x338] sm:$0xff]  ;;  %v6328_v10 = vpack.c.bf16 %v3119_v41, %v3115_v40  ;;  %v3114_v41 = vld [vmem:[#allocation8] sm:$0xff] }
 0x5b6   :  { %6295 = vmatpush1.bf16.msra.mxu1 %v6294_v50  ;;  %v2918_v50 = vld [vmem:[#allocation10 + $0x320] sm:$0xff]  ;;  %v6312_v56 = vpack.c.bf16 %v2921_v53, %v2917_v51 }
 0x5b7   :  { %6297 = vmatprep.subr.bf16.mxu1 %v6296_v62  ;;  %v6250_v52 = vpack.c.bf16 %v2918_v50, %v2914_v49  ;;  %v2922_v62 = vld [vmem:[#allocation10 + $0x340] sm:$0xff] }
 0x5b8   :  { %6235 = vmatpush1.bf16.msra.mxu0 %v6234_v57  ;;  %v6314_v57 = vpack.c.bf16 %v2920_v55, %v2916_v54 }
 0x5b9   :  { %6237 = vmatprep.subr.bf16.mxu0 %v6236_v5  ;;  %v2929_v5 = vld [vmem:[#allocation10 + $0x378] sm:$0xff] }
 0x5ba   :  { %6299 = vmatpush1.bf16.msra.mxu1 %v6298_v63  ;;  %v2926_v63 = vld [vmem:[#allocation10 + $0x360] sm:$0xff]  ;;  %v6316_v7 = vpack.c.bf16 %v2929_v5, %v2925_v1 }
 0x5bb   :  { %6301 = vmatprep.subr.bf16.mxu1 %v6300_v45  ;;  %v6254_v2 = vpack.c.bf16 %v2926_v63, %v2922_v62  ;;  %v2930_v45 = vld [vmem:[#allocation10 + $0x380] sm:$0xff] }
 0x5bc   :  { %6239 = vmatpush1.bf16.msra.mxu0 %v6238_v9  ;;  %v6318_v9 = vpack.c.bf16 %v2928_v43, %v2924_v6 }
 0x5bd   :  { %6241 = vmatprep.subr.bf16.mxu0 %v6240_v19  ;;  %v2937_v19 = vld [vmem:[#allocation10 + $0x3b8] sm:$0xff] }
 0x5be   :  { %6303 = vmatpush1.bf16.msra.mxu1 %v6302_v16  ;;  %v2934_v16 = vld [vmem:[#allocation10 + $0x3a0] sm:$0xff]  ;;  %v6320_v25 = vpack.c.bf16 %v2937_v19, %v2933_v14 }
 0x5bf   :  { %6305 = vmatprep.subr.bf16.mxu1 %v6304_v31  ;;  %v6258_v17 = vpack.c.bf16 %v2934_v16, %v2930_v45  ;;  %v2938_v31 = vld [vmem:[#allocation10 + $0x3c0] sm:$0xff] }
 0x5c0   :  { %6243 = vmatpush1.bf16.msra.mxu0 %v6242_v28  ;;  %v6322_v28 = vpack.c.bf16 %v2936_v24, %v2932_v22 }
 0x5c1   :  { %6245 = vmatprep.subr.bf16.mxu0 %v6244_v35  ;;  %v2945_v35 = vld [vmem:[#allocation10 + $0x3f8] sm:$0xff] }
 0x5c2   :  { %6307 = vmatpush1.bf16.msra.mxu1 %v6306_v15  ;;  %v2942_v15 = vld [vmem:[#allocation10 + $0x3e0] sm:$0xff]  ;;  %v6324_v38 = vpack.c.bf16 %v2945_v35, %v2941_v26 }
 0x5c3   :  { %6309 = vmatprep.subr.bf16.mxu1 %v6308_v42  ;;  %v6262_v34 = vpack.c.bf16 %v2942_v15, %v2938_v31  ;;  %v3117_v42 = vld [vmem:[#allocation8 + $0x18] sm:$0xff] }
 0x5c4   :  { %6247 = vmatpush1.bf16.msra.mxu0 %v6246_v39  ;;  %v6326_v39 = vpack.c.bf16 %v2944_v37, %v2940_v36 }
 0x5c5   :  { %6249 = vmatprep.subr.bf16.mxu0 %v6248_v48 }
 0x5c6   :  { %6311 = vmatpush1.bf16.msra.mxu1 %v6310_v44  ;;  %v3121_v44 = vld [vmem:[#allocation8 + $0x38] sm:$0xff] }
 0x5c7   :  { %6313 = vmatprep.subr.bf16.mxu1 %v6312_v56  ;;  %v6392_v46 = vpack.c.bf16 %v3121_v44, %v3117_v42  ;;  %v3123_v42 = vld [vmem:[#allocation8 + $0x48] sm:$0xff] }
 0x5c8   :  { %6251 = vmatpush1.bf16.msra.mxu0 %v6250_v52  ;;  %v3127_v44 = vld [vmem:[#allocation8 + $0x68] sm:$0xff] }
 0x5c9   :  { %6253 = vmatprep.subr.bf16.mxu0 %v6252_v61 }
 0x5ca   :  { %6315 = vmatpush1.bf16.msra.mxu1 %v6314_v57 }
 0x5cb   :  { %6317 = vmatprep.subr.bf16.mxu1 %v6316_v7 }
 0x5cc   :  { %6255 = vmatpush1.bf16.msra.mxu0 %v6254_v2 }
 0x5cd   :  { %6257 = vmatprep.subr.bf16.mxu0 %v6256_v13 }
 0x5ce   :  { %6319 = vmatpush1.bf16.msra.mxu1 %v6318_v9 }
 0x5cf   :  { %6321 = vmatprep.subr.bf16.mxu1 %v6320_v25 }
 0x5d0   :  { %6259 = vmatpush1.bf16.msra.mxu0 %v6258_v17 }
 0x5d1   :  { %6261 = vmatprep.subr.bf16.mxu0 %v6260_v58 }
 0x5d2   :  { %6323 = vmatpush1.bf16.msra.mxu1 %v6322_v28 }
 0x5d3   :  { %6325 = vmatprep.subr.bf16.mxu1 %v6324_v38 }
 0x5d4   :  { %6263 = vmatpush1.bf16.msra.mxu0 %v6262_v34 }
 0x5d5   :  { %6329 = vmatprep.subr.bf16.mxu0 %v6328_v10  ;;  %v3118_v10 = vld [vmem:[#allocation8 + $0x20] sm:$0xff] }
 0x5d6   :  { %6327 = vmatpush1.bf16.msra.mxu1 %v6326_v39 }
 0x5d7   :  { %6393 = vmatprep.subr.bf16.mxu1 %v6392_v46 }
 0x62a   :  { %v2422_v47 = vpop.f32.mrb[14].mxu0  ;;  %v2493_v48 = vpop.f32.mrb[14].mxu1 }
 0x62b   :  { %v2423_v49 = vadd.f32 %v2422_v47, %v7630_v3  ;;  %v2424_v50 = vpop.f32.mrb[15].mxu0  ;;  %v2495_v51 = vpop.f32.mrb[15].mxu1  ;;  %v2494_v55 = vadd.f32 %v2493_v48, %v7639_v8  ;;  %v3116_v47 = vld [vmem:[#allocation8 + $0x10] sm:$0xff] }
 0x62c   :  { %v2425_v52 = vadd.f32 %v2424_v50, %v7634_v4  ;;  %v2496_v56 = vadd.f32 %v2495_v51, %v7645_v18  ;;  %v3120_v48 = vld [vmem:[#allocation8 + $0x30] sm:$0xff]  ;;  %v6330_v50 = vpack.c.bf16 %v3118_v10, %v3114_v41  ;;  %v3125_v51 = vld [vmem:[#allocation8 + $0x58] sm:$0xff]  ;;  %v3159_v41 = vld [vmem:[#allocation8 + $0x168] sm:$0xff] }
 0x62d   :  { %v2498_v53 = vmul.f32 0.5, %v2423_v49 }
 0x62e   :  { %v2502_v54 = vmul.f32 0.5, %v2425_v52  ;;  %v2507_v57 = vmul.f32 0.5, %v2496_v56  ;;  %v3129_v52 = vld [vmem:[#allocation8 + $0x78] sm:$0xff]  ;;  %v6394_v56 = vpack.c.bf16 %v3120_v48, %v3116_v47 }
 0x62f   :  { %7206 = vtanh.f32 %v2498_v53  ;;  %v3157_v47 = vld [vmem:[#allocation8 + $0x158] sm:$0xff] }
 0x630   :  { %7208 = vtanh.f32 %v2502_v54  ;;  %v6332_v54 = vpack.c.bf16 %v3127_v44, %v3123_v42  ;;  %v3148_v42 = vld [vmem:[#allocation8 + $0x110] sm:$0xff]  ;;  %v3161_v48 = vld [vmem:[#allocation8 + $0x178] sm:$0xff] }
 0x631   :  { %7210 = vtanh.f32 %v2494_v55  ;;  %v3126_v55 = vld [vmem:[#allocation8 + $0x60] sm:$0xff]  ;;  %v3152_v44 = vld [vmem:[#allocation8 + $0x130] sm:$0xff] }
 0x632   :  { %7212 = vtanh.f32 %v2507_v57  ;;  %v3131_v57 = vld [vmem:[#allocation8 + $0x88] sm:$0xff] }
 0x639   :  { %v7207_v59 = vpop.eup %7206 }
 0x63a   :  { %v7209_v60 = vpop.eup %7208  ;;  %v2500_v61 = vmul.f32 0.5, %v7207_v59  ;;  %v3135_v59 = vld [vmem:[#allocation8 + $0xa8] sm:$0xff] }
 0x63b   :  { %v2504_v62 = vmul.f32 0.5, %v7209_v60  ;;  %v7211_v1 = vpop.eup %7210  ;;  %v6396_v60 = vpack.c.bf16 %v3129_v52, %v3125_v51  ;;  %v3158_v51 = vld [vmem:[#allocation8 + $0x160] sm:$0xff]  ;;  %v6410_v52 = vpack.c.bf16 %v3152_v44, %v3148_v42 }
 0x63c   :  { %v2501_v63 = vadd.f32 0.5, %v2500_v61  ;;  %v7213_v7 = vpop.eup %7212  ;;  %v3124_v61 = vld [vmem:[#allocation8 + $0x50] sm:$0xff]  ;;  %v3186_v44 = vld [vmem:[#allocation8 + $0x240] sm:$0xff] }
 0x63d   :  { %v2505_v2 = vadd.f32 0.5, %v2504_v62  ;;  %v2509_v9 = vmul.f32 0.5, %v7213_v7  ;;  %v3128_v62 = vld [vmem:[#allocation8 + $0x70] sm:$0xff]  ;;  %v3134_v7 = vld [vmem:[#allocation8 + $0xa0] sm:$0xff] }
 0x63e   :  { %v2513_v5 = vmul.f32 %v7211_v1, %v2501_v63  ;;  %v3133_v1 = vld [vmem:[#allocation8 + $0x98] sm:$0xff] }
 0x63f   :  { %v2512_v6 = vmul.f32 %v2505_v2, %v7680_v32  ;;  %v2510_v11 = vadd.f32 0.5, %v2509_v9  ;;  %v3137_v2 = vld [vmem:[#allocation8 + $0xb8] sm:$0xff]  ;;  %v6398_v9 = vpack.c.bf16 %v3128_v62, %v3124_v61  ;;  %v3162_v62 = vld [vmem:[#allocation8 + $0x180] sm:$0xff] }
 0x641   :  { %v7696_v43 = vadd.f32 %v2513_v5, %v2512_v6  ;;  %v6336_v5 = vpack.c.bf16 %v3135_v59, %v3131_v57  ;;  %v3130_v6 = vld [vmem:[#allocation8 + $0x80] sm:$0xff]  ;;  %v3165_v59 = vld [vmem:[#allocation8 + $0x198] sm:$0xff] }
 0x643   :  { %7214 = vtanh.f32 %v7696_v43 }
 0x64d   :  { %v7215_v12 = vpop.eup %7214 }
 0x64e   :  { %v2516_v13 = vmul.f32 %v7215_v12, %v2510_v11  ;;  %v3139_v11 = vld [vmem:[#allocation8 + $0xc8] sm:$0xff] }
 0x64f   :  { %v3143_v12 = vld [vmem:[#allocation8 + $0xe8] sm:$0xff] }
 0x650   :  { %3010 = vmatprep.mubr.f32.mxu0 %v2516_v13  ;;  %3081 = vmatprep.mubr.f32.mxu1 %v2516_v13  ;;  %v6400_v13 = vpack.c.bf16 %v3137_v2, %v3133_v1  ;;  %v3171_v2 = vld [vmem:[#allocation8 + $0x1c8] sm:$0xff] }
 0x66a   :  { %v2718_v45 = vpop.f32.mrb[16].mxu0 }
 0x66b   :  { %v2719_v16 = vadd.f32 %v2718_v45, %v7606_v20  ;;  %v2720_v14 = vpop.f32.mrb[17].mxu0  ;;  %v3132_v45 = vld [vmem:[#allocation8 + $0x90] sm:$0xff] }
 0x66c   :  { %v2721_v17 = vadd.f32 %v2720_v14, %v7610_v21  ;;  %v2789_v19 = vpop.f32.mrb[16].mxu1  ;;  %v6338_v14 = vpack.c.bf16 %v3134_v7, %v3130_v6  ;;  %v3164_v7 = vld [vmem:[#allocation8 + $0x190] sm:$0xff] }
 0x66d   :  { %v2794_v22 = vmul.f32 0.5, %v2719_v16  ;;  %v2790_v32 = vadd.f32 %v2789_v19, %v7614_v23  ;;  %v2791_v24 = vpop.f32.mrb[17].mxu1  ;;  %v3136_v16 = vld [vmem:[#allocation8 + $0xb0] sm:$0xff]  ;;  %v3145_v19 = vld [vmem:[#allocation8 + $0xf8] sm:$0xff] }
 0x66e   :  { %v2798_v25 = vmul.f32 0.5, %v2721_v17  ;;  %v2792_v28 = vadd.f32 %v2791_v24, %v7622_v33  ;;  %v3141_v17 = vld [vmem:[#allocation8 + $0xd8] sm:$0xff]  ;;  %v3142_v24 = vld [vmem:[#allocation8 + $0xe0] sm:$0xff] }
 0x66f   :  { %7216 = vtanh.f32 %v2794_v22  ;;  %v6340_v22 = vpack.c.bf16 %v3143_v12, %v3139_v11  ;;  %v3173_v12 = vld [vmem:[#allocation8 + $0x1d8] sm:$0xff] }
 0x670   :  { %7218 = vtanh.f32 %v2798_v25  ;;  %v2803_v29 = vmul.f32 0.5, %v2792_v28  ;;  %v6402_v25 = vpack.c.bf16 %v3136_v16, %v3132_v45  ;;  %v3147_v28 = vld [vmem:[#allocation8 + $0x108] sm:$0xff]  ;;  %v3170_v16 = vld [vmem:[#allocation8 + $0x1c0] sm:$0xff] }
 0x671   :  { %7220 = vtanh.f32 %v2790_v32  ;;  %v3138_v32 = vld [vmem:[#allocation8 + $0xc0] sm:$0xff] }
 0x672   :  { %7222 = vtanh.f32 %v2803_v29  ;;  %v3151_v29 = vld [vmem:[#allocation8 + $0x128] sm:$0xff] }
 0x679   :  { %v7217_v30 = vpop.eup %7216 }
 0x67a   :  { %v7219_v58 = vpop.eup %7218  ;;  %v2796_v31 = vmul.f32 0.5, %v7217_v30  ;;  %v6404_v30 = vpack.c.bf16 %v3145_v19, %v3141_v17  ;;  %v3179_v19 = vld [vmem:[#allocation8 + $0x208] sm:$0xff] }
 0x67b   :  { %v7221_v15 = vpop.eup %7220  ;;  %v2800_v26 = vmul.f32 0.5, %v7219_v58  ;;  %v3140_v58 = vld [vmem:[#allocation8 + $0xd0] sm:$0xff] }
 0x67c   :  { %v2797_v34 = vadd.f32 0.5, %v2796_v31  ;;  %v7223_v39 = vpop.eup %7222  ;;  %v3144_v31 = vld [vmem:[#allocation8 + $0xf0] sm:$0xff] }
 0x67d   :  { %v2801_v35 = vadd.f32 0.5, %v2800_v26  ;;  %v2805_v40 = vmul.f32 0.5, %v7223_v39  ;;  %v3149_v26 = vld [vmem:[#allocation8 + $0x118] sm:$0xff]  ;;  %v6406_v39 = vpack.c.bf16 %v3144_v31, %v3140_v58  ;;  %v3178_v31 = vld [vmem:[#allocation8 + $0x200] sm:$0xff] }
 0x67e   :  { %v2809_v36 = vmul.f32 %v7221_v15, %v2797_v34  ;;  %v6342_v15 = vpack.c.bf16 %v3142_v24, %v3138_v32  ;;  %v3153_v34 = vld [vmem:[#allocation8 + $0x138] sm:$0xff]  ;;  %v3172_v24 = vld [vmem:[#allocation8 + $0x1d0] sm:$0xff] }
 0x67f   :  { %v2808_v37 = vmul.f32 %v2801_v35, %v7688_v27  ;;  %v2806_v46 = vadd.f32 0.5, %v2805_v40  ;;  %v3122_v27 = vld [vmem:[#allocation8 + $0x40] sm:$0xff]  ;;  %v6344_v35 = vpack.c.bf16 %v3151_v29, %v3147_v28  ;;  %v3155_v40 = vld [vmem:[#allocation8 + $0x148] sm:$0xff]  ;;  %v6408_v10 = vpack.c.bf16 %v3153_v34, %v3149_v26  ;;  %v3181_v29 = vld [vmem:[#allocation8 + $0x218] sm:$0xff] }
 0x680   :  { %v6334_v63 = vpack.c.bf16 %v3126_v55, %v3122_v27  ;;  %v6412_v27 = vpack.c.bf16 %v3161_v48, %v3157_v47  ;;  %v3156_v55 = vld [vmem:[#allocation8 + $0x150] sm:$0xff]  ;;  %v3187_v34 = vld [vmem:[#allocation8 + $0x248] sm:$0xff] }
 0x681   :  { %v7704_v38 = vadd.f32 %v2809_v36, %v2808_v37  ;;  %v3146_v36 = vld [vmem:[#allocation8 + $0x100] sm:$0xff]  ;;  %v3195_v48 = vld [vmem:[#allocation8 + $0x288] sm:$0xff] }
 0x682   :  { %v3150_v37 = vld [vmem:[#allocation8 + $0x120] sm:$0xff] }
 0x683   :  { %7224 = vtanh.f32 %v7704_v38 }
 0x68d   :  { %v7225_v49 = vpop.eup %7224 }
 0x68e   :  { %v2812_v53 = vmul.f32 %v7225_v49, %v2806_v46  ;;  %v6346_v46 = vpack.c.bf16 %v3150_v37, %v3146_v36  ;;  %v6348_v49 = vpack.c.bf16 %v3159_v41, %v3155_v40  ;;  %v3180_v37 = vld [vmem:[#allocation8 + $0x210] sm:$0xff]  ;;  %v3189_v41 = vld [vmem:[#allocation8 + $0x258] sm:$0xff] }
 0x690   :  { %3011 = vmatmul.mubr.f32.vlgmr.msra.gmra.mrb[18].mxu0 %v2812_v53  ;;  %3082 = vmatmul.mubr.f32.vlgmr.msra.gmra.mrb[18].mxu1 %v2812_v53 }
 0x691   :  { %6331 = vmatpush1.bf16.msra.mxu0 %v6330_v50  ;;  %3306 = vmatprep.mubr.f32.mxu0 %v2812_v53  ;;  %v3154_v50 = vld [vmem:[#allocation8 + $0x140] sm:$0xff] }
 0x692   :  { %3377 = vmatprep.mubr.f32.mxu1 %v2812_v53  ;;  %6333 = vmatprep.subr.bf16.mxu0 %v6332_v54  ;;  %v3163_v53 = vld [vmem:[#allocation8 + $0x188] sm:$0xff]  ;;  %v6350_v57 = vpack.c.bf16 %v3158_v51, %v3154_v50  ;;  %v3188_v51 = vld [vmem:[#allocation8 + $0x250] sm:$0xff] }
 0x693   :  { %6395 = vmatpush1.bf16.msra.mxu1 %v6394_v56  ;;  %v3167_v54 = vld [vmem:[#allocation8 + $0x1a8] sm:$0xff]  ;;  %v3160_v56 = vld [vmem:[#allocation8 + $0x170] sm:$0xff] }
 0x694   :  { %6397 = vmatprep.subr.bf16.mxu1 %v6396_v60  ;;  %v3169_v60 = vld [vmem:[#allocation8 + $0x1b8] sm:$0xff]  ;;  %v6352_v61 = vpack.c.bf16 %v3167_v54, %v3163_v53  ;;  %v6414_v1 = vpack.c.bf16 %v3160_v56, %v3156_v55  ;;  %v3194_v56 = vld [vmem:[#allocation8 + $0x280] sm:$0xff] }
 0x695   :  { %6335 = vmatpush1.bf16.msra.mxu0 %v6334_v63  ;;  %v3166_v63 = vld [vmem:[#allocation8 + $0x1a0] sm:$0xff]  ;;  %v6416_v6 = vpack.c.bf16 %v3169_v60, %v3165_v59  ;;  %v3197_v54 = vld [vmem:[#allocation8 + $0x298] sm:$0xff]  ;;  %v3203_v60 = vld [vmem:[#allocation8 + $0x2c8] sm:$0xff] }
 0x696   :  { %6337 = vmatprep.subr.bf16.mxu0 %v6336_v5  ;;  %v3175_v5 = vld [vmem:[#allocation8 + $0x1e8] sm:$0xff]  ;;  %v6354_v11 = vpack.c.bf16 %v3166_v63, %v3162_v62  ;;  %v3196_v63 = vld [vmem:[#allocation8 + $0x290] sm:$0xff] }
 0x697   :  { %6399 = vmatpush1.bf16.msra.mxu1 %v6398_v9  ;;  %v3168_v9 = vld [vmem:[#allocation8 + $0x1b0] sm:$0xff]  ;;  %v6356_v45 = vpack.c.bf16 %v3175_v5, %v3171_v2  ;;  %v3205_v5 = vld [vmem:[#allocation8 + $0x2d8] sm:$0xff] }
 0x698   :  { %6401 = vmatprep.subr.bf16.mxu1 %v6400_v13  ;;  %v3177_v13 = vld [vmem:[#allocation8 + $0x1f8] sm:$0xff]  ;;  %v6418_v17 = vpack.c.bf16 %v3168_v9, %v3164_v7  ;;  %v3202_v9 = vld [vmem:[#allocation8 + $0x2c0] sm:$0xff] }
 0x699   :  { %6339 = vmatpush1.bf16.msra.mxu0 %v6338_v14  ;;  %v3174_v14 = vld [vmem:[#allocation8 + $0x1e0] sm:$0xff]  ;;  %v6420_v32 = vpack.c.bf16 %v3177_v13, %v3173_v12  ;;  %v3211_v13 = vld [vmem:[#allocation8 + $0x308] sm:$0xff] }
 0x69a   :  { %6341 = vmatprep.subr.bf16.mxu0 %v6340_v22  ;;  %v3183_v22 = vld [vmem:[#allocation8 + $0x228] sm:$0xff]  ;;  %v6358_v28 = vpack.c.bf16 %v3174_v14, %v3170_v16  ;;  %v3204_v14 = vld [vmem:[#allocation8 + $0x2d0] sm:$0xff] }
 0x69b   :  { %6403 = vmatpush1.bf16.msra.mxu1 %v6402_v25  ;;  %v3176_v25 = vld [vmem:[#allocation8 + $0x1f0] sm:$0xff]  ;;  %v6360_v58 = vpack.c.bf16 %v3183_v22, %v3179_v19  ;;  %v3213_v22 = vld [vmem:[#allocation8 + $0x318] sm:$0xff] }
 0x69c   :  { %6405 = vmatprep.subr.bf16.mxu1 %v6404_v30  ;;  %v3185_v30 = vld [vmem:[#allocation8 + $0x238] sm:$0xff]  ;;  %v6422_v26 = vpack.c.bf16 %v3176_v25, %v3172_v24  ;;  %v3210_v25 = vld [vmem:[#allocation8 + $0x300] sm:$0xff] }
 0x69d   :  { %6343 = vmatpush1.bf16.msra.mxu0 %v6342_v15  ;;  %v3182_v15 = vld [vmem:[#allocation8 + $0x220] sm:$0xff]  ;;  %v6424_v36 = vpack.c.bf16 %v3185_v30, %v3181_v29  ;;  %v3219_v30 = vld [vmem:[#allocation8 + $0x348] sm:$0xff] }
 0x69e   :  { %6345 = vmatprep.subr.bf16.mxu0 %v6344_v35  ;;  %v3191_v35 = vld [vmem:[#allocation8 + $0x268] sm:$0xff]  ;;  %v6362_v40 = vpack.c.bf16 %v3182_v15, %v3178_v31  ;;  %v3212_v15 = vld [vmem:[#allocation8 + $0x310] sm:$0xff] }
 0x69f   :  { %6407 = vmatpush1.bf16.msra.mxu1 %v6406_v39  ;;  %v3184_v39 = vld [vmem:[#allocation8 + $0x230] sm:$0xff]  ;;  %v6364_v42 = vpack.c.bf16 %v3191_v35, %v3187_v34  ;;  %v3221_v35 = vld [vmem:[#allocation8 + $0x358] sm:$0xff] }
 0x6a0   :  { %6409 = vmatprep.subr.bf16.mxu1 %v6408_v10  ;;  %v3193_v10 = vld [vmem:[#allocation8 + $0x278] sm:$0xff]  ;;  %v6426_v47 = vpack.c.bf16 %v3184_v39, %v3180_v37  ;;  %v3218_v39 = vld [vmem:[#allocation8 + $0x340] sm:$0xff] }
 0x6a1   :  { %6347 = vmatpush1.bf16.msra.mxu0 %v6346_v46  ;;  %v3190_v46 = vld [vmem:[#allocation8 + $0x260] sm:$0xff]  ;;  %v6428_v50 = vpack.c.bf16 %v3193_v10, %v3189_v41  ;;  %v3227_v10 = vld [vmem:[#allocation8 + $0x388] sm:$0xff] }
 0x6a2   :  { %6349 = vmatprep.subr.bf16.mxu0 %v6348_v49  ;;  %v3199_v49 = vld [vmem:[#allocation8 + $0x2a8] sm:$0xff]  ;;  %v6366_v53 = vpack.c.bf16 %v3190_v46, %v3186_v44  ;;  %v3220_v46 = vld [vmem:[#allocation8 + $0x350] sm:$0xff] }
 0x6a3   :  { %6411 = vmatpush1.bf16.msra.mxu1 %v6410_v52  ;;  %v3192_v52 = vld [vmem:[#allocation8 + $0x270] sm:$0xff]  ;;  %v6368_v55 = vpack.c.bf16 %v3199_v49, %v3195_v48  ;;  %v3229_v49 = vld [vmem:[#allocation8 + $0x398] sm:$0xff] }
 0x6a4   :  { %6413 = vmatprep.subr.bf16.mxu1 %v6412_v27  ;;  %v3201_v27 = vld [vmem:[#allocation8 + $0x2b8] sm:$0xff]  ;;  %v6430_v59 = vpack.c.bf16 %v3192_v52, %v3188_v51  ;;  %v3226_v52 = vld [vmem:[#allocation8 + $0x380] sm:$0xff] }
 0x6a5   :  { %6351 = vmatpush1.bf16.msra.mxu0 %v6350_v57  ;;  %v3198_v57 = vld [vmem:[#allocation8 + $0x2a0] sm:$0xff]  ;;  %v6432_v62 = vpack.c.bf16 %v3201_v27, %v3197_v54  ;;  %v3235_v27 = vld [vmem:[#allocation8 + $0x3c8] sm:$0xff] }
 0x6a6   :  { %6353 = vmatprep.subr.bf16.mxu0 %v6352_v61  ;;  %v3207_v61 = vld [vmem:[#allocation8 + $0x2e8] sm:$0xff]  ;;  %v6370_v2 = vpack.c.bf16 %v3198_v57, %v3194_v56  ;;  %v3228_v57 = vld [vmem:[#allocation8 + $0x390] sm:$0xff] }
 0x6a7   :  { %6415 = vmatpush1.bf16.msra.mxu1 %v6414_v1  ;;  %v3200_v1 = vld [vmem:[#allocation8 + $0x2b0] sm:$0xff]  ;;  %v6372_v7 = vpack.c.bf16 %v3207_v61, %v3203_v60  ;;  %v3237_v61 = vld [vmem:[#allocation8 + $0x3d8] sm:$0xff] }
 0x6a8   :  { %6417 = vmatprep.subr.bf16.mxu1 %v6416_v6  ;;  %v3209_v6 = vld [vmem:[#allocation8 + $0x2f8] sm:$0xff]  ;;  %v6434_v12 = vpack.c.bf16 %v3200_v1, %v3196_v63  ;;  %v3234_v1 = vld [vmem:[#allocation8 + $0x3c0] sm:$0xff] }
 0x6a9   :  { %6355 = vmatpush1.bf16.msra.mxu0 %v6354_v11  ;;  %v3206_v11 = vld [vmem:[#allocation8 + $0x2e0] sm:$0xff]  ;;  %v6436_v16 = vpack.c.bf16 %v3209_v6, %v3205_v5 }
 0x6aa   :  { %6357 = vmatprep.subr.bf16.mxu0 %v6356_v45  ;;  %v3215_v45 = vld [vmem:[#allocation8 + $0x328] sm:$0xff]  ;;  %v6374_v19 = vpack.c.bf16 %v3206_v11, %v3202_v9  ;;  %v3240_v9 = vld [vmem:[#allocation8 + $0x3f0] sm:$0xff] }
 0x6ab   :  { %6419 = vmatpush1.bf16.msra.mxu1 %v6418_v17  ;;  %v3208_v17 = vld [vmem:[#allocation8 + $0x2f0] sm:$0xff]  ;;  %v6376_v24 = vpack.c.bf16 %v3215_v45, %v3211_v13  ;;  %v3110_v13 = vld [vmem:[#allocation5 + $0x28] sm:$0xff] }
 0x6ac   :  { %6421 = vmatprep.subr.bf16.mxu1 %v6420_v32  ;;  %v3217_v32 = vld [vmem:[#allocation8 + $0x338] sm:$0xff]  ;;  %v6438_v29 = vpack.c.bf16 %v3208_v17, %v3204_v14  ;;  %v3409_v45 = vld [vmem:[#allocation10 + $0x8] sm:$0xff]  ;;  %v3408_v14 = vld [vmem:[#allocation10] sm:$0xff] }
 0x6ad   :  { %6359 = vmatpush1.bf16.msra.mxu0 %v6358_v28  ;;  %v3214_v28 = vld [vmem:[#allocation8 + $0x320] sm:$0xff]  ;;  %v6440_v31 = vpack.c.bf16 %v3217_v32, %v3213_v22  ;;  %v3411_v22 = vld [vmem:[#allocation10 + $0x18] sm:$0xff] }
 0x6ae   :  { %6361 = vmatprep.subr.bf16.mxu0 %v6360_v58  ;;  %v3223_v58 = vld [vmem:[#allocation8 + $0x368] sm:$0xff]  ;;  %v6378_v34 = vpack.c.bf16 %v3214_v28, %v3210_v25  ;;  %v3415_v32 = vld [vmem:[#allocation10 + $0x38] sm:$0xff]  ;;  %v3410_v28 = vld [vmem:[#allocation10 + $0x10] sm:$0xff] }
 0x6af   :  { %6423 = vmatpush1.bf16.msra.mxu1 %v6422_v26  ;;  %v3216_v26 = vld [vmem:[#allocation8 + $0x330] sm:$0xff]  ;;  %v6380_v37 = vpack.c.bf16 %v3223_v58, %v3219_v30  ;;  %v6520_v25 = vpack.c.bf16 %v3415_v32, %v3411_v22  ;;  %v3417_v58 = vld [vmem:[#allocation10 + $0x48] sm:$0xff] }
 0x6b0   :  { %6425 = vmatprep.subr.bf16.mxu1 %v6424_v36  ;;  %v3225_v36 = vld [vmem:[#allocation8 + $0x378] sm:$0xff]  ;;  %v6442_v41 = vpack.c.bf16 %v3216_v26, %v3212_v15  ;;  %v3416_v15 = vld [vmem:[#allocation10 + $0x40] sm:$0xff]  ;;  %v3449_v22 = vld [vmem:[#allocation10 + $0x148] sm:$0xff] }
 0x6b1   :  { %6363 = vmatpush1.bf16.msra.mxu0 %v6362_v40  ;;  %v3222_v40 = vld [vmem:[#allocation8 + $0x360] sm:$0xff]  ;;  %v6444_v44 = vpack.c.bf16 %v3225_v36, %v3221_v35  ;;  %v3419_v35 = vld [vmem:[#allocation10 + $0x58] sm:$0xff]  ;;  %v3453_v32 = vld [vmem:[#allocation10 + $0x168] sm:$0xff] }
 0x6b2   :  { %6365 = vmatprep.subr.bf16.mxu0 %v6364_v42  ;;  %v3231_v42 = vld [vmem:[#allocation8 + $0x3a8] sm:$0xff]  ;;  %v6382_v48 = vpack.c.bf16 %v3222_v40, %v3218_v39  ;;  %v3423_v36 = vld [vmem:[#allocation10 + $0x78] sm:$0xff]  ;;  %v3418_v40 = vld [vmem:[#allocation10 + $0x50] sm:$0xff] }
 0x6b3   :  { %6427 = vmatpush1.bf16.msra.mxu1 %v6426_v47  ;;  %v3224_v47 = vld [vmem:[#allocation8 + $0x370] sm:$0xff]  ;;  %v6384_v51 = vpack.c.bf16 %v3231_v42, %v3227_v10  ;;  %v6524_v39 = vpack.c.bf16 %v3423_v36, %v3419_v35  ;;  %v3425_v10 = vld [vmem:[#allocation10 + $0x88] sm:$0xff] }
 0x6b4   :  { %6429 = vmatprep.subr.bf16.mxu1 %v6428_v50  ;;  %v3233_v50 = vld [vmem:[#allocation8 + $0x3b8] sm:$0xff]  ;;  %v6446_v54 = vpack.c.bf16 %v3224_v47, %v3220_v46  ;;  %v3424_v46 = vld [vmem:[#allocation10 + $0x80] sm:$0xff]  ;;  %v3457_v35 = vld [vmem:[#allocation10 + $0x188] sm:$0xff] }
 0x6b5   :  { %6367 = vmatpush1.bf16.msra.mxu0 %v6366_v53  ;;  %v3230_v53 = vld [vmem:[#allocation8 + $0x3a0] sm:$0xff]  ;;  %v6448_v56 = vpack.c.bf16 %v3233_v50, %v3229_v49  ;;  %v3427_v50 = vld [vmem:[#allocation10 + $0x98] sm:$0xff]  ;;  %v3461_v36 = vld [vmem:[#allocation10 + $0x1a8] sm:$0xff] }
 0x6b6   :  { %6369 = vmatprep.subr.bf16.mxu0 %v6368_v55  ;;  %v3239_v55 = vld [vmem:[#allocation8 + $0x3e8] sm:$0xff]  ;;  %v6386_v60 = vpack.c.bf16 %v3230_v53, %v3226_v52  ;;  %v3428_v47 = vld [vmem:[#allocation10 + $0xa0] sm:$0xff]  ;;  %v3426_v52 = vld [vmem:[#allocation10 + $0x90] sm:$0xff] }
 0x6b7   :  { %6431 = vmatpush1.bf16.msra.mxu1 %v6430_v59  ;;  %v3232_v59 = vld [vmem:[#allocation8 + $0x3b0] sm:$0xff]  ;;  %v6388_v63 = vpack.c.bf16 %v3239_v55, %v3235_v27  ;;  %v6466_v49 = vpack.c.bf16 %v3428_v47, %v3424_v46  ;;  %v3433_v27 = vld [vmem:[#allocation10 + $0xc8] sm:$0xff] }
 0x6b8   :  { %6433 = vmatprep.subr.bf16.mxu1 %v6432_v62  ;;  %v3241_v62 = vld [vmem:[#allocation8 + $0x3f8] sm:$0xff]  ;;  %v6450_v5 = vpack.c.bf16 %v3232_v59, %v3228_v57  ;;  %v3437_v55 = vld [vmem:[#allocation10 + $0xe8] sm:$0xff]  ;;  %v3432_v59 = vld [vmem:[#allocation10 + $0xc0] sm:$0xff] }
 0x6b9   :  { %6371 = vmatpush1.bf16.msra.mxu0 %v6370_v2  ;;  %v3238_v2 = vld [vmem:[#allocation8 + $0x3e0] sm:$0xff]  ;;  %v6452_v6 = vpack.c.bf16 %v3241_v62, %v3237_v61  ;;  %v6468_v57 = vpack.c.bf16 %v3437_v55, %v3433_v27  ;;  %v3435_v61 = vld [vmem:[#allocation10 + $0xd8] sm:$0xff]  ;;  %v3458_v47 = vld [vmem:[#allocation10 + $0x190] sm:$0xff] }
 0x6ba   :  { %6373 = vmatprep.subr.bf16.mxu0 %v6372_v7  ;;  %v3236_v7 = vld [vmem:[#allocation8 + $0x3d0] sm:$0xff]  ;;  %v6390_v11 = vpack.c.bf16 %v3238_v2, %v3234_v1  ;;  %v3439_v62 = vld [vmem:[#allocation10 + $0xf8] sm:$0xff]  ;;  %v3468_v27 = vld [vmem:[#allocation10 + $0x1e0] sm:$0xff] }
 0x6bb   :  { %6435 = vmatpush1.bf16.msra.mxu1 %v6434_v12  ;;  %v6454_v12 = vpack.c.bf16 %v3240_v9, %v3236_v7  ;;  %v3438_v1 = vld [vmem:[#allocation10 + $0xf0] sm:$0xff]  ;;  %v3445_v7 = vld [vmem:[#allocation10 + $0x128] sm:$0xff]  ;;  %v3440_v9 = vld [vmem:[#allocation10 + $0x100] sm:$0xff] }
 0x6bc   :  { %6437 = vmatprep.subr.bf16.mxu1 %v6436_v16  ;;  %v3413_v16 = vld [vmem:[#allocation10 + $0x28] sm:$0xff]  ;;  %v3467_v55 = vld [vmem:[#allocation10 + $0x1d8] sm:$0xff] }
 0x6bd   :  { %6375 = vmatpush1.bf16.msra.mxu0 %v6374_v19  ;;  %v6456_v17 = vpack.c.bf16 %v3413_v16, %v3409_v45  ;;  %v3412_v19 = vld [vmem:[#allocation10 + $0x20] sm:$0xff]  ;;  %v3443_v45 = vld [vmem:[#allocation10 + $0x118] sm:$0xff] }
 0x6be   :  { %6377 = vmatprep.subr.bf16.mxu0 %v6376_v24  ;;  %v6458_v24 = vpack.c.bf16 %v3412_v19, %v3408_v14  ;;  %v3447_v16 = vld [vmem:[#allocation10 + $0x138] sm:$0xff]  ;;  %v3446_v19 = vld [vmem:[#allocation10 + $0x130] sm:$0xff] }
 0x6bf   :  { %6439 = vmatpush1.bf16.msra.mxu1 %v6438_v29  ;;  %v3414_v29 = vld [vmem:[#allocation10 + $0x30] sm:$0xff]  ;;  %v6536_v14 = vpack.c.bf16 %v3447_v16, %v3443_v45 }
 0x6c0   :  { %6441 = vmatprep.subr.bf16.mxu1 %v6440_v31  ;;  %v6522_v30 = vpack.c.bf16 %v3414_v29, %v3410_v28  ;;  %v3421_v31 = vld [vmem:[#allocation10 + $0x68] sm:$0xff]  ;;  %v3455_v28 = vld [vmem:[#allocation10 + $0x178] sm:$0xff] }
 0x6c1   :  { %6379 = vmatpush1.bf16.msra.mxu0 %v6378_v34  ;;  %v6460_v26 = vpack.c.bf16 %v3421_v31, %v3417_v58  ;;  %v3420_v34 = vld [vmem:[#allocation10 + $0x60] sm:$0xff] }
 0x6c2   :  { %6381 = vmatprep.subr.bf16.mxu0 %v6380_v37  ;;  %v6462_v37 = vpack.c.bf16 %v3420_v34, %v3416_v15  ;;  %v3448_v58 = vld [vmem:[#allocation10 + $0x140] sm:$0xff]  ;;  %v3450_v15 = vld [vmem:[#allocation10 + $0x150] sm:$0xff] }
 0x6c3   :  { %6443 = vmatpush1.bf16.msra.mxu1 %v6442_v41  ;;  %v3422_v41 = vld [vmem:[#allocation10 + $0x70] sm:$0xff]  ;;  %v3452_v31 = vld [vmem:[#allocation10 + $0x160] sm:$0xff] }
 0x6c4   :  { %6445 = vmatprep.subr.bf16.mxu1 %v6444_v44  ;;  %v6526_v42 = vpack.c.bf16 %v3422_v41, %v3418_v40  ;;  %v3429_v44 = vld [vmem:[#allocation10 + $0xa8] sm:$0xff]  ;;  %v3454_v34 = vld [vmem:[#allocation10 + $0x170] sm:$0xff]  ;;  %v6478_v40 = vpack.c.bf16 %v3452_v31, %v3448_v58 }
 0x6c5   :  { %6383 = vmatpush1.bf16.msra.mxu0 %v6382_v48  ;;  %v6464_v48 = vpack.c.bf16 %v3429_v44, %v3425_v10  ;;  %v6542_v41 = vpack.c.bf16 %v3454_v34, %v3450_v15  ;;  %v6480_v10 = vpack.c.bf16 %v3461_v36, %v3457_v35  ;;  %v3460_v44 = vld [vmem:[#allocation10 + $0x1a0] sm:$0xff]  ;;  %v3489_v15 = vld [vmem:[#allocation10 + $0x288] sm:$0xff] }
 0x6c6   :  { %6385 = vmatprep.subr.bf16.mxu0 %v6384_v51  ;;  %v3431_v51 = vld [vmem:[#allocation10 + $0xb8] sm:$0xff]  ;;  %v3488_v35 = vld [vmem:[#allocation10 + $0x280] sm:$0xff] }
 0x6c7   :  { %6447 = vmatpush1.bf16.msra.mxu1 %v6446_v54  ;;  %v6528_v53 = vpack.c.bf16 %v3431_v51, %v3427_v50  ;;  %v3430_v54 = vld [vmem:[#allocation10 + $0xb0] sm:$0xff]  ;;  %v3465_v51 = vld [vmem:[#allocation10 + $0x1c8] sm:$0xff]  ;;  %v3492_v36 = vld [vmem:[#allocation10 + $0x2a0] sm:$0xff] }
 0x6c8   :  { %6449 = vmatprep.subr.bf16.mxu1 %v6448_v56  ;;  %v6530_v56 = vpack.c.bf16 %v3430_v54, %v3426_v52  ;;  %v3469_v52 = vld [vmem:[#allocation10 + $0x1e8] sm:$0xff]  ;;  %v3464_v54 = vld [vmem:[#allocation10 + $0x1c0] sm:$0xff] }
 0x6c9   :  { %6387 = vmatpush1.bf16.msra.mxu0 %v6386_v60  ;;  %v3436_v60 = vld [vmem:[#allocation10 + $0xe0] sm:$0xff] }
 0x6ca   :  { %6389 = vmatprep.subr.bf16.mxu0 %v6388_v63  ;;  %v3434_v63 = vld [vmem:[#allocation10 + $0xd0] sm:$0xff]  ;;  %v6470_v2 = vpack.c.bf16 %v3436_v60, %v3432_v59 }
 0x6cb   :  { %6451 = vmatpush1.bf16.msra.mxu1 %v6450_v5  ;;  %v6532_v5 = vpack.c.bf16 %v3439_v62, %v3435_v61  ;;  %v3466_v59 = vld [vmem:[#allocation10 + $0x1d0] sm:$0xff] }
 0x6cc   :  { %6453 = vmatprep.subr.bf16.mxu1 %v6452_v6  ;;  %v3441_v6 = vld [vmem:[#allocation10 + $0x108] sm:$0xff]  ;;  %v3470_v60 = vld [vmem:[#allocation10 + $0x1f0] sm:$0xff] }
 0x6cd   :  { %6391 = vmatpush1.bf16.msra.mxu0 %v6390_v11  ;;  %v6534_v11 = vpack.c.bf16 %v3438_v1, %v3434_v63  ;;  %v6550_v62 = vpack.c.bf16 %v3470_v60, %v3466_v59  ;;  %v3473_v63 = vld [vmem:[#allocation10 + $0x208] sm:$0xff] }
 0x6ce   :  { %6457 = vmatprep.subr.bf16.mxu0 %v6456_v17  ;;  %v3442_v17 = vld [vmem:[#allocation10 + $0x110] sm:$0xff]  ;;  %v3477_v1 = vld [vmem:[#allocation10 + $0x228] sm:$0xff] }
 0x6cf   :  { %6455 = vmatpush1.bf16.msra.mxu1 %v6454_v12  ;;  %v6472_v12 = vpack.c.bf16 %v3445_v7, %v3441_v6  ;;  %v6538_v29 = vpack.c.bf16 %v3446_v19, %v3442_v17  ;;  %v3476_v6 = vld [vmem:[#allocation10 + $0x220] sm:$0xff]  ;;  %v3475_v7 = vld [vmem:[#allocation10 + $0x218] sm:$0xff]  ;;  %v3485_v17 = vld [vmem:[#allocation10 + $0x268] sm:$0xff] }
 0x6d0   :  { %3307 = vmatmul.mubr.f32.vlgmr.msra.gmra.mrb[20].mxu0 %v3110_v13  ;;  %6521 = vmatprep.subr.bf16.mxu1 %v6520_v25  ;;  %v3451_v25 = vld [vmem:[#allocation10 + $0x158] sm:$0xff]  ;;  %v3509_v59 = vld [vmem:[#allocation10 + $0x328] sm:$0xff] }
 0x6d1   :  { %6459 = vmatpush1.bf16.msra.mxu0 %v6458_v24 }
 0x6d2   :  { %3378 = vmatmul.mubr.f32.vlgmr.msra.gmra.mrb[20].mxu1 %v3110_v13  ;;  %6461 = vmatprep.subr.bf16.mxu0 %v6460_v26  ;;  %v3444_v13 = vld [vmem:[#allocation10 + $0x120] sm:$0xff]  ;;  %v6540_v26 = vpack.c.bf16 %v3455_v28, %v3451_v25  ;;  %v3487_v28 = vld [vmem:[#allocation10 + $0x278] sm:$0xff] }
 0x6d3   :  { %6523 = vmatpush1.bf16.msra.mxu1 %v6522_v30  ;;  %v6474_v24 = vpack.c.bf16 %v3444_v13, %v3440_v9  ;;  %v6476_v30 = vpack.c.bf16 %v3453_v32, %v3449_v22  ;;  %v3478_v13 = vld [vmem:[#allocation10 + $0x230] sm:$0xff]  ;;  %v3480_v22 = vld [vmem:[#allocation10 + $0x240] sm:$0xff] }
 0x6d4   :  { %6525 = vmatprep.subr.bf16.mxu1 %v6524_v39  ;;  %v3463_v39 = vld [vmem:[#allocation10 + $0x1b8] sm:$0xff]  ;;  %v3484_v32 = vld [vmem:[#allocation10 + $0x260] sm:$0xff] }
 0x6d5   :  { %6463 = vmatpush1.bf16.msra.mxu0 %v6462_v37  ;;  %v3459_v37 = vld [vmem:[#allocation10 + $0x198] sm:$0xff]  ;;  %v6494_v25 = vpack.c.bf16 %v3484_v32, %v3480_v22  ;;  %v3514_v22 = vld [vmem:[#allocation10 + $0x350] sm:$0xff] }
 0x6d6   :  { %6465 = vmatprep.subr.bf16.mxu0 %v6464_v48  ;;  %v6544_v46 = vpack.c.bf16 %v3463_v39, %v3459_v37  ;;  %v3462_v48 = vld [vmem:[#allocation10 + $0x1b0] sm:$0xff]  ;;  %v3491_v37 = vld [vmem:[#allocation10 + $0x298] sm:$0xff]  ;;  %v6498_v39 = vpack.c.bf16 %v3492_v36, %v3488_v35 }
 0x6d7   :  { %6527 = vmatpush1.bf16.msra.mxu1 %v6526_v42  ;;  %v3456_v42 = vld [vmem:[#allocation10 + $0x180] sm:$0xff]  ;;  %v6546_v50 = vpack.c.bf16 %v3462_v48, %v3458_v47  ;;  %v3501_v47 = vld [vmem:[#allocation10 + $0x2e8] sm:$0xff]  ;;  %v3518_v32 = vld [vmem:[#allocation10 + $0x370] sm:$0xff] }
 0x6d8   :  { %6529 = vmatprep.subr.bf16.mxu1 %v6528_v53  ;;  %v6484_v53 = vpack.c.bf16 %v3469_v52, %v3465_v51  ;;  %v3499_v51 = vld [vmem:[#allocation10 + $0x2d8] sm:$0xff]  ;;  %v3522_v35 = vld [vmem:[#allocation10 + $0x390] sm:$0xff] }
 0x6d9   :  { %6467 = vmatpush1.bf16.msra.mxu0 %v6466_v49  ;;  %v6482_v49 = vpack.c.bf16 %v3460_v44, %v3456_v42  ;;  %v3526_v36 = vld [vmem:[#allocation10 + $0x3b0] sm:$0xff] }
 0x6da   :  { %6469 = vmatprep.subr.bf16.mxu0 %v6468_v57  ;;  %v3471_v57 = vld [vmem:[#allocation10 + $0x1f8] sm:$0xff] }
 0x6db   :  { %6531 = vmatpush1.bf16.msra.mxu1 %v6530_v56  ;;  %v6486_v56 = vpack.c.bf16 %v3468_v27, %v3464_v54  ;;  %v6548_v61 = vpack.c.bf16 %v3471_v57, %v3467_v55  ;;  %v3498_v54 = vld [vmem:[#allocation10 + $0x2d0] sm:$0xff]  ;;  %v3505_v57 = vld [vmem:[#allocation10 + $0x308] sm:$0xff] }
 0x6dc   :  { %6533 = vmatprep.subr.bf16.mxu1 %v6532_v5  ;;  %v3472_v5 = vld [vmem:[#allocation10 + $0x200] sm:$0xff]  ;;  %v3502_v27 = vld [vmem:[#allocation10 + $0x2f0] sm:$0xff]  ;;  %v6504_v60 = vpack.c.bf16 %v3509_v59, %v3505_v57 }
 0x6dd   :  { %6471 = vmatpush1.bf16.msra.mxu0 %v6470_v2  ;;  %v6488_v2 = vpack.c.bf16 %v3477_v1, %v3473_v63  ;;  %v6490_v9 = vpack.c.bf16 %v3476_v6, %v3472_v5  ;;  %v3507_v63 = vld [vmem:[#allocation10 + $0x318] sm:$0xff]  ;;  %v3506_v5 = vld [vmem:[#allocation10 + $0x310] sm:$0xff] }
 0x6de   :  { %6473 = vmatprep.subr.bf16.mxu0 %v6472_v12  ;;  %v3474_v12 = vld [vmem:[#allocation10 + $0x210] sm:$0xff] }
 0x6df   :  { %6535 = vmatpush1.bf16.msra.mxu1 %v6534_v11  ;;  %v3479_v11 = vld [vmem:[#allocation10 + $0x238] sm:$0xff]  ;;  %v6554_v16 = vpack.c.bf16 %v3478_v13, %v3474_v12  ;;  %v3510_v6 = vld [vmem:[#allocation10 + $0x330] sm:$0xff]  ;;  %v3517_v12 = vld [vmem:[#allocation10 + $0x368] sm:$0xff] }
 0x6e0   :  { %6537 = vmatprep.subr.bf16.mxu1 %v6536_v14  ;;  %v6552_v45 = vpack.c.bf16 %v3479_v11, %v3475_v7  ;;  %v3481_v14 = vld [vmem:[#allocation10 + $0x248] sm:$0xff] }
 0x6e1   :  { %6475 = vmatpush1.bf16.msra.mxu0 %v6474_v24  ;;  %v6492_v19 = vpack.c.bf16 %v3485_v17, %v3481_v14  ;;  %v3483_v24 = vld [vmem:[#allocation10 + $0x258] sm:$0xff]  ;;  %v3513_v11 = vld [vmem:[#allocation10 + $0x348] sm:$0xff] }
 0x6e2   :  { %6477 = vmatprep.subr.bf16.mxu0 %v6476_v30  ;;  %v3486_v30 = vld [vmem:[#allocation10 + $0x270] sm:$0xff]  ;;  %v6556_v58 = vpack.c.bf16 %v3487_v28, %v3483_v24  ;;  %v6508_v13 = vpack.c.bf16 %v3517_v12, %v3513_v11  ;;  %v3515_v14 = vld [vmem:[#allocation10 + $0x358] sm:$0xff]  ;;  %v3521_v28 = vld [vmem:[#allocation10 + $0x388] sm:$0xff] }
 0x6e3   :  { %6539 = vmatpush1.bf16.msra.mxu1 %v6538_v29  ;;  %v3482_v29 = vld [vmem:[#allocation10 + $0x250] sm:$0xff] }
 0x6e4   :  { %6541 = vmatprep.subr.bf16.mxu1 %v6540_v26  ;;  %v6558_v31 = vpack.c.bf16 %v3486_v30, %v3482_v29  ;;  %v3493_v26 = vld [vmem:[#allocation10 + $0x2a8] sm:$0xff] }
 0x6e5   :  { %6479 = vmatpush1.bf16.msra.mxu0 %v6478_v40  ;;  %v6496_v34 = vpack.c.bf16 %v3493_v26, %v3489_v15  ;;  %v3495_v40 = vld [vmem:[#allocation10 + $0x2b8] sm:$0xff]  ;;  %v3525_v29 = vld [vmem:[#allocation10 + $0x3a8] sm:$0xff] }
 0x6e6   :  { %6481 = vmatprep.subr.bf16.mxu0 %v6480_v10  ;;  %v3494_v10 = vld [vmem:[#allocation10 + $0x2b0] sm:$0xff]  ;;  %v6560_v42 = vpack.c.bf16 %v3495_v40, %v3491_v37  ;;  %v6512_v30 = vpack.c.bf16 %v3525_v29, %v3521_v28  ;;  %v3523_v15 = vld [vmem:[#allocation10 + $0x398] sm:$0xff]  ;;  %v3529_v40 = vld [vmem:[#allocation10 + $0x3c8] sm:$0xff] }
 0x6e7   :  { %6543 = vmatpush1.bf16.msra.mxu1 %v6542_v41  ;;  %v3490_v41 = vld [vmem:[#allocation10 + $0x290] sm:$0xff] }
 0x6e8   :  { %6545 = vmatprep.subr.bf16.mxu1 %v6544_v46  ;;  %v6562_v44 = vpack.c.bf16 %v3494_v10, %v3490_v41  ;;  %v3497_v46 = vld [vmem:[#allocation10 + $0x2c8] sm:$0xff] }
 0x6e9   :  { %6483 = vmatpush1.bf16.msra.mxu0 %v6482_v49  ;;  %v6500_v48 = vpack.c.bf16 %v3501_v47, %v3497_v46  ;;  %v3496_v49 = vld [vmem:[#allocation10 + $0x2c0] sm:$0xff]  ;;  %v3533_v41 = vld [vmem:[#allocation10 + $0x3e8] sm:$0xff]  ;;  %v3531_v46 = vld [vmem:[#allocation10 + $0x3d8] sm:$0xff] }
 0x6ea   :  { %6485 = vmatprep.subr.bf16.mxu0 %v6484_v53  ;;  %v3503_v53 = vld [vmem:[#allocation10 + $0x2f8] sm:$0xff]  ;;  %v6516_v10 = vpack.c.bf16 %v3533_v41, %v3529_v40 }
 0x6eb   :  { %6547 = vmatpush1.bf16.msra.mxu1 %v6546_v50  ;;  %v3500_v50 = vld [vmem:[#allocation10 + $0x2e0] sm:$0xff]  ;;  %v6564_v55 = vpack.c.bf16 %v3503_v53, %v3499_v51  ;;  %v3705_v53 = vld [vmem:[#allocation8 + $0x8] sm:$0xff] }
 0x6ec   :  { %6549 = vmatprep.subr.bf16.mxu1 %v6548_v61  ;;  %v6502_v52 = vpack.c.bf16 %v3500_v50, %v3496_v49  ;;  %v3504_v61 = vld [vmem:[#allocation10 + $0x300] sm:$0xff]  ;;  %v3530_v49 = vld [vmem:[#allocation10 + $0x3d0] sm:$0xff] }
 0x6ed   :  { %6487 = vmatpush1.bf16.msra.mxu0 %v6486_v56  ;;  %v6566_v56 = vpack.c.bf16 %v3502_v27, %v3498_v54  ;;  %v3534_v50 = vld [vmem:[#allocation10 + $0x3f0] sm:$0xff]  ;;  %v3709_v54 = vld [vmem:[#allocation8 + $0x28] sm:$0xff] }
 0x6ee   :  { %6489 = vmatprep.subr.bf16.mxu0 %v6488_v2  ;;  %v3511_v2 = vld [vmem:[#allocation10 + $0x338] sm:$0xff]  ;;  %v6584_v27 = vpack.c.bf16 %v3709_v54, %v3705_v53  ;;  %v3704_v54 = vld [vmem:[#allocation8] sm:$0xff] }
 0x6ef   :  { %6551 = vmatpush1.bf16.msra.mxu1 %v6550_v62  ;;  %v3508_v62 = vld [vmem:[#allocation10 + $0x320] sm:$0xff]  ;;  %v6568_v7 = vpack.c.bf16 %v3511_v2, %v3507_v63 }
 0x6f0   :  { %6553 = vmatprep.subr.bf16.mxu1 %v6552_v45  ;;  %v6506_v1 = vpack.c.bf16 %v3508_v62, %v3504_v61  ;;  %v3512_v45 = vld [vmem:[#allocation10 + $0x340] sm:$0xff] }
 0x6f1   :  { %6491 = vmatpush1.bf16.msra.mxu0 %v6490_v9  ;;  %v6570_v9 = vpack.c.bf16 %v3510_v6, %v3506_v5 }
 0x6f2   :  { %6493 = vmatprep.subr.bf16.mxu0 %v6492_v19  ;;  %v3519_v19 = vld [vmem:[#allocation10 + $0x378] sm:$0xff] }
 0x6f3   :  { %6555 = vmatpush1.bf16.msra.mxu1 %v6554_v16  ;;  %v3516_v16 = vld [vmem:[#allocation10 + $0x360] sm:$0xff]  ;;  %v6572_v24 = vpack.c.bf16 %v3519_v19, %v3515_v14 }
 0x6f4   :  { %6557 = vmatprep.subr.bf16.mxu1 %v6556_v58  ;;  %v6510_v17 = vpack.c.bf16 %v3516_v16, %v3512_v45  ;;  %v3520_v58 = vld [vmem:[#allocation10 + $0x380] sm:$0xff] }
 0x6f5   :  { %6495 = vmatpush1.bf16.msra.mxu0 %v6494_v25  ;;  %v6574_v25 = vpack.c.bf16 %v3518_v32, %v3514_v22 }
 0x6f6   :  { %6497 = vmatprep.subr.bf16.mxu0 %v6496_v34  ;;  %v3527_v34 = vld [vmem:[#allocation10 + $0x3b8] sm:$0xff] }
 0x6f7   :  { %6559 = vmatpush1.bf16.msra.mxu1 %v6558_v31  ;;  %v3524_v31 = vld [vmem:[#allocation10 + $0x3a0] sm:$0xff]  ;;  %v6576_v37 = vpack.c.bf16 %v3527_v34, %v3523_v15 }
 0x6f8   :  { %6561 = vmatprep.subr.bf16.mxu1 %v6560_v42  ;;  %v6514_v26 = vpack.c.bf16 %v3524_v31, %v3520_v58  ;;  %v3528_v42 = vld [vmem:[#allocation10 + $0x3c0] sm:$0xff] }
 0x6f9   :  { %6499 = vmatpush1.bf16.msra.mxu0 %v6498_v39  ;;  %v6578_v39 = vpack.c.bf16 %v3526_v36, %v3522_v35 }
 0x6fa   :  { %6501 = vmatprep.subr.bf16.mxu0 %v6500_v48  ;;  %v3535_v48 = vld [vmem:[#allocation10 + $0x3f8] sm:$0xff] }
 0x6fb   :  { %6563 = vmatpush1.bf16.msra.mxu1 %v6562_v44  ;;  %v3532_v44 = vld [vmem:[#allocation10 + $0x3e0] sm:$0xff]  ;;  %v6580_v51 = vpack.c.bf16 %v3535_v48, %v3531_v46 }
 0x6fc   :  { %6565 = vmatprep.subr.bf16.mxu1 %v6564_v55  ;;  %v6518_v47 = vpack.c.bf16 %v3532_v44, %v3528_v42  ;;  %v3707_v55 = vld [vmem:[#allocation8 + $0x18] sm:$0xff] }
 0x6fd   :  { %6503 = vmatpush1.bf16.msra.mxu0 %v6502_v52  ;;  %v6582_v52 = vpack.c.bf16 %v3534_v50, %v3530_v49 }
 0x6fe   :  { %6505 = vmatprep.subr.bf16.mxu0 %v6504_v60 }
 0x6ff   :  { %6567 = vmatpush1.bf16.msra.mxu1 %v6566_v56  ;;  %v3711_v56 = vld [vmem:[#allocation8 + $0x38] sm:$0xff] }
 0x700   :  { %6569 = vmatprep.subr.bf16.mxu1 %v6568_v7  ;;  %v6648_v57 = vpack.c.bf16 %v3711_v56, %v3707_v55  ;;  %v3713_v55 = vld [vmem:[#allocation8 + $0x48] sm:$0xff] }
 0x701   :  { %6507 = vmatpush1.bf16.msra.mxu0 %v6506_v1  ;;  %v3717_v56 = vld [vmem:[#allocation8 + $0x68] sm:$0xff] }
 0x702   :  { %6509 = vmatprep.subr.bf16.mxu0 %v6508_v13 }
 0x703   :  { %6571 = vmatpush1.bf16.msra.mxu1 %v6570_v9 }
 0x704   :  { %6573 = vmatprep.subr.bf16.mxu1 %v6572_v24 }
 0x705   :  { %6511 = vmatpush1.bf16.msra.mxu0 %v6510_v17 }
 0x706   :  { %6513 = vmatprep.subr.bf16.mxu0 %v6512_v30 }
 0x707   :  { %6575 = vmatpush1.bf16.msra.mxu1 %v6574_v25 }
 0x708   :  { %6577 = vmatprep.subr.bf16.mxu1 %v6576_v37 }
 0x709   :  { %6515 = vmatpush1.bf16.msra.mxu0 %v6514_v26 }
 0x70a   :  { %6517 = vmatprep.subr.bf16.mxu0 %v6516_v10 }
 0x70b   :  { %6579 = vmatpush1.bf16.msra.mxu1 %v6578_v39 }
 0x70c   :  { %6581 = vmatprep.subr.bf16.mxu1 %v6580_v51 }
 0x70d   :  { %6519 = vmatpush1.bf16.msra.mxu0 %v6518_v47 }
 0x70e   :  { %6585 = vmatprep.subr.bf16.mxu0 %v6584_v27  ;;  %v3708_v27 = vld [vmem:[#allocation8 + $0x20] sm:$0xff] }
 0x70f   :  { %6583 = vmatpush1.bf16.msra.mxu1 %v6582_v52 }
 0x710   :  { %6649 = vmatprep.subr.bf16.mxu1 %v6648_v57 }
 0x763   :  { %v3012_v59 = vpop.f32.mrb[18].mxu0  ;;  %v3083_v60 = vpop.f32.mrb[18].mxu1 }
 0x764   :  { %v3013_v61 = vadd.f32 %v3012_v59, %v7630_v3  ;;  %v3014_v62 = vpop.f32.mrb[19].mxu0  ;;  %v3085_v63 = vpop.f32.mrb[19].mxu1  ;;  %v3084_v6 = vadd.f32 %v3083_v60, %v7639_v8  ;;  %v3706_v59 = vld [vmem:[#allocation8 + $0x10] sm:$0xff] }
 0x765   :  { %v3015_v1 = vadd.f32 %v3014_v62, %v7634_v4  ;;  %v3086_v7 = vadd.f32 %v3085_v63, %v7645_v18  ;;  %v3710_v60 = vld [vmem:[#allocation8 + $0x30] sm:$0xff]  ;;  %v6586_v62 = vpack.c.bf16 %v3708_v27, %v3704_v54  ;;  %v3715_v63 = vld [vmem:[#allocation8 + $0x58] sm:$0xff]  ;;  %v3749_v54 = vld [vmem:[#allocation8 + $0x168] sm:$0xff] }
 0x766   :  { %v3088_v2 = vmul.f32 0.5, %v3013_v61 }
 0x767   :  { %v3092_v5 = vmul.f32 0.5, %v3015_v1  ;;  %v3097_v9 = vmul.f32 0.5, %v3086_v7  ;;  %v3719_v1 = vld [vmem:[#allocation8 + $0x78] sm:$0xff]  ;;  %v6650_v7 = vpack.c.bf16 %v3710_v60, %v3706_v59 }
 0x768   :  { %7226 = vtanh.f32 %v3088_v2  ;;  %v3747_v59 = vld [vmem:[#allocation8 + $0x158] sm:$0xff] }
 0x769   :  { %7228 = vtanh.f32 %v3092_v5  ;;  %v6588_v5 = vpack.c.bf16 %v3717_v56, %v3713_v55  ;;  %v3738_v55 = vld [vmem:[#allocation8 + $0x110] sm:$0xff]  ;;  %v3751_v60 = vld [vmem:[#allocation8 + $0x178] sm:$0xff] }
 0x76a   :  { %7230 = vtanh.f32 %v3084_v6  ;;  %v3716_v6 = vld [vmem:[#allocation8 + $0x60] sm:$0xff]  ;;  %v3742_v56 = vld [vmem:[#allocation8 + $0x130] sm:$0xff] }
 0x76b   :  { %7232 = vtanh.f32 %v3097_v9  ;;  %v3721_v9 = vld [vmem:[#allocation8 + $0x88] sm:$0xff] }
 0x772   :  { %v7227_v11 = vpop.eup %7226 }
 0x773   :  { %v7229_v12 = vpop.eup %7228  ;;  %v3090_v13 = vmul.f32 0.5, %v7227_v11  ;;  %v3725_v11 = vld [vmem:[#allocation8 + $0xa8] sm:$0xff] }
 0x774   :  { %v3094_v45 = vmul.f32 0.5, %v7229_v12  ;;  %v7231_v14 = vpop.eup %7230  ;;  %v6652_v12 = vpack.c.bf16 %v3719_v1, %v3715_v63  ;;  %v3748_v63 = vld [vmem:[#allocation8 + $0x160] sm:$0xff]  ;;  %v6666_v1 = vpack.c.bf16 %v3742_v56, %v3738_v55 }
 0x775   :  { %v3091_v16 = vadd.f32 0.5, %v3090_v13  ;;  %v7233_v24 = vpop.eup %7232  ;;  %v3714_v13 = vld [vmem:[#allocation8 + $0x50] sm:$0xff]  ;;  %v3776_v56 = vld [vmem:[#allocation8 + $0x240] sm:$0xff] }
 0x776   :  { %v3095_v17 = vadd.f32 0.5, %v3094_v45  ;;  %v3099_v25 = vmul.f32 0.5, %v7233_v24  ;;  %v3718_v45 = vld [vmem:[#allocation8 + $0x70] sm:$0xff]  ;;  %v3724_v24 = vld [vmem:[#allocation8 + $0xa0] sm:$0xff] }
 0x777   :  { %v3103_v19 = vmul.f32 %v7231_v14, %v3091_v16  ;;  %v3723_v14 = vld [vmem:[#allocation8 + $0x98] sm:$0xff] }
 0x778   :  { %v3102_v22 = vmul.f32 %v3095_v17, %v7696_v43  ;;  %v3100_v28 = vadd.f32 0.5, %v3099_v25  ;;  %v3727_v17 = vld [vmem:[#allocation8 + $0xb8] sm:$0xff]  ;;  %v6654_v25 = vpack.c.bf16 %v3718_v45, %v3714_v13  ;;  %v3752_v45 = vld [vmem:[#allocation8 + $0x180] sm:$0xff] }
 0x77a   :  { %v7712_v32 = vadd.f32 %v3103_v19, %v3102_v22  ;;  %v6592_v19 = vpack.c.bf16 %v3725_v11, %v3721_v9  ;;  %v3720_v22 = vld [vmem:[#allocation8 + $0x80] sm:$0xff]  ;;  %v3755_v11 = vld [vmem:[#allocation8 + $0x198] sm:$0xff] }
 0x77c   :  { %7234 = vtanh.f32 %v7712_v32 }
 0x786   :  { %v7235_v29 = vpop.eup %7234 }
 0x787   :  { %v3106_v30 = vmul.f32 %v7235_v29, %v3100_v28  ;;  %v3729_v28 = vld [vmem:[#allocation8 + $0xc8] sm:$0xff] }
 0x788   :  { %v3733_v29 = vld [vmem:[#allocation8 + $0xe8] sm:$0xff] }
 0x789   :  { %3600 = vmatprep.mubr.f32.mxu0 %v3106_v30  ;;  %3671 = vmatprep.mubr.f32.mxu1 %v3106_v30  ;;  %v6656_v30 = vpack.c.bf16 %v3727_v17, %v3723_v14  ;;  %v3761_v17 = vld [vmem:[#allocation8 + $0x1c8] sm:$0xff] }
 0x7a3   :  { %v3308_v58 = vpop.f32.mrb[20].mxu0 }
 0x7a4   :  { %v3309_v31 = vadd.f32 %v3308_v58, %v7606_v20  ;;  %v3310_v15 = vpop.f32.mrb[21].mxu0  ;;  %v3722_v58 = vld [vmem:[#allocation8 + $0x90] sm:$0xff] }
 0x7a5   :  { %v3311_v26 = vadd.f32 %v3310_v15, %v7610_v21  ;;  %v3379_v34 = vpop.f32.mrb[20].mxu1  ;;  %v6594_v15 = vpack.c.bf16 %v3724_v24, %v3720_v22  ;;  %v3754_v24 = vld [vmem:[#allocation8 + $0x190] sm:$0xff] }
 0x7a6   :  { %v3384_v35 = vmul.f32 0.5, %v3309_v31  ;;  %v3380_v43 = vadd.f32 %v3379_v34, %v7614_v23  ;;  %v3381_v36 = vpop.f32.mrb[21].mxu1  ;;  %v3726_v31 = vld [vmem:[#allocation8 + $0xb0] sm:$0xff]  ;;  %v3735_v34 = vld [vmem:[#allocation8 + $0xf8] sm:$0xff] }
 0x7a7   :  { %v3388_v37 = vmul.f32 0.5, %v3311_v26  ;;  %v3382_v39 = vadd.f32 %v3381_v36, %v7622_v33  ;;  %v3731_v26 = vld [vmem:[#allocation8 + $0xd8] sm:$0xff]  ;;  %v3732_v36 = vld [vmem:[#allocation8 + $0xe0] sm:$0xff] }
 0x7a8   :  { %7236 = vtanh.f32 %v3384_v35  ;;  %v6596_v35 = vpack.c.bf16 %v3733_v29, %v3729_v28  ;;  %v3763_v29 = vld [vmem:[#allocation8 + $0x1d8] sm:$0xff] }
 0x7a9   :  { %7238 = vtanh.f32 %v3388_v37  ;;  %v3393_v40 = vmul.f32 0.5, %v3382_v39  ;;  %v6658_v37 = vpack.c.bf16 %v3726_v31, %v3722_v58  ;;  %v3737_v39 = vld [vmem:[#allocation8 + $0x108] sm:$0xff]  ;;  %v3760_v31 = vld [vmem:[#allocation8 + $0x1c0] sm:$0xff] }
 0x7aa   :  { %7240 = vtanh.f32 %v3380_v43  ;;  %v3728_v43 = vld [vmem:[#allocation8 + $0xc0] sm:$0xff] }
 0x7ab   :  { %7242 = vtanh.f32 %v3393_v40  ;;  %v3741_v40 = vld [vmem:[#allocation8 + $0x128] sm:$0xff] }
 0x7b2   :  { %v7237_v41 = vpop.eup %7236 }
 0x7b3   :  { %v7239_v10 = vpop.eup %7238  ;;  %v3386_v42 = vmul.f32 0.5, %v7237_v41  ;;  %v6660_v41 = vpack.c.bf16 %v3735_v34, %v3731_v26  ;;  %v3769_v34 = vld [vmem:[#allocation8 + $0x208] sm:$0xff] }
 0x7b4   :  { %v7241_v44 = vpop.eup %7240  ;;  %v3390_v46 = vmul.f32 0.5, %v7239_v10  ;;  %v3730_v10 = vld [vmem:[#allocation8 + $0xd0] sm:$0xff] }
 0x7b5   :  { %v3387_v47 = vadd.f32 0.5, %v3386_v42  ;;  %v7243_v52 = vpop.eup %7242  ;;  %v3734_v42 = vld [vmem:[#allocation8 + $0xf0] sm:$0xff] }
 0x7b6   :  { %v3391_v48 = vadd.f32 0.5, %v3390_v46  ;;  %v3395_v53 = vmul.f32 0.5, %v7243_v52  ;;  %v3739_v46 = vld [vmem:[#allocation8 + $0x118] sm:$0xff]  ;;  %v6662_v52 = vpack.c.bf16 %v3734_v42, %v3730_v10  ;;  %v3768_v42 = vld [vmem:[#allocation8 + $0x200] sm:$0xff] }
 0x7b7   :  { %v3399_v49 = vmul.f32 %v7241_v44, %v3387_v47  ;;  %v6598_v44 = vpack.c.bf16 %v3732_v36, %v3728_v43  ;;  %v3743_v47 = vld [vmem:[#allocation8 + $0x138] sm:$0xff]  ;;  %v3762_v36 = vld [vmem:[#allocation8 + $0x1d0] sm:$0xff] }
 0x7b8   :  { %v3398_v50 = vmul.f32 %v3391_v48, %v7704_v38  ;;  %v3396_v57 = vadd.f32 0.5, %v3395_v53  ;;  %v3712_v38 = vld [vmem:[#allocation8 + $0x40] sm:$0xff]  ;;  %v6600_v48 = vpack.c.bf16 %v3741_v40, %v3737_v39  ;;  %v3745_v53 = vld [vmem:[#allocation8 + $0x148] sm:$0xff]  ;;  %v6664_v27 = vpack.c.bf16 %v3743_v47, %v3739_v46  ;;  %v3771_v40 = vld [vmem:[#allocation8 + $0x218] sm:$0xff] }
 0x7b9   :  { %v6590_v16 = vpack.c.bf16 %v3716_v6, %v3712_v38  ;;  %v6668_v38 = vpack.c.bf16 %v3751_v60, %v3747_v59  ;;  %v3746_v6 = vld [vmem:[#allocation8 + $0x150] sm:$0xff]  ;;  %v3777_v47 = vld [vmem:[#allocation8 + $0x248] sm:$0xff] }
 0x7ba   :  { %v7720_v51 = vadd.f32 %v3399_v49, %v3398_v50  ;;  %v3736_v49 = vld [vmem:[#allocation8 + $0x100] sm:$0xff]  ;;  %v3785_v60 = vld [vmem:[#allocation8 + $0x288] sm:$0xff] }
 0x7bb   :  { %v3740_v50 = vld [vmem:[#allocation8 + $0x120] sm:$0xff] }
 0x7bc   :  { %7244 = vtanh.f32 %v7720_v51 }
 0x7c6   :  { %v7245_v61 = vpop.eup %7244 }
 0x7c7   :  { %v3402_v2 = vmul.f32 %v7245_v61, %v3396_v57  ;;  %v6602_v57 = vpack.c.bf16 %v3740_v50, %v3736_v49  ;;  %v6604_v61 = vpack.c.bf16 %v3749_v54, %v3745_v53  ;;  %v3770_v50 = vld [vmem:[#allocation8 + $0x210] sm:$0xff]  ;;  %v3779_v54 = vld [vmem:[#allocation8 + $0x258] sm:$0xff] }
 0x7c9   :  { %3601 = vmatmul.mubr.f32.vlgmr.msra.gmra.mrb[22].mxu0 %v3402_v2  ;;  %3672 = vmatmul.mubr.f32.vlgmr.msra.gmra.mrb[22].mxu1 %v3402_v2 }
 0x7ca   :  { %6587 = vmatpush1.bf16.msra.mxu0 %v6586_v62  ;;  %3896 = vmatprep.mubr.f32.mxu0 %v3402_v2  ;;  %v3744_v62 = vld [vmem:[#allocation8 + $0x140] sm:$0xff] }
 0x7cb   :  { %3967 = vmatprep.mubr.f32.mxu1 %v3402_v2  ;;  %6589 = vmatprep.subr.bf16.mxu0 %v6588_v5  ;;  %v3753_v2 = vld [vmem:[#allocation8 + $0x188] sm:$0xff]  ;;  %v6606_v9 = vpack.c.bf16 %v3748_v63, %v3744_v62  ;;  %v3778_v63 = vld [vmem:[#allocation8 + $0x250] sm:$0xff] }
 0x7cc   :  { %6651 = vmatpush1.bf16.msra.mxu1 %v6650_v7  ;;  %v3757_v5 = vld [vmem:[#allocation8 + $0x1a8] sm:$0xff]  ;;  %v3750_v7 = vld [vmem:[#allocation8 + $0x170] sm:$0xff] }
 0x7cd   :  { %6653 = vmatprep.subr.bf16.mxu1 %v6652_v12  ;;  %v3759_v12 = vld [vmem:[#allocation8 + $0x1b8] sm:$0xff]  ;;  %v6608_v13 = vpack.c.bf16 %v3757_v5, %v3753_v2  ;;  %v6670_v14 = vpack.c.bf16 %v3750_v7, %v3746_v6  ;;  %v3784_v7 = vld [vmem:[#allocation8 + $0x280] sm:$0xff] }
 0x7ce   :  { %6591 = vmatpush1.bf16.msra.mxu0 %v6590_v16  ;;  %v3756_v16 = vld [vmem:[#allocation8 + $0x1a0] sm:$0xff]  ;;  %v6672_v22 = vpack.c.bf16 %v3759_v12, %v3755_v11  ;;  %v3787_v5 = vld [vmem:[#allocation8 + $0x298] sm:$0xff]  ;;  %v3793_v12 = vld [vmem:[#allocation8 + $0x2c8] sm:$0xff] }
 0x7cf   :  { %6593 = vmatprep.subr.bf16.mxu0 %v6592_v19  ;;  %v3765_v19 = vld [vmem:[#allocation8 + $0x1e8] sm:$0xff]  ;;  %v6610_v28 = vpack.c.bf16 %v3756_v16, %v3752_v45  ;;  %v3786_v16 = vld [vmem:[#allocation8 + $0x290] sm:$0xff] }
 0x7d0   :  { %6655 = vmatpush1.bf16.msra.mxu1 %v6654_v25  ;;  %v3758_v25 = vld [vmem:[#allocation8 + $0x1b0] sm:$0xff]  ;;  %v6612_v58 = vpack.c.bf16 %v3765_v19, %v3761_v17  ;;  %v3795_v19 = vld [vmem:[#allocation8 + $0x2d8] sm:$0xff] }
 0x7d1   :  { %6657 = vmatprep.subr.bf16.mxu1 %v6656_v30  ;;  %v3767_v30 = vld [vmem:[#allocation8 + $0x1f8] sm:$0xff]  ;;  %v6674_v26 = vpack.c.bf16 %v3758_v25, %v3754_v24  ;;  %v3792_v25 = vld [vmem:[#allocation8 + $0x2c0] sm:$0xff] }
 0x7d2   :  { %6595 = vmatpush1.bf16.msra.mxu0 %v6594_v15  ;;  %v3764_v15 = vld [vmem:[#allocation8 + $0x1e0] sm:$0xff]  ;;  %v6676_v43 = vpack.c.bf16 %v3767_v30, %v3763_v29  ;;  %v3801_v30 = vld [vmem:[#allocation8 + $0x308] sm:$0xff] }
 0x7d3   :  { %6597 = vmatprep.subr.bf16.mxu0 %v6596_v35  ;;  %v3773_v35 = vld [vmem:[#allocation8 + $0x228] sm:$0xff]  ;;  %v6614_v39 = vpack.c.bf16 %v3764_v15, %v3760_v31  ;;  %v3794_v15 = vld [vmem:[#allocation8 + $0x2d0] sm:$0xff] }
 0x7d4   :  { %6659 = vmatpush1.bf16.msra.mxu1 %v6658_v37  ;;  %v3766_v37 = vld [vmem:[#allocation8 + $0x1f0] sm:$0xff]  ;;  %v6616_v10 = vpack.c.bf16 %v3773_v35, %v3769_v34  ;;  %v3803_v35 = vld [vmem:[#allocation8 + $0x318] sm:$0xff] }
 0x7d5   :  { %6661 = vmatprep.subr.bf16.mxu1 %v6660_v41  ;;  %v3775_v41 = vld [vmem:[#allocation8 + $0x238] sm:$0xff]  ;;  %v6678_v46 = vpack.c.bf16 %v3766_v37, %v3762_v36  ;;  %v3800_v37 = vld [vmem:[#allocation8 + $0x300] sm:$0xff] }
 0x7d6   :  { %6599 = vmatpush1.bf16.msra.mxu0 %v6598_v44  ;;  %v3772_v44 = vld [vmem:[#allocation8 + $0x220] sm:$0xff]  ;;  %v6680_v49 = vpack.c.bf16 %v3775_v41, %v3771_v40  ;;  %v3809_v41 = vld [vmem:[#allocation8 + $0x348] sm:$0xff] }
 0x7d7   :  { %6601 = vmatprep.subr.bf16.mxu0 %v6600_v48  ;;  %v3781_v48 = vld [vmem:[#allocation8 + $0x268] sm:$0xff]  ;;  %v6618_v53 = vpack.c.bf16 %v3772_v44, %v3768_v42  ;;  %v3802_v44 = vld [vmem:[#allocation8 + $0x310] sm:$0xff] }
 0x7d8   :  { %6663 = vmatpush1.bf16.msra.mxu1 %v6662_v52  ;;  %v3774_v52 = vld [vmem:[#allocation8 + $0x230] sm:$0xff]  ;;  %v6620_v55 = vpack.c.bf16 %v3781_v48, %v3777_v47  ;;  %v3811_v48 = vld [vmem:[#allocation8 + $0x358] sm:$0xff] }
 0x7d9   :  { %6665 = vmatprep.subr.bf16.mxu1 %v6664_v27  ;;  %v3783_v27 = vld [vmem:[#allocation8 + $0x278] sm:$0xff]  ;;  %v6682_v59 = vpack.c.bf16 %v3774_v52, %v3770_v50  ;;  %v3808_v52 = vld [vmem:[#allocation8 + $0x340] sm:$0xff] }
 0x7da   :  { %6603 = vmatpush1.bf16.msra.mxu0 %v6602_v57  ;;  %v3780_v57 = vld [vmem:[#allocation8 + $0x260] sm:$0xff]  ;;  %v6684_v62 = vpack.c.bf16 %v3783_v27, %v3779_v54  ;;  %v3817_v27 = vld [vmem:[#allocation8 + $0x388] sm:$0xff] }
 0x7db   :  { %6605 = vmatprep.subr.bf16.mxu0 %v6604_v61  ;;  %v3789_v61 = vld [vmem:[#allocation8 + $0x2a8] sm:$0xff]  ;;  %v6622_v2 = vpack.c.bf16 %v3780_v57, %v3776_v56  ;;  %v3810_v57 = vld [vmem:[#allocation8 + $0x350] sm:$0xff] }
 0x7dc   :  { %6667 = vmatpush1.bf16.msra.mxu1 %v6666_v1  ;;  %v3782_v1 = vld [vmem:[#allocation8 + $0x270] sm:$0xff]  ;;  %v6624_v6 = vpack.c.bf16 %v3789_v61, %v3785_v60  ;;  %v3819_v61 = vld [vmem:[#allocation8 + $0x398] sm:$0xff] }
 0x7dd   :  { %6669 = vmatprep.subr.bf16.mxu1 %v6668_v38  ;;  %v3791_v38 = vld [vmem:[#allocation8 + $0x2b8] sm:$0xff]  ;;  %v6686_v11 = vpack.c.bf16 %v3782_v1, %v3778_v63  ;;  %v3816_v1 = vld [vmem:[#allocation8 + $0x380] sm:$0xff] }
 0x7de   :  { %6607 = vmatpush1.bf16.msra.mxu0 %v6606_v9  ;;  %v3788_v9 = vld [vmem:[#allocation8 + $0x2a0] sm:$0xff]  ;;  %v6688_v45 = vpack.c.bf16 %v3791_v38, %v3787_v5  ;;  %v3825_v38 = vld [vmem:[#allocation8 + $0x3c8] sm:$0xff] }
 0x7df   :  { %6609 = vmatprep.subr.bf16.mxu0 %v6608_v13  ;;  %v3797_v13 = vld [vmem:[#allocation8 + $0x2e8] sm:$0xff]  ;;  %v6626_v17 = vpack.c.bf16 %v3788_v9, %v3784_v7  ;;  %v3818_v9 = vld [vmem:[#allocation8 + $0x390] sm:$0xff] }
 0x7e0   :  { %6671 = vmatpush1.bf16.msra.mxu1 %v6670_v14  ;;  %v3790_v14 = vld [vmem:[#allocation8 + $0x2b0] sm:$0xff]  ;;  %v6628_v24 = vpack.c.bf16 %v3797_v13, %v3793_v12  ;;  %v3827_v13 = vld [vmem:[#allocation8 + $0x3d8] sm:$0xff] }
 0x7e1   :  { %6673 = vmatprep.subr.bf16.mxu1 %v6672_v22  ;;  %v3799_v22 = vld [vmem:[#allocation8 + $0x2f8] sm:$0xff]  ;;  %v6690_v29 = vpack.c.bf16 %v3790_v14, %v3786_v16  ;;  %v3824_v14 = vld [vmem:[#allocation8 + $0x3c0] sm:$0xff] }
 0x7e2   :  { %6611 = vmatpush1.bf16.msra.mxu0 %v6610_v28  ;;  %v3796_v28 = vld [vmem:[#allocation8 + $0x2e0] sm:$0xff]  ;;  %v6692_v31 = vpack.c.bf16 %v3799_v22, %v3795_v19 }
 0x7e3   :  { %6613 = vmatprep.subr.bf16.mxu0 %v6612_v58  ;;  %v3805_v58 = vld [vmem:[#allocation8 + $0x328] sm:$0xff]  ;;  %v6630_v34 = vpack.c.bf16 %v3796_v28, %v3792_v25  ;;  %v3830_v25 = vld [vmem:[#allocation8 + $0x3f0] sm:$0xff] }
 0x7e4   :  { %6675 = vmatpush1.bf16.msra.mxu1 %v6674_v26  ;;  %v3798_v26 = vld [vmem:[#allocation8 + $0x2f0] sm:$0xff]  ;;  %v6632_v36 = vpack.c.bf16 %v3805_v58, %v3801_v30  ;;  %v3999_v58 = vld [vmem:[#allocation10 + $0x8] sm:$0xff] }
 0x7e5   :  { %6677 = vmatprep.subr.bf16.mxu1 %v6676_v43  ;;  %v3807_v43 = vld [vmem:[#allocation8 + $0x338] sm:$0xff]  ;;  %v6694_v40 = vpack.c.bf16 %v3798_v26, %v3794_v15  ;;  %v3700_v30 = vld [vmem:[#allocation5 + $0x30] sm:$0xff]  ;;  %v3998_v15 = vld [vmem:[#allocation10] sm:$0xff] }
 0x7e6   :  { %6615 = vmatpush1.bf16.msra.mxu0 %v6614_v39  ;;  %v3804_v39 = vld [vmem:[#allocation8 + $0x320] sm:$0xff]  ;;  %v6696_v42 = vpack.c.bf16 %v3807_v43, %v3803_v35  ;;  %v4001_v35 = vld [vmem:[#allocation10 + $0x18] sm:$0xff] }
 0x7e7   :  { %6617 = vmatprep.subr.bf16.mxu0 %v6616_v10  ;;  %v3813_v10 = vld [vmem:[#allocation8 + $0x368] sm:$0xff]  ;;  %v6634_v47 = vpack.c.bf16 %v3804_v39, %v3800_v37  ;;  %v4005_v43 = vld [vmem:[#allocation10 + $0x38] sm:$0xff]  ;;  %v4000_v39 = vld [vmem:[#allocation10 + $0x10] sm:$0xff] }
 0x7e8   :  { %6679 = vmatpush1.bf16.msra.mxu1 %v6678_v46  ;;  %v3806_v46 = vld [vmem:[#allocation8 + $0x330] sm:$0xff]  ;;  %v6636_v50 = vpack.c.bf16 %v3813_v10, %v3809_v41  ;;  %v6776_v37 = vpack.c.bf16 %v4005_v43, %v4001_v35  ;;  %v4007_v10 = vld [vmem:[#allocation10 + $0x48] sm:$0xff] }
 0x7e9   :  { %6681 = vmatprep.subr.bf16.mxu1 %v6680_v49  ;;  %v3815_v49 = vld [vmem:[#allocation8 + $0x378] sm:$0xff]  ;;  %v6698_v54 = vpack.c.bf16 %v3806_v46, %v3802_v44  ;;  %v4006_v44 = vld [vmem:[#allocation10 + $0x40] sm:$0xff]  ;;  %v4039_v35 = vld [vmem:[#allocation10 + $0x148] sm:$0xff] }
 0x7ea   :  { %6619 = vmatpush1.bf16.msra.mxu0 %v6618_v53  ;;  %v3812_v53 = vld [vmem:[#allocation8 + $0x360] sm:$0xff]  ;;  %v6700_v56 = vpack.c.bf16 %v3815_v49, %v3811_v48  ;;  %v4009_v48 = vld [vmem:[#allocation10 + $0x58] sm:$0xff]  ;;  %v4043_v43 = vld [vmem:[#allocation10 + $0x168] sm:$0xff] }
 0x7eb   :  { %6621 = vmatprep.subr.bf16.mxu0 %v6620_v55  ;;  %v3821_v55 = vld [vmem:[#allocation8 + $0x3a8] sm:$0xff]  ;;  %v6638_v60 = vpack.c.bf16 %v3812_v53, %v3808_v52  ;;  %v4013_v49 = vld [vmem:[#allocation10 + $0x78] sm:$0xff]  ;;  %v4008_v53 = vld [vmem:[#allocation10 + $0x50] sm:$0xff] }
 0x7ec   :  { %6683 = vmatpush1.bf16.msra.mxu1 %v6682_v59  ;;  %v3814_v59 = vld [vmem:[#allocation8 + $0x370] sm:$0xff]  ;;  %v6640_v63 = vpack.c.bf16 %v3821_v55, %v3817_v27  ;;  %v6780_v52 = vpack.c.bf16 %v4013_v49, %v4009_v48  ;;  %v4015_v27 = vld [vmem:[#allocation10 + $0x88] sm:$0xff] }
 0x7ed   :  { %6685 = vmatprep.subr.bf16.mxu1 %v6684_v62  ;;  %v3823_v62 = vld [vmem:[#allocation8 + $0x3b8] sm:$0xff]  ;;  %v6702_v5 = vpack.c.bf16 %v3814_v59, %v3810_v57  ;;  %v4014_v57 = vld [vmem:[#allocation10 + $0x80] sm:$0xff]  ;;  %v4047_v48 = vld [vmem:[#allocation10 + $0x188] sm:$0xff] }
 0x7ee   :  { %6623 = vmatpush1.bf16.msra.mxu0 %v6622_v2  ;;  %v3820_v2 = vld [vmem:[#allocation8 + $0x3a0] sm:$0xff]  ;;  %v6704_v7 = vpack.c.bf16 %v3823_v62, %v3819_v61  ;;  %v4017_v62 = vld [vmem:[#allocation10 + $0x98] sm:$0xff]  ;;  %v4051_v49 = vld [vmem:[#allocation10 + $0x1a8] sm:$0xff] }
 0x7ef   :  { %6625 = vmatprep.subr.bf16.mxu0 %v6624_v6  ;;  %v3829_v6 = vld [vmem:[#allocation8 + $0x3e8] sm:$0xff]  ;;  %v6642_v12 = vpack.c.bf16 %v3820_v2, %v3816_v1  ;;  %v4018_v59 = vld [vmem:[#allocation10 + $0xa0] sm:$0xff]  ;;  %v4016_v1 = vld [vmem:[#allocation10 + $0x90] sm:$0xff] }
 0x7f0   :  { %6687 = vmatpush1.bf16.msra.mxu1 %v6686_v11  ;;  %v3822_v11 = vld [vmem:[#allocation8 + $0x3b0] sm:$0xff]  ;;  %v6644_v16 = vpack.c.bf16 %v3829_v6, %v3825_v38  ;;  %v6722_v61 = vpack.c.bf16 %v4018_v59, %v4014_v57  ;;  %v4023_v38 = vld [vmem:[#allocation10 + $0xc8] sm:$0xff] }
 0x7f1   :  { %6689 = vmatprep.subr.bf16.mxu1 %v6688_v45  ;;  %v3831_v45 = vld [vmem:[#allocation8 + $0x3f8] sm:$0xff]  ;;  %v6706_v19 = vpack.c.bf16 %v3822_v11, %v3818_v9  ;;  %v4027_v6 = vld [vmem:[#allocation10 + $0xe8] sm:$0xff]  ;;  %v4022_v11 = vld [vmem:[#allocation10 + $0xc0] sm:$0xff] }
 0x7f2   :  { %6627 = vmatpush1.bf16.msra.mxu0 %v6626_v17  ;;  %v3828_v17 = vld [vmem:[#allocation8 + $0x3e0] sm:$0xff]  ;;  %v6708_v22 = vpack.c.bf16 %v3831_v45, %v3827_v13  ;;  %v6724_v9 = vpack.c.bf16 %v4027_v6, %v4023_v38  ;;  %v4025_v13 = vld [vmem:[#allocation10 + $0xd8] sm:$0xff]  ;;  %v4048_v59 = vld [vmem:[#allocation10 + $0x190] sm:$0xff] }
 0x7f3   :  { %6629 = vmatprep.subr.bf16.mxu0 %v6628_v24  ;;  %v3826_v24 = vld [vmem:[#allocation8 + $0x3d0] sm:$0xff]  ;;  %v6646_v28 = vpack.c.bf16 %v3828_v17, %v3824_v14  ;;  %v4029_v45 = vld [vmem:[#allocation10 + $0xf8] sm:$0xff]  ;;  %v4058_v38 = vld [vmem:[#allocation10 + $0x1e0] sm:$0xff] }
 0x7f4   :  { %6691 = vmatpush1.bf16.msra.mxu1 %v6690_v29  ;;  %v6710_v29 = vpack.c.bf16 %v3830_v25, %v3826_v24  ;;  %v4028_v14 = vld [vmem:[#allocation10 + $0xf0] sm:$0xff]  ;;  %v4035_v24 = vld [vmem:[#allocation10 + $0x128] sm:$0xff]  ;;  %v4030_v25 = vld [vmem:[#allocation10 + $0x100] sm:$0xff] }
 0x7f5   :  { %6693 = vmatprep.subr.bf16.mxu1 %v6692_v31  ;;  %v4003_v31 = vld [vmem:[#allocation10 + $0x28] sm:$0xff]  ;;  %v4057_v6 = vld [vmem:[#allocation10 + $0x1d8] sm:$0xff] }
 0x7f6   :  { %6631 = vmatpush1.bf16.msra.mxu0 %v6630_v34  ;;  %v6712_v26 = vpack.c.bf16 %v4003_v31, %v3999_v58  ;;  %v4002_v34 = vld [vmem:[#allocation10 + $0x20] sm:$0xff]  ;;  %v4033_v58 = vld [vmem:[#allocation10 + $0x118] sm:$0xff] }
 0x7f7   :  { %6633 = vmatprep.subr.bf16.mxu0 %v6632_v36  ;;  %v6714_v36 = vpack.c.bf16 %v4002_v34, %v3998_v15  ;;  %v4037_v31 = vld [vmem:[#allocation10 + $0x138] sm:$0xff]  ;;  %v4036_v34 = vld [vmem:[#allocation10 + $0x130] sm:$0xff] }
 0x7f8   :  { %6695 = vmatpush1.bf16.msra.mxu1 %v6694_v40  ;;  %v4004_v40 = vld [vmem:[#allocation10 + $0x30] sm:$0xff]  ;;  %v6792_v15 = vpack.c.bf16 %v4037_v31, %v4033_v58 }
 0x7f9   :  { %6697 = vmatprep.subr.bf16.mxu1 %v6696_v42  ;;  %v6778_v41 = vpack.c.bf16 %v4004_v40, %v4000_v39  ;;  %v4011_v42 = vld [vmem:[#allocation10 + $0x68] sm:$0xff]  ;;  %v4045_v39 = vld [vmem:[#allocation10 + $0x178] sm:$0xff] }
 0x7fa   :  { %6635 = vmatpush1.bf16.msra.mxu0 %v6634_v47  ;;  %v6716_v46 = vpack.c.bf16 %v4011_v42, %v4007_v10  ;;  %v4010_v47 = vld [vmem:[#allocation10 + $0x60] sm:$0xff] }
 0x7fb   :  { %6637 = vmatprep.subr.bf16.mxu0 %v6636_v50  ;;  %v6718_v50 = vpack.c.bf16 %v4010_v47, %v4006_v44  ;;  %v4038_v10 = vld [vmem:[#allocation10 + $0x140] sm:$0xff]  ;;  %v4040_v44 = vld [vmem:[#allocation10 + $0x150] sm:$0xff] }
 0x7fc   :  { %6699 = vmatpush1.bf16.msra.mxu1 %v6698_v54  ;;  %v4012_v54 = vld [vmem:[#allocation10 + $0x70] sm:$0xff]  ;;  %v4042_v42 = vld [vmem:[#allocation10 + $0x160] sm:$0xff] }
 0x7fd   :  { %6701 = vmatprep.subr.bf16.mxu1 %v6700_v56  ;;  %v6782_v55 = vpack.c.bf16 %v4012_v54, %v4008_v53  ;;  %v4019_v56 = vld [vmem:[#allocation10 + $0xa8] sm:$0xff]  ;;  %v4044_v47 = vld [vmem:[#allocation10 + $0x170] sm:$0xff]  ;;  %v6734_v53 = vpack.c.bf16 %v4042_v42, %v4038_v10 }
 0x7fe   :  { %6639 = vmatpush1.bf16.msra.mxu0 %v6638_v60  ;;  %v6720_v60 = vpack.c.bf16 %v4019_v56, %v4015_v27  ;;  %v6798_v54 = vpack.c.bf16 %v4044_v47, %v4040_v44  ;;  %v6736_v27 = vpack.c.bf16 %v4051_v49, %v4047_v48  ;;  %v4050_v56 = vld [vmem:[#allocation10 + $0x1a0] sm:$0xff]  ;;  %v4079_v44 = vld [vmem:[#allocation10 + $0x288] sm:$0xff] }
 0x7ff   :  { %6641 = vmatprep.subr.bf16.mxu0 %v6640_v63  ;;  %v4021_v63 = vld [vmem:[#allocation10 + $0xb8] sm:$0xff]  ;;  %v4078_v48 = vld [vmem:[#allocation10 + $0x280] sm:$0xff] }
 0x800   :  { %6703 = vmatpush1.bf16.msra.mxu1 %v6702_v5  ;;  %v6784_v2 = vpack.c.bf16 %v4021_v63, %v4017_v62  ;;  %v4020_v5 = vld [vmem:[#allocation10 + $0xb0] sm:$0xff]  ;;  %v4055_v63 = vld [vmem:[#allocation10 + $0x1c8] sm:$0xff]  ;;  %v4082_v49 = vld [vmem:[#allocation10 + $0x2a0] sm:$0xff] }
 0x801   :  { %6705 = vmatprep.subr.bf16.mxu1 %v6704_v7  ;;  %v6786_v7 = vpack.c.bf16 %v4020_v5, %v4016_v1  ;;  %v4059_v1 = vld [vmem:[#allocation10 + $0x1e8] sm:$0xff]  ;;  %v4054_v5 = vld [vmem:[#allocation10 + $0x1c0] sm:$0xff] }
 0x802   :  { %6643 = vmatpush1.bf16.msra.mxu0 %v6642_v12  ;;  %v4026_v12 = vld [vmem:[#allocation10 + $0xe0] sm:$0xff] }
 0x803   :  { %6645 = vmatprep.subr.bf16.mxu0 %v6644_v16  ;;  %v4024_v16 = vld [vmem:[#allocation10 + $0xd0] sm:$0xff]  ;;  %v6726_v17 = vpack.c.bf16 %v4026_v12, %v4022_v11 }
 0x804   :  { %6707 = vmatpush1.bf16.msra.mxu1 %v6706_v19  ;;  %v6788_v19 = vpack.c.bf16 %v4029_v45, %v4025_v13  ;;  %v4056_v11 = vld [vmem:[#allocation10 + $0x1d0] sm:$0xff] }
 0x805   :  { %6709 = vmatprep.subr.bf16.mxu1 %v6708_v22  ;;  %v4031_v22 = vld [vmem:[#allocation10 + $0x108] sm:$0xff]  ;;  %v4060_v12 = vld [vmem:[#allocation10 + $0x1f0] sm:$0xff] }
 0x806   :  { %6647 = vmatpush1.bf16.msra.mxu0 %v6646_v28  ;;  %v6790_v28 = vpack.c.bf16 %v4028_v14, %v4024_v16  ;;  %v6806_v45 = vpack.c.bf16 %v4060_v12, %v4056_v11  ;;  %v4063_v16 = vld [vmem:[#allocation10 + $0x208] sm:$0xff] }
 0x807   :  { %6713 = vmatprep.subr.bf16.mxu0 %v6712_v26  ;;  %v4032_v26 = vld [vmem:[#allocation10 + $0x110] sm:$0xff]  ;;  %v4067_v14 = vld [vmem:[#allocation10 + $0x228] sm:$0xff] }
 0x808   :  { %6711 = vmatpush1.bf16.msra.mxu1 %v6710_v29  ;;  %v6728_v29 = vpack.c.bf16 %v4035_v24, %v4031_v22  ;;  %v6794_v40 = vpack.c.bf16 %v4036_v34, %v4032_v26  ;;  %v4066_v22 = vld [vmem:[#allocation10 + $0x220] sm:$0xff]  ;;  %v4065_v24 = vld [vmem:[#allocation10 + $0x218] sm:$0xff]  ;;  %v4075_v26 = vld [vmem:[#allocation10 + $0x268] sm:$0xff] }
 0x809   :  { %3897 = vmatmul.mubr.f32.vlgmr.msra.gmra.mrb[24].mxu0 %v3700_v30  ;;  %6777 = vmatprep.subr.bf16.mxu1 %v6776_v37  ;;  %v4041_v37 = vld [vmem:[#allocation10 + $0x158] sm:$0xff]  ;;  %v4099_v11 = vld [vmem:[#allocation10 + $0x328] sm:$0xff] }
 0x80a   :  { %6715 = vmatpush1.bf16.msra.mxu0 %v6714_v36 }
 0x80b   :  { %3968 = vmatmul.mubr.f32.vlgmr.msra.gmra.mrb[24].mxu1 %v3700_v30  ;;  %6717 = vmatprep.subr.bf16.mxu0 %v6716_v46  ;;  %v4034_v30 = vld [vmem:[#allocation10 + $0x120] sm:$0xff]  ;;  %v6796_v46 = vpack.c.bf16 %v4045_v39, %v4041_v37  ;;  %v4077_v39 = vld [vmem:[#allocation10 + $0x278] sm:$0xff] }
 0x80c   :  { %6779 = vmatpush1.bf16.msra.mxu1 %v6778_v41  ;;  %v6730_v36 = vpack.c.bf16 %v4034_v30, %v4030_v25  ;;  %v6732_v41 = vpack.c.bf16 %v4043_v43, %v4039_v35  ;;  %v4068_v30 = vld [vmem:[#allocation10 + $0x230] sm:$0xff]  ;;  %v4070_v35 = vld [vmem:[#allocation10 + $0x240] sm:$0xff] }
 0x80d   :  { %6781 = vmatprep.subr.bf16.mxu1 %v6780_v52  ;;  %v4053_v52 = vld [vmem:[#allocation10 + $0x1b8] sm:$0xff]  ;;  %v4074_v43 = vld [vmem:[#allocation10 + $0x260] sm:$0xff] }
 0x80e   :  { %6719 = vmatpush1.bf16.msra.mxu0 %v6718_v50  ;;  %v4049_v50 = vld [vmem:[#allocation10 + $0x198] sm:$0xff]  ;;  %v6750_v37 = vpack.c.bf16 %v4074_v43, %v4070_v35  ;;  %v4104_v35 = vld [vmem:[#allocation10 + $0x350] sm:$0xff] }
 0x80f   :  { %6721 = vmatprep.subr.bf16.mxu0 %v6720_v60  ;;  %v6800_v57 = vpack.c.bf16 %v4053_v52, %v4049_v50  ;;  %v4052_v60 = vld [vmem:[#allocation10 + $0x1b0] sm:$0xff]  ;;  %v4081_v50 = vld [vmem:[#allocation10 + $0x298] sm:$0xff]  ;;  %v6754_v52 = vpack.c.bf16 %v4082_v49, %v4078_v48 }
 0x810   :  { %6783 = vmatpush1.bf16.msra.mxu1 %v6782_v55  ;;  %v4046_v55 = vld [vmem:[#allocation10 + $0x180] sm:$0xff]  ;;  %v6802_v62 = vpack.c.bf16 %v4052_v60, %v4048_v59  ;;  %v4091_v59 = vld [vmem:[#allocation10 + $0x2e8] sm:$0xff]  ;;  %v4108_v43 = vld [vmem:[#allocation10 + $0x370] sm:$0xff] }
 0x811   :  { %6785 = vmatprep.subr.bf16.mxu1 %v6784_v2  ;;  %v6740_v2 = vpack.c.bf16 %v4059_v1, %v4055_v63  ;;  %v4089_v63 = vld [vmem:[#allocation10 + $0x2d8] sm:$0xff]  ;;  %v4112_v48 = vld [vmem:[#allocation10 + $0x390] sm:$0xff] }
 0x812   :  { %6723 = vmatpush1.bf16.msra.mxu0 %v6722_v61  ;;  %v6738_v61 = vpack.c.bf16 %v4050_v56, %v4046_v55  ;;  %v4116_v49 = vld [vmem:[#allocation10 + $0x3b0] sm:$0xff] }
 0x813   :  { %6725 = vmatprep.subr.bf16.mxu0 %v6724_v9  ;;  %v4061_v9 = vld [vmem:[#allocation10 + $0x1f8] sm:$0xff] }
 0x814   :  { %6787 = vmatpush1.bf16.msra.mxu1 %v6786_v7  ;;  %v6742_v7 = vpack.c.bf16 %v4058_v38, %v4054_v5  ;;  %v6804_v13 = vpack.c.bf16 %v4061_v9, %v4057_v6  ;;  %v4088_v5 = vld [vmem:[#allocation10 + $0x2d0] sm:$0xff]  ;;  %v4095_v9 = vld [vmem:[#allocation10 + $0x308] sm:$0xff] }
 0x815   :  { %6789 = vmatprep.subr.bf16.mxu1 %v6788_v19  ;;  %v4062_v19 = vld [vmem:[#allocation10 + $0x200] sm:$0xff]  ;;  %v4092_v38 = vld [vmem:[#allocation10 + $0x2f0] sm:$0xff]  ;;  %v6760_v12 = vpack.c.bf16 %v4099_v11, %v4095_v9 }
 0x816   :  { %6727 = vmatpush1.bf16.msra.mxu0 %v6726_v17  ;;  %v6744_v17 = vpack.c.bf16 %v4067_v14, %v4063_v16  ;;  %v6746_v25 = vpack.c.bf16 %v4066_v22, %v4062_v19  ;;  %v4097_v16 = vld [vmem:[#allocation10 + $0x318] sm:$0xff]  ;;  %v4096_v19 = vld [vmem:[#allocation10 + $0x310] sm:$0xff] }
 0x817   :  { %6729 = vmatprep.subr.bf16.mxu0 %v6728_v29  ;;  %v4064_v29 = vld [vmem:[#allocation10 + $0x210] sm:$0xff] }
 0x818   :  { %6791 = vmatpush1.bf16.msra.mxu1 %v6790_v28  ;;  %v4069_v28 = vld [vmem:[#allocation10 + $0x238] sm:$0xff]  ;;  %v6810_v31 = vpack.c.bf16 %v4068_v30, %v4064_v29  ;;  %v4100_v22 = vld [vmem:[#allocation10 + $0x330] sm:$0xff]  ;;  %v4107_v29 = vld [vmem:[#allocation10 + $0x368] sm:$0xff] }
 0x819   :  { %6793 = vmatprep.subr.bf16.mxu1 %v6792_v15  ;;  %v6808_v58 = vpack.c.bf16 %v4069_v28, %v4065_v24  ;;  %v4071_v15 = vld [vmem:[#allocation10 + $0x248] sm:$0xff] }
 0x81a   :  { %6731 = vmatpush1.bf16.msra.mxu0 %v6730_v36  ;;  %v6748_v34 = vpack.c.bf16 %v4075_v26, %v4071_v15  ;;  %v4073_v36 = vld [vmem:[#allocation10 + $0x258] sm:$0xff]  ;;  %v4103_v28 = vld [vmem:[#allocation10 + $0x348] sm:$0xff] }
 0x81b   :  { %6733 = vmatprep.subr.bf16.mxu0 %v6732_v41  ;;  %v4076_v41 = vld [vmem:[#allocation10 + $0x270] sm:$0xff]  ;;  %v6812_v10 = vpack.c.bf16 %v4077_v39, %v4073_v36  ;;  %v6764_v30 = vpack.c.bf16 %v4107_v29, %v4103_v28  ;;  %v4105_v15 = vld [vmem:[#allocation10 + $0x358] sm:$0xff]  ;;  %v4111_v39 = vld [vmem:[#allocation10 + $0x388] sm:$0xff] }
 0x81c   :  { %6795 = vmatpush1.bf16.msra.mxu1 %v6794_v40  ;;  %v4072_v40 = vld [vmem:[#allocation10 + $0x250] sm:$0xff] }
 0x81d   :  { %6797 = vmatprep.subr.bf16.mxu1 %v6796_v46  ;;  %v6814_v42 = vpack.c.bf16 %v4076_v41, %v4072_v40  ;;  %v4083_v46 = vld [vmem:[#allocation10 + $0x2a8] sm:$0xff] }
 0x81e   :  { %6735 = vmatpush1.bf16.msra.mxu0 %v6734_v53  ;;  %v6752_v47 = vpack.c.bf16 %v4083_v46, %v4079_v44  ;;  %v4085_v53 = vld [vmem:[#allocation10 + $0x2b8] sm:$0xff]  ;;  %v4115_v40 = vld [vmem:[#allocation10 + $0x3a8] sm:$0xff] }
 0x81f   :  { %6737 = vmatprep.subr.bf16.mxu0 %v6736_v27  ;;  %v4084_v27 = vld [vmem:[#allocation10 + $0x2b0] sm:$0xff]  ;;  %v6816_v55 = vpack.c.bf16 %v4085_v53, %v4081_v50  ;;  %v6768_v41 = vpack.c.bf16 %v4115_v40, %v4111_v39  ;;  %v4113_v44 = vld [vmem:[#allocation10 + $0x398] sm:$0xff]  ;;  %v4119_v53 = vld [vmem:[#allocation10 + $0x3c8] sm:$0xff] }
 0x820   :  { %6799 = vmatpush1.bf16.msra.mxu1 %v6798_v54  ;;  %v4080_v54 = vld [vmem:[#allocation10 + $0x290] sm:$0xff] }
 0x821   :  { %6801 = vmatprep.subr.bf16.mxu1 %v6800_v57  ;;  %v6818_v56 = vpack.c.bf16 %v4084_v27, %v4080_v54  ;;  %v4087_v57 = vld [vmem:[#allocation10 + $0x2c8] sm:$0xff] }
 0x822   :  { %6739 = vmatpush1.bf16.msra.mxu0 %v6738_v61  ;;  %v6756_v60 = vpack.c.bf16 %v4091_v59, %v4087_v57  ;;  %v4086_v61 = vld [vmem:[#allocation10 + $0x2c0] sm:$0xff]  ;;  %v4123_v54 = vld [vmem:[#allocation10 + $0x3e8] sm:$0xff]  ;;  %v4121_v57 = vld [vmem:[#allocation10 + $0x3d8] sm:$0xff] }
 0x823   :  { %6741 = vmatprep.subr.bf16.mxu0 %v6740_v2  ;;  %v4093_v2 = vld [vmem:[#allocation10 + $0x2f8] sm:$0xff]  ;;  %v6772_v27 = vpack.c.bf16 %v4123_v54, %v4119_v53 }
 0x824   :  { %6803 = vmatpush1.bf16.msra.mxu1 %v6802_v62  ;;  %v4090_v62 = vld [vmem:[#allocation10 + $0x2e0] sm:$0xff]  ;;  %v6820_v6 = vpack.c.bf16 %v4093_v2, %v4089_v63  ;;  %v4295_v2 = vld [vmem:[#allocation8 + $0x8] sm:$0xff] }
 0x825   :  { %6805 = vmatprep.subr.bf16.mxu1 %v6804_v13  ;;  %v6758_v1 = vpack.c.bf16 %v4090_v62, %v4086_v61  ;;  %v4094_v13 = vld [vmem:[#allocation10 + $0x300] sm:$0xff]  ;;  %v4120_v61 = vld [vmem:[#allocation10 + $0x3d0] sm:$0xff] }
 0x826   :  { %6743 = vmatpush1.bf16.msra.mxu0 %v6742_v7  ;;  %v6822_v7 = vpack.c.bf16 %v4092_v38, %v4088_v5  ;;  %v4124_v62 = vld [vmem:[#allocation10 + $0x3f0] sm:$0xff]  ;;  %v4299_v5 = vld [vmem:[#allocation8 + $0x28] sm:$0xff] }
 0x827   :  { %6745 = vmatprep.subr.bf16.mxu0 %v6744_v17  ;;  %v4101_v17 = vld [vmem:[#allocation10 + $0x338] sm:$0xff]  ;;  %v6840_v38 = vpack.c.bf16 %v4299_v5, %v4295_v2  ;;  %v4294_v5 = vld [vmem:[#allocation8] sm:$0xff] }
 0x828   :  { %6807 = vmatpush1.bf16.msra.mxu1 %v6806_v45  ;;  %v4098_v45 = vld [vmem:[#allocation10 + $0x320] sm:$0xff]  ;;  %v6824_v24 = vpack.c.bf16 %v4101_v17, %v4097_v16 }
 0x829   :  { %6809 = vmatprep.subr.bf16.mxu1 %v6808_v58  ;;  %v6762_v14 = vpack.c.bf16 %v4098_v45, %v4094_v13  ;;  %v4102_v58 = vld [vmem:[#allocation10 + $0x340] sm:$0xff] }
 0x82a   :  { %6747 = vmatpush1.bf16.msra.mxu0 %v6746_v25  ;;  %v6826_v25 = vpack.c.bf16 %v4100_v22, %v4096_v19 }
 0x82b   :  { %6749 = vmatprep.subr.bf16.mxu0 %v6748_v34  ;;  %v4109_v34 = vld [vmem:[#allocation10 + $0x378] sm:$0xff] }
 0x82c   :  { %6811 = vmatpush1.bf16.msra.mxu1 %v6810_v31  ;;  %v4106_v31 = vld [vmem:[#allocation10 + $0x360] sm:$0xff]  ;;  %v6828_v36 = vpack.c.bf16 %v4109_v34, %v4105_v15 }
 0x82d   :  { %6813 = vmatprep.subr.bf16.mxu1 %v6812_v10  ;;  %v6766_v26 = vpack.c.bf16 %v4106_v31, %v4102_v58  ;;  %v4110_v10 = vld [vmem:[#allocation10 + $0x380] sm:$0xff] }
 0x82e   :  { %6751 = vmatpush1.bf16.msra.mxu0 %v6750_v37  ;;  %v6830_v37 = vpack.c.bf16 %v4108_v43, %v4104_v35 }
 0x82f   :  { %6753 = vmatprep.subr.bf16.mxu0 %v6752_v47  ;;  %v4117_v47 = vld [vmem:[#allocation10 + $0x3b8] sm:$0xff] }
 0x830   :  { %6815 = vmatpush1.bf16.msra.mxu1 %v6814_v42  ;;  %v4114_v42 = vld [vmem:[#allocation10 + $0x3a0] sm:$0xff]  ;;  %v6832_v50 = vpack.c.bf16 %v4117_v47, %v4113_v44 }
 0x831   :  { %6817 = vmatprep.subr.bf16.mxu1 %v6816_v55  ;;  %v6770_v46 = vpack.c.bf16 %v4114_v42, %v4110_v10  ;;  %v4118_v55 = vld [vmem:[#allocation10 + $0x3c0] sm:$0xff] }
 0x832   :  { %6755 = vmatpush1.bf16.msra.mxu0 %v6754_v52  ;;  %v6834_v52 = vpack.c.bf16 %v4116_v49, %v4112_v48 }
 0x833   :  { %6757 = vmatprep.subr.bf16.mxu0 %v6756_v60  ;;  %v4125_v60 = vld [vmem:[#allocation10 + $0x3f8] sm:$0xff] }
 0x834   :  { %6819 = vmatpush1.bf16.msra.mxu1 %v6818_v56  ;;  %v4122_v56 = vld [vmem:[#allocation10 + $0x3e0] sm:$0xff]  ;;  %v6836_v63 = vpack.c.bf16 %v4125_v60, %v4121_v57 }
 0x835   :  { %6821 = vmatprep.subr.bf16.mxu1 %v6820_v6  ;;  %v6774_v59 = vpack.c.bf16 %v4122_v56, %v4118_v55  ;;  %v4297_v6 = vld [vmem:[#allocation8 + $0x18] sm:$0xff] }
 0x836   :  { %6759 = vmatpush1.bf16.msra.mxu0 %v6758_v1  ;;  %v6838_v1 = vpack.c.bf16 %v4124_v62, %v4120_v61 }
 0x837   :  { %6761 = vmatprep.subr.bf16.mxu0 %v6760_v12 }
 0x838   :  { %6823 = vmatpush1.bf16.msra.mxu1 %v6822_v7  ;;  %v4301_v7 = vld [vmem:[#allocation8 + $0x38] sm:$0xff] }
 0x839   :  { %6825 = vmatprep.subr.bf16.mxu1 %v6824_v24  ;;  %v6904_v9 = vpack.c.bf16 %v4301_v7, %v4297_v6  ;;  %v4303_v6 = vld [vmem:[#allocation8 + $0x48] sm:$0xff] }
 0x83a   :  { %6763 = vmatpush1.bf16.msra.mxu0 %v6762_v14  ;;  %v4307_v7 = vld [vmem:[#allocation8 + $0x68] sm:$0xff] }
 0x83b   :  { %6765 = vmatprep.subr.bf16.mxu0 %v6764_v30 }
 0x83c   :  { %6827 = vmatpush1.bf16.msra.mxu1 %v6826_v25 }
 0x83d   :  { %6829 = vmatprep.subr.bf16.mxu1 %v6828_v36 }
 0x83e   :  { %6767 = vmatpush1.bf16.msra.mxu0 %v6766_v26 }
 0x83f   :  { %6769 = vmatprep.subr.bf16.mxu0 %v6768_v41 }
 0x840   :  { %6831 = vmatpush1.bf16.msra.mxu1 %v6830_v37 }
 0x841   :  { %6833 = vmatprep.subr.bf16.mxu1 %v6832_v50 }
 0x842   :  { %6771 = vmatpush1.bf16.msra.mxu0 %v6770_v46 }
 0x843   :  { %6773 = vmatprep.subr.bf16.mxu0 %v6772_v27 }
 0x844   :  { %6835 = vmatpush1.bf16.msra.mxu1 %v6834_v52 }
 0x845   :  { %6837 = vmatprep.subr.bf16.mxu1 %v6836_v63 }
 0x846   :  { %6775 = vmatpush1.bf16.msra.mxu0 %v6774_v59 }
 0x847   :  { %6841 = vmatprep.subr.bf16.mxu0 %v6840_v38  ;;  %v4298_v38 = vld [vmem:[#allocation8 + $0x20] sm:$0xff] }
 0x848   :  { %6839 = vmatpush1.bf16.msra.mxu1 %v6838_v1 }
 0x849   :  { %6905 = vmatprep.subr.bf16.mxu1 %v6904_v9 }
 0x89c   :  { %v3602_v11 = vpop.f32.mrb[22].mxu0  ;;  %v3673_v12 = vpop.f32.mrb[22].mxu1 }
 0x89d   :  { %v3603_v13 = vadd.f32 %v3602_v11, %v7630_v3  ;;  %v3604_v45 = vpop.f32.mrb[23].mxu0  ;;  %v3675_v16 = vpop.f32.mrb[23].mxu1  ;;  %v3674_v22 = vadd.f32 %v3673_v12, %v7639_v8  ;;  %v4296_v11 = vld [vmem:[#allocation8 + $0x10] sm:$0xff] }
 0x89e   :  { %v3605_v14 = vadd.f32 %v3604_v45, %v7634_v4  ;;  %v3676_v24 = vadd.f32 %v3675_v16, %v7645_v18  ;;  %v4300_v12 = vld [vmem:[#allocation8 + $0x30] sm:$0xff]  ;;  %v6842_v45 = vpack.c.bf16 %v4298_v38, %v4294_v5  ;;  %v4305_v16 = vld [vmem:[#allocation8 + $0x58] sm:$0xff]  ;;  %v4339_v5 = vld [vmem:[#allocation8 + $0x168] sm:$0xff] }
 0x89f   :  { %v3678_v17 = vmul.f32 0.5, %v3603_v13 }
 0x8a0   :  { %v3682_v19 = vmul.f32 0.5, %v3605_v14  ;;  %v3687_v25 = vmul.f32 0.5, %v3676_v24  ;;  %v4309_v14 = vld [vmem:[#allocation8 + $0x78] sm:$0xff]  ;;  %v6906_v24 = vpack.c.bf16 %v4300_v12, %v4296_v11 }
 0x8a1   :  { %7246 = vtanh.f32 %v3678_v17  ;;  %v4337_v11 = vld [vmem:[#allocation8 + $0x158] sm:$0xff] }
 0x8a2   :  { %7248 = vtanh.f32 %v3682_v19  ;;  %v6844_v19 = vpack.c.bf16 %v4307_v7, %v4303_v6  ;;  %v4328_v6 = vld [vmem:[#allocation8 + $0x110] sm:$0xff]  ;;  %v4341_v12 = vld [vmem:[#allocation8 + $0x178] sm:$0xff] }
 0x8a3   :  { %7250 = vtanh.f32 %v3674_v22  ;;  %v4306_v22 = vld [vmem:[#allocation8 + $0x60] sm:$0xff]  ;;  %v4332_v7 = vld [vmem:[#allocation8 + $0x130] sm:$0xff] }
 0x8a4   :  { %7252 = vtanh.f32 %v3687_v25  ;;  %v4311_v25 = vld [vmem:[#allocation8 + $0x88] sm:$0xff] }
 0x8ab   :  { %v7247_v28 = vpop.eup %7246 }
 0x8ac   :  { %v7249_v29 = vpop.eup %7248  ;;  %v3680_v30 = vmul.f32 0.5, %v7247_v28  ;;  %v4315_v28 = vld [vmem:[#allocation8 + $0xa8] sm:$0xff] }
 0x8ad   :  { %v3684_v58 = vmul.f32 0.5, %v7249_v29  ;;  %v7251_v15 = vpop.eup %7250  ;;  %v6908_v29 = vpack.c.bf16 %v4309_v14, %v4305_v16  ;;  %v4338_v16 = vld [vmem:[#allocation8 + $0x160] sm:$0xff]  ;;  %v6922_v14 = vpack.c.bf16 %v4332_v7, %v4328_v6 }
 0x8ae   :  { %v3681_v31 = vadd.f32 0.5, %v3680_v30  ;;  %v7253_v36 = vpop.eup %7252  ;;  %v4304_v30 = vld [vmem:[#allocation8 + $0x50] sm:$0xff]  ;;  %v4366_v7 = vld [vmem:[#allocation8 + $0x240] sm:$0xff] }
 0x8af   :  { %v3685_v26 = vadd.f32 0.5, %v3684_v58  ;;  %v3689_v37 = vmul.f32 0.5, %v7253_v36  ;;  %v4308_v58 = vld [vmem:[#allocation8 + $0x70] sm:$0xff]  ;;  %v4314_v36 = vld [vmem:[#allocation8 + $0xa0] sm:$0xff] }
 0x8b0   :  { %v3693_v34 = vmul.f32 %v7251_v15, %v3681_v31  ;;  %v4313_v15 = vld [vmem:[#allocation8 + $0x98] sm:$0xff] }
 0x8b1   :  { %v3692_v35 = vmul.f32 %v3685_v26, %v7712_v32  ;;  %v3690_v39 = vadd.f32 0.5, %v3689_v37  ;;  %v4317_v26 = vld [vmem:[#allocation8 + $0xb8] sm:$0xff]  ;;  %v6910_v37 = vpack.c.bf16 %v4308_v58, %v4304_v30  ;;  %v4342_v58 = vld [vmem:[#allocation8 + $0x180] sm:$0xff] }
 0x8b3   :  { %v7728_v43 = vadd.f32 %v3693_v34, %v3692_v35  ;;  %v6848_v34 = vpack.c.bf16 %v4315_v28, %v4311_v25  ;;  %v4310_v35 = vld [vmem:[#allocation8 + $0x80] sm:$0xff]  ;;  %v4345_v28 = vld [vmem:[#allocation8 + $0x198] sm:$0xff] }
 0x8b5   :  { %7254 = vtanh.f32 %v7728_v43 }
 0x8bf   :  { %v7255_v40 = vpop.eup %7254 }
 0x8c0   :  { %v3696_v41 = vmul.f32 %v7255_v40, %v3690_v39  ;;  %v4319_v39 = vld [vmem:[#allocation8 + $0xc8] sm:$0xff] }
 0x8c1   :  { %v4323_v40 = vld [vmem:[#allocation8 + $0xe8] sm:$0xff] }
 0x8c2   :  { %4190 = vmatprep.mubr.f32.mxu0 %v3696_v41  ;;  %4261 = vmatprep.mubr.f32.mxu1 %v3696_v41  ;;  %v6912_v41 = vpack.c.bf16 %v4317_v26, %v4313_v15  ;;  %v4351_v26 = vld [vmem:[#allocation8 + $0x1c8] sm:$0xff] }
 0x8dc   :  { %v3898_v10 = vpop.f32.mrb[24].mxu0 }
 0x8dd   :  { %v3899_v42 = vadd.f32 %v3898_v10, %v7606_v20  ;;  %v3900_v44 = vpop.f32.mrb[25].mxu0  ;;  %v4312_v10 = vld [vmem:[#allocation8 + $0x90] sm:$0xff] }
 0x8de   :  { %v3901_v46 = vadd.f32 %v3900_v44, %v7610_v21  ;;  %v3969_v47 = vpop.f32.mrb[24].mxu1  ;;  %v6850_v44 = vpack.c.bf16 %v4314_v36, %v4310_v35  ;;  %v4344_v36 = vld [vmem:[#allocation8 + $0x190] sm:$0xff] }
 0x8df   :  { %v3974_v48 = vmul.f32 0.5, %v3899_v42  ;;  %v3970_v32 = vadd.f32 %v3969_v47, %v7614_v23  ;;  %v3971_v49 = vpop.f32.mrb[25].mxu1  ;;  %v4316_v42 = vld [vmem:[#allocation8 + $0xb0] sm:$0xff]  ;;  %v4325_v47 = vld [vmem:[#allocation8 + $0xf8] sm:$0xff] }
 0x8e0   :  { %v3978_v50 = vmul.f32 0.5, %v3901_v46  ;;  %v3972_v52 = vadd.f32 %v3971_v49, %v7622_v33  ;;  %v4321_v46 = vld [vmem:[#allocation8 + $0xd8] sm:$0xff]  ;;  %v4322_v49 = vld [vmem:[#allocation8 + $0xe0] sm:$0xff] }
 0x8e1   :  { %7256 = vtanh.f32 %v3974_v48  ;;  %v6852_v48 = vpack.c.bf16 %v4323_v40, %v4319_v39  ;;  %v4353_v40 = vld [vmem:[#allocation8 + $0x1d8] sm:$0xff] }
 0x8e2   :  { %7258 = vtanh.f32 %v3978_v50  ;;  %v3983_v53 = vmul.f32 0.5, %v3972_v52  ;;  %v6914_v50 = vpack.c.bf16 %v4316_v42, %v4312_v10  ;;  %v4327_v52 = vld [vmem:[#allocation8 + $0x108] sm:$0xff]  ;;  %v4350_v42 = vld [vmem:[#allocation8 + $0x1c0] sm:$0xff] }
 0x8e3   :  { %7260 = vtanh.f32 %v3970_v32  ;;  %v4318_v32 = vld [vmem:[#allocation8 + $0xc0] sm:$0xff] }
 0x8e4   :  { %7262 = vtanh.f32 %v3983_v53  ;;  %v4331_v53 = vld [vmem:[#allocation8 + $0x128] sm:$0xff] }
 0x8eb   :  { %v7257_v54 = vpop.eup %7256 }
 0x8ec   :  { %v7259_v27 = vpop.eup %7258  ;;  %v3976_v55 = vmul.f32 0.5, %v7257_v54  ;;  %v6916_v54 = vpack.c.bf16 %v4325_v47, %v4321_v46  ;;  %v4359_v47 = vld [vmem:[#allocation8 + $0x208] sm:$0xff] }
 0x8ed   :  { %v7261_v56 = vpop.eup %7260  ;;  %v3980_v57 = vmul.f32 0.5, %v7259_v27  ;;  %v4320_v27 = vld [vmem:[#allocation8 + $0xd0] sm:$0xff] }
 0x8ee   :  { %v3977_v59 = vadd.f32 0.5, %v3976_v55  ;;  %v7263_v1 = vpop.eup %7262  ;;  %v4324_v55 = vld [vmem:[#allocation8 + $0xf0] sm:$0xff] }
 0x8ef   :  { %v3981_v60 = vadd.f32 0.5, %v3980_v57  ;;  %v3985_v2 = vmul.f32 0.5, %v7263_v1  ;;  %v4329_v57 = vld [vmem:[#allocation8 + $0x118] sm:$0xff]  ;;  %v6918_v1 = vpack.c.bf16 %v4324_v55, %v4320_v27  ;;  %v4358_v55 = vld [vmem:[#allocation8 + $0x200] sm:$0xff] }
 0x8f0   :  { %v3989_v61 = vmul.f32 %v7261_v56, %v3977_v59  ;;  %v6854_v56 = vpack.c.bf16 %v4322_v49, %v4318_v32  ;;  %v4333_v59 = vld [vmem:[#allocation8 + $0x138] sm:$0xff]  ;;  %v4352_v49 = vld [vmem:[#allocation8 + $0x1d0] sm:$0xff] }
 0x8f1   :  { %v3988_v62 = vmul.f32 %v3981_v60, %v7720_v51  ;;  %v3986_v9 = vadd.f32 0.5, %v3985_v2  ;;  %v4302_v51 = vld [vmem:[#allocation8 + $0x40] sm:$0xff]  ;;  %v6856_v60 = vpack.c.bf16 %v4331_v53, %v4327_v52  ;;  %v4335_v2 = vld [vmem:[#allocation8 + $0x148] sm:$0xff]  ;;  %v6920_v38 = vpack.c.bf16 %v4333_v59, %v4329_v57  ;;  %v4361_v53 = vld [vmem:[#allocation8 + $0x218] sm:$0xff] }
 0x8f2   :  { %v6846_v31 = vpack.c.bf16 %v4306_v22, %v4302_v51  ;;  %v6924_v51 = vpack.c.bf16 %v4341_v12, %v4337_v11  ;;  %v4336_v22 = vld [vmem:[#allocation8 + $0x150] sm:$0xff]  ;;  %v4367_v59 = vld [vmem:[#allocation8 + $0x248] sm:$0xff] }
 0x8f3   :  { %v7736_v63 = vadd.f32 %v3989_v61, %v3988_v62  ;;  %v4326_v61 = vld [vmem:[#allocation8 + $0x100] sm:$0xff]  ;;  %v4375_v12 = vld [vmem:[#allocation8 + $0x288] sm:$0xff] }
 0x8f4   :  { %v4330_v62 = vld [vmem:[#allocation8 + $0x120] sm:$0xff] }
 0x8f5   :  { %7264 = vtanh.f32 %v7736_v63 }
 0x8ff   :  { %v7265_v13 = vpop.eup %7264 }
 0x900   :  { %v3992_v17 = vmul.f32 %v7265_v13, %v3986_v9  ;;  %v6858_v9 = vpack.c.bf16 %v4330_v62, %v4326_v61  ;;  %v6860_v13 = vpack.c.bf16 %v4339_v5, %v4335_v2  ;;  %v4360_v62 = vld [vmem:[#allocation8 + $0x210] sm:$0xff]  ;;  %v4369_v5 = vld [vmem:[#allocation8 + $0x258] sm:$0xff] }
 0x902   :  { %4191 = vmatmul.mubr.f32.vlgmr.msra.gmra.mrb[26].mxu0 %v3992_v17  ;;  %4262 = vmatmul.mubr.f32.vlgmr.msra.gmra.mrb[26].mxu1 %v3992_v17 }
 0x903   :  { %6843 = vmatpush1.bf16.msra.mxu0 %v6842_v45  ;;  %4486 = vmatprep.mubr.f32.mxu0 %v3992_v17  ;;  %v4334_v45 = vld [vmem:[#allocation8 + $0x140] sm:$0xff] }
 0x904   :  { %4557 = vmatprep.mubr.f32.mxu1 %v3992_v17  ;;  %6845 = vmatprep.subr.bf16.mxu0 %v6844_v19  ;;  %v4343_v17 = vld [vmem:[#allocation8 + $0x188] sm:$0xff]  ;;  %v6862_v25 = vpack.c.bf16 %v4338_v16, %v4334_v45  ;;  %v4368_v16 = vld [vmem:[#allocation8 + $0x250] sm:$0xff] }
 0x905   :  { %6907 = vmatpush1.bf16.msra.mxu1 %v6906_v24  ;;  %v4347_v19 = vld [vmem:[#allocation8 + $0x1a8] sm:$0xff]  ;;  %v4340_v24 = vld [vmem:[#allocation8 + $0x170] sm:$0xff] }
 0x906   :  { %6909 = vmatprep.subr.bf16.mxu1 %v6908_v29  ;;  %v4349_v29 = vld [vmem:[#allocation8 + $0x1b8] sm:$0xff]  ;;  %v6864_v30 = vpack.c.bf16 %v4347_v19, %v4343_v17  ;;  %v6926_v15 = vpack.c.bf16 %v4340_v24, %v4336_v22  ;;  %v4374_v24 = vld [vmem:[#allocation8 + $0x280] sm:$0xff] }
 0x907   :  { %6847 = vmatpush1.bf16.msra.mxu0 %v6846_v31  ;;  %v4346_v31 = vld [vmem:[#allocation8 + $0x1a0] sm:$0xff]  ;;  %v6928_v35 = vpack.c.bf16 %v4349_v29, %v4345_v28  ;;  %v4377_v19 = vld [vmem:[#allocation8 + $0x298] sm:$0xff]  ;;  %v4383_v29 = vld [vmem:[#allocation8 + $0x2c8] sm:$0xff] }
 0x908   :  { %6849 = vmatprep.subr.bf16.mxu0 %v6848_v34  ;;  %v4355_v34 = vld [vmem:[#allocation8 + $0x1e8] sm:$0xff]  ;;  %v6866_v39 = vpack.c.bf16 %v4346_v31, %v4342_v58  ;;  %v4376_v31 = vld [vmem:[#allocation8 + $0x290] sm:$0xff] }
 0x909   :  { %6911 = vmatpush1.bf16.msra.mxu1 %v6910_v37  ;;  %v4348_v37 = vld [vmem:[#allocation8 + $0x1b0] sm:$0xff]  ;;  %v6868_v10 = vpack.c.bf16 %v4355_v34, %v4351_v26  ;;  %v4385_v34 = vld [vmem:[#allocation8 + $0x2d8] sm:$0xff] }
 0x90a   :  { %6913 = vmatprep.subr.bf16.mxu1 %v6912_v41  ;;  %v4357_v41 = vld [vmem:[#allocation8 + $0x1f8] sm:$0xff]  ;;  %v6930_v46 = vpack.c.bf16 %v4348_v37, %v4344_v36  ;;  %v4382_v37 = vld [vmem:[#allocation8 + $0x2c0] sm:$0xff] }
 0x90b   :  { %6851 = vmatpush1.bf16.msra.mxu0 %v6850_v44  ;;  %v4354_v44 = vld [vmem:[#allocation8 + $0x1e0] sm:$0xff]  ;;  %v6932_v32 = vpack.c.bf16 %v4357_v41, %v4353_v40  ;;  %v4391_v41 = vld [vmem:[#allocation8 + $0x308] sm:$0xff] }
 0x90c   :  { %6853 = vmatprep.subr.bf16.mxu0 %v6852_v48  ;;  %v4363_v48 = vld [vmem:[#allocation8 + $0x228] sm:$0xff]  ;;  %v6870_v52 = vpack.c.bf16 %v4354_v44, %v4350_v42  ;;  %v4384_v44 = vld [vmem:[#allocation8 + $0x2d0] sm:$0xff] }
 0x90d   :  { %6915 = vmatpush1.bf16.msra.mxu1 %v6914_v50  ;;  %v4356_v50 = vld [vmem:[#allocation8 + $0x1f0] sm:$0xff]  ;;  %v6872_v27 = vpack.c.bf16 %v4363_v48, %v4359_v47  ;;  %v4393_v48 = vld [vmem:[#allocation8 + $0x318] sm:$0xff] }
 0x90e   :  { %6917 = vmatprep.subr.bf16.mxu1 %v6916_v54  ;;  %v4365_v54 = vld [vmem:[#allocation8 + $0x238] sm:$0xff]  ;;  %v6934_v57 = vpack.c.bf16 %v4356_v50, %v4352_v49  ;;  %v4390_v50 = vld [vmem:[#allocation8 + $0x300] sm:$0xff] }
 0x90f   :  { %6855 = vmatpush1.bf16.msra.mxu0 %v6854_v56  ;;  %v4362_v56 = vld [vmem:[#allocation8 + $0x220] sm:$0xff]  ;;  %v6936_v61 = vpack.c.bf16 %v4365_v54, %v4361_v53  ;;  %v4399_v54 = vld [vmem:[#allocation8 + $0x348] sm:$0xff] }
 0x910   :  { %6857 = vmatprep.subr.bf16.mxu0 %v6856_v60  ;;  %v4371_v60 = vld [vmem:[#allocation8 + $0x268] sm:$0xff]  ;;  %v6874_v2 = vpack.c.bf16 %v4362_v56, %v4358_v55  ;;  %v4392_v56 = vld [vmem:[#allocation8 + $0x310] sm:$0xff] }
 0x911   :  { %6919 = vmatpush1.bf16.msra.mxu1 %v6918_v1  ;;  %v4364_v1 = vld [vmem:[#allocation8 + $0x230] sm:$0xff]  ;;  %v6876_v6 = vpack.c.bf16 %v4371_v60, %v4367_v59  ;;  %v4401_v60 = vld [vmem:[#allocation8 + $0x358] sm:$0xff] }
 0x912   :  { %6921 = vmatprep.subr.bf16.mxu1 %v6920_v38  ;;  %v4373_v38 = vld [vmem:[#allocation8 + $0x278] sm:$0xff]  ;;  %v6938_v11 = vpack.c.bf16 %v4364_v1, %v4360_v62  ;;  %v4398_v1 = vld [vmem:[#allocation8 + $0x340] sm:$0xff] }
 0x913   :  { %6859 = vmatpush1.bf16.msra.mxu0 %v6858_v9  ;;  %v4370_v9 = vld [vmem:[#allocation8 + $0x260] sm:$0xff]  ;;  %v6940_v45 = vpack.c.bf16 %v4373_v38, %v4369_v5  ;;  %v4407_v38 = vld [vmem:[#allocation8 + $0x388] sm:$0xff] }
 0x914   :  { %6861 = vmatprep.subr.bf16.mxu0 %v6860_v13  ;;  %v4379_v13 = vld [vmem:[#allocation8 + $0x2a8] sm:$0xff]  ;;  %v6878_v17 = vpack.c.bf16 %v4370_v9, %v4366_v7  ;;  %v4400_v9 = vld [vmem:[#allocation8 + $0x350] sm:$0xff] }
 0x915   :  { %6923 = vmatpush1.bf16.msra.mxu1 %v6922_v14  ;;  %v4372_v14 = vld [vmem:[#allocation8 + $0x270] sm:$0xff]  ;;  %v6880_v22 = vpack.c.bf16 %v4379_v13, %v4375_v12  ;;  %v4409_v13 = vld [vmem:[#allocation8 + $0x398] sm:$0xff] }
 0x916   :  { %6925 = vmatprep.subr.bf16.mxu1 %v6924_v51  ;;  %v4381_v51 = vld [vmem:[#allocation8 + $0x2b8] sm:$0xff]  ;;  %v6942_v28 = vpack.c.bf16 %v4372_v14, %v4368_v16  ;;  %v4406_v14 = vld [vmem:[#allocation8 + $0x380] sm:$0xff] }
 0x917   :  { %6863 = vmatpush1.bf16.msra.mxu0 %v6862_v25  ;;  %v4378_v25 = vld [vmem:[#allocation8 + $0x2a0] sm:$0xff]  ;;  %v6944_v58 = vpack.c.bf16 %v4381_v51, %v4377_v19  ;;  %v4415_v51 = vld [vmem:[#allocation8 + $0x3c8] sm:$0xff] }
 0x918   :  { %6865 = vmatprep.subr.bf16.mxu0 %v6864_v30  ;;  %v4387_v30 = vld [vmem:[#allocation8 + $0x2e8] sm:$0xff]  ;;  %v6882_v26 = vpack.c.bf16 %v4378_v25, %v4374_v24  ;;  %v4408_v25 = vld [vmem:[#allocation8 + $0x390] sm:$0xff] }
 0x919   :  { %6927 = vmatpush1.bf16.msra.mxu1 %v6926_v15  ;;  %v4380_v15 = vld [vmem:[#allocation8 + $0x2b0] sm:$0xff]  ;;  %v6884_v36 = vpack.c.bf16 %v4387_v30, %v4383_v29  ;;  %v4417_v30 = vld [vmem:[#allocation8 + $0x3d8] sm:$0xff] }
 0x91a   :  { %6929 = vmatprep.subr.bf16.mxu1 %v6928_v35  ;;  %v4389_v35 = vld [vmem:[#allocation8 + $0x2f8] sm:$0xff]  ;;  %v6946_v40 = vpack.c.bf16 %v4380_v15, %v4376_v31  ;;  %v4414_v15 = vld [vmem:[#allocation8 + $0x3c0] sm:$0xff] }
 0x91b   :  { %6867 = vmatpush1.bf16.msra.mxu0 %v6866_v39  ;;  %v4386_v39 = vld [vmem:[#allocation8 + $0x2e0] sm:$0xff]  ;;  %v6948_v42 = vpack.c.bf16 %v4389_v35, %v4385_v34 }
 0x91c   :  { %6869 = vmatprep.subr.bf16.mxu0 %v6868_v10  ;;  %v4395_v10 = vld [vmem:[#allocation8 + $0x328] sm:$0xff]  ;;  %v6886_v47 = vpack.c.bf16 %v4386_v39, %v4382_v37  ;;  %v4420_v37 = vld [vmem:[#allocation8 + $0x3f0] sm:$0xff] }
 0x91d   :  { %6931 = vmatpush1.bf16.msra.mxu1 %v6930_v46  ;;  %v4388_v46 = vld [vmem:[#allocation8 + $0x2f0] sm:$0xff]  ;;  %v6888_v49 = vpack.c.bf16 %v4395_v10, %v4391_v41  ;;  %v4290_v41 = vld [vmem:[#allocation5 + $0x38] sm:$0xff]  ;;  %v4589_v10 = vld [vmem:[#allocation10 + $0x8] sm:$0xff] }
 0x91e   :  { %6933 = vmatprep.subr.bf16.mxu1 %v6932_v32  ;;  %v4397_v32 = vld [vmem:[#allocation8 + $0x338] sm:$0xff]  ;;  %v6950_v53 = vpack.c.bf16 %v4388_v46, %v4384_v44 }
 0x91f   :  { %6871 = vmatpush1.bf16.msra.mxu0 %v6870_v52  ;;  %v4394_v52 = vld [vmem:[#allocation8 + $0x320] sm:$0xff]  ;;  %v6952_v55 = vpack.c.bf16 %v4397_v32, %v4393_v48  ;;  %v4591_v44 = vld [vmem:[#allocation10 + $0x18] sm:$0xff] }
 0x920   :  { %6873 = vmatprep.subr.bf16.mxu0 %v6872_v27  ;;  %v4403_v27 = vld [vmem:[#allocation8 + $0x368] sm:$0xff]  ;;  %v6890_v59 = vpack.c.bf16 %v4394_v52, %v4390_v50  ;;  %v4588_v48 = vld [vmem:[#allocation10] sm:$0xff]  ;;  %v4590_v52 = vld [vmem:[#allocation10 + $0x10] sm:$0xff] }
 0x921   :  { %6935 = vmatpush1.bf16.msra.mxu1 %v6934_v57  ;;  %v4396_v57 = vld [vmem:[#allocation8 + $0x330] sm:$0xff]  ;;  %v6892_v62 = vpack.c.bf16 %v4403_v27, %v4399_v54  ;;  %v4592_v32 = vld [vmem:[#allocation10 + $0x20] sm:$0xff]  ;;  %v4597_v27 = vld [vmem:[#allocation10 + $0x48] sm:$0xff] }
 0x922   :  { %6937 = vmatprep.subr.bf16.mxu1 %v6936_v61  ;;  %v4405_v61 = vld [vmem:[#allocation8 + $0x378] sm:$0xff]  ;;  %v6954_v5 = vpack.c.bf16 %v4396_v57, %v4392_v56  ;;  %v6970_v50 = vpack.c.bf16 %v4592_v32, %v4588_v48  ;;  %v4629_v48 = vld [vmem:[#allocation10 + $0x148] sm:$0xff] }
 0x923   :  { %6875 = vmatpush1.bf16.msra.mxu0 %v6874_v2  ;;  %v4402_v2 = vld [vmem:[#allocation8 + $0x360] sm:$0xff]  ;;  %v6956_v7 = vpack.c.bf16 %v4405_v61, %v4401_v60  ;;  %v4599_v56 = vld [vmem:[#allocation10 + $0x58] sm:$0xff]  ;;  %v4633_v32 = vld [vmem:[#allocation10 + $0x168] sm:$0xff] }
 0x924   :  { %6877 = vmatprep.subr.bf16.mxu0 %v6876_v6  ;;  %v4411_v6 = vld [vmem:[#allocation8 + $0x3a8] sm:$0xff]  ;;  %v6894_v12 = vpack.c.bf16 %v4402_v2, %v4398_v1  ;;  %v4596_v60 = vld [vmem:[#allocation10 + $0x40] sm:$0xff]  ;;  %v4598_v2 = vld [vmem:[#allocation10 + $0x50] sm:$0xff] }
 0x925   :  { %6939 = vmatpush1.bf16.msra.mxu1 %v6938_v11  ;;  %v4404_v11 = vld [vmem:[#allocation8 + $0x370] sm:$0xff]  ;;  %v6896_v16 = vpack.c.bf16 %v4411_v6, %v4407_v38  ;;  %v4600_v61 = vld [vmem:[#allocation10 + $0x60] sm:$0xff]  ;;  %v4605_v38 = vld [vmem:[#allocation10 + $0x88] sm:$0xff] }
 0x926   :  { %6941 = vmatprep.subr.bf16.mxu1 %v6940_v45  ;;  %v4413_v45 = vld [vmem:[#allocation8 + $0x3b8] sm:$0xff]  ;;  %v6958_v19 = vpack.c.bf16 %v4404_v11, %v4400_v9  ;;  %v6974_v1 = vpack.c.bf16 %v4600_v61, %v4596_v60  ;;  %v4637_v60 = vld [vmem:[#allocation10 + $0x188] sm:$0xff] }
 0x927   :  { %6879 = vmatpush1.bf16.msra.mxu0 %v6878_v17  ;;  %v4410_v17 = vld [vmem:[#allocation8 + $0x3a0] sm:$0xff]  ;;  %v6960_v24 = vpack.c.bf16 %v4413_v45, %v4409_v13  ;;  %v4607_v9 = vld [vmem:[#allocation10 + $0x98] sm:$0xff]  ;;  %v4641_v61 = vld [vmem:[#allocation10 + $0x1a8] sm:$0xff] }
 0x928   :  { %6881 = vmatprep.subr.bf16.mxu0 %v6880_v22  ;;  %v4419_v22 = vld [vmem:[#allocation8 + $0x3e8] sm:$0xff]  ;;  %v6898_v29 = vpack.c.bf16 %v4410_v17, %v4406_v14  ;;  %v4611_v11 = vld [vmem:[#allocation10 + $0xb8] sm:$0xff]  ;;  %v4604_v45 = vld [vmem:[#allocation10 + $0x80] sm:$0xff] }
 0x929   :  { %6943 = vmatpush1.bf16.msra.mxu1 %v6942_v28  ;;  %v4412_v28 = vld [vmem:[#allocation8 + $0x3b0] sm:$0xff]  ;;  %v6900_v31 = vpack.c.bf16 %v4419_v22, %v4415_v51  ;;  %v7040_v13 = vpack.c.bf16 %v4611_v11, %v4607_v9  ;;  %v4613_v51 = vld [vmem:[#allocation10 + $0xc8] sm:$0xff] }
 0x92a   :  { %6945 = vmatprep.subr.bf16.mxu1 %v6944_v58  ;;  %v4421_v58 = vld [vmem:[#allocation8 + $0x3f8] sm:$0xff]  ;;  %v6962_v34 = vpack.c.bf16 %v4412_v28, %v4408_v25  ;;  %v4606_v14 = vld [vmem:[#allocation10 + $0x90] sm:$0xff]  ;;  %v4617_v22 = vld [vmem:[#allocation10 + $0xe8] sm:$0xff] }
 0x92b   :  { %6883 = vmatpush1.bf16.msra.mxu0 %v6882_v26  ;;  %v4418_v26 = vld [vmem:[#allocation8 + $0x3e0] sm:$0xff]  ;;  %v6964_v35 = vpack.c.bf16 %v4421_v58, %v4417_v30  ;;  %v6980_v25 = vpack.c.bf16 %v4617_v22, %v4613_v51  ;;  %v4615_v28 = vld [vmem:[#allocation10 + $0xd8] sm:$0xff]  ;;  %v4638_v11 = vld [vmem:[#allocation10 + $0x190] sm:$0xff] }
 0x92c   :  { %6885 = vmatprep.subr.bf16.mxu0 %v6884_v36  ;;  %v4416_v36 = vld [vmem:[#allocation8 + $0x3d0] sm:$0xff]  ;;  %v6902_v39 = vpack.c.bf16 %v4418_v26, %v4414_v15  ;;  %v4612_v30 = vld [vmem:[#allocation10 + $0xc0] sm:$0xff]  ;;  %v4651_v51 = vld [vmem:[#allocation10 + $0x1f8] sm:$0xff] }
 0x92d   :  { %6947 = vmatpush1.bf16.msra.mxu1 %v6946_v40  ;;  %v6966_v40 = vpack.c.bf16 %v4420_v37, %v4416_v36  ;;  %v4614_v15 = vld [vmem:[#allocation10 + $0xd0] sm:$0xff]  ;;  %v4625_v36 = vld [vmem:[#allocation10 + $0x128] sm:$0xff]  ;;  %v4623_v37 = vld [vmem:[#allocation10 + $0x118] sm:$0xff] }
 0x92e   :  { %6949 = vmatprep.subr.bf16.mxu1 %v6948_v42  ;;  %v4593_v42 = vld [vmem:[#allocation10 + $0x28] sm:$0xff]  ;;  %v4618_v26 = vld [vmem:[#allocation10 + $0xf0] sm:$0xff]  ;;  %v4644_v22 = vld [vmem:[#allocation10 + $0x1c0] sm:$0xff] }
 0x92f   :  { %6887 = vmatpush1.bf16.msra.mxu0 %v6886_v47  ;;  %v6968_v46 = vpack.c.bf16 %v4593_v42, %v4589_v10  ;;  %v4595_v47 = vld [vmem:[#allocation10 + $0x38] sm:$0xff]  ;;  %v4620_v10 = vld [vmem:[#allocation10 + $0x100] sm:$0xff] }
 0x930   :  { %6889 = vmatprep.subr.bf16.mxu0 %v6888_v49  ;;  %v7032_v49 = vpack.c.bf16 %v4595_v47, %v4591_v44  ;;  %v4624_v42 = vld [vmem:[#allocation10 + $0x120] sm:$0xff]  ;;  %v4626_v47 = vld [vmem:[#allocation10 + $0x130] sm:$0xff] }
 0x931   :  { %6951 = vmatpush1.bf16.msra.mxu1 %v6950_v53  ;;  %v4594_v53 = vld [vmem:[#allocation10 + $0x30] sm:$0xff] }
 0x932   :  { %6953 = vmatprep.subr.bf16.mxu1 %v6952_v55  ;;  %v7034_v54 = vpack.c.bf16 %v4594_v53, %v4590_v52  ;;  %v4601_v55 = vld [vmem:[#allocation10 + $0x68] sm:$0xff]  ;;  %v6986_v52 = vpack.c.bf16 %v4624_v42, %v4620_v10  ;;  %v4658_v10 = vld [vmem:[#allocation10 + $0x230] sm:$0xff] }
 0x933   :  { %6891 = vmatpush1.bf16.msra.mxu0 %v6890_v59  ;;  %v6972_v57 = vpack.c.bf16 %v4601_v55, %v4597_v27  ;;  %v4603_v59 = vld [vmem:[#allocation10 + $0x78] sm:$0xff]  ;;  %v4628_v27 = vld [vmem:[#allocation10 + $0x140] sm:$0xff] }
 0x934   :  { %6893 = vmatprep.subr.bf16.mxu0 %v6892_v62  ;;  %v7036_v62 = vpack.c.bf16 %v4603_v59, %v4599_v56  ;;  %v4632_v55 = vld [vmem:[#allocation10 + $0x160] sm:$0xff]  ;;  %v4630_v56 = vld [vmem:[#allocation10 + $0x150] sm:$0xff] }
 0x935   :  { %6955 = vmatpush1.bf16.msra.mxu1 %v6954_v5  ;;  %v4602_v5 = vld [vmem:[#allocation10 + $0x70] sm:$0xff] }
 0x936   :  { %6957 = vmatprep.subr.bf16.mxu1 %v6956_v7  ;;  %v7038_v6 = vpack.c.bf16 %v4602_v5, %v4598_v2  ;;  %v4609_v7 = vld [vmem:[#allocation10 + $0xa8] sm:$0xff]  ;;  %v4634_v59 = vld [vmem:[#allocation10 + $0x170] sm:$0xff]  ;;  %v6990_v2 = vpack.c.bf16 %v4632_v55, %v4628_v27 }
 0x937   :  { %6895 = vmatpush1.bf16.msra.mxu0 %v6894_v12  ;;  %v6976_v12 = vpack.c.bf16 %v4609_v7, %v4605_v38  ;;  %v7054_v5 = vpack.c.bf16 %v4634_v59, %v4630_v56  ;;  %v6992_v38 = vpack.c.bf16 %v4641_v61, %v4637_v60  ;;  %v4640_v7 = vld [vmem:[#allocation10 + $0x1a0] sm:$0xff]  ;;  %v4666_v27 = vld [vmem:[#allocation10 + $0x270] sm:$0xff]  ;;  %v4669_v56 = vld [vmem:[#allocation10 + $0x288] sm:$0xff] }
 0x938   :  { %6897 = vmatprep.subr.bf16.mxu0 %v6896_v16  ;;  %v4608_v16 = vld [vmem:[#allocation10 + $0xa0] sm:$0xff]  ;;  %v4671_v59 = vld [vmem:[#allocation10 + $0x298] sm:$0xff] }
 0x939   :  { %6959 = vmatpush1.bf16.msra.mxu1 %v6958_v19  ;;  %v6978_v17 = vpack.c.bf16 %v4608_v16, %v4604_v45  ;;  %v4610_v19 = vld [vmem:[#allocation10 + $0xb0] sm:$0xff]  ;;  %v4645_v16 = vld [vmem:[#allocation10 + $0x1c8] sm:$0xff]  ;;  %v4675_v61 = vld [vmem:[#allocation10 + $0x2b8] sm:$0xff] }
 0x93a   :  { %6961 = vmatprep.subr.bf16.mxu1 %v6960_v24  ;;  %v7042_v24 = vpack.c.bf16 %v4610_v19, %v4606_v14  ;;  %v4649_v14 = vld [vmem:[#allocation10 + $0x1e8] sm:$0xff] }
 0x93b   :  { %6899 = vmatpush1.bf16.msra.mxu0 %v6898_v29  ;;  %v4619_v29 = vld [vmem:[#allocation10 + $0xf8] sm:$0xff]  ;;  %v6996_v19 = vpack.c.bf16 %v4649_v14, %v4645_v16  ;;  %v4676_v16 = vld [vmem:[#allocation10 + $0x2c0] sm:$0xff] }
 0x93c   :  { %6901 = vmatprep.subr.bf16.mxu0 %v6900_v31  ;;  %v7044_v58 = vpack.c.bf16 %v4619_v29, %v4615_v28  ;;  %v4616_v31 = vld [vmem:[#allocation10 + $0xe0] sm:$0xff]  ;;  %v4646_v29 = vld [vmem:[#allocation10 + $0x1d0] sm:$0xff] }
 0x93d   :  { %6963 = vmatpush1.bf16.msra.mxu1 %v6962_v34  ;;  %v6982_v34 = vpack.c.bf16 %v4616_v31, %v4612_v30  ;;  %v4650_v30 = vld [vmem:[#allocation10 + $0x1f0] sm:$0xff]  ;;  %v4653_v31 = vld [vmem:[#allocation10 + $0x208] sm:$0xff]  ;;  %v4680_v14 = vld [vmem:[#allocation10 + $0x2e0] sm:$0xff] }
 0x93e   :  { %6965 = vmatprep.subr.bf16.mxu1 %v6964_v35  ;;  %v4621_v35 = vld [vmem:[#allocation10 + $0x108] sm:$0xff] }
 0x93f   :  { %6903 = vmatpush1.bf16.msra.mxu0 %v6902_v39  ;;  %v7046_v39 = vpack.c.bf16 %v4618_v26, %v4614_v15  ;;  %v4657_v15 = vld [vmem:[#allocation10 + $0x228] sm:$0xff]  ;;  %v4655_v26 = vld [vmem:[#allocation10 + $0x218] sm:$0xff] }
 0x940   :  { %6969 = vmatprep.subr.bf16.mxu0 %v6968_v46  ;;  %v4622_v46 = vld [vmem:[#allocation10 + $0x110] sm:$0xff] }
 0x941   :  { %6967 = vmatpush1.bf16.msra.mxu1 %v6966_v40  ;;  %v6984_v40 = vpack.c.bf16 %v4625_v36, %v4621_v35  ;;  %v7050_v53 = vpack.c.bf16 %v4626_v47, %v4622_v46  ;;  %v4659_v35 = vld [vmem:[#allocation10 + $0x238] sm:$0xff]  ;;  %v4652_v36 = vld [vmem:[#allocation10 + $0x200] sm:$0xff]  ;;  %v4665_v46 = vld [vmem:[#allocation10 + $0x268] sm:$0xff] }
 0x942   :  { %4487 = vmatmul.mubr.f32.vlgmr.msra.gmra.mrb[28].mxu0 %v4290_v41  ;;  %7033 = vmatprep.subr.bf16.mxu1 %v7032_v49  ;;  %v4631_v49 = vld [vmem:[#allocation10 + $0x158] sm:$0xff] }
 0x943   :  { %6971 = vmatpush1.bf16.msra.mxu0 %v6970_v50  ;;  %v4635_v50 = vld [vmem:[#allocation10 + $0x178] sm:$0xff] }
 0x944   :  { %4558 = vmatmul.mubr.f32.vlgmr.msra.gmra.mrb[28].mxu1 %v4290_v41  ;;  %6973 = vmatprep.subr.bf16.mxu0 %v6972_v57  ;;  %v4627_v41 = vld [vmem:[#allocation10 + $0x138] sm:$0xff]  ;;  %v7052_v57 = vpack.c.bf16 %v4635_v50, %v4631_v49  ;;  %v4660_v49 = vld [vmem:[#allocation10 + $0x240] sm:$0xff] }
 0x945   :  { %7035 = vmatpush1.bf16.msra.mxu1 %v7034_v54  ;;  %v7048_v44 = vpack.c.bf16 %v4627_v41, %v4623_v37  ;;  %v6988_v54 = vpack.c.bf16 %v4633_v32, %v4629_v48  ;;  %v4656_v37 = vld [vmem:[#allocation10 + $0x220] sm:$0xff]  ;;  %v4654_v41 = vld [vmem:[#allocation10 + $0x210] sm:$0xff]  ;;  %v4663_v47 = vld [vmem:[#allocation10 + $0x258] sm:$0xff] }
 0x946   :  { %7037 = vmatprep.subr.bf16.mxu1 %v7036_v62  ;;  %v4639_v62 = vld [vmem:[#allocation10 + $0x198] sm:$0xff]  ;;  %v7066_v42 = vpack.c.bf16 %v4658_v10, %v4654_v41  ;;  %v4664_v50 = vld [vmem:[#allocation10 + $0x260] sm:$0xff] }
 0x947   :  { %6975 = vmatpush1.bf16.msra.mxu0 %v6974_v1  ;;  %v4643_v1 = vld [vmem:[#allocation10 + $0x1b8] sm:$0xff] }
 0x948   :  { %6977 = vmatprep.subr.bf16.mxu0 %v6976_v12  ;;  %v7056_v9 = vpack.c.bf16 %v4643_v1, %v4639_v62  ;;  %v4642_v12 = vld [vmem:[#allocation10 + $0x1b0] sm:$0xff]  ;;  %v4667_v32 = vld [vmem:[#allocation10 + $0x278] sm:$0xff]  ;;  %v4668_v62 = vld [vmem:[#allocation10 + $0x280] sm:$0xff] }
 0x949   :  { %7039 = vmatpush1.bf16.msra.mxu1 %v7038_v6  ;;  %v4636_v6 = vld [vmem:[#allocation10 + $0x180] sm:$0xff]  ;;  %v7058_v45 = vpack.c.bf16 %v4642_v12, %v4638_v11  ;;  %v4681_v11 = vld [vmem:[#allocation10 + $0x2e8] sm:$0xff]  ;;  %v4679_v12 = vld [vmem:[#allocation10 + $0x2d8] sm:$0xff] }
 0x94a   :  { %7041 = vmatprep.subr.bf16.mxu1 %v7040_v13  ;;  %v6994_v13 = vpack.c.bf16 %v4640_v7, %v4636_v6  ;;  %v4672_v1 = vld [vmem:[#allocation10 + $0x2a0] sm:$0xff]  ;;  %v4674_v6 = vld [vmem:[#allocation10 + $0x2b0] sm:$0xff]  ;;  %v4695_v41 = vld [vmem:[#allocation10 + $0x358] sm:$0xff] }
 0x94b   :  { %6979 = vmatpush1.bf16.msra.mxu0 %v6978_v17  ;;  %v4647_v17 = vld [vmem:[#allocation10 + $0x1d8] sm:$0xff] }
 0x94c   :  { %6981 = vmatprep.subr.bf16.mxu0 %v6980_v25  ;;  %v7060_v25 = vpack.c.bf16 %v4651_v51, %v4647_v17  ;;  %v4678_v51 = vld [vmem:[#allocation10 + $0x2d0] sm:$0xff] }
 0x94d   :  { %7043 = vmatpush1.bf16.msra.mxu1 %v7042_v24  ;;  %v4648_v24 = vld [vmem:[#allocation10 + $0x1e0] sm:$0xff] }
 0x94e   :  { %7045 = vmatprep.subr.bf16.mxu1 %v7044_v58  ;;  %v6998_v28 = vpack.c.bf16 %v4648_v24, %v4644_v22  ;;  %v7062_v58 = vpack.c.bf16 %v4650_v30, %v4646_v29  ;;  %v4682_v22 = vld [vmem:[#allocation10 + $0x2f0] sm:$0xff]  ;;  %v4687_v29 = vld [vmem:[#allocation10 + $0x318] sm:$0xff] }
 0x94f   :  { %6983 = vmatpush1.bf16.msra.mxu0 %v6982_v34  ;;  %v7000_v34 = vpack.c.bf16 %v4657_v15, %v4653_v31  ;;  %v7078_v24 = vpack.c.bf16 %v4682_v22, %v4678_v51  ;;  %v4684_v31 = vld [vmem:[#allocation10 + $0x300] sm:$0xff] }
 0x950   :  { %6985 = vmatprep.subr.bf16.mxu0 %v6984_v40  ;;  %v7002_v40 = vpack.c.bf16 %v4656_v37, %v4652_v36  ;;  %v4688_v15 = vld [vmem:[#allocation10 + $0x320] sm:$0xff]  ;;  %v4690_v36 = vld [vmem:[#allocation10 + $0x330] sm:$0xff] }
 0x951   :  { %7047 = vmatpush1.bf16.msra.mxu1 %v7046_v39  ;;  %v7064_v39 = vpack.c.bf16 %v4659_v35, %v4655_v26  ;;  %v4686_v35 = vld [vmem:[#allocation10 + $0x310] sm:$0xff] }
 0x952   :  { %7049 = vmatprep.subr.bf16.mxu1 %v7048_v44  ;;  %v4661_v44 = vld [vmem:[#allocation10 + $0x248] sm:$0xff]  ;;  %v7082_v37 = vpack.c.bf16 %v4690_v36, %v4686_v35 }
 0x953   :  { %6987 = vmatpush1.bf16.msra.mxu0 %v6986_v52  ;;  %v7004_v48 = vpack.c.bf16 %v4665_v46, %v4661_v44  ;;  %v7068_v52 = vpack.c.bf16 %v4667_v32, %v4663_v47  ;;  %v4692_v44 = vld [vmem:[#allocation10 + $0x340] sm:$0xff]  ;;  %v4694_v32 = vld [vmem:[#allocation10 + $0x350] sm:$0xff] }
 0x954   :  { %6989 = vmatprep.subr.bf16.mxu0 %v6988_v54  ;;  %v4662_v54 = vld [vmem:[#allocation10 + $0x250] sm:$0xff]  ;;  %v4696_v46 = vld [vmem:[#allocation10 + $0x360] sm:$0xff] }
 0x955   :  { %7051 = vmatpush1.bf16.msra.mxu1 %v7050_v53  ;;  %v7006_v53 = vpack.c.bf16 %v4664_v50, %v4660_v49  ;;  %v7070_v55 = vpack.c.bf16 %v4666_v27, %v4662_v54  ;;  %v4698_v49 = vld [vmem:[#allocation10 + $0x370] sm:$0xff]  ;;  %v4703_v54 = vld [vmem:[#allocation10 + $0x398] sm:$0xff] }
 0x956   :  { %7053 = vmatprep.subr.bf16.mxu1 %v7052_v57  ;;  %v4673_v57 = vld [vmem:[#allocation10 + $0x2a8] sm:$0xff]  ;;  %v7086_v50 = vpack.c.bf16 %v4698_v49, %v4694_v32 }
 0x957   :  { %6991 = vmatpush1.bf16.msra.mxu0 %v6990_v2  ;;  %v7008_v60 = vpack.c.bf16 %v4673_v57, %v4669_v56  ;;  %v7072_v2 = vpack.c.bf16 %v4675_v61, %v4671_v59  ;;  %v4700_v56 = vld [vmem:[#allocation10 + $0x380] sm:$0xff]  ;;  %v4702_v61 = vld [vmem:[#allocation10 + $0x390] sm:$0xff] }
 0x958   :  { %6993 = vmatprep.subr.bf16.mxu0 %v6992_v38  ;;  %v4670_v38 = vld [vmem:[#allocation10 + $0x290] sm:$0xff]  ;;  %v4704_v57 = vld [vmem:[#allocation10 + $0x3a0] sm:$0xff] }
 0x959   :  { %7055 = vmatpush1.bf16.msra.mxu1 %v7054_v5  ;;  %v7010_v5 = vpack.c.bf16 %v4672_v1, %v4668_v62  ;;  %v7074_v7 = vpack.c.bf16 %v4674_v6, %v4670_v38  ;;  %v4706_v62 = vld [vmem:[#allocation10 + $0x3b0] sm:$0xff]  ;;  %v4711_v38 = vld [vmem:[#allocation10 + $0x3d8] sm:$0xff] }
 0x95a   :  { %7057 = vmatprep.subr.bf16.mxu1 %v7056_v9  ;;  %v4677_v9 = vld [vmem:[#allocation10 + $0x2c8] sm:$0xff]  ;;  %v7090_v1 = vpack.c.bf16 %v4706_v62, %v4702_v61 }
 0x95b   :  { %6995 = vmatpush1.bf16.msra.mxu0 %v6994_v13  ;;  %v7012_v13 = vpack.c.bf16 %v4681_v11, %v4677_v9  ;;  %v4708_v9 = vld [vmem:[#allocation10 + $0x3c0] sm:$0xff] }
 0x95c   :  { %6997 = vmatprep.subr.bf16.mxu0 %v6996_v19  ;;  %v7014_v19 = vpack.c.bf16 %v4680_v14, %v4676_v16  ;;  %v4712_v11 = vld [vmem:[#allocation10 + $0x3e0] sm:$0xff]  ;;  %v4714_v16 = vld [vmem:[#allocation10 + $0x3f0] sm:$0xff] }
 0x95d   :  { %7059 = vmatpush1.bf16.msra.mxu1 %v7058_v45  ;;  %v4683_v45 = vld [vmem:[#allocation10 + $0x2f8] sm:$0xff] }
 0x95e   :  { %7061 = vmatprep.subr.bf16.mxu1 %v7060_v25  ;;  %v7076_v17 = vpack.c.bf16 %v4683_v45, %v4679_v12  ;;  %v4685_v25 = vld [vmem:[#allocation10 + $0x308] sm:$0xff]  ;;  %v4710_v45 = vld [vmem:[#allocation10 + $0x3d0] sm:$0xff] }
 0x95f   :  { %6999 = vmatpush1.bf16.msra.mxu0 %v6998_v28  ;;  %v4689_v28 = vld [vmem:[#allocation10 + $0x328] sm:$0xff]  ;;  %v7094_v14 = vpack.c.bf16 %v4714_v16, %v4710_v45  ;;  %v7473_v45 = vmov 0.0|0.0   ;;  %v4885_v16 = vld [vmem:[#allocation13 + $0x10] sm:$0xff] }
 0x960   :  { %7001 = vmatprep.subr.bf16.mxu0 %v7000_v34  ;;  %v7016_v30 = vpack.c.bf16 %v4689_v28, %v4685_v25  ;;  %v7018_v34 = vpack.c.bf16 %v4688_v15, %v4684_v31 }
 0x961   :  { %7063 = vmatpush1.bf16.msra.mxu1 %v7062_v58  ;;  %v4691_v58 = vld [vmem:[#allocation10 + $0x338] sm:$0xff] }
 0x962   :  { %7065 = vmatprep.subr.bf16.mxu1 %v7064_v39  ;;  %v7080_v26 = vpack.c.bf16 %v4691_v58, %v4687_v29  ;;  %v4693_v39 = vld [vmem:[#allocation10 + $0x348] sm:$0xff] }
 0x963   :  { %7003 = vmatpush1.bf16.msra.mxu0 %v7002_v40  ;;  %v4697_v40 = vld [vmem:[#allocation10 + $0x368] sm:$0xff] }
 0x964   :  { %7005 = vmatprep.subr.bf16.mxu0 %v7004_v48  ;;  %v7020_v10 = vpack.c.bf16 %v4697_v40, %v4693_v39  ;;  %v7022_v48 = vpack.c.bf16 %v4696_v46, %v4692_v44 }
 0x965   :  { %7067 = vmatpush1.bf16.msra.mxu1 %v7066_v42  ;;  %v4699_v42 = vld [vmem:[#allocation10 + $0x378] sm:$0xff] }
 0x966   :  { %7069 = vmatprep.subr.bf16.mxu1 %v7068_v52  ;;  %v7084_v47 = vpack.c.bf16 %v4699_v42, %v4695_v41  ;;  %v4701_v52 = vld [vmem:[#allocation10 + $0x388] sm:$0xff] }
 0x967   :  { %7007 = vmatpush1.bf16.msra.mxu0 %v7006_v53  ;;  %v4705_v53 = vld [vmem:[#allocation10 + $0x3a8] sm:$0xff] }
 0x968   :  { %7009 = vmatprep.subr.bf16.mxu0 %v7008_v60  ;;  %v7024_v27 = vpack.c.bf16 %v4705_v53, %v4701_v52  ;;  %v7026_v60 = vpack.c.bf16 %v4704_v57, %v4700_v56 }
 0x969   :  { %7071 = vmatpush1.bf16.msra.mxu1 %v7070_v55  ;;  %v4707_v55 = vld [vmem:[#allocation10 + $0x3b8] sm:$0xff] }
 0x96a   :  { %7073 = vmatprep.subr.bf16.mxu1 %v7072_v2  ;;  %v7088_v59 = vpack.c.bf16 %v4707_v55, %v4703_v54  ;;  %v4709_v2 = vld [vmem:[#allocation10 + $0x3c8] sm:$0xff] }
 0x96b   :  { %7011 = vmatpush1.bf16.msra.mxu0 %v7010_v5  ;;  %v4713_v5 = vld [vmem:[#allocation10 + $0x3e8] sm:$0xff] }
 0x96c   :  { %7013 = vmatprep.subr.bf16.mxu0 %v7012_v13  ;;  %v7028_v6 = vpack.c.bf16 %v4713_v5, %v4709_v2  ;;  %v7030_v13 = vpack.c.bf16 %v4712_v11, %v4708_v9 }
 0x96d   :  { %7075 = vmatpush1.bf16.msra.mxu1 %v7074_v7  ;;  %v4715_v7 = vld [vmem:[#allocation10 + $0x3f8] sm:$0xff] }
 0x96e   :  { %7077 = vmatprep.subr.bf16.mxu1 %v7076_v17  ;;  %v7092_v12 = vpack.c.bf16 %v4715_v7, %v4711_v38 }
 0x96f   :  { %7015 = vmatpush1.bf16.msra.mxu0 %v7014_v19 }
 0x970   :  { %7017 = vmatprep.subr.bf16.mxu0 %v7016_v30 }
 0x971   :  { %7079 = vmatpush1.bf16.msra.mxu1 %v7078_v24 }
 0x972   :  { %7081 = vmatprep.subr.bf16.mxu1 %v7080_v26 }
 0x973   :  { %7019 = vmatpush1.bf16.msra.mxu0 %v7018_v34 }
 0x974   :  { %7021 = vmatprep.subr.bf16.mxu0 %v7020_v10 }
 0x975   :  { %7083 = vmatpush1.bf16.msra.mxu1 %v7082_v37 }
 0x976   :  { %7085 = vmatprep.subr.bf16.mxu1 %v7084_v47 }
 0x977   :  { %7023 = vmatpush1.bf16.msra.mxu0 %v7022_v48 }
 0x978   :  { %7025 = vmatprep.subr.bf16.mxu0 %v7024_v27 }
 0x979   :  { %7087 = vmatpush1.bf16.msra.mxu1 %v7086_v50 }
 0x97a   :  { %7089 = vmatprep.subr.bf16.mxu1 %v7088_v59 }
 0x97b   :  { %7027 = vmatpush1.bf16.msra.mxu0 %v7026_v60 }
 0x97c   :  { %7029 = vmatprep.subr.bf16.mxu0 %v7028_v6 }
 0x97d   :  { %7091 = vmatpush1.bf16.msra.mxu1 %v7090_v1 }
 0x97e   :  { %7093 = vmatprep.subr.bf16.mxu1 %v7092_v12  ;;  %v4884_v12 = vld [vmem:[#allocation13 + $0x8] sm:$0xff] }
 0x97f   :  { %7031 = vmatpush1.bf16.msra.mxu0 %v7030_v13 }
 0x980   :  { %7096 = vmatprep.subr.bf16.mxu0 %v7473_v45 }
 0x981   :  { %7095 = vmatpush1.bf16.msra.mxu1 %v7094_v14  ;;  %v4886_v14 = vld [vmem:[#allocation13 + $0x18] sm:$0xff] }
 0x9d5   :  { %v4192_v17 = vpop.f32.mrb[26].mxu0  ;;  %v4263_v19 = vpop.f32.mrb[26].mxu1 }
 0x9d6   :  { %v4193_v51 = vadd.f32 %v4192_v17, %v7630_v3  ;;  %v4194_v22 = vpop.f32.mrb[27].mxu0  ;;  %v4265_v24 = vpop.f32.mrb[27].mxu1  ;;  %v4264_v30 = vadd.f32 %v4263_v19, %v7639_v8  ;;  %v7100_v17 = vpack.c.bf16 %v4886_v14, %v4885_v16  ;;  %v4888_v19 = vld [vmem:[#allocation13 + $0x28] sm:$0xff] }
 0x9d7   :  { %v4195_v25 = vadd.f32 %v4194_v22, %v7634_v4  ;;  %v4266_v58 = vadd.f32 %v4265_v24, %v7645_v18  ;;  %v4889_v22 = vld [vmem:[#allocation13 + $0x30] sm:$0xff]  ;;  %v4890_v24 = vld [vmem:[#allocation13 + $0x38] sm:$0xff] }
 0x9d8   :  { %v4268_v28 = vmul.f32 0.5, %v4193_v51 }
 0x9d9   :  { %v4272_v29 = vmul.f32 0.5, %v4195_v25  ;;  %v4277_v31 = vmul.f32 0.5, %v4266_v58  ;;  %v7106_v25 = vpack.c.bf16 %v4890_v24, %v4889_v22  ;;  %v4893_v58 = vld [vmem:[#allocation13 + $0x50] sm:$0xff] }
 0x9da   :  { %7266 = vtanh.f32 %v4268_v28  ;;  %v4891_v28 = vld [vmem:[#allocation13 + $0x40] sm:$0xff] }
 0x9db   :  { %7268 = vtanh.f32 %v4272_v29  ;;  %v4892_v29 = vld [vmem:[#allocation13 + $0x48] sm:$0xff] }
 0x9dc   :  { %7270 = vtanh.f32 %v4264_v30  ;;  %v7109_v30 = vpack.c.bf16 %v4892_v29, %v4891_v28 }
 0x9dd   :  { %7272 = vtanh.f32 %v4277_v31  ;;  %v4894_v31 = vld [vmem:[#allocation13 + $0x58] sm:$0xff] }
 0x9e4   :  { %v7267_v15 = vpop.eup %7266 }
 0x9e5   :  { %v7269_v26 = vpop.eup %7268  ;;  %v4270_v34 = vmul.f32 0.5, %v7267_v15  ;;  %v7112_v15 = vpack.c.bf16 %v4894_v31, %v4893_v58 }
 0x9e6   :  { %v4274_v35 = vmul.f32 0.5, %v7269_v26  ;;  %v7271_v37 = vpop.eup %7270  ;;  %v4895_v26 = vld [vmem:[#allocation13 + $0x60] sm:$0xff] }
 0x9e7   :  { %v4271_v36 = vadd.f32 0.5, %v4270_v34  ;;  %v7273_v42 = vpop.eup %7272  ;;  %v4896_v34 = vld [vmem:[#allocation13 + $0x68] sm:$0xff] }
 0x9e8   :  { %v4275_v39 = vadd.f32 0.5, %v4274_v35  ;;  %v4279_v44 = vmul.f32 0.5, %v7273_v42  ;;  %v7115_v35 = vpack.c.bf16 %v4896_v34, %v4895_v26 }
 0x9e9   :  { %v4283_v40 = vmul.f32 %v7271_v37, %v4271_v36  ;;  %v4897_v36 = vld [vmem:[#allocation13 + $0x70] sm:$0xff]  ;;  %v4898_v37 = vld [vmem:[#allocation13 + $0x78] sm:$0xff] }
 0x9ea   :  { %v4282_v41 = vmul.f32 %v4275_v39, %v7728_v43  ;;  %v4280_v46 = vadd.f32 0.5, %v4279_v44  ;;  %v7118_v39 = vpack.c.bf16 %v4898_v37, %v4897_v36 }
 0x9ec   :  { %v7744_v10 = vadd.f32 %v4283_v40, %v4282_v41 }
 0x9ee   :  { %7274 = vtanh.f32 %v7744_v10 }
 0x9f8   :  { %v7275_v47 = vpop.eup %7274 }
 0x9f9   :  { %v4286_v48 = vmul.f32 %v7275_v47, %v4280_v46 }
 0x9fb   :  { %4780 = vmatprep.mubr.f32.mxu0 %v4286_v48  ;;  %4851 = vmatprep.mubr.f32.mxu1 %v4286_v48 }
 0xa15   :  { %v4488_v32 = vpop.f32.mrb[28].mxu0 }
 0xa16   :  { %v4489_v49 = vadd.f32 %v4488_v32, %v7606_v20  ;;  %v4490_v50 = vpop.f32.mrb[29].mxu0 }
 0xa17   :  { %v4491_v52 = vadd.f32 %v4490_v50, %v7610_v21  ;;  %v4559_v53 = vpop.f32.mrb[28].mxu1 }
 0xa18   :  { %v4564_v54 = vmul.f32 0.5, %v4489_v49  ;;  %v4560_v43 = vadd.f32 %v4559_v53, %v7614_v23  ;;  %v4561_v27 = vpop.f32.mrb[29].mxu1 }
 0xa19   :  { %v4568_v55 = vmul.f32 0.5, %v4491_v52  ;;  %v4562_v56 = vadd.f32 %v4561_v27, %v7622_v33  ;;  %v4883_v33 = vld [vmem:[#allocation13] sm:$0xff] }
 0xa1a   :  { %7276 = vtanh.f32 %v4564_v54  ;;  %v7097_v13 = vpack.c.bf16 %v4884_v12, %v4883_v33 }
 0xa1b   :  { %7278 = vtanh.f32 %v4568_v55  ;;  %v4573_v57 = vmul.f32 0.5, %v4562_v56 }
 0xa1c   :  { %7280 = vtanh.f32 %v4560_v43 }
 0xa1d   :  { %7282 = vtanh.f32 %v4573_v57 }
 0xa24   :  { %v7277_v59 = vpop.eup %7276 }
 0xa25   :  { %v7279_v60 = vpop.eup %7278  ;;  %v4566_v61 = vmul.f32 0.5, %v7277_v59 }
 0xa26   :  { %v7281_v62 = vpop.eup %7280  ;;  %v4570_v20 = vmul.f32 0.5, %v7279_v60 }
 0xa27   :  { %v4567_v1 = vadd.f32 0.5, %v4566_v61  ;;  %v7283_v38 = vpop.eup %7282 }
 0xa28   :  { %v4571_v21 = vadd.f32 0.5, %v4570_v20  ;;  %v4575_v6 = vmul.f32 0.5, %v7283_v38 }
 0xa29   :  { %v4579_v2 = vmul.f32 %v7281_v62, %v4567_v1 }
 0xa2a   :  { %v4578_v5 = vmul.f32 %v4571_v21, %v7736_v63  ;;  %v4576_v7 = vadd.f32 0.5, %v4575_v6  ;;  %v4887_v63 = vld [vmem:[#allocation13 + $0x20] sm:$0xff] }
 0xa2b   :  { %v7103_v51 = vpack.c.bf16 %v4888_v19, %v4887_v63 }
 0xa2c   :  { %v4580_v23 = vadd.f32 %v4579_v2, %v4578_v5 }
 0xa2e   :  { %7284 = vtanh.f32 %v4580_v23 }
 0xa38   :  { %v7285_v9 = vpop.eup %7284 }
 0xa39   :  { %v4582_v11 = vmul.f32 %v7285_v9, %v4576_v7 }
 0xa3b   :  { %4781 = vmatmul.mubr.f32.vlgmr.msra.gmra.mrb[30].mxu0 %v4582_v11  ;;  %4852 = vmatmul.mubr.f32.vlgmr.msra.gmra.mrb[30].mxu1 %v4582_v11 }
 0xa3c   :  { %7098 = vmatpush3.bf16.msra.mxu0 %v7097_v13  ;;  %5045 = vmatprep.mubr.msk.f32.mxu0 %vm7474_vm0, %v7472_v0 }
 0xa3d   :  { %7099 = vmatprep.subr.bf16.mxu0 %v7473_v45 }
 0xa40   :  { %7101 = vmatpush3.bf16.msra.mxu0 %v7100_v17 }
 0xa41   :  { %7102 = vmatprep.subr.bf16.mxu0 %v7473_v45 }
 0xa44   :  { %7104 = vmatpush3.bf16.msra.mxu0 %v7103_v51 }
 0xa45   :  { %7105 = vmatprep.subr.bf16.mxu0 %v7473_v45 }
 0xa48   :  { %7107 = vmatpush3.bf16.msra.mxu0 %v7106_v25 }
 0xa49   :  { %7108 = vmatprep.subr.bf16.mxu0 %v7473_v45 }
 0xa4c   :  { %7110 = vmatpush3.bf16.msra.mxu0 %v7109_v30 }
 0xa4d   :  { %7111 = vmatprep.subr.bf16.mxu0 %v7473_v45 }
 0xa50   :  { %7113 = vmatpush3.bf16.msra.mxu0 %v7112_v15 }
 0xa51   :  { %7114 = vmatprep.subr.bf16.mxu0 %v7473_v45 }
 0xa54   :  { %7116 = vmatpush3.bf16.msra.mxu0 %v7115_v35 }
 0xa55   :  { %7117 = vmatprep.subr.bf16.mxu0 %v7473_v45 }
 0xa58   :  { %7119 = vmatpush3.bf16.msra.mxu0 %v7118_v39 }
 0xb0e   :  { %v4782_v40 = vpop.f32.mrb[30].mxu0  ;;  %v4853_v41 = vpop.f32.mrb[30].mxu1 }
 0xb0f   :  { %v4783_v42 = vadd.f32 %v4782_v40, %v7630_v3  ;;  %v4784_v44 = vpop.f32.mrb[31].mxu0  ;;  %v4855_v46 = vpop.f32.mrb[31].mxu1  ;;  %v4854_v49 = vadd.f32 %v4853_v41, %v7639_v8 }
 0xb10   :  { %v4785_v47 = vadd.f32 %v4784_v44, %v7634_v4  ;;  %v4856_v50 = vadd.f32 %v4855_v46, %v7645_v18  ;;  %v4995_v18 = vld [vmem:[#allocation14] ss:$0 sm:$0xff] }
 0xb11   :  { %v4858_v48 = vmul.f32 0.5, %v4783_v42 }
 0xb12   :  { %v4862_v32 = vmul.f32 0.5, %v4785_v47  ;;  %v4867_v52 = vmul.f32 0.5, %v4856_v50 }
 0xb13   :  { %7286 = vtanh.f32 %v4858_v48 }
 0xb14   :  { %7288 = vtanh.f32 %v4862_v32 }
 0xb15   :  { %7290 = vtanh.f32 %v4854_v49 }
 0xb16   :  { %7292 = vtanh.f32 %v4867_v52 }
 0xb1d   :  { %v7287_v53 = vpop.eup %7286 }
 0xb1e   :  { %v7289_v0 = vpop.eup %7288  ;;  %v4860_v54 = vmul.f32 0.5, %v7287_v53 }
 0xb1f   :  { %v4864_v43 = vmul.f32 0.5, %v7289_v0  ;;  %v7291_v27 = vpop.eup %7290 }
 0xb20   :  { %v4861_v3 = vadd.f32 0.5, %v4860_v54  ;;  %v7293_v59 = vpop.eup %7292 }
 0xb21   :  { %v4865_v55 = vadd.f32 0.5, %v4864_v43  ;;  %v4869_v8 = vmul.f32 0.5, %v7293_v59 }
 0xb22   :  { %v4873_v56 = vmul.f32 %v7291_v27, %v4861_v3 }
 0xb23   :  { %v4872_v4 = vmul.f32 %v4865_v55, %v7744_v10  ;;  %v4870_v60 = vadd.f32 0.5, %v4869_v8 }
 0xb25   :  { %v4874_v57 = vadd.f32 %v4873_v56, %v4872_v4 }
 0xb27   :  { %7294 = vtanh.f32 %v4874_v57 }
 0xb31   :  { %v7295_v61 = vpop.eup %7294 }
 0xb32   :  { %v4876_v62 = vmul.f32 %v7295_v61, %v4870_v60 }
 0xb34   :  { %5046 = vmatmul.mubr.f32.vlgmr.msra.gmra.mrb[32].mxu0 %v4876_v62 }
 0xc07   :  { %v4972_v20 = vpop.f32.mrb[32].mxu0 }
 0xc08   :  { %v4973_v1 = vadd.f32 %v4995_v18, %v4972_v20  ;;  %v5047_v21 = vpop.f32.mrb[33].mxu0 }
 0xc0a   :  { %4976 = vst [vmem:[#allocation16] sm:$0xff] %v4973_v1 }
 0xc0b   :  { %7439 = shalt.err (!%p7436_p10)
}
 0xc0c   :  { %s7440_s25 = scalar_lea.hbm %s7776_s6, 128 }
 0xc0d   :  { %p7441_p11 = scmp.ne.s32.totalorder %s7776_s6, %s7440_s25  ;;  %p7444_p12 = scmp.lt.u32.totalorder %s7440_s25, %s7776_s6 }
 0xc0f   :  { %p7446_p13 = pnand %p7444_p12, %p7441_p11 }
 0xc11   :  { %7449 = shalt.err (!%p7446_p13)
}
 0xc12   :  { %4986 = dma.vmem_to_hbm [thread:$0]  %s4984_s18, 128, %s7776_s6, [#allocation7]  }
 0xc13   :  { %7458 = dma.done.wait [#allocation7], 128  }
 0xc14   :  { %7459 = vsyncadd [#allocation7], 4294967168 }
 0xc15   :  { %4990 = vsyncpa [#allocation6], 1 }
 0xc16   :  { %4991 = vsyncpa [#allocation9], 1 }
 0xc17   :  { %4992 = vsyncpa [#allocation12], 1 }
 0xc18   :  { %4993 = vsyncpa [#allocation15], 1 }
 0xc19   :  { %4994 = vsyncpa [#allocation7], 1 }

</bundles_post_ra>
